<compile_context>
chip_gen: v7x
topology: tpu7x:2x2x1
jax: 0.10.0
libtpu: 0.0.40
codegen_flags: <defaults>
</compile_context>

<pallas_src>
import functools
import math

import jax
import jax.numpy as jnp
from jax.experimental import pallas as pl
from jax.experimental.pallas import tpu as pltpu


# --------------------------------------------------------------------------- #
# Kernel
# --------------------------------------------------------------------------- #
def encoding_block_kernel(
    mix_ref,                                   # SMEM (H, 4*M+1) f32 mixed-score params
    row_ref, col_ref, cost_ref,                # VMEM activations for this batch block
    qw_ref, kvw_ref, combw_ref,                # packed projection / combine weights
    ffw1_ref, ffb1_ref, ffw2_ref, vecs_ref,    # feed-forward weights + packed 1-D params
    out_ref,
    *, head_num, ms_hidden, mm_dtype,
):
    f32 = jnp.float32
    BB, R, E = row_ref.shape
    C = col_ref.shape[1]
    H, M = head_num, ms_hidden
    HD = qw_ref.shape[1]
    D = HD // H
    eps = 1e-5

    x = row_ref[...].astype(f32)                          # (BB, R, E)
    y = col_ref[...].astype(f32)                          # (BB, C, E)
    cm = cost_ref[...].astype(f32)                        # (BB, R, C)

    # ---- projections: Q (1/sqrt(D) pre-folded into the weight) and fused K|V
    xf = x.reshape(BB * R, E).astype(mm_dtype)
    yf = y.reshape(BB * C, E).astype(mm_dtype)
    q = jnp.dot(xf, qw_ref[...], preferred_element_type=f32)      # (BB*R, HD)
    kv = jnp.dot(yf, kvw_ref[...], preferred_element_type=f32)    # (BB*C, 2*HD)

    q3 = q.reshape(BB, R, HD)
    k3 = kv[:, :HD].reshape(BB, C, HD)
    v3 = kv[:, HD:].reshape(BB, C, HD)

    # ---- per-head mixed-score attention (static loop over heads) ------------
    ctx_heads = []
    for h in range(H):
        q_h = q3[:, :, h * D:(h + 1) * D].astype(mm_dtype)        # (BB, R, D)
        k_h = k3[:, :, h * D:(h + 1) * D].astype(mm_dtype)        # (BB, C, D)
        v_h = v3[:, :, h * D:(h + 1) * D]                         # (BB, C, D) f32

        dots = jnp.einsum('brd,bcd->brc', q_h, k_h,
                          preferred_element_type=f32)             # (BB, R, C)

        # 2-layer mixed-score MLP as per-m scalar VPU FMAs in the native
        # (BB, R, C) layout: never materializes an (H*BB, M, R*C) intermediate
        # and never replicates the cost matrix over heads.
        acc = None
        for m in range(M):
            w1d = mix_ref[h, m]                # weight on dot-product score
            w1c = mix_ref[h, M + m]            # weight on cost-matrix score
            b1 = mix_ref[h, 2 * M + m]
            w2 = mix_ref[h, 3 * M + m]
            hm = jnp.maximum(dots * w1d + cm * w1c + b1, 0.0)
            acc = hm * w2 if acc is None else acc + hm * w2
        scores = acc + mix_ref[h, 4 * M]                          # (BB, R, C)

        # softmax over columns (f32; EUP reciprocal -> rows sum to ~1)
        smax = jnp.max(scores, axis=-1, keepdims=True)
        p = jnp.exp(scores - smax)
        attn = p * pl.reciprocal(jnp.sum(p, axis=-1, keepdims=True), approx=True)

        ctx_h = jnp.einsum('brc,bcd->brd', attn, v_h,
                           preferred_element_type=f32)            # (BB, R, D)
        ctx_heads.append(ctx_h.reshape(BB * R, D))

    # head merge: one lane concat + ONE combine matmul with K = H*D
    ctx = jnp.concatenate(ctx_heads, axis=1)                      # (BB*R, HD)
    mh = jnp.dot(ctx, combw_ref[...], preferred_element_type=f32) \
        + vecs_ref[0:1, :]                                        # (BB*R, E)

    # ---- add & instance-norm 1 (normalize over rows, per batch & channel) ---
    add1 = x + mh.reshape(BB, R, E)
    mean1 = jnp.mean(add1, axis=1, keepdims=True)
    cen1 = add1 - mean1
    var1 = jnp.mean(cen1 * cen1, axis=1, keepdims=True)
    out1 = cen1 * jax.lax.rsqrt(var1 + eps) * vecs_ref[1:2, :] + vecs_ref[2:3, :]

    # ---- feed forward --------------------------------------------------------
    hid = jnp.dot(out1.reshape(BB * R, E).astype(mm_dtype), ffw1_ref[...],
                  preferred_element_type=f32) + ffb1_ref[...]
    hid = jnp.maximum(hid, 0.0)
    ff = jnp.dot(hid.astype(mm_dtype), ffw2_ref[...],
                 preferred_element_type=f32) + vecs_ref[5:6, :]   # (BB*R, E)

    # ---- add & instance-norm 2 -----------------------------------------------
    add2 = out1 + ff.reshape(BB, R, E)
    mean2 = jnp.mean(add2, axis=1, keepdims=True)
    cen2 = add2 - mean2
    var2 = jnp.mean(cen2 * cen2, axis=1, keepdims=True)
    out3 = cen2 * jax.lax.rsqrt(var2 + eps) * vecs_ref[3:4, :] + vecs_ref[4:5, :]

    out_ref[...] = out3.astype(out_ref.dtype)


# --------------------------------------------------------------------------- #
# Parameter packing (PyTorch-shaped params -> kernel layout)
# --------------------------------------------------------------------------- #
def _prepare_params(p, *, head_num, qkv_dim, mm_dtype):
    f32 = jnp.float32
    H, D = head_num, qkv_dim
    M = p["mix1_weight"].shape[2]
    inv_sqrt_d = 1.0 / math.sqrt(D)

    qw = (p["wq"].T * inv_sqrt_d).astype(mm_dtype)                    # (E, HD)
    kvw = jnp.concatenate([p["wk"].T, p["wv"].T], axis=1).astype(mm_dtype)  # (E, 2HD)
    combw = p["comb_w"].T.astype(f32)                                 # (HD, E)
    ffw1 = p["ff_w1"].T.astype(mm_dtype)                              # (E, F)
    ffb1 = p["ff_b1"].reshape(1, -1).astype(f32)                      # (1, F)
    ffw2 = p["ff_w2"].T.astype(mm_dtype)                              # (F, E)
    vecs = jnp.stack([p["comb_b"], p["norm1_g"], p["norm1_b"],
                      p["norm2_g"], p["norm2_b"], p["ff_b2"]],
                     axis=0).astype(f32)                              # (6, E)

    # Mixed-score scalar table for SMEM: per head
    #   [ w1_dot(M) | w1_cost(M) | b1(M) | w2(M) | b2 ]  ->  (H, 4*M + 1)
    mix = jnp.concatenate([
        p["mix1_weight"][:, 0, :],
        p["mix1_weight"][:, 1, :],
        p["mix1_bias"][:, 0, :],
        p["mix2_weight"][:, :, 0],
        p["mix2_bias"][:, 0, :],
    ], axis=1).astype(f32)                                            # (H, 4M+1)

    weights = (qw, kvw, combw, ffw1, ffb1, ffw2, vecs)
    return mix, weights


def _per_batch_vmem_bytes(R, C, E, F, H, D):
    """Crude f32 per-batch-element working-set estimate (drives block_b)."""
    words = (4 * (R * E + C * E + R * C)       # double-buffered in/out blocks
             + R * H * D + 2 * C * H * D       # q / k|v projections
             + 8 * R * C                       # live score / attn temporaries
             + 2 * R * F                       # feed-forward hidden
             + 6 * R * E)                      # norm / residual temporaries
    return 4 * words


# --------------------------------------------------------------------------- #
# Wrapper
# --------------------------------------------------------------------------- #
def encoding_block(row_emb, col_emb, cost_mat, params, *,
                   head_num, qkv_dim, block_b=None, mm_dtype=jnp.bfloat16):
    """One EncodingBlock forward; grid over blocks of batch elements."""
    B, R, E = row_emb.shape
    C = col_emb.shape[1]

    mix, weights = _prepare_params(params, head_num=head_num, qkv_dim=qkv_dim,
                                   mm_dtype=mm_dtype)
    M = (mix.shape[1] - 1) // 4
    F = weights[3].shape[1]

    per_b = _per_batch_vmem_bytes(R, C, E, F, head_num, qkv_dim)
    if block_b is None:
        # VMEM-driven choice, conservative across v5e/v6e/v7x scoped budgets,
        # but always leave >= 2 grid steps so v7x's two TensorCores share work.
        budget = 40 * 1024 * 1024
        divs = [d for d in range(1, B + 1) if B % d == 0]
        fits = [d for d in divs if d * per_b <= budget] or [1]
        block_b = max(fits)
        if block_b == B and B > 1:
            smaller = [d for d in fits if d < B]
            if smaller:
                block_b = max(smaller)
    assert B % block_b == 0, "batch must be divisible by block_b"
    grid = (B // block_b,)

    weight_bytes = sum(int(w.size) * w.dtype.itemsize for w in weights)
    vmem_limit = int(min(100 * 2 ** 20,
                         max(32 * 2 ** 20, 2 * (block_b * per_b + weight_bytes))))

    kernel = functools.partial(encoding_block_kernel, head_num=head_num,
                               ms_hidden=M, mm_dtype=mm_dtype)

    def batched_spec(shape):
        return pl.BlockSpec((block_b,) + tuple(shape[1:]), lambda b: (b, 0, 0))

    def const_spec(arr):
        nd = arr.ndim
        return pl.BlockSpec(tuple(arr.shape), lambda b, nd=nd: (0,) * nd)

    smem_spec = pl.BlockSpec(memory_space=pltpu.MemorySpace.SMEM)

    out = pl.pallas_call(
        kernel,
        out_shape=jax.ShapeDtypeStruct((B, R, E), row_emb.dtype),
        grid_spec=pltpu.PrefetchScalarGridSpec(
            num_scalar_prefetch=0,
            grid=grid,
            in_specs=[smem_spec,
                      batched_spec(row_emb.shape),
                      batched_spec(col_emb.shape),
                      batched_spec(cost_mat.shape)]
                     + [const_spec(w) for w in weights],
            out_specs=pl.BlockSpec((block_b, R, E), lambda b: (b, 0, 0)),
        ),
        compiler_params=pltpu.CompilerParams(
            dimension_semantics=("parallel",),
            vmem_limit_bytes=vmem_limit),
    )(mix, row_emb, col_emb, cost_mat, *weights)
    return out


def matrix_encoder_forward(row_emb, col_emb, cost_mat, layers_params, *,
                           head_num, qkv_dim, block_b=None,
                           mm_dtype=jnp.bfloat16):
    """Matrix_Encoder-style alternation of row / col EncodingBlocks."""
    cost_t = jnp.swapaxes(cost_mat, 1, 2)
    for lp in layers_params:
        new_row = encoding_block(row_emb, col_emb, cost_mat, lp["row"],
                                 head_num=head_num, qkv_dim=qkv_dim,
                                 block_b=block_b, mm_dtype=mm_dtype)
        new_col = encoding_block(col_emb, row_emb, cost_t, lp["col"],
                                 head_num=head_num, qkv_dim=qkv_dim,
                                 block_b=block_b, mm_dtype=mm_dtype)
        row_emb, col_emb = new_row, new_col
    return row_emb, col_emb


# --------------------------------------------------------------------------- #
# Pure-JAX reference (PyTorch semantics) and parameter init
# --------------------------------------------------------------------------- #
def encoding_block_reference(row_emb, col_emb, cost_mat, p, *, head_num, qkv_dim):
    H, D = head_num, qkv_dim
    B, R, E = row_emb.shape
    C = col_emb.shape[1]
    q = (row_emb @ p["wq"].T).reshape(B, R, H, D).transpose(0, 2, 1, 3)
    k = (col_emb @ p["wk"].T).reshape(B, C, H, D).transpose(0, 2, 1, 3)
    v = (col_emb @ p["wv"].T).reshape(B, C, H, D).transpose(0, 2, 1, 3)
    dot = jnp.einsum('bhrd,bhcd->bhrc', q, k) / math.sqrt(D)
    cost = jnp.broadcast_to(cost_mat[:, None], (B, H, R, C))
    two = jnp.stack([dot, cost], axis=-1)                       # (B,H,R,C,2)
    ms1 = jnp.einsum('bhrcf,hfm->bhrcm', two, p["mix1_weight"])
    ms1 = jax.nn.relu(ms1 + p["mix1_bias"][None, :, None])
    ms2 = jnp.einsum('bhrcm,hmk->bhrck', ms1, p["mix2_weight"])
    scores = (ms2 + p["mix2_bias"][None, :, None])[..., 0]
    attn = jax.nn.softmax(scores, axis=-1)
    ctx = jnp.einsum('bhrc,bhcd->bhrd', attn, v)
    ctx = ctx.transpose(0, 2, 1, 3).reshape(B, R, H * D)
    mh = ctx @ p["comb_w"].T + p["comb_b"]

    def inorm(t, g, b):
        m = t.mean(axis=1, keepdims=True)
        var = ((t - m) ** 2).mean(axis=1, keepdims=True)
        return (t - m) * jax.lax.rsqrt(var + 1e-5) * g + b

    out1 = inorm(row_emb + mh, p["norm1_g"], p["norm1_b"])
    hid = jax.nn.relu(out1 @ p["ff_w1"].T + p["ff_b1"])
    ff = hid @ p["ff_w2"].T + p["ff_b2"]
    return inorm(out1 + ff, p["norm2_g"], p["norm2_b"])


def init_block_params(key, E, H, D, M, F):
    """Deterministic synthetic init in PyTorch parameter layouts."""
    HD = H * D
    ks = jax.random.split(key, 13)

    def u(k, shape, bound):
        return jax.random.uniform(k, shape, jnp.float32, -bound, bound)

    s_e, s_hd, s_f = 1.0 / math.sqrt(E), 1.0 / math.sqrt(HD), 1.0 / math.sqrt(F)
    mix1_init, mix2_init = math.sqrt(0.5), math.sqrt(1.0 / 16.0)
    return {
        "wq": u(ks[0], (HD, E), s_e),            # nn.Linear(E, HD).weight
        "wk": u(ks[1], (HD, E), s_e),
        "wv": u(ks[2], (HD, E), s_e),
        "mix1_weight": u(ks[3], (H, 2, M), mix1_init),
        "mix1_bias":   u(ks[4], (H, 1, M), mix1_init),
        "mix2_weight": u(ks[5], (H, M, 1), mix2_init),
        "mix2_bias":   u(ks[6], (H, 1, 1), mix2_init),
        "comb_w": u(ks[7], (E, HD), s_hd),       # nn.Linear(HD, E).weight
        "comb_b": u(ks[8], (E,), s_hd),
        "norm1_g": jnp.ones((E,), jnp.float32),
        "norm1_b": jnp.zeros((E,), jnp.float32),
        "ff_w1": u(ks[9], (F, E), s_e),          # nn.Linear(E, F).weight
        "ff_b1": u(ks[10], (F,), s_e),
        "ff_w2": u(ks[11], (E, F), s_f),         # nn.Linear(F, E).weight
        "ff_b2": u(ks[12], (E,), s_f),
        "norm2_g": jnp.ones((E,), jnp.float32),
        "norm2_b": jnp.zeros((E,), jnp.float32),
    }


# --------------------------------------------------------------------------- #
# Demo
# --------------------------------------------------------------------------- #
if __name__ == "__main__":
    B, R, C = 4, 8, 16                # batch, row count, col count
    E, H, D = 32, 4, 8                # embedding_dim, head_num, qkv_dim
    M, F = 16, 64                     # ms_hidden_dim, ff_hidden_dim
    N_LAYERS = 2

    key = jax.random.PRNGKey(0)
    k_in, k_par = jax.random.split(key)
    kr, kc, km = jax.random.split(k_in, 3)
    row_emb = jax.random.normal(kr, (B, R, E), jnp.float32)
    col_emb = jax.random.normal(kc, (B, C, E), jnp.float32)
    cost_mat = jax.random.uniform(km, (B, R, C), jnp.float32)

    # Single EncodingBlock: kernel vs pure-JAX reference.
    block_params = init_block_params(k_par, E, H, D, M, F)
    out = encoding_block(row_emb, col_emb, cost_mat, block_params,
                         head_num=H, qkv_dim=D)
    ref = encoding_block_reference(row_emb, col_emb, cost_mat, block_params,
                                   head_num=H, qkv_dim=D)
    jax.block_until_ready((out, ref))
    assert out.shape == (B, R, E)
    # bf16 MXU projections / FF + approx softmax reciprocal -> small, bounded
    # deviation from the f32 reference.
    rel_err = float(jnp.linalg.norm(out - ref) / jnp.linalg.norm(ref))
    assert rel_err < 2e-2, f"kernel/reference mismatch: rel err {rel_err}"

    # Matrix_Encoder-style alternating row/col stacking of the same kernel.
    layer_keys = jax.random.split(k_par, N_LAYERS * 2)
    layers_params = [
        {"row": init_block_params(layer_keys[2 * i], E, H, D, M, F),
         "col": init_block_params(layer_keys[2 * i + 1], E, H, D, M, F)}
        for i in range(N_LAYERS)]
    row_out, col_out = matrix_encoder_forward(
        row_emb, col_emb, cost_mat, layers_params,
        head_num=H, qkv_dim=D)
    jax.block_until_ready((row_out, col_out))

    assert row_out.shape == (B, R, E) and col_out.shape == (B, C, E)
    assert bool(jnp.all(jnp.isfinite(row_out)))
    assert bool(jnp.all(jnp.isfinite(col_out)))
    print("KERNEL_OK")
</pallas_src>

<mosaic_0001>
module attributes {stable_mosaic.version = 11 : i64} {
  func.func @encoding_block_kernel(%arg0: i32, %arg1: memref<4x65xf32, #tpu.memory_space<smem>>, %arg2: memref<2x8x32xf32, #tpu.memory_space<vmem>>, %arg3: memref<2x16x32xf32, #tpu.memory_space<vmem>>, %arg4: memref<2x8x16xf32, #tpu.memory_space<vmem>>, %arg5: memref<32x32xbf16, #tpu.memory_space<vmem>>, %arg6: memref<32x64xbf16, #tpu.memory_space<vmem>>, %arg7: memref<32x32xf32, #tpu.memory_space<vmem>>, %arg8: memref<32x64xbf16, #tpu.memory_space<vmem>>, %arg9: memref<1x64xf32, #tpu.memory_space<vmem>>, %arg10: memref<64x32xbf16, #tpu.memory_space<vmem>>, %arg11: memref<6x32xf32, #tpu.memory_space<vmem>>, %arg12: memref<2x8x32xf32, #tpu.memory_space<vmem>>) attributes {dimension_semantics = [#tpu.dimension_semantics<parallel>], iteration_bounds = array<i64: 2>, scalar_prefetch = 0 : i64, scratch_operands = 0 : i64, tpu.core_type = #tpu.core_type<tc>, window_params = [{transform_indices = @transform_0, window_bounds = array<i64: 4, 65>}, {transform_indices = @transform_1, window_bounds = array<i64: 2, 8, 32>}, {transform_indices = @transform_2, window_bounds = array<i64: 2, 16, 32>}, {transform_indices = @transform_3, window_bounds = array<i64: 2, 8, 16>}, {pipeline_mode = #tpu.pipeline_mode<synchronous>, transform_indices = @transform_4, window_bounds = array<i64: 32, 32>}, {pipeline_mode = #tpu.pipeline_mode<synchronous>, transform_indices = @transform_5, window_bounds = array<i64: 32, 64>}, {pipeline_mode = #tpu.pipeline_mode<synchronous>, transform_indices = @transform_6, window_bounds = array<i64: 32, 32>}, {pipeline_mode = #tpu.pipeline_mode<synchronous>, transform_indices = @transform_7, window_bounds = array<i64: 32, 64>}, {pipeline_mode = #tpu.pipeline_mode<synchronous>, transform_indices = @transform_8, window_bounds = array<i64: 1, 64>}, {pipeline_mode = #tpu.pipeline_mode<synchronous>, transform_indices = @transform_9, window_bounds = array<i64: 64, 32>}, {pipeline_mode = #tpu.pipeline_mode<synchronous>, transform_indices = @transform_10, window_bounds = array<i64: 6, 32>}, {transform_indices = @transform_11, window_bounds = array<i64: 2, 8, 32>}]} {
    %c0 = arith.constant 0 : index
    %c0_0 = arith.constant 0 : index
    %c0_1 = arith.constant 0 : index
    %0 = vector.load %arg2[%c0, %c0_0, %c0_1] : memref<2x8x32xf32, #tpu.memory_space<vmem>>, vector<2x8x32xf32>
    %c0_2 = arith.constant 0 : index
    %c0_3 = arith.constant 0 : index
    %c0_4 = arith.constant 0 : index
    %1 = vector.load %arg3[%c0_2, %c0_3, %c0_4] : memref<2x16x32xf32, #tpu.memory_space<vmem>>, vector<2x16x32xf32>
    %c0_5 = arith.constant 0 : index
    %c0_6 = arith.constant 0 : index
    %c0_7 = arith.constant 0 : index
    %2 = vector.load %arg4[%c0_5, %c0_6, %c0_7] : memref<2x8x16xf32, #tpu.memory_space<vmem>>, vector<2x8x16xf32>
    %3 = vector.shape_cast %0 : vector<2x8x32xf32> to vector<16x32xf32>
    %4 = arith.truncf %3 : vector<16x32xf32> to vector<16x32xbf16>
    %5 = vector.shape_cast %1 : vector<2x16x32xf32> to vector<32x32xf32>
    %6 = arith.truncf %5 : vector<32x32xf32> to vector<32x32xbf16>
    %c0_8 = arith.constant 0 : index
    %c0_9 = arith.constant 0 : index
    %7 = vector.load %arg5[%c0_8, %c0_9] : memref<32x32xbf16, #tpu.memory_space<vmem>>, vector<32x32xbf16>
    %cst = arith.constant dense<0.000000e+00> : vector<16x32xf32>
    %8 = tpu.matmul %4, %7, %cst {dimension_numbers = #tpu.dot_dimension_numbers<[1], [0], [0], [1], [0, 0, 1, 1], [], []>} : vector<16x32xbf16>, vector<32x32xbf16>, vector<16x32xf32> -> vector<16x32xf32>
    %c0_10 = arith.constant 0 : index
    %c0_11 = arith.constant 0 : index
    %9 = vector.load %arg6[%c0_10, %c0_11] : memref<32x64xbf16, #tpu.memory_space<vmem>>, vector<32x64xbf16>
    %cst_12 = arith.constant dense<0.000000e+00> : vector<32x64xf32>
    %10 = tpu.matmul %6, %9, %cst_12 {dimension_numbers = #tpu.dot_dimension_numbers<[1], [0], [0], [1], [0, 0, 1, 1], [], []>} : vector<32x32xbf16>, vector<32x64xbf16>, vector<32x64xf32> -> vector<32x64xf32>
    %11 = vector.shape_cast %8 : vector<16x32xf32> to vector<2x8x32xf32>
    %12 = vector.extract_strided_slice %10 {offsets = [0, 0], sizes = [32, 32], strides = [1, 1]} : vector<32x64xf32> to vector<32x32xf32>
    %13 = vector.shape_cast %12 : vector<32x32xf32> to vector<2x16x32xf32>
    %14 = vector.extract_strided_slice %10 {offsets = [0, 32], sizes = [32, 32], strides = [1, 1]} : vector<32x64xf32> to vector<32x32xf32>
    %15 = vector.shape_cast %14 : vector<32x32xf32> to vector<2x16x32xf32>
    %16 = vector.extract_strided_slice %11 {offsets = [0, 0, 0], sizes = [2, 8, 8], strides = [1, 1, 1]} : vector<2x8x32xf32> to vector<2x8x8xf32>
    %17 = arith.truncf %16 : vector<2x8x8xf32> to vector<2x8x8xbf16>
    %18 = vector.extract_strided_slice %13 {offsets = [0, 0, 0], sizes = [2, 16, 8], strides = [1, 1, 1]} : vector<2x16x32xf32> to vector<2x16x8xf32>
    %19 = arith.truncf %18 : vector<2x16x8xf32> to vector<2x16x8xbf16>
    %20 = vector.extract_strided_slice %15 {offsets = [0, 0, 0], sizes = [2, 16, 8], strides = [1, 1, 1]} : vector<2x16x32xf32> to vector<2x16x8xf32>
    "tpu.trace_start"() <{level = 10 : i32, message = "brd,bcd->brc"}> : () -> ()
    %cst_13 = arith.constant dense<0.000000e+00> : vector<2x8x16xf32>
    %21 = tpu.matmul %17, %19, %cst_13 {dimension_numbers = #tpu.dot_dimension_numbers<[2], [2], [1], [1], [0, 0, 0, 1, 1, 1], [0], [0]>} : vector<2x8x8xbf16>, vector<2x16x8xbf16>, vector<2x8x16xf32> -> vector<2x8x16xf32>
    "tpu.trace_stop"() : () -> ()
    %c0_14 = arith.constant 0 : index
    %c0_15 = arith.constant 0 : index
    %22 = memref.load %arg1[%c0_14, %c0_15] : memref<4x65xf32, #tpu.memory_space<smem>>
    %c0_16 = arith.constant 0 : index
    %c16 = arith.constant 16 : index
    %23 = memref.load %arg1[%c0_16, %c16] : memref<4x65xf32, #tpu.memory_space<smem>>
    %c0_17 = arith.constant 0 : index
    %c32 = arith.constant 32 : index
    %24 = memref.load %arg1[%c0_17, %c32] : memref<4x65xf32, #tpu.memory_space<smem>>
    %c0_18 = arith.constant 0 : index
    %c48 = arith.constant 48 : index
    %25 = memref.load %arg1[%c0_18, %c48] : memref<4x65xf32, #tpu.memory_space<smem>>
    %26 = vector.broadcast %22 : f32 to vector<2x8x16xf32>
    %27 = arith.mulf %21, %26 : vector<2x8x16xf32>
    %28 = vector.broadcast %23 : f32 to vector<2x8x16xf32>
    %29 = arith.mulf %2, %28 : vector<2x8x16xf32>
    %30 = arith.addf %27, %29 : vector<2x8x16xf32>
    %31 = vector.broadcast %24 : f32 to vector<2x8x16xf32>
    %32 = arith.addf %30, %31 : vector<2x8x16xf32>
    %cst_19 = arith.constant 0.000000e+00 : f32
    %33 = vector.broadcast %cst_19 : f32 to vector<2x8x16xf32>
    %34 = arith.maximumf %32, %33 : vector<2x8x16xf32>
    %35 = vector.broadcast %25 : f32 to vector<2x8x16xf32>
    %36 = arith.mulf %34, %35 : vector<2x8x16xf32>
    %c0_20 = arith.constant 0 : index
    %c1 = arith.constant 1 : index
    %37 = memref.load %arg1[%c0_20, %c1] : memref<4x65xf32, #tpu.memory_space<smem>>
    %c0_21 = arith.constant 0 : index
    %c17 = arith.constant 17 : index
    %38 = memref.load %arg1[%c0_21, %c17] : memref<4x65xf32, #tpu.memory_space<smem>>
    %c0_22 = arith.constant 0 : index
    %c33 = arith.constant 33 : index
    %39 = memref.load %arg1[%c0_22, %c33] : memref<4x65xf32, #tpu.memory_space<smem>>
    %c0_23 = arith.constant 0 : index
    %c49 = arith.constant 49 : index
    %40 = memref.load %arg1[%c0_23, %c49] : memref<4x65xf32, #tpu.memory_space<smem>>
    %41 = vector.broadcast %37 : f32 to vector<2x8x16xf32>
    %42 = arith.mulf %21, %41 : vector<2x8x16xf32>
    %43 = vector.broadcast %38 : f32 to vector<2x8x16xf32>
    %44 = arith.mulf %2, %43 : vector<2x8x16xf32>
    %45 = arith.addf %42, %44 : vector<2x8x16xf32>
    %46 = vector.broadcast %39 : f32 to vector<2x8x16xf32>
    %47 = arith.addf %45, %46 : vector<2x8x16xf32>
    %cst_24 = arith.constant 0.000000e+00 : f32
    %48 = vector.broadcast %cst_24 : f32 to vector<2x8x16xf32>
    %49 = arith.maximumf %47, %48 : vector<2x8x16xf32>
    %50 = vector.broadcast %40 : f32 to vector<2x8x16xf32>
    %51 = arith.mulf %49, %50 : vector<2x8x16xf32>
    %52 = arith.addf %36, %51 : vector<2x8x16xf32>
    %c0_25 = arith.constant 0 : index
    %c2 = arith.constant 2 : index
    %53 = memref.load %arg1[%c0_25, %c2] : memref<4x65xf32, #tpu.memory_space<smem>>
    %c0_26 = arith.constant 0 : index
    %c18 = arith.constant 18 : index
    %54 = memref.load %arg1[%c0_26, %c18] : memref<4x65xf32, #tpu.memory_space<smem>>
    %c0_27 = arith.constant 0 : index
    %c34 = arith.constant 34 : index
    %55 = memref.load %arg1[%c0_27, %c34] : memref<4x65xf32, #tpu.memory_space<smem>>
    %c0_28 = arith.constant 0 : index
    %c50 = arith.constant 50 : index
    %56 = memref.load %arg1[%c0_28, %c50] : memref<4x65xf32, #tpu.memory_space<smem>>
    %57 = vector.broadcast %53 : f32 to vector<2x8x16xf32>
    %58 = arith.mulf %21, %57 : vector<2x8x16xf32>
    %59 = vector.broadcast %54 : f32 to vector<2x8x16xf32>
    %60 = arith.mulf %2, %59 : vector<2x8x16xf32>
    %61 = arith.addf %58, %60 : vector<2x8x16xf32>
    %62 = vector.broadcast %55 : f32 to vector<2x8x16xf32>
    %63 = arith.addf %61, %62 : vector<2x8x16xf32>
    %cst_29 = arith.constant 0.000000e+00 : f32
    %64 = vector.broadcast %cst_29 : f32 to vector<2x8x16xf32>
    %65 = arith.maximumf %63, %64 : vector<2x8x16xf32>
    %66 = vector.broadcast %56 : f32 to vector<2x8x16xf32>
    %67 = arith.mulf %65, %66 : vector<2x8x16xf32>
    %68 = arith.addf %52, %67 : vector<2x8x16xf32>
    %c0_30 = arith.constant 0 : index
    %c3 = arith.constant 3 : index
    %69 = memref.load %arg1[%c0_30, %c3] : memref<4x65xf32, #tpu.memory_space<smem>>
    %c0_31 = arith.constant 0 : index
    %c19 = arith.constant 19 : index
    %70 = memref.load %arg1[%c0_31, %c19] : memref<4x65xf32, #tpu.memory_space<smem>>
    %c0_32 = arith.constant 0 : index
    %c35 = arith.constant 35 : index
    %71 = memref.load %arg1[%c0_32, %c35] : memref<4x65xf32, #tpu.memory_space<smem>>
    %c0_33 = arith.constant 0 : index
    %c51 = arith.constant 51 : index
    %72 = memref.load %arg1[%c0_33, %c51] : memref<4x65xf32, #tpu.memory_space<smem>>
    %73 = vector.broadcast %69 : f32 to vector<2x8x16xf32>
    %74 = arith.mulf %21, %73 : vector<2x8x16xf32>
    %75 = vector.broadcast %70 : f32 to vector<2x8x16xf32>
    %76 = arith.mulf %2, %75 : vector<2x8x16xf32>
    %77 = arith.addf %74, %76 : vector<2x8x16xf32>
    %78 = vector.broadcast %71 : f32 to vector<2x8x16xf32>
    %79 = arith.addf %77, %78 : vector<2x8x16xf32>
    %cst_34 = arith.constant 0.000000e+00 : f32
    %80 = vector.broadcast %cst_34 : f32 to vector<2x8x16xf32>
    %81 = arith.maximumf %79, %80 : vector<2x8x16xf32>
    %82 = vector.broadcast %72 : f32 to vector<2x8x16xf32>
    %83 = arith.mulf %81, %82 : vector<2x8x16xf32>
    %84 = arith.addf %68, %83 : vector<2x8x16xf32>
    %c0_35 = arith.constant 0 : index
    %c4 = arith.constant 4 : index
    %85 = memref.load %arg1[%c0_35, %c4] : memref<4x65xf32, #tpu.memory_space<smem>>
    %c0_36 = arith.constant 0 : index
    %c20 = arith.constant 20 : index
    %86 = memref.load %arg1[%c0_36, %c20] : memref<4x65xf32, #tpu.memory_space<smem>>
    %c0_37 = arith.constant 0 : index
    %c36 = arith.constant 36 : index
    %87 = memref.load %arg1[%c0_37, %c36] : memref<4x65xf32, #tpu.memory_space<smem>>
    %c0_38 = arith.constant 0 : index
    %c52 = arith.constant 52 : index
    %88 = memref.load %arg1[%c0_38, %c52] : memref<4x65xf32, #tpu.memory_space<smem>>
    %89 = vector.broadcast %85 : f32 to vector<2x8x16xf32>
    %90 = arith.mulf %21, %89 : vector<2x8x16xf32>
    %91 = vector.broadcast %86 : f32 to vector<2x8x16xf32>
    %92 = arith.mulf %2, %91 : vector<2x8x16xf32>
    %93 = arith.addf %90, %92 : vector<2x8x16xf32>
    %94 = vector.broadcast %87 : f32 to vector<2x8x16xf32>
    %95 = arith.addf %93, %94 : vector<2x8x16xf32>
    %cst_39 = arith.constant 0.000000e+00 : f32
    %96 = vector.broadcast %cst_39 : f32 to vector<2x8x16xf32>
    %97 = arith.maximumf %95, %96 : vector<2x8x16xf32>
    %98 = vector.broadcast %88 : f32 to vector<2x8x16xf32>
    %99 = arith.mulf %97, %98 : vector<2x8x16xf32>
    %100 = arith.addf %84, %99 : vector<2x8x16xf32>
    %c0_40 = arith.constant 0 : index
    %c5 = arith.constant 5 : index
    %101 = memref.load %arg1[%c0_40, %c5] : memref<4x65xf32, #tpu.memory_space<smem>>
    %c0_41 = arith.constant 0 : index
    %c21 = arith.constant 21 : index
    %102 = memref.load %arg1[%c0_41, %c21] : memref<4x65xf32, #tpu.memory_space<smem>>
    %c0_42 = arith.constant 0 : index
    %c37 = arith.constant 37 : index
    %103 = memref.load %arg1[%c0_42, %c37] : memref<4x65xf32, #tpu.memory_space<smem>>
    %c0_43 = arith.constant 0 : index
    %c53 = arith.constant 53 : index
    %104 = memref.load %arg1[%c0_43, %c53] : memref<4x65xf32, #tpu.memory_space<smem>>
    %105 = vector.broadcast %101 : f32 to vector<2x8x16xf32>
    %106 = arith.mulf %21, %105 : vector<2x8x16xf32>
    %107 = vector.broadcast %102 : f32 to vector<2x8x16xf32>
    %108 = arith.mulf %2, %107 : vector<2x8x16xf32>
    %109 = arith.addf %106, %108 : vector<2x8x16xf32>
    %110 = vector.broadcast %103 : f32 to vector<2x8x16xf32>
    %111 = arith.addf %109, %110 : vector<2x8x16xf32>
    %cst_44 = arith.constant 0.000000e+00 : f32
    %112 = vector.broadcast %cst_44 : f32 to vector<2x8x16xf32>
    %113 = arith.maximumf %111, %112 : vector<2x8x16xf32>
    %114 = vector.broadcast %104 : f32 to vector<2x8x16xf32>
    %115 = arith.mulf %113, %114 : vector<2x8x16xf32>
    %116 = arith.addf %100, %115 : vector<2x8x16xf32>
    %c0_45 = arith.constant 0 : index
    %c6 = arith.constant 6 : index
    %117 = memref.load %arg1[%c0_45, %c6] : memref<4x65xf32, #tpu.memory_space<smem>>
    %c0_46 = arith.constant 0 : index
    %c22 = arith.constant 22 : index
    %118 = memref.load %arg1[%c0_46, %c22] : memref<4x65xf32, #tpu.memory_space<smem>>
    %c0_47 = arith.constant 0 : index
    %c38 = arith.constant 38 : index
    %119 = memref.load %arg1[%c0_47, %c38] : memref<4x65xf32, #tpu.memory_space<smem>>
    %c0_48 = arith.constant 0 : index
    %c54 = arith.constant 54 : index
    %120 = memref.load %arg1[%c0_48, %c54] : memref<4x65xf32, #tpu.memory_space<smem>>
    %121 = vector.broadcast %117 : f32 to vector<2x8x16xf32>
    %122 = arith.mulf %21, %121 : vector<2x8x16xf32>
    %123 = vector.broadcast %118 : f32 to vector<2x8x16xf32>
    %124 = arith.mulf %2, %123 : vector<2x8x16xf32>
    %125 = arith.addf %122, %124 : vector<2x8x16xf32>
    %126 = vector.broadcast %119 : f32 to vector<2x8x16xf32>
    %127 = arith.addf %125, %126 : vector<2x8x16xf32>
    %cst_49 = arith.constant 0.000000e+00 : f32
    %128 = vector.broadcast %cst_49 : f32 to vector<2x8x16xf32>
    %129 = arith.maximumf %127, %128 : vector<2x8x16xf32>
    %130 = vector.broadcast %120 : f32 to vector<2x8x16xf32>
    %131 = arith.mulf %129, %130 : vector<2x8x16xf32>
    %132 = arith.addf %116, %131 : vector<2x8x16xf32>
    %c0_50 = arith.constant 0 : index
    %c7 = arith.constant 7 : index
    %133 = memref.load %arg1[%c0_50, %c7] : memref<4x65xf32, #tpu.memory_space<smem>>
    %c0_51 = arith.constant 0 : index
    %c23 = arith.constant 23 : index
    %134 = memref.load %arg1[%c0_51, %c23] : memref<4x65xf32, #tpu.memory_space<smem>>
    %c0_52 = arith.constant 0 : index
    %c39 = arith.constant 39 : index
    %135 = memref.load %arg1[%c0_52, %c39] : memref<4x65xf32, #tpu.memory_space<smem>>
    %c0_53 = arith.constant 0 : index
    %c55 = arith.constant 55 : index
    %136 = memref.load %arg1[%c0_53, %c55] : memref<4x65xf32, #tpu.memory_space<smem>>
    %137 = vector.broadcast %133 : f32 to vector<2x8x16xf32>
    %138 = arith.mulf %21, %137 : vector<2x8x16xf32>
    %139 = vector.broadcast %134 : f32 to vector<2x8x16xf32>
    %140 = arith.mulf %2, %139 : vector<2x8x16xf32>
    %141 = arith.addf %138, %140 : vector<2x8x16xf32>
    %142 = vector.broadcast %135 : f32 to vector<2x8x16xf32>
    %143 = arith.addf %141, %142 : vector<2x8x16xf32>
    %cst_54 = arith.constant 0.000000e+00 : f32
    %144 = vector.broadcast %cst_54 : f32 to vector<2x8x16xf32>
    %145 = arith.maximumf %143, %144 : vector<2x8x16xf32>
    %146 = vector.broadcast %136 : f32 to vector<2x8x16xf32>
    %147 = arith.mulf %145, %146 : vector<2x8x16xf32>
    %148 = arith.addf %132, %147 : vector<2x8x16xf32>
    %c0_55 = arith.constant 0 : index
    %c8 = arith.constant 8 : index
    %149 = memref.load %arg1[%c0_55, %c8] : memref<4x65xf32, #tpu.memory_space<smem>>
    %c0_56 = arith.constant 0 : index
    %c24 = arith.constant 24 : index
    %150 = memref.load %arg1[%c0_56, %c24] : memref<4x65xf32, #tpu.memory_space<smem>>
    %c0_57 = arith.constant 0 : index
    %c40 = arith.constant 40 : index
    %151 = memref.load %arg1[%c0_57, %c40] : memref<4x65xf32, #tpu.memory_space<smem>>
    %c0_58 = arith.constant 0 : index
    %c56 = arith.constant 56 : index
    %152 = memref.load %arg1[%c0_58, %c56] : memref<4x65xf32, #tpu.memory_space<smem>>
    %153 = vector.broadcast %149 : f32 to vector<2x8x16xf32>
    %154 = arith.mulf %21, %153 : vector<2x8x16xf32>
    %155 = vector.broadcast %150 : f32 to vector<2x8x16xf32>
    %156 = arith.mulf %2, %155 : vector<2x8x16xf32>
    %157 = arith.addf %154, %156 : vector<2x8x16xf32>
    %158 = vector.broadcast %151 : f32 to vector<2x8x16xf32>
    %159 = arith.addf %157, %158 : vector<2x8x16xf32>
    %cst_59 = arith.constant 0.000000e+00 : f32
    %160 = vector.broadcast %cst_59 : f32 to vector<2x8x16xf32>
    %161 = arith.maximumf %159, %160 : vector<2x8x16xf32>
    %162 = vector.broadcast %152 : f32 to vector<2x8x16xf32>
    %163 = arith.mulf %161, %162 : vector<2x8x16xf32>
    %164 = arith.addf %148, %163 : vector<2x8x16xf32>
    %c0_60 = arith.constant 0 : index
    %c9 = arith.constant 9 : index
    %165 = memref.load %arg1[%c0_60, %c9] : memref<4x65xf32, #tpu.memory_space<smem>>
    %c0_61 = arith.constant 0 : index
    %c25 = arith.constant 25 : index
    %166 = memref.load %arg1[%c0_61, %c25] : memref<4x65xf32, #tpu.memory_space<smem>>
    %c0_62 = arith.constant 0 : index
    %c41 = arith.constant 41 : index
    %167 = memref.load %arg1[%c0_62, %c41] : memref<4x65xf32, #tpu.memory_space<smem>>
    %c0_63 = arith.constant 0 : index
    %c57 = arith.constant 57 : index
    %168 = memref.load %arg1[%c0_63, %c57] : memref<4x65xf32, #tpu.memory_space<smem>>
    %169 = vector.broadcast %165 : f32 to vector<2x8x16xf32>
    %170 = arith.mulf %21, %169 : vector<2x8x16xf32>
    %171 = vector.broadcast %166 : f32 to vector<2x8x16xf32>
    %172 = arith.mulf %2, %171 : vector<2x8x16xf32>
    %173 = arith.addf %170, %172 : vector<2x8x16xf32>
    %174 = vector.broadcast %167 : f32 to vector<2x8x16xf32>
    %175 = arith.addf %173, %174 : vector<2x8x16xf32>
    %cst_64 = arith.constant 0.000000e+00 : f32
    %176 = vector.broadcast %cst_64 : f32 to vector<2x8x16xf32>
    %177 = arith.maximumf %175, %176 : vector<2x8x16xf32>
    %178 = vector.broadcast %168 : f32 to vector<2x8x16xf32>
    %179 = arith.mulf %177, %178 : vector<2x8x16xf32>
    %180 = arith.addf %164, %179 : vector<2x8x16xf32>
    %c0_65 = arith.constant 0 : index
    %c10 = arith.constant 10 : index
    %181 = memref.load %arg1[%c0_65, %c10] : memref<4x65xf32, #tpu.memory_space<smem>>
    %c0_66 = arith.constant 0 : index
    %c26 = arith.constant 26 : index
    %182 = memref.load %arg1[%c0_66, %c26] : memref<4x65xf32, #tpu.memory_space<smem>>
    %c0_67 = arith.constant 0 : index
    %c42 = arith.constant 42 : index
    %183 = memref.load %arg1[%c0_67, %c42] : memref<4x65xf32, #tpu.memory_space<smem>>
    %c0_68 = arith.constant 0 : index
    %c58 = arith.constant 58 : index
    %184 = memref.load %arg1[%c0_68, %c58] : memref<4x65xf32, #tpu.memory_space<smem>>
    %185 = vector.broadcast %181 : f32 to vector<2x8x16xf32>
    %186 = arith.mulf %21, %185 : vector<2x8x16xf32>
    %187 = vector.broadcast %182 : f32 to vector<2x8x16xf32>
    %188 = arith.mulf %2, %187 : vector<2x8x16xf32>
    %189 = arith.addf %186, %188 : vector<2x8x16xf32>
    %190 = vector.broadcast %183 : f32 to vector<2x8x16xf32>
    %191 = arith.addf %189, %190 : vector<2x8x16xf32>
    %cst_69 = arith.constant 0.000000e+00 : f32
    %192 = vector.broadcast %cst_69 : f32 to vector<2x8x16xf32>
    %193 = arith.maximumf %191, %192 : vector<2x8x16xf32>
    %194 = vector.broadcast %184 : f32 to vector<2x8x16xf32>
    %195 = arith.mulf %193, %194 : vector<2x8x16xf32>
    %196 = arith.addf %180, %195 : vector<2x8x16xf32>
    %c0_70 = arith.constant 0 : index
    %c11 = arith.constant 11 : index
    %197 = memref.load %arg1[%c0_70, %c11] : memref<4x65xf32, #tpu.memory_space<smem>>
    %c0_71 = arith.constant 0 : index
    %c27 = arith.constant 27 : index
    %198 = memref.load %arg1[%c0_71, %c27] : memref<4x65xf32, #tpu.memory_space<smem>>
    %c0_72 = arith.constant 0 : index
    %c43 = arith.constant 43 : index
    %199 = memref.load %arg1[%c0_72, %c43] : memref<4x65xf32, #tpu.memory_space<smem>>
    %c0_73 = arith.constant 0 : index
    %c59 = arith.constant 59 : index
    %200 = memref.load %arg1[%c0_73, %c59] : memref<4x65xf32, #tpu.memory_space<smem>>
    %201 = vector.broadcast %197 : f32 to vector<2x8x16xf32>
    %202 = arith.mulf %21, %201 : vector<2x8x16xf32>
    %203 = vector.broadcast %198 : f32 to vector<2x8x16xf32>
    %204 = arith.mulf %2, %203 : vector<2x8x16xf32>
    %205 = arith.addf %202, %204 : vector<2x8x16xf32>
    %206 = vector.broadcast %199 : f32 to vector<2x8x16xf32>
    %207 = arith.addf %205, %206 : vector<2x8x16xf32>
    %cst_74 = arith.constant 0.000000e+00 : f32
    %208 = vector.broadcast %cst_74 : f32 to vector<2x8x16xf32>
    %209 = arith.maximumf %207, %208 : vector<2x8x16xf32>
    %210 = vector.broadcast %200 : f32 to vector<2x8x16xf32>
    %211 = arith.mulf %209, %210 : vector<2x8x16xf32>
    %212 = arith.addf %196, %211 : vector<2x8x16xf32>
    %c0_75 = arith.constant 0 : index
    %c12 = arith.constant 12 : index
    %213 = memref.load %arg1[%c0_75, %c12] : memref<4x65xf32, #tpu.memory_space<smem>>
    %c0_76 = arith.constant 0 : index
    %c28 = arith.constant 28 : index
    %214 = memref.load %arg1[%c0_76, %c28] : memref<4x65xf32, #tpu.memory_space<smem>>
    %c0_77 = arith.constant 0 : index
    %c44 = arith.constant 44 : index
    %215 = memref.load %arg1[%c0_77, %c44] : memref<4x65xf32, #tpu.memory_space<smem>>
    %c0_78 = arith.constant 0 : index
    %c60 = arith.constant 60 : index
    %216 = memref.load %arg1[%c0_78, %c60] : memref<4x65xf32, #tpu.memory_space<smem>>
    %217 = vector.broadcast %213 : f32 to vector<2x8x16xf32>
    %218 = arith.mulf %21, %217 : vector<2x8x16xf32>
    %219 = vector.broadcast %214 : f32 to vector<2x8x16xf32>
    %220 = arith.mulf %2, %219 : vector<2x8x16xf32>
    %221 = arith.addf %218, %220 : vector<2x8x16xf32>
    %222 = vector.broadcast %215 : f32 to vector<2x8x16xf32>
    %223 = arith.addf %221, %222 : vector<2x8x16xf32>
    %cst_79 = arith.constant 0.000000e+00 : f32
    %224 = vector.broadcast %cst_79 : f32 to vector<2x8x16xf32>
    %225 = arith.maximumf %223, %224 : vector<2x8x16xf32>
    %226 = vector.broadcast %216 : f32 to vector<2x8x16xf32>
    %227 = arith.mulf %225, %226 : vector<2x8x16xf32>
    %228 = arith.addf %212, %227 : vector<2x8x16xf32>
    %c0_80 = arith.constant 0 : index
    %c13 = arith.constant 13 : index
    %229 = memref.load %arg1[%c0_80, %c13] : memref<4x65xf32, #tpu.memory_space<smem>>
    %c0_81 = arith.constant 0 : index
    %c29 = arith.constant 29 : index
    %230 = memref.load %arg1[%c0_81, %c29] : memref<4x65xf32, #tpu.memory_space<smem>>
    %c0_82 = arith.constant 0 : index
    %c45 = arith.constant 45 : index
    %231 = memref.load %arg1[%c0_82, %c45] : memref<4x65xf32, #tpu.memory_space<smem>>
    %c0_83 = arith.constant 0 : index
    %c61 = arith.constant 61 : index
    %232 = memref.load %arg1[%c0_83, %c61] : memref<4x65xf32, #tpu.memory_space<smem>>
    %233 = vector.broadcast %229 : f32 to vector<2x8x16xf32>
    %234 = arith.mulf %21, %233 : vector<2x8x16xf32>
    %235 = vector.broadcast %230 : f32 to vector<2x8x16xf32>
    %236 = arith.mulf %2, %235 : vector<2x8x16xf32>
    %237 = arith.addf %234, %236 : vector<2x8x16xf32>
    %238 = vector.broadcast %231 : f32 to vector<2x8x16xf32>
    %239 = arith.addf %237, %238 : vector<2x8x16xf32>
    %cst_84 = arith.constant 0.000000e+00 : f32
    %240 = vector.broadcast %cst_84 : f32 to vector<2x8x16xf32>
    %241 = arith.maximumf %239, %240 : vector<2x8x16xf32>
    %242 = vector.broadcast %232 : f32 to vector<2x8x16xf32>
    %243 = arith.mulf %241, %242 : vector<2x8x16xf32>
    %244 = arith.addf %228, %243 : vector<2x8x16xf32>
    %c0_85 = arith.constant 0 : index
    %c14 = arith.constant 14 : index
    %245 = memref.load %arg1[%c0_85, %c14] : memref<4x65xf32, #tpu.memory_space<smem>>
    %c0_86 = arith.constant 0 : index
    %c30 = arith.constant 30 : index
    %246 = memref.load %arg1[%c0_86, %c30] : memref<4x65xf32, #tpu.memory_space<smem>>
    %c0_87 = arith.constant 0 : index
    %c46 = arith.constant 46 : index
    %247 = memref.load %arg1[%c0_87, %c46] : memref<4x65xf32, #tpu.memory_space<smem>>
    %c0_88 = arith.constant 0 : index
    %c62 = arith.constant 62 : index
    %248 = memref.load %arg1[%c0_88, %c62] : memref<4x65xf32, #tpu.memory_space<smem>>
    %249 = vector.broadcast %245 : f32 to vector<2x8x16xf32>
    %250 = arith.mulf %21, %249 : vector<2x8x16xf32>
    %251 = vector.broadcast %246 : f32 to vector<2x8x16xf32>
    %252 = arith.mulf %2, %251 : vector<2x8x16xf32>
    %253 = arith.addf %250, %252 : vector<2x8x16xf32>
    %254 = vector.broadcast %247 : f32 to vector<2x8x16xf32>
    %255 = arith.addf %253, %254 : vector<2x8x16xf32>
    %cst_89 = arith.constant 0.000000e+00 : f32
    %256 = vector.broadcast %cst_89 : f32 to vector<2x8x16xf32>
    %257 = arith.maximumf %255, %256 : vector<2x8x16xf32>
    %258 = vector.broadcast %248 : f32 to vector<2x8x16xf32>
    %259 = arith.mulf %257, %258 : vector<2x8x16xf32>
    %260 = arith.addf %244, %259 : vector<2x8x16xf32>
    %c0_90 = arith.constant 0 : index
    %c15 = arith.constant 15 : index
    %261 = memref.load %arg1[%c0_90, %c15] : memref<4x65xf32, #tpu.memory_space<smem>>
    %c0_91 = arith.constant 0 : index
    %c31 = arith.constant 31 : index
    %262 = memref.load %arg1[%c0_91, %c31] : memref<4x65xf32, #tpu.memory_space<smem>>
    %c0_92 = arith.constant 0 : index
    %c47 = arith.constant 47 : index
    %263 = memref.load %arg1[%c0_92, %c47] : memref<4x65xf32, #tpu.memory_space<smem>>
    %c0_93 = arith.constant 0 : index
    %c63 = arith.constant 63 : index
    %264 = memref.load %arg1[%c0_93, %c63] : memref<4x65xf32, #tpu.memory_space<smem>>
    %265 = vector.broadcast %261 : f32 to vector<2x8x16xf32>
    %266 = arith.mulf %21, %265 : vector<2x8x16xf32>
    %267 = vector.broadcast %262 : f32 to vector<2x8x16xf32>
    %268 = arith.mulf %2, %267 : vector<2x8x16xf32>
    %269 = arith.addf %266, %268 : vector<2x8x16xf32>
    %270 = vector.broadcast %263 : f32 to vector<2x8x16xf32>
    %271 = arith.addf %269, %270 : vector<2x8x16xf32>
    %cst_94 = arith.constant 0.000000e+00 : f32
    %272 = vector.broadcast %cst_94 : f32 to vector<2x8x16xf32>
    %273 = arith.maximumf %271, %272 : vector<2x8x16xf32>
    %274 = vector.broadcast %264 : f32 to vector<2x8x16xf32>
    %275 = arith.mulf %273, %274 : vector<2x8x16xf32>
    %276 = arith.addf %260, %275 : vector<2x8x16xf32>
    %c0_95 = arith.constant 0 : index
    %c64 = arith.constant 64 : index
    %277 = memref.load %arg1[%c0_95, %c64] : memref<4x65xf32, #tpu.memory_space<smem>>
    %278 = vector.broadcast %277 : f32 to vector<2x8x16xf32>
    %279 = arith.addf %276, %278 : vector<2x8x16xf32>
    %cst_96 = arith.constant dense<0xFF800000> : vector<2x8xf32>
    %280 = vector.multi_reduction <maximumf>, %279, %cst_96 [2] : vector<2x8x16xf32> to vector<2x8xf32>
    %281 = vector.shape_cast %280 : vector<2x8xf32> to vector<2x8x1xf32>
    %282 = vector.broadcast %281 : vector<2x8x1xf32> to vector<2x8x16xf32>
    %283 = arith.subf %279, %282 : vector<2x8x16xf32>
    %284 = math.exp %283 : vector<2x8x16xf32>
    %cst_97 = arith.constant dense<0.000000e+00> : vector<2x8xf32>
    %285 = vector.multi_reduction <add>, %284, %cst_97 [2] : vector<2x8x16xf32> to vector<2x8xf32>
    %286 = vector.shape_cast %285 : vector<2x8xf32> to vector<2x8x1xf32>
    %287 = tpu.reciprocal %286 {approx = true} : vector<2x8x1xf32> -> vector<2x8x1xf32>
    %288 = vector.broadcast %287 : vector<2x8x1xf32> to vector<2x8x16xf32>
    %289 = arith.mulf %284, %288 : vector<2x8x16xf32>
    "tpu.trace_start"() <{level = 10 : i32, message = "brc,bcd->brd"}> : () -> ()
    %cst_98 = arith.constant dense<0.000000e+00> : vector<2x8x8xf32>
    %290 = tpu.matmul %289, %20, %cst_98 {dimension_numbers = #tpu.dot_dimension_numbers<[2], [1], [1], [2], [0, 0, 0, 1, 1, 2], [0], [0]>} : vector<2x8x16xf32>, vector<2x16x8xf32>, vector<2x8x8xf32> -> vector<2x8x8xf32>
    "tpu.trace_stop"() : () -> ()
    %291 = vector.shape_cast %290 : vector<2x8x8xf32> to vector<16x8xf32>
    %292 = vector.extract_strided_slice %11 {offsets = [0, 0, 8], sizes = [2, 8, 8], strides = [1, 1, 1]} : vector<2x8x32xf32> to vector<2x8x8xf32>
    %293 = arith.truncf %292 : vector<2x8x8xf32> to vector<2x8x8xbf16>
    %294 = vector.extract_strided_slice %13 {offsets = [0, 0, 8], sizes = [2, 16, 8], strides = [1, 1, 1]} : vector<2x16x32xf32> to vector<2x16x8xf32>
    %295 = arith.truncf %294 : vector<2x16x8xf32> to vector<2x16x8xbf16>
    %296 = vector.extract_strided_slice %15 {offsets = [0, 0, 8], sizes = [2, 16, 8], strides = [1, 1, 1]} : vector<2x16x32xf32> to vector<2x16x8xf32>
    "tpu.trace_start"() <{level = 10 : i32, message = "brd,bcd->brc"}> : () -> ()
    %cst_99 = arith.constant dense<0.000000e+00> : vector<2x8x16xf32>
    %297 = tpu.matmul %293, %295, %cst_99 {dimension_numbers = #tpu.dot_dimension_numbers<[2], [2], [1], [1], [0, 0, 0, 1, 1, 1], [0], [0]>} : vector<2x8x8xbf16>, vector<2x16x8xbf16>, vector<2x8x16xf32> -> vector<2x8x16xf32>
    "tpu.trace_stop"() : () -> ()
    %c1_100 = arith.constant 1 : index
    %c0_101 = arith.constant 0 : index
    %298 = memref.load %arg1[%c1_100, %c0_101] : memref<4x65xf32, #tpu.memory_space<smem>>
    %c1_102 = arith.constant 1 : index
    %c16_103 = arith.constant 16 : index
    %299 = memref.load %arg1[%c1_102, %c16_103] : memref<4x65xf32, #tpu.memory_space<smem>>
    %c1_104 = arith.constant 1 : index
    %c32_105 = arith.constant 32 : index
    %300 = memref.load %arg1[%c1_104, %c32_105] : memref<4x65xf32, #tpu.memory_space<smem>>
    %c1_106 = arith.constant 1 : index
    %c48_107 = arith.constant 48 : index
    %301 = memref.load %arg1[%c1_106, %c48_107] : memref<4x65xf32, #tpu.memory_space<smem>>
    %302 = vector.broadcast %298 : f32 to vector<2x8x16xf32>
    %303 = arith.mulf %297, %302 : vector<2x8x16xf32>
    %304 = vector.broadcast %299 : f32 to vector<2x8x16xf32>
    %305 = arith.mulf %2, %304 : vector<2x8x16xf32>
    %306 = arith.addf %303, %305 : vector<2x8x16xf32>
    %307 = vector.broadcast %300 : f32 to vector<2x8x16xf32>
    %308 = arith.addf %306, %307 : vector<2x8x16xf32>
    %cst_108 = arith.constant 0.000000e+00 : f32
    %309 = vector.broadcast %cst_108 : f32 to vector<2x8x16xf32>
    %310 = arith.maximumf %308, %309 : vector<2x8x16xf32>
    %311 = vector.broadcast %301 : f32 to vector<2x8x16xf32>
    %312 = arith.mulf %310, %311 : vector<2x8x16xf32>
    %c1_109 = arith.constant 1 : index
    %c1_110 = arith.constant 1 : index
    %313 = memref.load %arg1[%c1_109, %c1_110] : memref<4x65xf32, #tpu.memory_space<smem>>
    %c1_111 = arith.constant 1 : index
    %c17_112 = arith.constant 17 : index
    %314 = memref.load %arg1[%c1_111, %c17_112] : memref<4x65xf32, #tpu.memory_space<smem>>
    %c1_113 = arith.constant 1 : index
    %c33_114 = arith.constant 33 : index
    %315 = memref.load %arg1[%c1_113, %c33_114] : memref<4x65xf32, #tpu.memory_space<smem>>
    %c1_115 = arith.constant 1 : index
    %c49_116 = arith.constant 49 : index
    %316 = memref.load %arg1[%c1_115, %c49_116] : memref<4x65xf32, #tpu.memory_space<smem>>
    %317 = vector.broadcast %313 : f32 to vector<2x8x16xf32>
    %318 = arith.mulf %297, %317 : vector<2x8x16xf32>
    %319 = vector.broadcast %314 : f32 to vector<2x8x16xf32>
    %320 = arith.mulf %2, %319 : vector<2x8x16xf32>
    %321 = arith.addf %318, %320 : vector<2x8x16xf32>
    %322 = vector.broadcast %315 : f32 to vector<2x8x16xf32>
    %323 = arith.addf %321, %322 : vector<2x8x16xf32>
    %cst_117 = arith.constant 0.000000e+00 : f32
    %324 = vector.broadcast %cst_117 : f32 to vector<2x8x16xf32>
    %325 = arith.maximumf %323, %324 : vector<2x8x16xf32>
    %326 = vector.broadcast %316 : f32 to vector<2x8x16xf32>
    %327 = arith.mulf %325, %326 : vector<2x8x16xf32>
    %328 = arith.addf %312, %327 : vector<2x8x16xf32>
    %c1_118 = arith.constant 1 : index
    %c2_119 = arith.constant 2 : index
    %329 = memref.load %arg1[%c1_118, %c2_119] : memref<4x65xf32, #tpu.memory_space<smem>>
    %c1_120 = arith.constant 1 : index
    %c18_121 = arith.constant 18 : index
    %330 = memref.load %arg1[%c1_120, %c18_121] : memref<4x65xf32, #tpu.memory_space<smem>>
    %c1_122 = arith.constant 1 : index
    %c34_123 = arith.constant 34 : index
    %331 = memref.load %arg1[%c1_122, %c34_123] : memref<4x65xf32, #tpu.memory_space<smem>>
    %c1_124 = arith.constant 1 : index
    %c50_125 = arith.constant 50 : index
    %332 = memref.load %arg1[%c1_124, %c50_125] : memref<4x65xf32, #tpu.memory_space<smem>>
    %333 = vector.broadcast %329 : f32 to vector<2x8x16xf32>
    %334 = arith.mulf %297, %333 : vector<2x8x16xf32>
    %335 = vector.broadcast %330 : f32 to vector<2x8x16xf32>
    %336 = arith.mulf %2, %335 : vector<2x8x16xf32>
    %337 = arith.addf %334, %336 : vector<2x8x16xf32>
    %338 = vector.broadcast %331 : f32 to vector<2x8x16xf32>
    %339 = arith.addf %337, %338 : vector<2x8x16xf32>
    %cst_126 = arith.constant 0.000000e+00 : f32
    %340 = vector.broadcast %cst_126 : f32 to vector<2x8x16xf32>
    %341 = arith.maximumf %339, %340 : vector<2x8x16xf32>
    %342 = vector.broadcast %332 : f32 to vector<2x8x16xf32>
    %343 = arith.mulf %341, %342 : vector<2x8x16xf32>
    %344 = arith.addf %328, %343 : vector<2x8x16xf32>
    %c1_127 = arith.constant 1 : index
    %c3_128 = arith.constant 3 : index
    %345 = memref.load %arg1[%c1_127, %c3_128] : memref<4x65xf32, #tpu.memory_space<smem>>
    %c1_129 = arith.constant 1 : index
    %c19_130 = arith.constant 19 : index
    %346 = memref.load %arg1[%c1_129, %c19_130] : memref<4x65xf32, #tpu.memory_space<smem>>
    %c1_131 = arith.constant 1 : index
    %c35_132 = arith.constant 35 : index
    %347 = memref.load %arg1[%c1_131, %c35_132] : memref<4x65xf32, #tpu.memory_space<smem>>
    %c1_133 = arith.constant 1 : index
    %c51_134 = arith.constant 51 : index
    %348 = memref.load %arg1[%c1_133, %c51_134] : memref<4x65xf32, #tpu.memory_space<smem>>
    %349 = vector.broadcast %345 : f32 to vector<2x8x16xf32>
    %350 = arith.mulf %297, %349 : vector<2x8x16xf32>
    %351 = vector.broadcast %346 : f32 to vector<2x8x16xf32>
    %352 = arith.mulf %2, %351 : vector<2x8x16xf32>
    %353 = arith.addf %350, %352 : vector<2x8x16xf32>
    %354 = vector.broadcast %347 : f32 to vector<2x8x16xf32>
    %355 = arith.addf %353, %354 : vector<2x8x16xf32>
    %cst_135 = arith.constant 0.000000e+00 : f32
    %356 = vector.broadcast %cst_135 : f32 to vector<2x8x16xf32>
    %357 = arith.maximumf %355, %356 : vector<2x8x16xf32>
    %358 = vector.broadcast %348 : f32 to vector<2x8x16xf32>
    %359 = arith.mulf %357, %358 : vector<2x8x16xf32>
    %360 = arith.addf %344, %359 : vector<2x8x16xf32>
    %c1_136 = arith.constant 1 : index
    %c4_137 = arith.constant 4 : index
    %361 = memref.load %arg1[%c1_136, %c4_137] : memref<4x65xf32, #tpu.memory_space<smem>>
    %c1_138 = arith.constant 1 : index
    %c20_139 = arith.constant 20 : index
    %362 = memref.load %arg1[%c1_138, %c20_139] : memref<4x65xf32, #tpu.memory_space<smem>>
    %c1_140 = arith.constant 1 : index
    %c36_141 = arith.constant 36 : index
    %363 = memref.load %arg1[%c1_140, %c36_141] : memref<4x65xf32, #tpu.memory_space<smem>>
    %c1_142 = arith.constant 1 : index
    %c52_143 = arith.constant 52 : index
    %364 = memref.load %arg1[%c1_142, %c52_143] : memref<4x65xf32, #tpu.memory_space<smem>>
    %365 = vector.broadcast %361 : f32 to vector<2x8x16xf32>
    %366 = arith.mulf %297, %365 : vector<2x8x16xf32>
    %367 = vector.broadcast %362 : f32 to vector<2x8x16xf32>
    %368 = arith.mulf %2, %367 : vector<2x8x16xf32>
    %369 = arith.addf %366, %368 : vector<2x8x16xf32>
    %370 = vector.broadcast %363 : f32 to vector<2x8x16xf32>
    %371 = arith.addf %369, %370 : vector<2x8x16xf32>
    %cst_144 = arith.constant 0.000000e+00 : f32
    %372 = vector.broadcast %cst_144 : f32 to vector<2x8x16xf32>
    %373 = arith.maximumf %371, %372 : vector<2x8x16xf32>
    %374 = vector.broadcast %364 : f32 to vector<2x8x16xf32>
    %375 = arith.mulf %373, %374 : vector<2x8x16xf32>
    %376 = arith.addf %360, %375 : vector<2x8x16xf32>
    %c1_145 = arith.constant 1 : index
    %c5_146 = arith.constant 5 : index
    %377 = memref.load %arg1[%c1_145, %c5_146] : memref<4x65xf32, #tpu.memory_space<smem>>
    %c1_147 = arith.constant 1 : index
    %c21_148 = arith.constant 21 : index
    %378 = memref.load %arg1[%c1_147, %c21_148] : memref<4x65xf32, #tpu.memory_space<smem>>
    %c1_149 = arith.constant 1 : index
    %c37_150 = arith.constant 37 : index
    %379 = memref.load %arg1[%c1_149, %c37_150] : memref<4x65xf32, #tpu.memory_space<smem>>
    %c1_151 = arith.constant 1 : index
    %c53_152 = arith.constant 53 : index
    %380 = memref.load %arg1[%c1_151, %c53_152] : memref<4x65xf32, #tpu.memory_space<smem>>
    %381 = vector.broadcast %377 : f32 to vector<2x8x16xf32>
    %382 = arith.mulf %297, %381 : vector<2x8x16xf32>
    %383 = vector.broadcast %378 : f32 to vector<2x8x16xf32>
    %384 = arith.mulf %2, %383 : vector<2x8x16xf32>
    %385 = arith.addf %382, %384 : vector<2x8x16xf32>
    %386 = vector.broadcast %379 : f32 to vector<2x8x16xf32>
    %387 = arith.addf %385, %386 : vector<2x8x16xf32>
    %cst_153 = arith.constant 0.000000e+00 : f32
    %388 = vector.broadcast %cst_153 : f32 to vector<2x8x16xf32>
    %389 = arith.maximumf %387, %388 : vector<2x8x16xf32>
    %390 = vector.broadcast %380 : f32 to vector<2x8x16xf32>
    %391 = arith.mulf %389, %390 : vector<2x8x16xf32>
    %392 = arith.addf %376, %391 : vector<2x8x16xf32>
    %c1_154 = arith.constant 1 : index
    %c6_155 = arith.constant 6 : index
    %393 = memref.load %arg1[%c1_154, %c6_155] : memref<4x65xf32, #tpu.memory_space<smem>>
    %c1_156 = arith.constant 1 : index
    %c22_157 = arith.constant 22 : index
    %394 = memref.load %arg1[%c1_156, %c22_157] : memref<4x65xf32, #tpu.memory_space<smem>>
    %c1_158 = arith.constant 1 : index
    %c38_159 = arith.constant 38 : index
    %395 = memref.load %arg1[%c1_158, %c38_159] : memref<4x65xf32, #tpu.memory_space<smem>>
    %c1_160 = arith.constant 1 : index
    %c54_161 = arith.constant 54 : index
    %396 = memref.load %arg1[%c1_160, %c54_161] : memref<4x65xf32, #tpu.memory_space<smem>>
    %397 = vector.broadcast %393 : f32 to vector<2x8x16xf32>
    %398 = arith.mulf %297, %397 : vector<2x8x16xf32>
    %399 = vector.broadcast %394 : f32 to vector<2x8x16xf32>
    %400 = arith.mulf %2, %399 : vector<2x8x16xf32>
    %401 = arith.addf %398, %400 : vector<2x8x16xf32>
    %402 = vector.broadcast %395 : f32 to vector<2x8x16xf32>
    %403 = arith.addf %401, %402 : vector<2x8x16xf32>
    %cst_162 = arith.constant 0.000000e+00 : f32
    %404 = vector.broadcast %cst_162 : f32 to vector<2x8x16xf32>
    %405 = arith.maximumf %403, %404 : vector<2x8x16xf32>
    %406 = vector.broadcast %396 : f32 to vector<2x8x16xf32>
    %407 = arith.mulf %405, %406 : vector<2x8x16xf32>
    %408 = arith.addf %392, %407 : vector<2x8x16xf32>
    %c1_163 = arith.constant 1 : index
    %c7_164 = arith.constant 7 : index
    %409 = memref.load %arg1[%c1_163, %c7_164] : memref<4x65xf32, #tpu.memory_space<smem>>
    %c1_165 = arith.constant 1 : index
    %c23_166 = arith.constant 23 : index
    %410 = memref.load %arg1[%c1_165, %c23_166] : memref<4x65xf32, #tpu.memory_space<smem>>
    %c1_167 = arith.constant 1 : index
    %c39_168 = arith.constant 39 : index
    %411 = memref.load %arg1[%c1_167, %c39_168] : memref<4x65xf32, #tpu.memory_space<smem>>
    %c1_169 = arith.constant 1 : index
    %c55_170 = arith.constant 55 : index
    %412 = memref.load %arg1[%c1_169, %c55_170] : memref<4x65xf32, #tpu.memory_space<smem>>
    %413 = vector.broadcast %409 : f32 to vector<2x8x16xf32>
    %414 = arith.mulf %297, %413 : vector<2x8x16xf32>
    %415 = vector.broadcast %410 : f32 to vector<2x8x16xf32>
    %416 = arith.mulf %2, %415 : vector<2x8x16xf32>
    %417 = arith.addf %414, %416 : vector<2x8x16xf32>
    %418 = vector.broadcast %411 : f32 to vector<2x8x16xf32>
    %419 = arith.addf %417, %418 : vector<2x8x16xf32>
    %cst_171 = arith.constant 0.000000e+00 : f32
    %420 = vector.broadcast %cst_171 : f32 to vector<2x8x16xf32>
    %421 = arith.maximumf %419, %420 : vector<2x8x16xf32>
    %422 = vector.broadcast %412 : f32 to vector<2x8x16xf32>
    %423 = arith.mulf %421, %422 : vector<2x8x16xf32>
    %424 = arith.addf %408, %423 : vector<2x8x16xf32>
    %c1_172 = arith.constant 1 : index
    %c8_173 = arith.constant 8 : index
    %425 = memref.load %arg1[%c1_172, %c8_173] : memref<4x65xf32, #tpu.memory_space<smem>>
    %c1_174 = arith.constant 1 : index
    %c24_175 = arith.constant 24 : index
    %426 = memref.load %arg1[%c1_174, %c24_175] : memref<4x65xf32, #tpu.memory_space<smem>>
    %c1_176 = arith.constant 1 : index
    %c40_177 = arith.constant 40 : index
    %427 = memref.load %arg1[%c1_176, %c40_177] : memref<4x65xf32, #tpu.memory_space<smem>>
    %c1_178 = arith.constant 1 : index
    %c56_179 = arith.constant 56 : index
    %428 = memref.load %arg1[%c1_178, %c56_179] : memref<4x65xf32, #tpu.memory_space<smem>>
    %429 = vector.broadcast %425 : f32 to vector<2x8x16xf32>
    %430 = arith.mulf %297, %429 : vector<2x8x16xf32>
    %431 = vector.broadcast %426 : f32 to vector<2x8x16xf32>
    %432 = arith.mulf %2, %431 : vector<2x8x16xf32>
    %433 = arith.addf %430, %432 : vector<2x8x16xf32>
    %434 = vector.broadcast %427 : f32 to vector<2x8x16xf32>
    %435 = arith.addf %433, %434 : vector<2x8x16xf32>
    %cst_180 = arith.constant 0.000000e+00 : f32
    %436 = vector.broadcast %cst_180 : f32 to vector<2x8x16xf32>
    %437 = arith.maximumf %435, %436 : vector<2x8x16xf32>
    %438 = vector.broadcast %428 : f32 to vector<2x8x16xf32>
    %439 = arith.mulf %437, %438 : vector<2x8x16xf32>
    %440 = arith.addf %424, %439 : vector<2x8x16xf32>
    %c1_181 = arith.constant 1 : index
    %c9_182 = arith.constant 9 : index
    %441 = memref.load %arg1[%c1_181, %c9_182] : memref<4x65xf32, #tpu.memory_space<smem>>
    %c1_183 = arith.constant 1 : index
    %c25_184 = arith.constant 25 : index
    %442 = memref.load %arg1[%c1_183, %c25_184] : memref<4x65xf32, #tpu.memory_space<smem>>
    %c1_185 = arith.constant 1 : index
    %c41_186 = arith.constant 41 : index
    %443 = memref.load %arg1[%c1_185, %c41_186] : memref<4x65xf32, #tpu.memory_space<smem>>
    %c1_187 = arith.constant 1 : index
    %c57_188 = arith.constant 57 : index
    %444 = memref.load %arg1[%c1_187, %c57_188] : memref<4x65xf32, #tpu.memory_space<smem>>
    %445 = vector.broadcast %441 : f32 to vector<2x8x16xf32>
    %446 = arith.mulf %297, %445 : vector<2x8x16xf32>
    %447 = vector.broadcast %442 : f32 to vector<2x8x16xf32>
    %448 = arith.mulf %2, %447 : vector<2x8x16xf32>
    %449 = arith.addf %446, %448 : vector<2x8x16xf32>
    %450 = vector.broadcast %443 : f32 to vector<2x8x16xf32>
    %451 = arith.addf %449, %450 : vector<2x8x16xf32>
    %cst_189 = arith.constant 0.000000e+00 : f32
    %452 = vector.broadcast %cst_189 : f32 to vector<2x8x16xf32>
    %453 = arith.maximumf %451, %452 : vector<2x8x16xf32>
    %454 = vector.broadcast %444 : f32 to vector<2x8x16xf32>
    %455 = arith.mulf %453, %454 : vector<2x8x16xf32>
    %456 = arith.addf %440, %455 : vector<2x8x16xf32>
    %c1_190 = arith.constant 1 : index
    %c10_191 = arith.constant 10 : index
    %457 = memref.load %arg1[%c1_190, %c10_191] : memref<4x65xf32, #tpu.memory_space<smem>>
    %c1_192 = arith.constant 1 : index
    %c26_193 = arith.constant 26 : index
    %458 = memref.load %arg1[%c1_192, %c26_193] : memref<4x65xf32, #tpu.memory_space<smem>>
    %c1_194 = arith.constant 1 : index
    %c42_195 = arith.constant 42 : index
    %459 = memref.load %arg1[%c1_194, %c42_195] : memref<4x65xf32, #tpu.memory_space<smem>>
    %c1_196 = arith.constant 1 : index
    %c58_197 = arith.constant 58 : index
    %460 = memref.load %arg1[%c1_196, %c58_197] : memref<4x65xf32, #tpu.memory_space<smem>>
    %461 = vector.broadcast %457 : f32 to vector<2x8x16xf32>
    %462 = arith.mulf %297, %461 : vector<2x8x16xf32>
    %463 = vector.broadcast %458 : f32 to vector<2x8x16xf32>
    %464 = arith.mulf %2, %463 : vector<2x8x16xf32>
    %465 = arith.addf %462, %464 : vector<2x8x16xf32>
    %466 = vector.broadcast %459 : f32 to vector<2x8x16xf32>
    %467 = arith.addf %465, %466 : vector<2x8x16xf32>
    %cst_198 = arith.constant 0.000000e+00 : f32
    %468 = vector.broadcast %cst_198 : f32 to vector<2x8x16xf32>
    %469 = arith.maximumf %467, %468 : vector<2x8x16xf32>
    %470 = vector.broadcast %460 : f32 to vector<2x8x16xf32>
    %471 = arith.mulf %469, %470 : vector<2x8x16xf32>
    %472 = arith.addf %456, %471 : vector<2x8x16xf32>
    %c1_199 = arith.constant 1 : index
    %c11_200 = arith.constant 11 : index
    %473 = memref.load %arg1[%c1_199, %c11_200] : memref<4x65xf32, #tpu.memory_space<smem>>
    %c1_201 = arith.constant 1 : index
    %c27_202 = arith.constant 27 : index
    %474 = memref.load %arg1[%c1_201, %c27_202] : memref<4x65xf32, #tpu.memory_space<smem>>
    %c1_203 = arith.constant 1 : index
    %c43_204 = arith.constant 43 : index
    %475 = memref.load %arg1[%c1_203, %c43_204] : memref<4x65xf32, #tpu.memory_space<smem>>
    %c1_205 = arith.constant 1 : index
    %c59_206 = arith.constant 59 : index
    %476 = memref.load %arg1[%c1_205, %c59_206] : memref<4x65xf32, #tpu.memory_space<smem>>
    %477 = vector.broadcast %473 : f32 to vector<2x8x16xf32>
    %478 = arith.mulf %297, %477 : vector<2x8x16xf32>
    %479 = vector.broadcast %474 : f32 to vector<2x8x16xf32>
    %480 = arith.mulf %2, %479 : vector<2x8x16xf32>
    %481 = arith.addf %478, %480 : vector<2x8x16xf32>
    %482 = vector.broadcast %475 : f32 to vector<2x8x16xf32>
    %483 = arith.addf %481, %482 : vector<2x8x16xf32>
    %cst_207 = arith.constant 0.000000e+00 : f32
    %484 = vector.broadcast %cst_207 : f32 to vector<2x8x16xf32>
    %485 = arith.maximumf %483, %484 : vector<2x8x16xf32>
    %486 = vector.broadcast %476 : f32 to vector<2x8x16xf32>
    %487 = arith.mulf %485, %486 : vector<2x8x16xf32>
    %488 = arith.addf %472, %487 : vector<2x8x16xf32>
    %c1_208 = arith.constant 1 : index
    %c12_209 = arith.constant 12 : index
    %489 = memref.load %arg1[%c1_208, %c12_209] : memref<4x65xf32, #tpu.memory_space<smem>>
    %c1_210 = arith.constant 1 : index
    %c28_211 = arith.constant 28 : index
    %490 = memref.load %arg1[%c1_210, %c28_211] : memref<4x65xf32, #tpu.memory_space<smem>>
    %c1_212 = arith.constant 1 : index
    %c44_213 = arith.constant 44 : index
    %491 = memref.load %arg1[%c1_212, %c44_213] : memref<4x65xf32, #tpu.memory_space<smem>>
    %c1_214 = arith.constant 1 : index
    %c60_215 = arith.constant 60 : index
    %492 = memref.load %arg1[%c1_214, %c60_215] : memref<4x65xf32, #tpu.memory_space<smem>>
    %493 = vector.broadcast %489 : f32 to vector<2x8x16xf32>
    %494 = arith.mulf %297, %493 : vector<2x8x16xf32>
    %495 = vector.broadcast %490 : f32 to vector<2x8x16xf32>
    %496 = arith.mulf %2, %495 : vector<2x8x16xf32>
    %497 = arith.addf %494, %496 : vector<2x8x16xf32>
    %498 = vector.broadcast %491 : f32 to vector<2x8x16xf32>
    %499 = arith.addf %497, %498 : vector<2x8x16xf32>
    %cst_216 = arith.constant 0.000000e+00 : f32
    %500 = vector.broadcast %cst_216 : f32 to vector<2x8x16xf32>
    %501 = arith.maximumf %499, %500 : vector<2x8x16xf32>
    %502 = vector.broadcast %492 : f32 to vector<2x8x16xf32>
    %503 = arith.mulf %501, %502 : vector<2x8x16xf32>
    %504 = arith.addf %488, %503 : vector<2x8x16xf32>
    %c1_217 = arith.constant 1 : index
    %c13_218 = arith.constant 13 : index
    %505 = memref.load %arg1[%c1_217, %c13_218] : memref<4x65xf32, #tpu.memory_space<smem>>
    %c1_219 = arith.constant 1 : index
    %c29_220 = arith.constant 29 : index
    %506 = memref.load %arg1[%c1_219, %c29_220] : memref<4x65xf32, #tpu.memory_space<smem>>
    %c1_221 = arith.constant 1 : index
    %c45_222 = arith.constant 45 : index
    %507 = memref.load %arg1[%c1_221, %c45_222] : memref<4x65xf32, #tpu.memory_space<smem>>
    %c1_223 = arith.constant 1 : index
    %c61_224 = arith.constant 61 : index
    %508 = memref.load %arg1[%c1_223, %c61_224] : memref<4x65xf32, #tpu.memory_space<smem>>
    %509 = vector.broadcast %505 : f32 to vector<2x8x16xf32>
    %510 = arith.mulf %297, %509 : vector<2x8x16xf32>
    %511 = vector.broadcast %506 : f32 to vector<2x8x16xf32>
    %512 = arith.mulf %2, %511 : vector<2x8x16xf32>
    %513 = arith.addf %510, %512 : vector<2x8x16xf32>
    %514 = vector.broadcast %507 : f32 to vector<2x8x16xf32>
    %515 = arith.addf %513, %514 : vector<2x8x16xf32>
    %cst_225 = arith.constant 0.000000e+00 : f32
    %516 = vector.broadcast %cst_225 : f32 to vector<2x8x16xf32>
    %517 = arith.maximumf %515, %516 : vector<2x8x16xf32>
    %518 = vector.broadcast %508 : f32 to vector<2x8x16xf32>
    %519 = arith.mulf %517, %518 : vector<2x8x16xf32>
    %520 = arith.addf %504, %519 : vector<2x8x16xf32>
    %c1_226 = arith.constant 1 : index
    %c14_227 = arith.constant 14 : index
    %521 = memref.load %arg1[%c1_226, %c14_227] : memref<4x65xf32, #tpu.memory_space<smem>>
    %c1_228 = arith.constant 1 : index
    %c30_229 = arith.constant 30 : index
    %522 = memref.load %arg1[%c1_228, %c30_229] : memref<4x65xf32, #tpu.memory_space<smem>>
    %c1_230 = arith.constant 1 : index
    %c46_231 = arith.constant 46 : index
    %523 = memref.load %arg1[%c1_230, %c46_231] : memref<4x65xf32, #tpu.memory_space<smem>>
    %c1_232 = arith.constant 1 : index
    %c62_233 = arith.constant 62 : index
    %524 = memref.load %arg1[%c1_232, %c62_233] : memref<4x65xf32, #tpu.memory_space<smem>>
    %525 = vector.broadcast %521 : f32 to vector<2x8x16xf32>
    %526 = arith.mulf %297, %525 : vector<2x8x16xf32>
    %527 = vector.broadcast %522 : f32 to vector<2x8x16xf32>
    %528 = arith.mulf %2, %527 : vector<2x8x16xf32>
    %529 = arith.addf %526, %528 : vector<2x8x16xf32>
    %530 = vector.broadcast %523 : f32 to vector<2x8x16xf32>
    %531 = arith.addf %529, %530 : vector<2x8x16xf32>
    %cst_234 = arith.constant 0.000000e+00 : f32
    %532 = vector.broadcast %cst_234 : f32 to vector<2x8x16xf32>
    %533 = arith.maximumf %531, %532 : vector<2x8x16xf32>
    %534 = vector.broadcast %524 : f32 to vector<2x8x16xf32>
    %535 = arith.mulf %533, %534 : vector<2x8x16xf32>
    %536 = arith.addf %520, %535 : vector<2x8x16xf32>
    %c1_235 = arith.constant 1 : index
    %c15_236 = arith.constant 15 : index
    %537 = memref.load %arg1[%c1_235, %c15_236] : memref<4x65xf32, #tpu.memory_space<smem>>
    %c1_237 = arith.constant 1 : index
    %c31_238 = arith.constant 31 : index
    %538 = memref.load %arg1[%c1_237, %c31_238] : memref<4x65xf32, #tpu.memory_space<smem>>
    %c1_239 = arith.constant 1 : index
    %c47_240 = arith.constant 47 : index
    %539 = memref.load %arg1[%c1_239, %c47_240] : memref<4x65xf32, #tpu.memory_space<smem>>
    %c1_241 = arith.constant 1 : index
    %c63_242 = arith.constant 63 : index
    %540 = memref.load %arg1[%c1_241, %c63_242] : memref<4x65xf32, #tpu.memory_space<smem>>
    %541 = vector.broadcast %537 : f32 to vector<2x8x16xf32>
    %542 = arith.mulf %297, %541 : vector<2x8x16xf32>
    %543 = vector.broadcast %538 : f32 to vector<2x8x16xf32>
    %544 = arith.mulf %2, %543 : vector<2x8x16xf32>
    %545 = arith.addf %542, %544 : vector<2x8x16xf32>
    %546 = vector.broadcast %539 : f32 to vector<2x8x16xf32>
    %547 = arith.addf %545, %546 : vector<2x8x16xf32>
    %cst_243 = arith.constant 0.000000e+00 : f32
    %548 = vector.broadcast %cst_243 : f32 to vector<2x8x16xf32>
    %549 = arith.maximumf %547, %548 : vector<2x8x16xf32>
    %550 = vector.broadcast %540 : f32 to vector<2x8x16xf32>
    %551 = arith.mulf %549, %550 : vector<2x8x16xf32>
    %552 = arith.addf %536, %551 : vector<2x8x16xf32>
    %c1_244 = arith.constant 1 : index
    %c64_245 = arith.constant 64 : index
    %553 = memref.load %arg1[%c1_244, %c64_245] : memref<4x65xf32, #tpu.memory_space<smem>>
    %554 = vector.broadcast %553 : f32 to vector<2x8x16xf32>
    %555 = arith.addf %552, %554 : vector<2x8x16xf32>
    %cst_246 = arith.constant dense<0xFF800000> : vector<2x8xf32>
    %556 = vector.multi_reduction <maximumf>, %555, %cst_246 [2] : vector<2x8x16xf32> to vector<2x8xf32>
    %557 = vector.shape_cast %556 : vector<2x8xf32> to vector<2x8x1xf32>
    %558 = vector.broadcast %557 : vector<2x8x1xf32> to vector<2x8x16xf32>
    %559 = arith.subf %555, %558 : vector<2x8x16xf32>
    %560 = math.exp %559 : vector<2x8x16xf32>
    %cst_247 = arith.constant dense<0.000000e+00> : vector<2x8xf32>
    %561 = vector.multi_reduction <add>, %560, %cst_247 [2] : vector<2x8x16xf32> to vector<2x8xf32>
    %562 = vector.shape_cast %561 : vector<2x8xf32> to vector<2x8x1xf32>
    %563 = tpu.reciprocal %562 {approx = true} : vector<2x8x1xf32> -> vector<2x8x1xf32>
    %564 = vector.broadcast %563 : vector<2x8x1xf32> to vector<2x8x16xf32>
    %565 = arith.mulf %560, %564 : vector<2x8x16xf32>
    "tpu.trace_start"() <{level = 10 : i32, message = "brc,bcd->brd"}> : () -> ()
    %cst_248 = arith.constant dense<0.000000e+00> : vector<2x8x8xf32>
    %566 = tpu.matmul %565, %296, %cst_248 {dimension_numbers = #tpu.dot_dimension_numbers<[2], [1], [1], [2], [0, 0, 0, 1, 1, 2], [0], [0]>} : vector<2x8x16xf32>, vector<2x16x8xf32>, vector<2x8x8xf32> -> vector<2x8x8xf32>
    "tpu.trace_stop"() : () -> ()
    %567 = vector.shape_cast %566 : vector<2x8x8xf32> to vector<16x8xf32>
    %568 = vector.extract_strided_slice %11 {offsets = [0, 0, 16], sizes = [2, 8, 8], strides = [1, 1, 1]} : vector<2x8x32xf32> to vector<2x8x8xf32>
    %569 = arith.truncf %568 : vector<2x8x8xf32> to vector<2x8x8xbf16>
    %570 = vector.extract_strided_slice %13 {offsets = [0, 0, 16], sizes = [2, 16, 8], strides = [1, 1, 1]} : vector<2x16x32xf32> to vector<2x16x8xf32>
    %571 = arith.truncf %570 : vector<2x16x8xf32> to vector<2x16x8xbf16>
    %572 = vector.extract_strided_slice %15 {offsets = [0, 0, 16], sizes = [2, 16, 8], strides = [1, 1, 1]} : vector<2x16x32xf32> to vector<2x16x8xf32>
    "tpu.trace_start"() <{level = 10 : i32, message = "brd,bcd->brc"}> : () -> ()
    %cst_249 = arith.constant dense<0.000000e+00> : vector<2x8x16xf32>
    %573 = tpu.matmul %569, %571, %cst_249 {dimension_numbers = #tpu.dot_dimension_numbers<[2], [2], [1], [1], [0, 0, 0, 1, 1, 1], [0], [0]>} : vector<2x8x8xbf16>, vector<2x16x8xbf16>, vector<2x8x16xf32> -> vector<2x8x16xf32>
    "tpu.trace_stop"() : () -> ()
    %c2_250 = arith.constant 2 : index
    %c0_251 = arith.constant 0 : index
    %574 = memref.load %arg1[%c2_250, %c0_251] : memref<4x65xf32, #tpu.memory_space<smem>>
    %c2_252 = arith.constant 2 : index
    %c16_253 = arith.constant 16 : index
    %575 = memref.load %arg1[%c2_252, %c16_253] : memref<4x65xf32, #tpu.memory_space<smem>>
    %c2_254 = arith.constant 2 : index
    %c32_255 = arith.constant 32 : index
    %576 = memref.load %arg1[%c2_254, %c32_255] : memref<4x65xf32, #tpu.memory_space<smem>>
    %c2_256 = arith.constant 2 : index
    %c48_257 = arith.constant 48 : index
    %577 = memref.load %arg1[%c2_256, %c48_257] : memref<4x65xf32, #tpu.memory_space<smem>>
    %578 = vector.broadcast %574 : f32 to vector<2x8x16xf32>
    %579 = arith.mulf %573, %578 : vector<2x8x16xf32>
    %580 = vector.broadcast %575 : f32 to vector<2x8x16xf32>
    %581 = arith.mulf %2, %580 : vector<2x8x16xf32>
    %582 = arith.addf %579, %581 : vector<2x8x16xf32>
    %583 = vector.broadcast %576 : f32 to vector<2x8x16xf32>
    %584 = arith.addf %582, %583 : vector<2x8x16xf32>
    %cst_258 = arith.constant 0.000000e+00 : f32
    %585 = vector.broadcast %cst_258 : f32 to vector<2x8x16xf32>
    %586 = arith.maximumf %584, %585 : vector<2x8x16xf32>
    %587 = vector.broadcast %577 : f32 to vector<2x8x16xf32>
    %588 = arith.mulf %586, %587 : vector<2x8x16xf32>
    %c2_259 = arith.constant 2 : index
    %c1_260 = arith.constant 1 : index
    %589 = memref.load %arg1[%c2_259, %c1_260] : memref<4x65xf32, #tpu.memory_space<smem>>
    %c2_261 = arith.constant 2 : index
    %c17_262 = arith.constant 17 : index
    %590 = memref.load %arg1[%c2_261, %c17_262] : memref<4x65xf32, #tpu.memory_space<smem>>
    %c2_263 = arith.constant 2 : index
    %c33_264 = arith.constant 33 : index
    %591 = memref.load %arg1[%c2_263, %c33_264] : memref<4x65xf32, #tpu.memory_space<smem>>
    %c2_265 = arith.constant 2 : index
    %c49_266 = arith.constant 49 : index
    %592 = memref.load %arg1[%c2_265, %c49_266] : memref<4x65xf32, #tpu.memory_space<smem>>
    %593 = vector.broadcast %589 : f32 to vector<2x8x16xf32>
    %594 = arith.mulf %573, %593 : vector<2x8x16xf32>
    %595 = vector.broadcast %590 : f32 to vector<2x8x16xf32>
    %596 = arith.mulf %2, %595 : vector<2x8x16xf32>
    %597 = arith.addf %594, %596 : vector<2x8x16xf32>
    %598 = vector.broadcast %591 : f32 to vector<2x8x16xf32>
    %599 = arith.addf %597, %598 : vector<2x8x16xf32>
    %cst_267 = arith.constant 0.000000e+00 : f32
    %600 = vector.broadcast %cst_267 : f32 to vector<2x8x16xf32>
    %601 = arith.maximumf %599, %600 : vector<2x8x16xf32>
    %602 = vector.broadcast %592 : f32 to vector<2x8x16xf32>
    %603 = arith.mulf %601, %602 : vector<2x8x16xf32>
    %604 = arith.addf %588, %603 : vector<2x8x16xf32>
    %c2_268 = arith.constant 2 : index
    %c2_269 = arith.constant 2 : index
    %605 = memref.load %arg1[%c2_268, %c2_269] : memref<4x65xf32, #tpu.memory_space<smem>>
    %c2_270 = arith.constant 2 : index
    %c18_271 = arith.constant 18 : index
    %606 = memref.load %arg1[%c2_270, %c18_271] : memref<4x65xf32, #tpu.memory_space<smem>>
    %c2_272 = arith.constant 2 : index
    %c34_273 = arith.constant 34 : index
    %607 = memref.load %arg1[%c2_272, %c34_273] : memref<4x65xf32, #tpu.memory_space<smem>>
    %c2_274 = arith.constant 2 : index
    %c50_275 = arith.constant 50 : index
    %608 = memref.load %arg1[%c2_274, %c50_275] : memref<4x65xf32, #tpu.memory_space<smem>>
    %609 = vector.broadcast %605 : f32 to vector<2x8x16xf32>
    %610 = arith.mulf %573, %609 : vector<2x8x16xf32>
    %611 = vector.broadcast %606 : f32 to vector<2x8x16xf32>
    %612 = arith.mulf %2, %611 : vector<2x8x16xf32>
    %613 = arith.addf %610, %612 : vector<2x8x16xf32>
    %614 = vector.broadcast %607 : f32 to vector<2x8x16xf32>
    %615 = arith.addf %613, %614 : vector<2x8x16xf32>
    %cst_276 = arith.constant 0.000000e+00 : f32
    %616 = vector.broadcast %cst_276 : f32 to vector<2x8x16xf32>
    %617 = arith.maximumf %615, %616 : vector<2x8x16xf32>
    %618 = vector.broadcast %608 : f32 to vector<2x8x16xf32>
    %619 = arith.mulf %617, %618 : vector<2x8x16xf32>
    %620 = arith.addf %604, %619 : vector<2x8x16xf32>
    %c2_277 = arith.constant 2 : index
    %c3_278 = arith.constant 3 : index
    %621 = memref.load %arg1[%c2_277, %c3_278] : memref<4x65xf32, #tpu.memory_space<smem>>
    %c2_279 = arith.constant 2 : index
    %c19_280 = arith.constant 19 : index
    %622 = memref.load %arg1[%c2_279, %c19_280] : memref<4x65xf32, #tpu.memory_space<smem>>
    %c2_281 = arith.constant 2 : index
    %c35_282 = arith.constant 35 : index
    %623 = memref.load %arg1[%c2_281, %c35_282] : memref<4x65xf32, #tpu.memory_space<smem>>
    %c2_283 = arith.constant 2 : index
    %c51_284 = arith.constant 51 : index
    %624 = memref.load %arg1[%c2_283, %c51_284] : memref<4x65xf32, #tpu.memory_space<smem>>
    %625 = vector.broadcast %621 : f32 to vector<2x8x16xf32>
    %626 = arith.mulf %573, %625 : vector<2x8x16xf32>
    %627 = vector.broadcast %622 : f32 to vector<2x8x16xf32>
    %628 = arith.mulf %2, %627 : vector<2x8x16xf32>
    %629 = arith.addf %626, %628 : vector<2x8x16xf32>
    %630 = vector.broadcast %623 : f32 to vector<2x8x16xf32>
    %631 = arith.addf %629, %630 : vector<2x8x16xf32>
    %cst_285 = arith.constant 0.000000e+00 : f32
    %632 = vector.broadcast %cst_285 : f32 to vector<2x8x16xf32>
    %633 = arith.maximumf %631, %632 : vector<2x8x16xf32>
    %634 = vector.broadcast %624 : f32 to vector<2x8x16xf32>
    %635 = arith.mulf %633, %634 : vector<2x8x16xf32>
    %636 = arith.addf %620, %635 : vector<2x8x16xf32>
    %c2_286 = arith.constant 2 : index
    %c4_287 = arith.constant 4 : index
    %637 = memref.load %arg1[%c2_286, %c4_287] : memref<4x65xf32, #tpu.memory_space<smem>>
    %c2_288 = arith.constant 2 : index
    %c20_289 = arith.constant 20 : index
    %638 = memref.load %arg1[%c2_288, %c20_289] : memref<4x65xf32, #tpu.memory_space<smem>>
    %c2_290 = arith.constant 2 : index
    %c36_291 = arith.constant 36 : index
    %639 = memref.load %arg1[%c2_290, %c36_291] : memref<4x65xf32, #tpu.memory_space<smem>>
    %c2_292 = arith.constant 2 : index
    %c52_293 = arith.constant 52 : index
    %640 = memref.load %arg1[%c2_292, %c52_293] : memref<4x65xf32, #tpu.memory_space<smem>>
    %641 = vector.broadcast %637 : f32 to vector<2x8x16xf32>
    %642 = arith.mulf %573, %641 : vector<2x8x16xf32>
    %643 = vector.broadcast %638 : f32 to vector<2x8x16xf32>
    %644 = arith.mulf %2, %643 : vector<2x8x16xf32>
    %645 = arith.addf %642, %644 : vector<2x8x16xf32>
    %646 = vector.broadcast %639 : f32 to vector<2x8x16xf32>
    %647 = arith.addf %645, %646 : vector<2x8x16xf32>
    %cst_294 = arith.constant 0.000000e+00 : f32
    %648 = vector.broadcast %cst_294 : f32 to vector<2x8x16xf32>
    %649 = arith.maximumf %647, %648 : vector<2x8x16xf32>
    %650 = vector.broadcast %640 : f32 to vector<2x8x16xf32>
    %651 = arith.mulf %649, %650 : vector<2x8x16xf32>
    %652 = arith.addf %636, %651 : vector<2x8x16xf32>
    %c2_295 = arith.constant 2 : index
    %c5_296 = arith.constant 5 : index
    %653 = memref.load %arg1[%c2_295, %c5_296] : memref<4x65xf32, #tpu.memory_space<smem>>
    %c2_297 = arith.constant 2 : index
    %c21_298 = arith.constant 21 : index
    %654 = memref.load %arg1[%c2_297, %c21_298] : memref<4x65xf32, #tpu.memory_space<smem>>
    %c2_299 = arith.constant 2 : index
    %c37_300 = arith.constant 37 : index
    %655 = memref.load %arg1[%c2_299, %c37_300] : memref<4x65xf32, #tpu.memory_space<smem>>
    %c2_301 = arith.constant 2 : index
    %c53_302 = arith.constant 53 : index
    %656 = memref.load %arg1[%c2_301, %c53_302] : memref<4x65xf32, #tpu.memory_space<smem>>
    %657 = vector.broadcast %653 : f32 to vector<2x8x16xf32>
    %658 = arith.mulf %573, %657 : vector<2x8x16xf32>
    %659 = vector.broadcast %654 : f32 to vector<2x8x16xf32>
    %660 = arith.mulf %2, %659 : vector<2x8x16xf32>
    %661 = arith.addf %658, %660 : vector<2x8x16xf32>
    %662 = vector.broadcast %655 : f32 to vector<2x8x16xf32>
    %663 = arith.addf %661, %662 : vector<2x8x16xf32>
    %cst_303 = arith.constant 0.000000e+00 : f32
    %664 = vector.broadcast %cst_303 : f32 to vector<2x8x16xf32>
    %665 = arith.maximumf %663, %664 : vector<2x8x16xf32>
    %666 = vector.broadcast %656 : f32 to vector<2x8x16xf32>
    %667 = arith.mulf %665, %666 : vector<2x8x16xf32>
    %668 = arith.addf %652, %667 : vector<2x8x16xf32>
    %c2_304 = arith.constant 2 : index
    %c6_305 = arith.constant 6 : index
    %669 = memref.load %arg1[%c2_304, %c6_305] : memref<4x65xf32, #tpu.memory_space<smem>>
    %c2_306 = arith.constant 2 : index
    %c22_307 = arith.constant 22 : index
    %670 = memref.load %arg1[%c2_306, %c22_307] : memref<4x65xf32, #tpu.memory_space<smem>>
    %c2_308 = arith.constant 2 : index
    %c38_309 = arith.constant 38 : index
    %671 = memref.load %arg1[%c2_308, %c38_309] : memref<4x65xf32, #tpu.memory_space<smem>>
    %c2_310 = arith.constant 2 : index
    %c54_311 = arith.constant 54 : index
    %672 = memref.load %arg1[%c2_310, %c54_311] : memref<4x65xf32, #tpu.memory_space<smem>>
    %673 = vector.broadcast %669 : f32 to vector<2x8x16xf32>
    %674 = arith.mulf %573, %673 : vector<2x8x16xf32>
    %675 = vector.broadcast %670 : f32 to vector<2x8x16xf32>
    %676 = arith.mulf %2, %675 : vector<2x8x16xf32>
    %677 = arith.addf %674, %676 : vector<2x8x16xf32>
    %678 = vector.broadcast %671 : f32 to vector<2x8x16xf32>
    %679 = arith.addf %677, %678 : vector<2x8x16xf32>
    %cst_312 = arith.constant 0.000000e+00 : f32
    %680 = vector.broadcast %cst_312 : f32 to vector<2x8x16xf32>
    %681 = arith.maximumf %679, %680 : vector<2x8x16xf32>
    %682 = vector.broadcast %672 : f32 to vector<2x8x16xf32>
    %683 = arith.mulf %681, %682 : vector<2x8x16xf32>
    %684 = arith.addf %668, %683 : vector<2x8x16xf32>
    %c2_313 = arith.constant 2 : index
    %c7_314 = arith.constant 7 : index
    %685 = memref.load %arg1[%c2_313, %c7_314] : memref<4x65xf32, #tpu.memory_space<smem>>
    %c2_315 = arith.constant 2 : index
    %c23_316 = arith.constant 23 : index
    %686 = memref.load %arg1[%c2_315, %c23_316] : memref<4x65xf32, #tpu.memory_space<smem>>
    %c2_317 = arith.constant 2 : index
    %c39_318 = arith.constant 39 : index
    %687 = memref.load %arg1[%c2_317, %c39_318] : memref<4x65xf32, #tpu.memory_space<smem>>
    %c2_319 = arith.constant 2 : index
    %c55_320 = arith.constant 55 : index
    %688 = memref.load %arg1[%c2_319, %c55_320] : memref<4x65xf32, #tpu.memory_space<smem>>
    %689 = vector.broadcast %685 : f32 to vector<2x8x16xf32>
    %690 = arith.mulf %573, %689 : vector<2x8x16xf32>
    %691 = vector.broadcast %686 : f32 to vector<2x8x16xf32>
    %692 = arith.mulf %2, %691 : vector<2x8x16xf32>
    %693 = arith.addf %690, %692 : vector<2x8x16xf32>
    %694 = vector.broadcast %687 : f32 to vector<2x8x16xf32>
    %695 = arith.addf %693, %694 : vector<2x8x16xf32>
    %cst_321 = arith.constant 0.000000e+00 : f32
    %696 = vector.broadcast %cst_321 : f32 to vector<2x8x16xf32>
    %697 = arith.maximumf %695, %696 : vector<2x8x16xf32>
    %698 = vector.broadcast %688 : f32 to vector<2x8x16xf32>
    %699 = arith.mulf %697, %698 : vector<2x8x16xf32>
    %700 = arith.addf %684, %699 : vector<2x8x16xf32>
    %c2_322 = arith.constant 2 : index
    %c8_323 = arith.constant 8 : index
    %701 = memref.load %arg1[%c2_322, %c8_323] : memref<4x65xf32, #tpu.memory_space<smem>>
    %c2_324 = arith.constant 2 : index
    %c24_325 = arith.constant 24 : index
    %702 = memref.load %arg1[%c2_324, %c24_325] : memref<4x65xf32, #tpu.memory_space<smem>>
    %c2_326 = arith.constant 2 : index
    %c40_327 = arith.constant 40 : index
    %703 = memref.load %arg1[%c2_326, %c40_327] : memref<4x65xf32, #tpu.memory_space<smem>>
    %c2_328 = arith.constant 2 : index
    %c56_329 = arith.constant 56 : index
    %704 = memref.load %arg1[%c2_328, %c56_329] : memref<4x65xf32, #tpu.memory_space<smem>>
    %705 = vector.broadcast %701 : f32 to vector<2x8x16xf32>
    %706 = arith.mulf %573, %705 : vector<2x8x16xf32>
    %707 = vector.broadcast %702 : f32 to vector<2x8x16xf32>
    %708 = arith.mulf %2, %707 : vector<2x8x16xf32>
    %709 = arith.addf %706, %708 : vector<2x8x16xf32>
    %710 = vector.broadcast %703 : f32 to vector<2x8x16xf32>
    %711 = arith.addf %709, %710 : vector<2x8x16xf32>
    %cst_330 = arith.constant 0.000000e+00 : f32
    %712 = vector.broadcast %cst_330 : f32 to vector<2x8x16xf32>
    %713 = arith.maximumf %711, %712 : vector<2x8x16xf32>
    %714 = vector.broadcast %704 : f32 to vector<2x8x16xf32>
    %715 = arith.mulf %713, %714 : vector<2x8x16xf32>
    %716 = arith.addf %700, %715 : vector<2x8x16xf32>
    %c2_331 = arith.constant 2 : index
    %c9_332 = arith.constant 9 : index
    %717 = memref.load %arg1[%c2_331, %c9_332] : memref<4x65xf32, #tpu.memory_space<smem>>
    %c2_333 = arith.constant 2 : index
    %c25_334 = arith.constant 25 : index
    %718 = memref.load %arg1[%c2_333, %c25_334] : memref<4x65xf32, #tpu.memory_space<smem>>
    %c2_335 = arith.constant 2 : index
    %c41_336 = arith.constant 41 : index
    %719 = memref.load %arg1[%c2_335, %c41_336] : memref<4x65xf32, #tpu.memory_space<smem>>
    %c2_337 = arith.constant 2 : index
    %c57_338 = arith.constant 57 : index
    %720 = memref.load %arg1[%c2_337, %c57_338] : memref<4x65xf32, #tpu.memory_space<smem>>
    %721 = vector.broadcast %717 : f32 to vector<2x8x16xf32>
    %722 = arith.mulf %573, %721 : vector<2x8x16xf32>
    %723 = vector.broadcast %718 : f32 to vector<2x8x16xf32>
    %724 = arith.mulf %2, %723 : vector<2x8x16xf32>
    %725 = arith.addf %722, %724 : vector<2x8x16xf32>
    %726 = vector.broadcast %719 : f32 to vector<2x8x16xf32>
    %727 = arith.addf %725, %726 : vector<2x8x16xf32>
    %cst_339 = arith.constant 0.000000e+00 : f32
    %728 = vector.broadcast %cst_339 : f32 to vector<2x8x16xf32>
    %729 = arith.maximumf %727, %728 : vector<2x8x16xf32>
    %730 = vector.broadcast %720 : f32 to vector<2x8x16xf32>
    %731 = arith.mulf %729, %730 : vector<2x8x16xf32>
    %732 = arith.addf %716, %731 : vector<2x8x16xf32>
    %c2_340 = arith.constant 2 : index
    %c10_341 = arith.constant 10 : index
    %733 = memref.load %arg1[%c2_340, %c10_341] : memref<4x65xf32, #tpu.memory_space<smem>>
    %c2_342 = arith.constant 2 : index
    %c26_343 = arith.constant 26 : index
    %734 = memref.load %arg1[%c2_342, %c26_343] : memref<4x65xf32, #tpu.memory_space<smem>>
    %c2_344 = arith.constant 2 : index
    %c42_345 = arith.constant 42 : index
    %735 = memref.load %arg1[%c2_344, %c42_345] : memref<4x65xf32, #tpu.memory_space<smem>>
    %c2_346 = arith.constant 2 : index
    %c58_347 = arith.constant 58 : index
    %736 = memref.load %arg1[%c2_346, %c58_347] : memref<4x65xf32, #tpu.memory_space<smem>>
    %737 = vector.broadcast %733 : f32 to vector<2x8x16xf32>
    %738 = arith.mulf %573, %737 : vector<2x8x16xf32>
    %739 = vector.broadcast %734 : f32 to vector<2x8x16xf32>
    %740 = arith.mulf %2, %739 : vector<2x8x16xf32>
    %741 = arith.addf %738, %740 : vector<2x8x16xf32>
    %742 = vector.broadcast %735 : f32 to vector<2x8x16xf32>
    %743 = arith.addf %741, %742 : vector<2x8x16xf32>
    %cst_348 = arith.constant 0.000000e+00 : f32
    %744 = vector.broadcast %cst_348 : f32 to vector<2x8x16xf32>
    %745 = arith.maximumf %743, %744 : vector<2x8x16xf32>
    %746 = vector.broadcast %736 : f32 to vector<2x8x16xf32>
    %747 = arith.mulf %745, %746 : vector<2x8x16xf32>
    %748 = arith.addf %732, %747 : vector<2x8x16xf32>
    %c2_349 = arith.constant 2 : index
    %c11_350 = arith.constant 11 : index
    %749 = memref.load %arg1[%c2_349, %c11_350] : memref<4x65xf32, #tpu.memory_space<smem>>
    %c2_351 = arith.constant 2 : index
    %c27_352 = arith.constant 27 : index
    %750 = memref.load %arg1[%c2_351, %c27_352] : memref<4x65xf32, #tpu.memory_space<smem>>
    %c2_353 = arith.constant 2 : index
    %c43_354 = arith.constant 43 : index
    %751 = memref.load %arg1[%c2_353, %c43_354] : memref<4x65xf32, #tpu.memory_space<smem>>
    %c2_355 = arith.constant 2 : index
    %c59_356 = arith.constant 59 : index
    %752 = memref.load %arg1[%c2_355, %c59_356] : memref<4x65xf32, #tpu.memory_space<smem>>
    %753 = vector.broadcast %749 : f32 to vector<2x8x16xf32>
    %754 = arith.mulf %573, %753 : vector<2x8x16xf32>
    %755 = vector.broadcast %750 : f32 to vector<2x8x16xf32>
    %756 = arith.mulf %2, %755 : vector<2x8x16xf32>
    %757 = arith.addf %754, %756 : vector<2x8x16xf32>
    %758 = vector.broadcast %751 : f32 to vector<2x8x16xf32>
    %759 = arith.addf %757, %758 : vector<2x8x16xf32>
    %cst_357 = arith.constant 0.000000e+00 : f32
    %760 = vector.broadcast %cst_357 : f32 to vector<2x8x16xf32>
    %761 = arith.maximumf %759, %760 : vector<2x8x16xf32>
    %762 = vector.broadcast %752 : f32 to vector<2x8x16xf32>
    %763 = arith.mulf %761, %762 : vector<2x8x16xf32>
    %764 = arith.addf %748, %763 : vector<2x8x16xf32>
    %c2_358 = arith.constant 2 : index
    %c12_359 = arith.constant 12 : index
    %765 = memref.load %arg1[%c2_358, %c12_359] : memref<4x65xf32, #tpu.memory_space<smem>>
    %c2_360 = arith.constant 2 : index
    %c28_361 = arith.constant 28 : index
    %766 = memref.load %arg1[%c2_360, %c28_361] : memref<4x65xf32, #tpu.memory_space<smem>>
    %c2_362 = arith.constant 2 : index
    %c44_363 = arith.constant 44 : index
    %767 = memref.load %arg1[%c2_362, %c44_363] : memref<4x65xf32, #tpu.memory_space<smem>>
    %c2_364 = arith.constant 2 : index
    %c60_365 = arith.constant 60 : index
    %768 = memref.load %arg1[%c2_364, %c60_365] : memref<4x65xf32, #tpu.memory_space<smem>>
    %769 = vector.broadcast %765 : f32 to vector<2x8x16xf32>
    %770 = arith.mulf %573, %769 : vector<2x8x16xf32>
    %771 = vector.broadcast %766 : f32 to vector<2x8x16xf32>
    %772 = arith.mulf %2, %771 : vector<2x8x16xf32>
    %773 = arith.addf %770, %772 : vector<2x8x16xf32>
    %774 = vector.broadcast %767 : f32 to vector<2x8x16xf32>
    %775 = arith.addf %773, %774 : vector<2x8x16xf32>
    %cst_366 = arith.constant 0.000000e+00 : f32
    %776 = vector.broadcast %cst_366 : f32 to vector<2x8x16xf32>
    %777 = arith.maximumf %775, %776 : vector<2x8x16xf32>
    %778 = vector.broadcast %768 : f32 to vector<2x8x16xf32>
    %779 = arith.mulf %777, %778 : vector<2x8x16xf32>
    %780 = arith.addf %764, %779 : vector<2x8x16xf32>
    %c2_367 = arith.constant 2 : index
    %c13_368 = arith.constant 13 : index
    %781 = memref.load %arg1[%c2_367, %c13_368] : memref<4x65xf32, #tpu.memory_space<smem>>
    %c2_369 = arith.constant 2 : index
    %c29_370 = arith.constant 29 : index
    %782 = memref.load %arg1[%c2_369, %c29_370] : memref<4x65xf32, #tpu.memory_space<smem>>
    %c2_371 = arith.constant 2 : index
    %c45_372 = arith.constant 45 : index
    %783 = memref.load %arg1[%c2_371, %c45_372] : memref<4x65xf32, #tpu.memory_space<smem>>
    %c2_373 = arith.constant 2 : index
    %c61_374 = arith.constant 61 : index
    %784 = memref.load %arg1[%c2_373, %c61_374] : memref<4x65xf32, #tpu.memory_space<smem>>
    %785 = vector.broadcast %781 : f32 to vector<2x8x16xf32>
    %786 = arith.mulf %573, %785 : vector<2x8x16xf32>
    %787 = vector.broadcast %782 : f32 to vector<2x8x16xf32>
    %788 = arith.mulf %2, %787 : vector<2x8x16xf32>
    %789 = arith.addf %786, %788 : vector<2x8x16xf32>
    %790 = vector.broadcast %783 : f32 to vector<2x8x16xf32>
    %791 = arith.addf %789, %790 : vector<2x8x16xf32>
    %cst_375 = arith.constant 0.000000e+00 : f32
    %792 = vector.broadcast %cst_375 : f32 to vector<2x8x16xf32>
    %793 = arith.maximumf %791, %792 : vector<2x8x16xf32>
    %794 = vector.broadcast %784 : f32 to vector<2x8x16xf32>
    %795 = arith.mulf %793, %794 : vector<2x8x16xf32>
    %796 = arith.addf %780, %795 : vector<2x8x16xf32>
    %c2_376 = arith.constant 2 : index
    %c14_377 = arith.constant 14 : index
    %797 = memref.load %arg1[%c2_376, %c14_377] : memref<4x65xf32, #tpu.memory_space<smem>>
    %c2_378 = arith.constant 2 : index
    %c30_379 = arith.constant 30 : index
    %798 = memref.load %arg1[%c2_378, %c30_379] : memref<4x65xf32, #tpu.memory_space<smem>>
    %c2_380 = arith.constant 2 : index
    %c46_381 = arith.constant 46 : index
    %799 = memref.load %arg1[%c2_380, %c46_381] : memref<4x65xf32, #tpu.memory_space<smem>>
    %c2_382 = arith.constant 2 : index
    %c62_383 = arith.constant 62 : index
    %800 = memref.load %arg1[%c2_382, %c62_383] : memref<4x65xf32, #tpu.memory_space<smem>>
    %801 = vector.broadcast %797 : f32 to vector<2x8x16xf32>
    %802 = arith.mulf %573, %801 : vector<2x8x16xf32>
    %803 = vector.broadcast %798 : f32 to vector<2x8x16xf32>
    %804 = arith.mulf %2, %803 : vector<2x8x16xf32>
    %805 = arith.addf %802, %804 : vector<2x8x16xf32>
    %806 = vector.broadcast %799 : f32 to vector<2x8x16xf32>
    %807 = arith.addf %805, %806 : vector<2x8x16xf32>
    %cst_384 = arith.constant 0.000000e+00 : f32
    %808 = vector.broadcast %cst_384 : f32 to vector<2x8x16xf32>
    %809 = arith.maximumf %807, %808 : vector<2x8x16xf32>
    %810 = vector.broadcast %800 : f32 to vector<2x8x16xf32>
    %811 = arith.mulf %809, %810 : vector<2x8x16xf32>
    %812 = arith.addf %796, %811 : vector<2x8x16xf32>
    %c2_385 = arith.constant 2 : index
    %c15_386 = arith.constant 15 : index
    %813 = memref.load %arg1[%c2_385, %c15_386] : memref<4x65xf32, #tpu.memory_space<smem>>
    %c2_387 = arith.constant 2 : index
    %c31_388 = arith.constant 31 : index
    %814 = memref.load %arg1[%c2_387, %c31_388] : memref<4x65xf32, #tpu.memory_space<smem>>
    %c2_389 = arith.constant 2 : index
    %c47_390 = arith.constant 47 : index
    %815 = memref.load %arg1[%c2_389, %c47_390] : memref<4x65xf32, #tpu.memory_space<smem>>
    %c2_391 = arith.constant 2 : index
    %c63_392 = arith.constant 63 : index
    %816 = memref.load %arg1[%c2_391, %c63_392] : memref<4x65xf32, #tpu.memory_space<smem>>
    %817 = vector.broadcast %813 : f32 to vector<2x8x16xf32>
    %818 = arith.mulf %573, %817 : vector<2x8x16xf32>
    %819 = vector.broadcast %814 : f32 to vector<2x8x16xf32>
    %820 = arith.mulf %2, %819 : vector<2x8x16xf32>
    %821 = arith.addf %818, %820 : vector<2x8x16xf32>
    %822 = vector.broadcast %815 : f32 to vector<2x8x16xf32>
    %823 = arith.addf %821, %822 : vector<2x8x16xf32>
    %cst_393 = arith.constant 0.000000e+00 : f32
    %824 = vector.broadcast %cst_393 : f32 to vector<2x8x16xf32>
    %825 = arith.maximumf %823, %824 : vector<2x8x16xf32>
    %826 = vector.broadcast %816 : f32 to vector<2x8x16xf32>
    %827 = arith.mulf %825, %826 : vector<2x8x16xf32>
    %828 = arith.addf %812, %827 : vector<2x8x16xf32>
    %c2_394 = arith.constant 2 : index
    %c64_395 = arith.constant 64 : index
    %829 = memref.load %arg1[%c2_394, %c64_395] : memref<4x65xf32, #tpu.memory_space<smem>>
    %830 = vector.broadcast %829 : f32 to vector<2x8x16xf32>
    %831 = arith.addf %828, %830 : vector<2x8x16xf32>
    %cst_396 = arith.constant dense<0xFF800000> : vector<2x8xf32>
    %832 = vector.multi_reduction <maximumf>, %831, %cst_396 [2] : vector<2x8x16xf32> to vector<2x8xf32>
    %833 = vector.shape_cast %832 : vector<2x8xf32> to vector<2x8x1xf32>
    %834 = vector.broadcast %833 : vector<2x8x1xf32> to vector<2x8x16xf32>
    %835 = arith.subf %831, %834 : vector<2x8x16xf32>
    %836 = math.exp %835 : vector<2x8x16xf32>
    %cst_397 = arith.constant dense<0.000000e+00> : vector<2x8xf32>
    %837 = vector.multi_reduction <add>, %836, %cst_397 [2] : vector<2x8x16xf32> to vector<2x8xf32>
    %838 = vector.shape_cast %837 : vector<2x8xf32> to vector<2x8x1xf32>
    %839 = tpu.reciprocal %838 {approx = true} : vector<2x8x1xf32> -> vector<2x8x1xf32>
    %840 = vector.broadcast %839 : vector<2x8x1xf32> to vector<2x8x16xf32>
    %841 = arith.mulf %836, %840 : vector<2x8x16xf32>
    "tpu.trace_start"() <{level = 10 : i32, message = "brc,bcd->brd"}> : () -> ()
    %cst_398 = arith.constant dense<0.000000e+00> : vector<2x8x8xf32>
    %842 = tpu.matmul %841, %572, %cst_398 {dimension_numbers = #tpu.dot_dimension_numbers<[2], [1], [1], [2], [0, 0, 0, 1, 1, 2], [0], [0]>} : vector<2x8x16xf32>, vector<2x16x8xf32>, vector<2x8x8xf32> -> vector<2x8x8xf32>
    "tpu.trace_stop"() : () -> ()
    %843 = vector.shape_cast %842 : vector<2x8x8xf32> to vector<16x8xf32>
    %844 = vector.extract_strided_slice %11 {offsets = [0, 0, 24], sizes = [2, 8, 8], strides = [1, 1, 1]} : vector<2x8x32xf32> to vector<2x8x8xf32>
    %845 = arith.truncf %844 : vector<2x8x8xf32> to vector<2x8x8xbf16>
    %846 = vector.extract_strided_slice %13 {offsets = [0, 0, 24], sizes = [2, 16, 8], strides = [1, 1, 1]} : vector<2x16x32xf32> to vector<2x16x8xf32>
    %847 = arith.truncf %846 : vector<2x16x8xf32> to vector<2x16x8xbf16>
    %848 = vector.extract_strided_slice %15 {offsets = [0, 0, 24], sizes = [2, 16, 8], strides = [1, 1, 1]} : vector<2x16x32xf32> to vector<2x16x8xf32>
    "tpu.trace_start"() <{level = 10 : i32, message = "brd,bcd->brc"}> : () -> ()
    %cst_399 = arith.constant dense<0.000000e+00> : vector<2x8x16xf32>
    %849 = tpu.matmul %845, %847, %cst_399 {dimension_numbers = #tpu.dot_dimension_numbers<[2], [2], [1], [1], [0, 0, 0, 1, 1, 1], [0], [0]>} : vector<2x8x8xbf16>, vector<2x16x8xbf16>, vector<2x8x16xf32> -> vector<2x8x16xf32>
    "tpu.trace_stop"() : () -> ()
    %c3_400 = arith.constant 3 : index
    %c0_401 = arith.constant 0 : index
    %850 = memref.load %arg1[%c3_400, %c0_401] : memref<4x65xf32, #tpu.memory_space<smem>>
    %c3_402 = arith.constant 3 : index
    %c16_403 = arith.constant 16 : index
    %851 = memref.load %arg1[%c3_402, %c16_403] : memref<4x65xf32, #tpu.memory_space<smem>>
    %c3_404 = arith.constant 3 : index
    %c32_405 = arith.constant 32 : index
    %852 = memref.load %arg1[%c3_404, %c32_405] : memref<4x65xf32, #tpu.memory_space<smem>>
    %c3_406 = arith.constant 3 : index
    %c48_407 = arith.constant 48 : index
    %853 = memref.load %arg1[%c3_406, %c48_407] : memref<4x65xf32, #tpu.memory_space<smem>>
    %854 = vector.broadcast %850 : f32 to vector<2x8x16xf32>
    %855 = arith.mulf %849, %854 : vector<2x8x16xf32>
    %856 = vector.broadcast %851 : f32 to vector<2x8x16xf32>
    %857 = arith.mulf %2, %856 : vector<2x8x16xf32>
    %858 = arith.addf %855, %857 : vector<2x8x16xf32>
    %859 = vector.broadcast %852 : f32 to vector<2x8x16xf32>
    %860 = arith.addf %858, %859 : vector<2x8x16xf32>
    %cst_408 = arith.constant 0.000000e+00 : f32
    %861 = vector.broadcast %cst_408 : f32 to vector<2x8x16xf32>
    %862 = arith.maximumf %860, %861 : vector<2x8x16xf32>
    %863 = vector.broadcast %853 : f32 to vector<2x8x16xf32>
    %864 = arith.mulf %862, %863 : vector<2x8x16xf32>
    %c3_409 = arith.constant 3 : index
    %c1_410 = arith.constant 1 : index
    %865 = memref.load %arg1[%c3_409, %c1_410] : memref<4x65xf32, #tpu.memory_space<smem>>
    %c3_411 = arith.constant 3 : index
    %c17_412 = arith.constant 17 : index
    %866 = memref.load %arg1[%c3_411, %c17_412] : memref<4x65xf32, #tpu.memory_space<smem>>
    %c3_413 = arith.constant 3 : index
    %c33_414 = arith.constant 33 : index
    %867 = memref.load %arg1[%c3_413, %c33_414] : memref<4x65xf32, #tpu.memory_space<smem>>
    %c3_415 = arith.constant 3 : index
    %c49_416 = arith.constant 49 : index
    %868 = memref.load %arg1[%c3_415, %c49_416] : memref<4x65xf32, #tpu.memory_space<smem>>
    %869 = vector.broadcast %865 : f32 to vector<2x8x16xf32>
    %870 = arith.mulf %849, %869 : vector<2x8x16xf32>
    %871 = vector.broadcast %866 : f32 to vector<2x8x16xf32>
    %872 = arith.mulf %2, %871 : vector<2x8x16xf32>
    %873 = arith.addf %870, %872 : vector<2x8x16xf32>
    %874 = vector.broadcast %867 : f32 to vector<2x8x16xf32>
    %875 = arith.addf %873, %874 : vector<2x8x16xf32>
    %cst_417 = arith.constant 0.000000e+00 : f32
    %876 = vector.broadcast %cst_417 : f32 to vector<2x8x16xf32>
    %877 = arith.maximumf %875, %876 : vector<2x8x16xf32>
    %878 = vector.broadcast %868 : f32 to vector<2x8x16xf32>
    %879 = arith.mulf %877, %878 : vector<2x8x16xf32>
    %880 = arith.addf %864, %879 : vector<2x8x16xf32>
    %c3_418 = arith.constant 3 : index
    %c2_419 = arith.constant 2 : index
    %881 = memref.load %arg1[%c3_418, %c2_419] : memref<4x65xf32, #tpu.memory_space<smem>>
    %c3_420 = arith.constant 3 : index
    %c18_421 = arith.constant 18 : index
    %882 = memref.load %arg1[%c3_420, %c18_421] : memref<4x65xf32, #tpu.memory_space<smem>>
    %c3_422 = arith.constant 3 : index
    %c34_423 = arith.constant 34 : index
    %883 = memref.load %arg1[%c3_422, %c34_423] : memref<4x65xf32, #tpu.memory_space<smem>>
    %c3_424 = arith.constant 3 : index
    %c50_425 = arith.constant 50 : index
    %884 = memref.load %arg1[%c3_424, %c50_425] : memref<4x65xf32, #tpu.memory_space<smem>>
    %885 = vector.broadcast %881 : f32 to vector<2x8x16xf32>
    %886 = arith.mulf %849, %885 : vector<2x8x16xf32>
    %887 = vector.broadcast %882 : f32 to vector<2x8x16xf32>
    %888 = arith.mulf %2, %887 : vector<2x8x16xf32>
    %889 = arith.addf %886, %888 : vector<2x8x16xf32>
    %890 = vector.broadcast %883 : f32 to vector<2x8x16xf32>
    %891 = arith.addf %889, %890 : vector<2x8x16xf32>
    %cst_426 = arith.constant 0.000000e+00 : f32
    %892 = vector.broadcast %cst_426 : f32 to vector<2x8x16xf32>
    %893 = arith.maximumf %891, %892 : vector<2x8x16xf32>
    %894 = vector.broadcast %884 : f32 to vector<2x8x16xf32>
    %895 = arith.mulf %893, %894 : vector<2x8x16xf32>
    %896 = arith.addf %880, %895 : vector<2x8x16xf32>
    %c3_427 = arith.constant 3 : index
    %c3_428 = arith.constant 3 : index
    %897 = memref.load %arg1[%c3_427, %c3_428] : memref<4x65xf32, #tpu.memory_space<smem>>
    %c3_429 = arith.constant 3 : index
    %c19_430 = arith.constant 19 : index
    %898 = memref.load %arg1[%c3_429, %c19_430] : memref<4x65xf32, #tpu.memory_space<smem>>
    %c3_431 = arith.constant 3 : index
    %c35_432 = arith.constant 35 : index
    %899 = memref.load %arg1[%c3_431, %c35_432] : memref<4x65xf32, #tpu.memory_space<smem>>
    %c3_433 = arith.constant 3 : index
    %c51_434 = arith.constant 51 : index
    %900 = memref.load %arg1[%c3_433, %c51_434] : memref<4x65xf32, #tpu.memory_space<smem>>
    %901 = vector.broadcast %897 : f32 to vector<2x8x16xf32>
    %902 = arith.mulf %849, %901 : vector<2x8x16xf32>
    %903 = vector.broadcast %898 : f32 to vector<2x8x16xf32>
    %904 = arith.mulf %2, %903 : vector<2x8x16xf32>
    %905 = arith.addf %902, %904 : vector<2x8x16xf32>
    %906 = vector.broadcast %899 : f32 to vector<2x8x16xf32>
    %907 = arith.addf %905, %906 : vector<2x8x16xf32>
    %cst_435 = arith.constant 0.000000e+00 : f32
    %908 = vector.broadcast %cst_435 : f32 to vector<2x8x16xf32>
    %909 = arith.maximumf %907, %908 : vector<2x8x16xf32>
    %910 = vector.broadcast %900 : f32 to vector<2x8x16xf32>
    %911 = arith.mulf %909, %910 : vector<2x8x16xf32>
    %912 = arith.addf %896, %911 : vector<2x8x16xf32>
    %c3_436 = arith.constant 3 : index
    %c4_437 = arith.constant 4 : index
    %913 = memref.load %arg1[%c3_436, %c4_437] : memref<4x65xf32, #tpu.memory_space<smem>>
    %c3_438 = arith.constant 3 : index
    %c20_439 = arith.constant 20 : index
    %914 = memref.load %arg1[%c3_438, %c20_439] : memref<4x65xf32, #tpu.memory_space<smem>>
    %c3_440 = arith.constant 3 : index
    %c36_441 = arith.constant 36 : index
    %915 = memref.load %arg1[%c3_440, %c36_441] : memref<4x65xf32, #tpu.memory_space<smem>>
    %c3_442 = arith.constant 3 : index
    %c52_443 = arith.constant 52 : index
    %916 = memref.load %arg1[%c3_442, %c52_443] : memref<4x65xf32, #tpu.memory_space<smem>>
    %917 = vector.broadcast %913 : f32 to vector<2x8x16xf32>
    %918 = arith.mulf %849, %917 : vector<2x8x16xf32>
    %919 = vector.broadcast %914 : f32 to vector<2x8x16xf32>
    %920 = arith.mulf %2, %919 : vector<2x8x16xf32>
    %921 = arith.addf %918, %920 : vector<2x8x16xf32>
    %922 = vector.broadcast %915 : f32 to vector<2x8x16xf32>
    %923 = arith.addf %921, %922 : vector<2x8x16xf32>
    %cst_444 = arith.constant 0.000000e+00 : f32
    %924 = vector.broadcast %cst_444 : f32 to vector<2x8x16xf32>
    %925 = arith.maximumf %923, %924 : vector<2x8x16xf32>
    %926 = vector.broadcast %916 : f32 to vector<2x8x16xf32>
    %927 = arith.mulf %925, %926 : vector<2x8x16xf32>
    %928 = arith.addf %912, %927 : vector<2x8x16xf32>
    %c3_445 = arith.constant 3 : index
    %c5_446 = arith.constant 5 : index
    %929 = memref.load %arg1[%c3_445, %c5_446] : memref<4x65xf32, #tpu.memory_space<smem>>
    %c3_447 = arith.constant 3 : index
    %c21_448 = arith.constant 21 : index
    %930 = memref.load %arg1[%c3_447, %c21_448] : memref<4x65xf32, #tpu.memory_space<smem>>
    %c3_449 = arith.constant 3 : index
    %c37_450 = arith.constant 37 : index
    %931 = memref.load %arg1[%c3_449, %c37_450] : memref<4x65xf32, #tpu.memory_space<smem>>
    %c3_451 = arith.constant 3 : index
    %c53_452 = arith.constant 53 : index
    %932 = memref.load %arg1[%c3_451, %c53_452] : memref<4x65xf32, #tpu.memory_space<smem>>
    %933 = vector.broadcast %929 : f32 to vector<2x8x16xf32>
    %934 = arith.mulf %849, %933 : vector<2x8x16xf32>
    %935 = vector.broadcast %930 : f32 to vector<2x8x16xf32>
    %936 = arith.mulf %2, %935 : vector<2x8x16xf32>
    %937 = arith.addf %934, %936 : vector<2x8x16xf32>
    %938 = vector.broadcast %931 : f32 to vector<2x8x16xf32>
    %939 = arith.addf %937, %938 : vector<2x8x16xf32>
    %cst_453 = arith.constant 0.000000e+00 : f32
    %940 = vector.broadcast %cst_453 : f32 to vector<2x8x16xf32>
    %941 = arith.maximumf %939, %940 : vector<2x8x16xf32>
    %942 = vector.broadcast %932 : f32 to vector<2x8x16xf32>
    %943 = arith.mulf %941, %942 : vector<2x8x16xf32>
    %944 = arith.addf %928, %943 : vector<2x8x16xf32>
    %c3_454 = arith.constant 3 : index
    %c6_455 = arith.constant 6 : index
    %945 = memref.load %arg1[%c3_454, %c6_455] : memref<4x65xf32, #tpu.memory_space<smem>>
    %c3_456 = arith.constant 3 : index
    %c22_457 = arith.constant 22 : index
    %946 = memref.load %arg1[%c3_456, %c22_457] : memref<4x65xf32, #tpu.memory_space<smem>>
    %c3_458 = arith.constant 3 : index
    %c38_459 = arith.constant 38 : index
    %947 = memref.load %arg1[%c3_458, %c38_459] : memref<4x65xf32, #tpu.memory_space<smem>>
    %c3_460 = arith.constant 3 : index
    %c54_461 = arith.constant 54 : index
    %948 = memref.load %arg1[%c3_460, %c54_461] : memref<4x65xf32, #tpu.memory_space<smem>>
    %949 = vector.broadcast %945 : f32 to vector<2x8x16xf32>
    %950 = arith.mulf %849, %949 : vector<2x8x16xf32>
    %951 = vector.broadcast %946 : f32 to vector<2x8x16xf32>
    %952 = arith.mulf %2, %951 : vector<2x8x16xf32>
    %953 = arith.addf %950, %952 : vector<2x8x16xf32>
    %954 = vector.broadcast %947 : f32 to vector<2x8x16xf32>
    %955 = arith.addf %953, %954 : vector<2x8x16xf32>
    %cst_462 = arith.constant 0.000000e+00 : f32
    %956 = vector.broadcast %cst_462 : f32 to vector<2x8x16xf32>
    %957 = arith.maximumf %955, %956 : vector<2x8x16xf32>
    %958 = vector.broadcast %948 : f32 to vector<2x8x16xf32>
    %959 = arith.mulf %957, %958 : vector<2x8x16xf32>
    %960 = arith.addf %944, %959 : vector<2x8x16xf32>
    %c3_463 = arith.constant 3 : index
    %c7_464 = arith.constant 7 : index
    %961 = memref.load %arg1[%c3_463, %c7_464] : memref<4x65xf32, #tpu.memory_space<smem>>
    %c3_465 = arith.constant 3 : index
    %c23_466 = arith.constant 23 : index
    %962 = memref.load %arg1[%c3_465, %c23_466] : memref<4x65xf32, #tpu.memory_space<smem>>
    %c3_467 = arith.constant 3 : index
    %c39_468 = arith.constant 39 : index
    %963 = memref.load %arg1[%c3_467, %c39_468] : memref<4x65xf32, #tpu.memory_space<smem>>
    %c3_469 = arith.constant 3 : index
    %c55_470 = arith.constant 55 : index
    %964 = memref.load %arg1[%c3_469, %c55_470] : memref<4x65xf32, #tpu.memory_space<smem>>
    %965 = vector.broadcast %961 : f32 to vector<2x8x16xf32>
    %966 = arith.mulf %849, %965 : vector<2x8x16xf32>
    %967 = vector.broadcast %962 : f32 to vector<2x8x16xf32>
    %968 = arith.mulf %2, %967 : vector<2x8x16xf32>
    %969 = arith.addf %966, %968 : vector<2x8x16xf32>
    %970 = vector.broadcast %963 : f32 to vector<2x8x16xf32>
    %971 = arith.addf %969, %970 : vector<2x8x16xf32>
    %cst_471 = arith.constant 0.000000e+00 : f32
    %972 = vector.broadcast %cst_471 : f32 to vector<2x8x16xf32>
    %973 = arith.maximumf %971, %972 : vector<2x8x16xf32>
    %974 = vector.broadcast %964 : f32 to vector<2x8x16xf32>
    %975 = arith.mulf %973, %974 : vector<2x8x16xf32>
    %976 = arith.addf %960, %975 : vector<2x8x16xf32>
    %c3_472 = arith.constant 3 : index
    %c8_473 = arith.constant 8 : index
    %977 = memref.load %arg1[%c3_472, %c8_473] : memref<4x65xf32, #tpu.memory_space<smem>>
    %c3_474 = arith.constant 3 : index
    %c24_475 = arith.constant 24 : index
    %978 = memref.load %arg1[%c3_474, %c24_475] : memref<4x65xf32, #tpu.memory_space<smem>>
    %c3_476 = arith.constant 3 : index
    %c40_477 = arith.constant 40 : index
    %979 = memref.load %arg1[%c3_476, %c40_477] : memref<4x65xf32, #tpu.memory_space<smem>>
    %c3_478 = arith.constant 3 : index
    %c56_479 = arith.constant 56 : index
    %980 = memref.load %arg1[%c3_478, %c56_479] : memref<4x65xf32, #tpu.memory_space<smem>>
    %981 = vector.broadcast %977 : f32 to vector<2x8x16xf32>
    %982 = arith.mulf %849, %981 : vector<2x8x16xf32>
    %983 = vector.broadcast %978 : f32 to vector<2x8x16xf32>
    %984 = arith.mulf %2, %983 : vector<2x8x16xf32>
    %985 = arith.addf %982, %984 : vector<2x8x16xf32>
    %986 = vector.broadcast %979 : f32 to vector<2x8x16xf32>
    %987 = arith.addf %985, %986 : vector<2x8x16xf32>
    %cst_480 = arith.constant 0.000000e+00 : f32
    %988 = vector.broadcast %cst_480 : f32 to vector<2x8x16xf32>
    %989 = arith.maximumf %987, %988 : vector<2x8x16xf32>
    %990 = vector.broadcast %980 : f32 to vector<2x8x16xf32>
    %991 = arith.mulf %989, %990 : vector<2x8x16xf32>
    %992 = arith.addf %976, %991 : vector<2x8x16xf32>
    %c3_481 = arith.constant 3 : index
    %c9_482 = arith.constant 9 : index
    %993 = memref.load %arg1[%c3_481, %c9_482] : memref<4x65xf32, #tpu.memory_space<smem>>
    %c3_483 = arith.constant 3 : index
    %c25_484 = arith.constant 25 : index
    %994 = memref.load %arg1[%c3_483, %c25_484] : memref<4x65xf32, #tpu.memory_space<smem>>
    %c3_485 = arith.constant 3 : index
    %c41_486 = arith.constant 41 : index
    %995 = memref.load %arg1[%c3_485, %c41_486] : memref<4x65xf32, #tpu.memory_space<smem>>
    %c3_487 = arith.constant 3 : index
    %c57_488 = arith.constant 57 : index
    %996 = memref.load %arg1[%c3_487, %c57_488] : memref<4x65xf32, #tpu.memory_space<smem>>
    %997 = vector.broadcast %993 : f32 to vector<2x8x16xf32>
    %998 = arith.mulf %849, %997 : vector<2x8x16xf32>
    %999 = vector.broadcast %994 : f32 to vector<2x8x16xf32>
    %1000 = arith.mulf %2, %999 : vector<2x8x16xf32>
    %1001 = arith.addf %998, %1000 : vector<2x8x16xf32>
    %1002 = vector.broadcast %995 : f32 to vector<2x8x16xf32>
    %1003 = arith.addf %1001, %1002 : vector<2x8x16xf32>
    %cst_489 = arith.constant 0.000000e+00 : f32
    %1004 = vector.broadcast %cst_489 : f32 to vector<2x8x16xf32>
    %1005 = arith.maximumf %1003, %1004 : vector<2x8x16xf32>
    %1006 = vector.broadcast %996 : f32 to vector<2x8x16xf32>
    %1007 = arith.mulf %1005, %1006 : vector<2x8x16xf32>
    %1008 = arith.addf %992, %1007 : vector<2x8x16xf32>
    %c3_490 = arith.constant 3 : index
    %c10_491 = arith.constant 10 : index
    %1009 = memref.load %arg1[%c3_490, %c10_491] : memref<4x65xf32, #tpu.memory_space<smem>>
    %c3_492 = arith.constant 3 : index
    %c26_493 = arith.constant 26 : index
    %1010 = memref.load %arg1[%c3_492, %c26_493] : memref<4x65xf32, #tpu.memory_space<smem>>
    %c3_494 = arith.constant 3 : index
    %c42_495 = arith.constant 42 : index
    %1011 = memref.load %arg1[%c3_494, %c42_495] : memref<4x65xf32, #tpu.memory_space<smem>>
    %c3_496 = arith.constant 3 : index
    %c58_497 = arith.constant 58 : index
    %1012 = memref.load %arg1[%c3_496, %c58_497] : memref<4x65xf32, #tpu.memory_space<smem>>
    %1013 = vector.broadcast %1009 : f32 to vector<2x8x16xf32>
    %1014 = arith.mulf %849, %1013 : vector<2x8x16xf32>
    %1015 = vector.broadcast %1010 : f32 to vector<2x8x16xf32>
    %1016 = arith.mulf %2, %1015 : vector<2x8x16xf32>
    %1017 = arith.addf %1014, %1016 : vector<2x8x16xf32>
    %1018 = vector.broadcast %1011 : f32 to vector<2x8x16xf32>
    %1019 = arith.addf %1017, %1018 : vector<2x8x16xf32>
    %cst_498 = arith.constant 0.000000e+00 : f32
    %1020 = vector.broadcast %cst_498 : f32 to vector<2x8x16xf32>
    %1021 = arith.maximumf %1019, %1020 : vector<2x8x16xf32>
    %1022 = vector.broadcast %1012 : f32 to vector<2x8x16xf32>
    %1023 = arith.mulf %1021, %1022 : vector<2x8x16xf32>
    %1024 = arith.addf %1008, %1023 : vector<2x8x16xf32>
    %c3_499 = arith.constant 3 : index
    %c11_500 = arith.constant 11 : index
    %1025 = memref.load %arg1[%c3_499, %c11_500] : memref<4x65xf32, #tpu.memory_space<smem>>
    %c3_501 = arith.constant 3 : index
    %c27_502 = arith.constant 27 : index
    %1026 = memref.load %arg1[%c3_501, %c27_502] : memref<4x65xf32, #tpu.memory_space<smem>>
    %c3_503 = arith.constant 3 : index
    %c43_504 = arith.constant 43 : index
    %1027 = memref.load %arg1[%c3_503, %c43_504] : memref<4x65xf32, #tpu.memory_space<smem>>
    %c3_505 = arith.constant 3 : index
    %c59_506 = arith.constant 59 : index
    %1028 = memref.load %arg1[%c3_505, %c59_506] : memref<4x65xf32, #tpu.memory_space<smem>>
    %1029 = vector.broadcast %1025 : f32 to vector<2x8x16xf32>
    %1030 = arith.mulf %849, %1029 : vector<2x8x16xf32>
    %1031 = vector.broadcast %1026 : f32 to vector<2x8x16xf32>
    %1032 = arith.mulf %2, %1031 : vector<2x8x16xf32>
    %1033 = arith.addf %1030, %1032 : vector<2x8x16xf32>
    %1034 = vector.broadcast %1027 : f32 to vector<2x8x16xf32>
    %1035 = arith.addf %1033, %1034 : vector<2x8x16xf32>
    %cst_507 = arith.constant 0.000000e+00 : f32
    %1036 = vector.broadcast %cst_507 : f32 to vector<2x8x16xf32>
    %1037 = arith.maximumf %1035, %1036 : vector<2x8x16xf32>
    %1038 = vector.broadcast %1028 : f32 to vector<2x8x16xf32>
    %1039 = arith.mulf %1037, %1038 : vector<2x8x16xf32>
    %1040 = arith.addf %1024, %1039 : vector<2x8x16xf32>
    %c3_508 = arith.constant 3 : index
    %c12_509 = arith.constant 12 : index
    %1041 = memref.load %arg1[%c3_508, %c12_509] : memref<4x65xf32, #tpu.memory_space<smem>>
    %c3_510 = arith.constant 3 : index
    %c28_511 = arith.constant 28 : index
    %1042 = memref.load %arg1[%c3_510, %c28_511] : memref<4x65xf32, #tpu.memory_space<smem>>
    %c3_512 = arith.constant 3 : index
    %c44_513 = arith.constant 44 : index
    %1043 = memref.load %arg1[%c3_512, %c44_513] : memref<4x65xf32, #tpu.memory_space<smem>>
    %c3_514 = arith.constant 3 : index
    %c60_515 = arith.constant 60 : index
    %1044 = memref.load %arg1[%c3_514, %c60_515] : memref<4x65xf32, #tpu.memory_space<smem>>
    %1045 = vector.broadcast %1041 : f32 to vector<2x8x16xf32>
    %1046 = arith.mulf %849, %1045 : vector<2x8x16xf32>
    %1047 = vector.broadcast %1042 : f32 to vector<2x8x16xf32>
    %1048 = arith.mulf %2, %1047 : vector<2x8x16xf32>
    %1049 = arith.addf %1046, %1048 : vector<2x8x16xf32>
    %1050 = vector.broadcast %1043 : f32 to vector<2x8x16xf32>
    %1051 = arith.addf %1049, %1050 : vector<2x8x16xf32>
    %cst_516 = arith.constant 0.000000e+00 : f32
    %1052 = vector.broadcast %cst_516 : f32 to vector<2x8x16xf32>
    %1053 = arith.maximumf %1051, %1052 : vector<2x8x16xf32>
    %1054 = vector.broadcast %1044 : f32 to vector<2x8x16xf32>
    %1055 = arith.mulf %1053, %1054 : vector<2x8x16xf32>
    %1056 = arith.addf %1040, %1055 : vector<2x8x16xf32>
    %c3_517 = arith.constant 3 : index
    %c13_518 = arith.constant 13 : index
    %1057 = memref.load %arg1[%c3_517, %c13_518] : memref<4x65xf32, #tpu.memory_space<smem>>
    %c3_519 = arith.constant 3 : index
    %c29_520 = arith.constant 29 : index
    %1058 = memref.load %arg1[%c3_519, %c29_520] : memref<4x65xf32, #tpu.memory_space<smem>>
    %c3_521 = arith.constant 3 : index
    %c45_522 = arith.constant 45 : index
    %1059 = memref.load %arg1[%c3_521, %c45_522] : memref<4x65xf32, #tpu.memory_space<smem>>
    %c3_523 = arith.constant 3 : index
    %c61_524 = arith.constant 61 : index
    %1060 = memref.load %arg1[%c3_523, %c61_524] : memref<4x65xf32, #tpu.memory_space<smem>>
    %1061 = vector.broadcast %1057 : f32 to vector<2x8x16xf32>
    %1062 = arith.mulf %849, %1061 : vector<2x8x16xf32>
    %1063 = vector.broadcast %1058 : f32 to vector<2x8x16xf32>
    %1064 = arith.mulf %2, %1063 : vector<2x8x16xf32>
    %1065 = arith.addf %1062, %1064 : vector<2x8x16xf32>
    %1066 = vector.broadcast %1059 : f32 to vector<2x8x16xf32>
    %1067 = arith.addf %1065, %1066 : vector<2x8x16xf32>
    %cst_525 = arith.constant 0.000000e+00 : f32
    %1068 = vector.broadcast %cst_525 : f32 to vector<2x8x16xf32>
    %1069 = arith.maximumf %1067, %1068 : vector<2x8x16xf32>
    %1070 = vector.broadcast %1060 : f32 to vector<2x8x16xf32>
    %1071 = arith.mulf %1069, %1070 : vector<2x8x16xf32>
    %1072 = arith.addf %1056, %1071 : vector<2x8x16xf32>
    %c3_526 = arith.constant 3 : index
    %c14_527 = arith.constant 14 : index
    %1073 = memref.load %arg1[%c3_526, %c14_527] : memref<4x65xf32, #tpu.memory_space<smem>>
    %c3_528 = arith.constant 3 : index
    %c30_529 = arith.constant 30 : index
    %1074 = memref.load %arg1[%c3_528, %c30_529] : memref<4x65xf32, #tpu.memory_space<smem>>
    %c3_530 = arith.constant 3 : index
    %c46_531 = arith.constant 46 : index
    %1075 = memref.load %arg1[%c3_530, %c46_531] : memref<4x65xf32, #tpu.memory_space<smem>>
    %c3_532 = arith.constant 3 : index
    %c62_533 = arith.constant 62 : index
    %1076 = memref.load %arg1[%c3_532, %c62_533] : memref<4x65xf32, #tpu.memory_space<smem>>
    %1077 = vector.broadcast %1073 : f32 to vector<2x8x16xf32>
    %1078 = arith.mulf %849, %1077 : vector<2x8x16xf32>
    %1079 = vector.broadcast %1074 : f32 to vector<2x8x16xf32>
    %1080 = arith.mulf %2, %1079 : vector<2x8x16xf32>
    %1081 = arith.addf %1078, %1080 : vector<2x8x16xf32>
    %1082 = vector.broadcast %1075 : f32 to vector<2x8x16xf32>
    %1083 = arith.addf %1081, %1082 : vector<2x8x16xf32>
    %cst_534 = arith.constant 0.000000e+00 : f32
    %1084 = vector.broadcast %cst_534 : f32 to vector<2x8x16xf32>
    %1085 = arith.maximumf %1083, %1084 : vector<2x8x16xf32>
    %1086 = vector.broadcast %1076 : f32 to vector<2x8x16xf32>
    %1087 = arith.mulf %1085, %1086 : vector<2x8x16xf32>
    %1088 = arith.addf %1072, %1087 : vector<2x8x16xf32>
    %c3_535 = arith.constant 3 : index
    %c15_536 = arith.constant 15 : index
    %1089 = memref.load %arg1[%c3_535, %c15_536] : memref<4x65xf32, #tpu.memory_space<smem>>
    %c3_537 = arith.constant 3 : index
    %c31_538 = arith.constant 31 : index
    %1090 = memref.load %arg1[%c3_537, %c31_538] : memref<4x65xf32, #tpu.memory_space<smem>>
    %c3_539 = arith.constant 3 : index
    %c47_540 = arith.constant 47 : index
    %1091 = memref.load %arg1[%c3_539, %c47_540] : memref<4x65xf32, #tpu.memory_space<smem>>
    %c3_541 = arith.constant 3 : index
    %c63_542 = arith.constant 63 : index
    %1092 = memref.load %arg1[%c3_541, %c63_542] : memref<4x65xf32, #tpu.memory_space<smem>>
    %1093 = vector.broadcast %1089 : f32 to vector<2x8x16xf32>
    %1094 = arith.mulf %849, %1093 : vector<2x8x16xf32>
    %1095 = vector.broadcast %1090 : f32 to vector<2x8x16xf32>
    %1096 = arith.mulf %2, %1095 : vector<2x8x16xf32>
    %1097 = arith.addf %1094, %1096 : vector<2x8x16xf32>
    %1098 = vector.broadcast %1091 : f32 to vector<2x8x16xf32>
    %1099 = arith.addf %1097, %1098 : vector<2x8x16xf32>
    %cst_543 = arith.constant 0.000000e+00 : f32
    %1100 = vector.broadcast %cst_543 : f32 to vector<2x8x16xf32>
    %1101 = arith.maximumf %1099, %1100 : vector<2x8x16xf32>
    %1102 = vector.broadcast %1092 : f32 to vector<2x8x16xf32>
    %1103 = arith.mulf %1101, %1102 : vector<2x8x16xf32>
    %1104 = arith.addf %1088, %1103 : vector<2x8x16xf32>
    %c3_544 = arith.constant 3 : index
    %c64_545 = arith.constant 64 : index
    %1105 = memref.load %arg1[%c3_544, %c64_545] : memref<4x65xf32, #tpu.memory_space<smem>>
    %1106 = vector.broadcast %1105 : f32 to vector<2x8x16xf32>
    %1107 = arith.addf %1104, %1106 : vector<2x8x16xf32>
    %cst_546 = arith.constant dense<0xFF800000> : vector<2x8xf32>
    %1108 = vector.multi_reduction <maximumf>, %1107, %cst_546 [2] : vector<2x8x16xf32> to vector<2x8xf32>
    %1109 = vector.shape_cast %1108 : vector<2x8xf32> to vector<2x8x1xf32>
    %1110 = vector.broadcast %1109 : vector<2x8x1xf32> to vector<2x8x16xf32>
    %1111 = arith.subf %1107, %1110 : vector<2x8x16xf32>
    %1112 = math.exp %1111 : vector<2x8x16xf32>
    %cst_547 = arith.constant dense<0.000000e+00> : vector<2x8xf32>
    %1113 = vector.multi_reduction <add>, %1112, %cst_547 [2] : vector<2x8x16xf32> to vector<2x8xf32>
    %1114 = vector.shape_cast %1113 : vector<2x8xf32> to vector<2x8x1xf32>
    %1115 = tpu.reciprocal %1114 {approx = true} : vector<2x8x1xf32> -> vector<2x8x1xf32>
    %1116 = vector.broadcast %1115 : vector<2x8x1xf32> to vector<2x8x16xf32>
    %1117 = arith.mulf %1112, %1116 : vector<2x8x16xf32>
    "tpu.trace_start"() <{level = 10 : i32, message = "brc,bcd->brd"}> : () -> ()
    %cst_548 = arith.constant dense<0.000000e+00> : vector<2x8x8xf32>
    %1118 = tpu.matmul %1117, %848, %cst_548 {dimension_numbers = #tpu.dot_dimension_numbers<[2], [1], [1], [2], [0, 0, 0, 1, 1, 2], [0], [0]>} : vector<2x8x16xf32>, vector<2x16x8xf32>, vector<2x8x8xf32> -> vector<2x8x8xf32>
    "tpu.trace_stop"() : () -> ()
    %1119 = vector.shape_cast %1118 : vector<2x8x8xf32> to vector<16x8xf32>
    %1120 = tpu.concatenate %291, %567, %843, %1119 in 1 : vector<16x8xf32>, vector<16x8xf32>, vector<16x8xf32>, vector<16x8xf32> -> vector<16x32xf32>
    %c0_549 = arith.constant 0 : index
    %c0_550 = arith.constant 0 : index
    %1121 = vector.load %arg7[%c0_549, %c0_550] : memref<32x32xf32, #tpu.memory_space<vmem>>, vector<32x32xf32>
    %cst_551 = arith.constant dense<0.000000e+00> : vector<16x32xf32>
    %1122 = tpu.matmul %1120, %1121, %cst_551 {dimension_numbers = #tpu.dot_dimension_numbers<[1], [0], [0], [1], [0, 0, 1, 1], [], []>} : vector<16x32xf32>, vector<32x32xf32>, vector<16x32xf32> -> vector<16x32xf32>
    %c0_552 = arith.constant 0 : index
    %c0_553 = arith.constant 0 : index
    %1123 = vector.load %arg11[%c0_552, %c0_553] : memref<6x32xf32, #tpu.memory_space<vmem>>, vector<1x32xf32>
    %1124 = vector.broadcast %1123 : vector<1x32xf32> to vector<16x32xf32>
    %1125 = arith.addf %1122, %1124 : vector<16x32xf32>
    %1126 = vector.shape_cast %1125 : vector<16x32xf32> to vector<2x8x32xf32>
    %1127 = arith.addf %0, %1126 : vector<2x8x32xf32>
    %cst_554 = arith.constant dense<0.000000e+00> : vector<2x32xf32>
    %1128 = vector.multi_reduction <add>, %1127, %cst_554 [1] : vector<2x8x32xf32> to vector<2x32xf32>
    %1129 = vector.shape_cast %1128 : vector<2x32xf32> to vector<2x1x32xf32>
    %cst_555 = arith.constant 8.000000e+00 : f32
    %1130 = vector.broadcast %cst_555 : f32 to vector<2x1x32xf32>
    %1131 = arith.divf %1129, %1130 : vector<2x1x32xf32>
    %1132 = vector.broadcast %1131 : vector<2x1x32xf32> to vector<2x8x32xf32>
    %1133 = arith.subf %1127, %1132 : vector<2x8x32xf32>
    %1134 = arith.mulf %1133, %1133 : vector<2x8x32xf32>
    %cst_556 = arith.constant dense<0.000000e+00> : vector<2x32xf32>
    %1135 = vector.multi_reduction <add>, %1134, %cst_556 [1] : vector<2x8x32xf32> to vector<2x32xf32>
    %1136 = vector.shape_cast %1135 : vector<2x32xf32> to vector<2x1x32xf32>
    %cst_557 = arith.constant 8.000000e+00 : f32
    %1137 = vector.broadcast %cst_557 : f32 to vector<2x1x32xf32>
    %1138 = arith.divf %1136, %1137 : vector<2x1x32xf32>
    %cst_558 = arith.constant 9.99999974E-6 : f32
    %1139 = vector.broadcast %cst_558 : f32 to vector<2x1x32xf32>
    %1140 = arith.addf %1138, %1139 : vector<2x1x32xf32>
    %1141 = math.rsqrt %1140 : vector<2x1x32xf32>
    %1142 = vector.broadcast %1141 : vector<2x1x32xf32> to vector<2x8x32xf32>
    %1143 = arith.mulf %1133, %1142 : vector<2x8x32xf32>
    %c1_559 = arith.constant 1 : index
    %c0_560 = arith.constant 0 : index
    %1144 = vector.load %arg11[%c1_559, %c0_560] : memref<6x32xf32, #tpu.memory_space<vmem>>, vector<1x32xf32>
    %1145 = vector.shape_cast %1144 : vector<1x32xf32> to vector<1x1x32xf32>
    %1146 = vector.broadcast %1145 : vector<1x1x32xf32> to vector<2x8x32xf32>
    %1147 = arith.mulf %1143, %1146 : vector<2x8x32xf32>
    %c2_561 = arith.constant 2 : index
    %c0_562 = arith.constant 0 : index
    %1148 = vector.load %arg11[%c2_561, %c0_562] : memref<6x32xf32, #tpu.memory_space<vmem>>, vector<1x32xf32>
    %1149 = vector.shape_cast %1148 : vector<1x32xf32> to vector<1x1x32xf32>
    %1150 = vector.broadcast %1149 : vector<1x1x32xf32> to vector<2x8x32xf32>
    %1151 = arith.addf %1147, %1150 : vector<2x8x32xf32>
    %1152 = vector.shape_cast %1151 : vector<2x8x32xf32> to vector<16x32xf32>
    %1153 = arith.truncf %1152 : vector<16x32xf32> to vector<16x32xbf16>
    %c0_563 = arith.constant 0 : index
    %c0_564 = arith.constant 0 : index
    %1154 = vector.load %arg8[%c0_563, %c0_564] : memref<32x64xbf16, #tpu.memory_space<vmem>>, vector<32x64xbf16>
    %cst_565 = arith.constant dense<0.000000e+00> : vector<16x64xf32>
    %1155 = tpu.matmul %1153, %1154, %cst_565 {dimension_numbers = #tpu.dot_dimension_numbers<[1], [0], [0], [1], [0, 0, 1, 1], [], []>} : vector<16x32xbf16>, vector<32x64xbf16>, vector<16x64xf32> -> vector<16x64xf32>
    %c0_566 = arith.constant 0 : index
    %c0_567 = arith.constant 0 : index
    %1156 = vector.load %arg9[%c0_566, %c0_567] : memref<1x64xf32, #tpu.memory_space<vmem>>, vector<1x64xf32>
    %1157 = vector.broadcast %1156 : vector<1x64xf32> to vector<16x64xf32>
    %1158 = arith.addf %1155, %1157 : vector<16x64xf32>
    %cst_568 = arith.constant 0.000000e+00 : f32
    %1159 = vector.broadcast %cst_568 : f32 to vector<16x64xf32>
    %1160 = arith.maximumf %1158, %1159 : vector<16x64xf32>
    %1161 = arith.truncf %1160 : vector<16x64xf32> to vector<16x64xbf16>
    %c0_569 = arith.constant 0 : index
    %c0_570 = arith.constant 0 : index
    %1162 = vector.load %arg10[%c0_569, %c0_570] : memref<64x32xbf16, #tpu.memory_space<vmem>>, vector<64x32xbf16>
    %cst_571 = arith.constant dense<0.000000e+00> : vector<16x32xf32>
    %1163 = tpu.matmul %1161, %1162, %cst_571 {dimension_numbers = #tpu.dot_dimension_numbers<[1], [0], [0], [1], [0, 0, 1, 1], [], []>} : vector<16x64xbf16>, vector<64x32xbf16>, vector<16x32xf32> -> vector<16x32xf32>
    %c5_572 = arith.constant 5 : index
    %c0_573 = arith.constant 0 : index
    %1164 = vector.load %arg11[%c5_572, %c0_573] : memref<6x32xf32, #tpu.memory_space<vmem>>, vector<1x32xf32>
    %1165 = vector.broadcast %1164 : vector<1x32xf32> to vector<16x32xf32>
    %1166 = arith.addf %1163, %1165 : vector<16x32xf32>
    %1167 = vector.shape_cast %1166 : vector<16x32xf32> to vector<2x8x32xf32>
    %1168 = arith.addf %1151, %1167 : vector<2x8x32xf32>
    %cst_574 = arith.constant dense<0.000000e+00> : vector<2x32xf32>
    %1169 = vector.multi_reduction <add>, %1168, %cst_574 [1] : vector<2x8x32xf32> to vector<2x32xf32>
    %1170 = vector.shape_cast %1169 : vector<2x32xf32> to vector<2x1x32xf32>
    %cst_575 = arith.constant 8.000000e+00 : f32
    %1171 = vector.broadcast %cst_575 : f32 to vector<2x1x32xf32>
    %1172 = arith.divf %1170, %1171 : vector<2x1x32xf32>
    %1173 = vector.broadcast %1172 : vector<2x1x32xf32> to vector<2x8x32xf32>
    %1174 = arith.subf %1168, %1173 : vector<2x8x32xf32>
    %1175 = arith.mulf %1174, %1174 : vector<2x8x32xf32>
    %cst_576 = arith.constant dense<0.000000e+00> : vector<2x32xf32>
    %1176 = vector.multi_reduction <add>, %1175, %cst_576 [1] : vector<2x8x32xf32> to vector<2x32xf32>
    %1177 = vector.shape_cast %1176 : vector<2x32xf32> to vector<2x1x32xf32>
    %cst_577 = arith.constant 8.000000e+00 : f32
    %1178 = vector.broadcast %cst_577 : f32 to vector<2x1x32xf32>
    %1179 = arith.divf %1177, %1178 : vector<2x1x32xf32>
    %cst_578 = arith.constant 9.99999974E-6 : f32
    %1180 = vector.broadcast %cst_578 : f32 to vector<2x1x32xf32>
    %1181 = arith.addf %1179, %1180 : vector<2x1x32xf32>
    %1182 = math.rsqrt %1181 : vector<2x1x32xf32>
    %1183 = vector.broadcast %1182 : vector<2x1x32xf32> to vector<2x8x32xf32>
    %1184 = arith.mulf %1174, %1183 : vector<2x8x32xf32>
    %c3_579 = arith.constant 3 : index
    %c0_580 = arith.constant 0 : index
    %1185 = vector.load %arg11[%c3_579, %c0_580] : memref<6x32xf32, #tpu.memory_space<vmem>>, vector<1x32xf32>
    %1186 = vector.shape_cast %1185 : vector<1x32xf32> to vector<1x1x32xf32>
    %1187 = vector.broadcast %1186 : vector<1x1x32xf32> to vector<2x8x32xf32>
    %1188 = arith.mulf %1184, %1187 : vector<2x8x32xf32>
    %c4_581 = arith.constant 4 : index
    %c0_582 = arith.constant 0 : index
    %1189 = vector.load %arg11[%c4_581, %c0_582] : memref<6x32xf32, #tpu.memory_space<vmem>>, vector<1x32xf32>
    %1190 = vector.shape_cast %1189 : vector<1x32xf32> to vector<1x1x32xf32>
    %1191 = vector.broadcast %1190 : vector<1x1x32xf32> to vector<2x8x32xf32>
    %1192 = arith.addf %1188, %1191 : vector<2x8x32xf32>
    %c0_583 = arith.constant 0 : index
    %c0_584 = arith.constant 0 : index
    %c0_585 = arith.constant 0 : index
    %1193 = vector.load %arg12[%c0_583, %c0_584, %c0_585] : memref<2x8x32xf32, #tpu.memory_space<vmem>>, vector<2x8x32xf32>
    tpu.vector_store %arg12[%c0_583, %c0_584, %c0_585], %1192 {strides = array<i32>} : memref<2x8x32xf32, #tpu.memory_space<vmem>>, vector<2x8x32xf32>,
    return
  }
  func.func @transform_0(%arg0: i32) -> (i32, i32) {
    %c0_i32 = arith.constant 0 : i32
    %c0_i32_0 = arith.constant 0 : i32
    %c0_i32_1 = arith.constant 0 : i32
    return %c0_i32, %c0_i32_0 : i32, i32
  }
  func.func @transform_1(%arg0: i32) -> (i32, i32, i32) {
    %c0_i32 = arith.constant 0 : i32
    %c0_i32_0 = arith.constant 0 : i32
    %c0_i32_1 = arith.constant 0 : i32
    return %arg0, %c0_i32, %c0_i32_0 : i32, i32, i32
  }
  func.func @transform_2(%arg0: i32) -> (i32, i32, i32) {
    %c0_i32 = arith.constant 0 : i32
    %c0_i32_0 = arith.constant 0 : i32
    %c0_i32_1 = arith.constant 0 : i32
    return %arg0, %c0_i32, %c0_i32_0 : i32, i32, i32
  }
  func.func @transform_3(%arg0: i32) -> (i32, i32, i32) {
    %c0_i32 = arith.constant 0 : i32
    %c0_i32_0 = arith.constant 0 : i32
    %c0_i32_1 = arith.constant 0 : i32
    return %arg0, %c0_i32, %c0_i32_0 : i32, i32, i32
  }
  func.func @transform_4(%arg0: i32) -> (i32, i32) {
    %c0_i32 = arith.constant 0 : i32
    %c0_i32_0 = arith.constant 0 : i32
    %c0_i32_1 = arith.constant 0 : i32
    return %c0_i32, %c0_i32_0 : i32, i32
  }
  func.func @transform_5(%arg0: i32) -> (i32, i32) {
    %c0_i32 = arith.constant 0 : i32
    %c0_i32_0 = arith.constant 0 : i32
    %c0_i32_1 = arith.constant 0 : i32
    return %c0_i32, %c0_i32_0 : i32, i32
  }
  func.func @transform_6(%arg0: i32) -> (i32, i32) {
    %c0_i32 = arith.constant 0 : i32
    %c0_i32_0 = arith.constant 0 : i32
    %c0_i32_1 = arith.constant 0 : i32
    return %c0_i32, %c0_i32_0 : i32, i32
  }
  func.func @transform_7(%arg0: i32) -> (i32, i32) {
    %c0_i32 = arith.constant 0 : i32
    %c0_i32_0 = arith.constant 0 : i32
    %c0_i32_1 = arith.constant 0 : i32
    return %c0_i32, %c0_i32_0 : i32, i32
  }
  func.func @transform_8(%arg0: i32) -> (i32, i32) {
    %c0_i32 = arith.constant 0 : i32
    %c0_i32_0 = arith.constant 0 : i32
    %c0_i32_1 = arith.constant 0 : i32
    return %c0_i32, %c0_i32_0 : i32, i32
  }
  func.func @transform_9(%arg0: i32) -> (i32, i32) {
    %c0_i32 = arith.constant 0 : i32
    %c0_i32_0 = arith.constant 0 : i32
    %c0_i32_1 = arith.constant 0 : i32
    return %c0_i32, %c0_i32_0 : i32, i32
  }
  func.func @transform_10(%arg0: i32) -> (i32, i32) {
    %c0_i32 = arith.constant 0 : i32
    %c0_i32_0 = arith.constant 0 : i32
    %c0_i32_1 = arith.constant 0 : i32
    return %c0_i32, %c0_i32_0 : i32, i32
  }
  func.func @transform_11(%arg0: i32) -> (i32, i32, i32) {
    %c0_i32 = arith.constant 0 : i32
    %c0_i32_0 = arith.constant 0 : i32
    %c0_i32_1 = arith.constant 0 : i32
    return %arg0, %c0_i32, %c0_i32_0 : i32, i32, i32
  }
}

</mosaic_0001>

<bundles_post_ra>
// kernel: tpu_custom_call.1
= control target key start
LH: loop header
LB: loop body
LE: loop exit
PB: predicated region body
PF: predicated region fallthrough
CT: control target
= control target key end

     0   :  { %s7854_s0 = inlined_call_operand.hbm [shape: f32[4,65], index: 0, kind: input, shape index: {}]   ;;  %s7855_s1 = inlined_call_operand.vmem [shape: f32[4,8,32], index: 1, kind: input, shape index: {}]   ;;  %s7856_s2 = inlined_call_operand.hbm [shape: f32[4,16,32], index: 2, kind: input, shape index: {}]   ;;  %s7857_s3 = inlined_call_operand.hbm [shape: f32[4,8,16], index: 3, kind: input, shape index: {}]   ;;  %s7858_s4 = inlined_call_operand.hbm [shape: bf16[32,32], index: 4, kind: input, shape index: {}]   ;;  %s7859_s5 = inlined_call_operand.hbm [shape: bf16[32,64], index: 5, kind: input, shape index: {}]   ;;  %s7860_s6 = inlined_call_operand.vmem [shape: f32[32,32], index: 6, kind: input, shape index: {}]   ;;  %s7861_s7 = inlined_call_operand.hbm [shape: bf16[32,64], index: 7, kind: input, shape index: {}]   ;;  %s7862_s8 = inlined_call_operand.vmem [shape: f32[1,64], index: 8, kind: input, shape index: {}]   ;;  %s7863_s9 = inlined_call_operand.vmem [shape: bf16[64,32], index: 9, kind: input, shape index: {}]   ;;  %s7864_s10 = inlined_call_operand.hbm [shape: f32[6,32], index: 10, kind: input, shape index: {}]   ;;  %s7865_s11 = inlined_call_operand.hbm [shape: f32[4,8,32], index: 11, kind: output, shape index: {}]  }
   0x1   :  { %8214 = sst [smem:[#allocation79_spill]] %s7854_s0 }
   0x2   :  { %8215 = sst [smem:[#allocation80_spill]] %s7855_s1 }
   0x3   :  { %8216 = sst [smem:[#allocation81_spill]] %s7856_s2 }
   0x4   :  { %8217 = sst [smem:[#allocation82_spill]] %s7857_s3 }
   0x5   :  { %8218 = sst [smem:[#allocation83_spill]] %s7858_s4 }
   0x6   :  { %8219 = sst [smem:[#allocation84_spill]] %s7859_s5 }
   0x7   :  { %8220 = sst [smem:[#allocation85_spill]] %s7860_s6 }
   0x8   :  { %8221 = sst [smem:[#allocation86_spill]] %s7861_s7 }
   0x9   :  { %8222 = sst [smem:[#allocation87_spill]] %s7862_s8 }
   0xa   :  { %8223 = sst [smem:[#allocation88_spill]] %s7863_s9 }
   0xb   :  { %8224 = sst [smem:[#allocation89_spill]] %s7864_s10 }
   0xc   :  { %8225 = sst [smem:[#allocation90_spill]] %s7865_s11 }
   0xd   :  { %16 = vsyncpa [#allocation5], 0 }
   0xe   :  { %17 = vsyncpa [#allocation3], 0 }
   0xf   :  { %19 = vsyncpa [#allocation3 + $0x1], 0 }
  0x10   :  { %20 = vsyncpa [#allocation8], 0 }
  0x11   :  { %22 = vsyncpa [#allocation8 + $0x1], 0 }
  0x12   :  { %23 = vsyncpa [#allocation11], 0 }
  0x13   :  { %24 = vsyncpa [#allocation14], 0 }
  0x14   :  { %25 = vsyncpa [#allocation4], 0 }
  0x15   :  { %27 = vsyncpa [#allocation4 + $0x1], 0  ;;  %s4943_s17 = smov 0   ;;  %s4945_s18 = smov 0  }
  0x16   :  { %s4947_s19 = smov 0   ;;  %s4949_s20 = smov 0  }
  0x17 LB: > { %8226 = sst [smem:[#allocation23_spill]] %s4843_s17  ;;  %s4857_s21 = smov [#allocation9]   ;;  %s4855_s20 = sphi %s4949_s20, %s8970_s20   ;;  %s4851_s19 = sphi %s4947_s19, %s8973_s19   ;;  %s4847_s18 = sphi %s4945_s18, %s8972_s18   ;;  %s4843_s17 = sphi %s4943_s17, %s8971_s17  }
  0x18   : > { %8227 = sst [smem:[#allocation24_spill]] %s4847_s18  ;;  %s331_s22 = sshll.u32 %s4857_s21, 4  ;;  %s4969_s22 = int_to_ptr.vmem [resolvable:$true] %s331_s22 }
  0x19   : > { %8228 = sst [smem:[#allocation25_spill]] %s4851_s19  ;;  %s4964_s23 = sadd.s32 4294967295, %s4855_s20  }
  0x1a   : > { %8229 = sst [smem:[#allocation26_spill]] %s4855_s20  ;;  %p3791_p0 = scmp.ge.s32.totalorder %s4855_s20, 1 }
  0x1b   : > { %8230 = sst [smem:[#allocation27_spill]] %s4964_s23  ;;  %p7869_p1 = scmp.eq.s32.totalorder %s4964_s23, 0 }
  0x1c   : > { %p310_p2 = scmp.lt.s32.totalorder %s4855_s20, 3  ;;  %s4858_s25 = smov [#allocation10]  }
  0x1d   : > { %s344_s26 = sshll.u32 %s4858_s25, 4  ;;  %s4859_s28 = smov [#allocation12]   ;;  %s4984_s26 = int_to_ptr.vmem [resolvable:$true] %s344_s26 }
  0x1e   : > { %p4971_p3 = pnand %p3791_p0, %p310_p2  ;;  %s4986_s29 = sshll.u32 %s4859_s28, 4  ;;  %s361_s29 = int_to_ptr.vmem [resolvable:$true] %s4986_s29 }
  0x1f   : > { %s8233_s4 = sld [smem:[#allocation83_spill]] }
  0x20   : > { %s8231_s24 = scalar_select %p4971_p3, 1, 0 }
  0x21   : > { %p4394_p5 = pneg %p4971_p3 }
  0x23   : > { %p4980_p6 = pnand %p4394_p5, %p7869_p1 }
  0x25   : > { %s4584_s13 = scalar_lea.hbm %s8233_s4, 256  ;;  %p4996_p8 = pneg %p4980_p6 }
  0x26   : > { %p4585_p7 = scmp.ne.s32.totalorder %s8233_s4, %s4584_s13  ;;  %p4591_p11 = scmp.lt.u32.totalorder %s4584_s13, %s8233_s4 }
  0x28   : > { %p4587_p9 = pnand %p4996_p8, %p4585_p7 }
  0x2a   : > { %p4588_p10 = pneg %p4587_p9 }
  0x2c   : > { %p4593_p12 = pnand %p4591_p11, %p4588_p10 }
  0x2e   : > { %4596 = shalt.err (!%p4593_p12)
}
  0x2f   : > { %s4597_s28 = scalar_lea.vmem %s4969_s22, 256  ;;  %p4605_p5 = scmp.lt.s32.totalorder %s4969_s22, %s4969_s22 }
  0x30   : > { %p4598_p13 = scmp.ne.s32.totalorder %s4969_s22, %s4597_s28  ;;  %p4606_p4 = scmp.lt.s32.totalorder %s4597_s28, %s4597_s28 }
  0x32   : > { %p4600_p0 = pnand %p4598_p13, %p4996_p8  ;;  %p4607_p7 = por %p4606_p4, %p4605_p5 }
  0x34   : > { %p4601_p2 = pneg %p4600_p0 }
  0x36   : > { %p4608_p9 = pnand %p4607_p7, %p4601_p2 }
  0x38   : > { %4611 = shalt.err (!%p4608_p9)
}
  0x39   : > { %s7868_s30 = smov 64   ;;  %s4861_s12 = smov 4  }
  0x3a   : > { %4400 = dma.hbm_to_vmem [thread:$0]  (!%p4980_p6), %s8233_s4, 256, %s4969_s22, [#allocation8], %s7868_s30, %s7868_s30, %s4861_s12  }
  0x3b   : > { %s8235_s5 = sld [smem:[#allocation84_spill]] }
  0x41   : > { %s4612_s25 = scalar_lea.hbm %s8235_s5, 256 }
  0x42   : > { %p4613_p4 = scmp.ne.s32.totalorder %s8235_s5, %s4612_s25  ;;  %p4619_p12 = scmp.lt.u32.totalorder %s4612_s25, %s8235_s5 }
  0x44   : > { %p4615_p10 = pnand %p4613_p4, %p4996_p8 }
  0x46   : > { %p4616_p11 = pneg %p4615_p10 }
  0x48   : > { %p4621_p13 = pnand %p4619_p12, %p4616_p11 }
  0x4a   : > { %4624 = shalt.err (!%p4621_p13)
}
  0x4b   : > { %s4625_s22 = scalar_lea.vmem %s4984_s26, 256  ;;  %p4633_p7 = scmp.lt.s32.totalorder %s4984_s26, %s4984_s26 }
  0x4c   : > { %p4626_p0 = scmp.ne.s32.totalorder %s4984_s26, %s4625_s22  ;;  %p4634_p9 = scmp.lt.s32.totalorder %s4625_s22, %s4625_s22 }
  0x4e   : > { %p4628_p2 = pnand %p4626_p0, %p4996_p8  ;;  %p4635_p4 = por %p4634_p9, %p4633_p7 }
  0x50   : > { %p4629_p5 = pneg %p4628_p2 }
  0x52   : > { %p4636_p10 = pnand %p4635_p4, %p4629_p5 }
  0x54   : > { %4639 = shalt.err (!%p4636_p10)
}
  0x55   : > { %4403 = dma.hbm_to_vmem [thread:$0]  (!%p4980_p6), %s8235_s5, 256, %s4984_s26, [#allocation11], %s7868_s30, %s7868_s30, %s4861_s12  }
  0x56   : > { %s8236_s0 = sld [smem:[#allocation79_spill]] }
  0x5c   : > { %s4640_s14 = scalar_lea.hbm %s8236_s0, 64 }
  0x5d   : > { %p4641_p11 = scmp.ne.s32.totalorder %s8236_s0, %s4640_s14  ;;  %p4647_p0 = scmp.lt.u32.totalorder %s4640_s14, %s8236_s0 }
  0x5f   : > { %p4643_p12 = pnand %p4641_p11, %p4996_p8 }
  0x61   : > { %p4644_p13 = pneg %p4643_p12 }
  0x63   : > { %p4649_p2 = pnand %p4647_p0, %p4644_p13 }
  0x65   : > { %4652 = shalt.err (!%p4649_p2)
}
  0x66   : > { %s4862_s22 = smov [#allocation2]   ;;  %s4863_s9 = smov [#allocation13]  }
  0x67   : > { %4397 = dma.hbm_to_smem (!%p4980_p6), %s8236_s0, 64, %s4862_s22, [#allocation5]  }
  0x68   : > { %s380_s11 = sshll.u32 %s4863_s9, 4  ;;  %s8237_s7 = sld [smem:[#allocation86_spill]]  ;;  %s381_s11 = int_to_ptr.vmem [resolvable:$true] %s380_s11 }
  0x6e   : > { %s4653_s21 = scalar_lea.hbm %s8237_s7, 256 }
  0x6f   : > { %p4654_p5 = scmp.ne.s32.totalorder %s8237_s7, %s4653_s21  ;;  %p4660_p4 = scmp.lt.u32.totalorder %s4653_s21, %s8237_s7 }
  0x71   : > { %p4656_p7 = pnand %p4654_p5, %p4996_p8 }
  0x73   : > { %p4657_p9 = pneg %p4656_p7 }
  0x75   : > { %p4662_p10 = pnand %p4660_p4, %p4657_p9 }
  0x77   : > { %4665 = shalt.err (!%p4662_p10)
}
  0x78   : > { %s4666_s22 = scalar_lea.vmem %s361_s29, 256  ;;  %p4674_p0 = scmp.lt.s32.totalorder %s361_s29, %s361_s29 }
  0x79   : > { %p4667_p11 = scmp.ne.s32.totalorder %s361_s29, %s4666_s22  ;;  %p4675_p2 = scmp.lt.s32.totalorder %s4666_s22, %s4666_s22 }
  0x7b   : > { %p4669_p12 = pnand %p4667_p11, %p4996_p8  ;;  %p4676_p1 = por %p4675_p2, %p4674_p0 }
  0x7d   : > { %p4670_p13 = pneg %p4669_p12 }
  0x7f   : > { %p4677_p3 = pnand %p4676_p1, %p4670_p13 }
  0x81   : > { %4680 = shalt.err (!%p4677_p3)
}
  0x82   : > { %s8238_s26 = smov 64   ;;  %s8239_s10 = sld [smem:[#allocation89_spill]] }
  0x83   : > { %4406 = dma.hbm_to_vmem [thread:$0]  (!%p4980_p6), %s8237_s7, 256, %s361_s29, [#allocation11], %s8238_s26, %s8238_s26, %s4861_s12  }
  0x88   : > { %s4681_s15 = scalar_lea.hbm %s8239_s10, 128 }
  0x89   : > { %p4682_p1 = scmp.ne.s32.totalorder %s8239_s10, %s4681_s15  ;;  %p4688_p7 = scmp.lt.u32.totalorder %s4681_s15, %s8239_s10 }
  0x8b   : > { %p4684_p3 = pnand %p4682_p1, %p4996_p8 }
  0x8d   : > { %p4685_p5 = pneg %p4684_p3 }
  0x8f   : > { %p4690_p9 = pnand %p4688_p7, %p4685_p5 }
  0x91   : > { %4693 = shalt.err (!%p4690_p9)
}
  0x92   : > { %s4694_s22 = scalar_lea.vmem %s381_s11, 128  ;;  %p4702_p12 = scmp.lt.s32.totalorder %s381_s11, %s381_s11 }
  0x93   : > { %p4695_p4 = scmp.ne.s32.totalorder %s381_s11, %s4694_s22  ;;  %p4703_p13 = scmp.lt.s32.totalorder %s4694_s22, %s4694_s22 }
  0x95   : > { %p4697_p10 = pnand %p4695_p4, %p4996_p8  ;;  %p4704_p0 = por %p4703_p13, %p4702_p12 }
  0x97   : > { %p4698_p11 = pneg %p4697_p10 }
  0x99   : > { %p4705_p2 = pnand %p4704_p0, %p4698_p11 }
  0x9b   : > { %4708 = shalt.err (!%p4705_p2)
}
  0x9c   : > { %4409 = dma.hbm_to_vmem [thread:$0]  (!%p4980_p6), %s8239_s10, 128, %s381_s11, [#allocation14]  }
  0x9d   : > { %s3790_s16 = sadd.s32 4294967294, %s4855_s20   ;;  %s5104_s27 = sadd.s32 1, %s4855_s20  }
  0x9e   : > { %8240 = sst [smem:[#allocation28_spill]] %s5104_s27  ;;  %s87_s26 = sadd.s32 1, %s4851_s19 }
  0x9f   : > { %s84_s30 = ssub.s32 %s4855_s20, %s5104_s27  ;;  %p94_p8 = scmp.ne.s32.totalorder %s4851_s19, %s4847_s18 }
  0xa0   : > { %p85_p1 = scmp.eq.s32.totalorder %s84_s30, 0  ;;  %p95_p3 = scmp.eq.s32.totalorder %s4855_s20, 0 }
  0xa1   : > { %p100_p5 = scmp.ne.s32.totalorder %s4847_s18, %s4843_s17  ;;  %p297_p7 = scmp.eq.s32.totalorder %s4964_s23, 1 }
  0xa2   : > { %s5116_s8 = scalar_select %p85_p1, %s4851_s19, %s87_s26  }
  0xa3   : > { %p96_p9 = por %p95_p3, %p94_p8  ;;  %p8242_p4 = scmp.eq.s32.totalorder %s4964_s23, 0 }
  0xa4   : > { %8241 = sst [smem:[#allocation29_spill]] %s5116_s8  ;;  %p5124_p6 = por %p297_p7, %p94_p8 }
  0xa5   : > { %p5120_p10 = por %p8242_p4, %p100_p5  ;;  %p303_p11 = scmp.eq.s32.totalorder %s3790_s16, 1 }
  0xa6   : > { %s8244_s11 = scalar_select %p5124_p6, 1, 0 }
  0xa7   : > { %p4426_p12 = scmp.lt.s32.totalorder %s4855_s20, 2  ;;  %s5130_s13 = sand.u32 1, %s4851_s19  }
  0xa8   : > { %8245 = sst [smem:[#allocation30_spill]] %s8244_s11  ;;  %p5132_p13 = por %p303_p11, %p100_p5 }
  0xa9   : > { %s3798_s21 = sshll.u32 %s5130_s13, 5  ;;  %s4121_s25 = sshll.u32 %s4855_s20, 9 }
  0xaa   : > { %s8246_s15 = scalar_select %p5132_p13, 1, 0 }
  0xab   : > { %s8248_s2 = sld [smem:[#allocation81_spill]]  ;;  %s404_s29 = scalar_lea.vmem [#allocation6], %s3798_s21 }
  0xac   : > { %8247 = sst [smem:[#allocation31_spill]] %s8246_s15  ;;  %s412_s12 = sshll.u32 %s404_s29, 4  ;;  %s5147_s12 = int_to_ptr.vmem [resolvable:$true] %s412_s12 }
  0xad   : > { %p5143_p0 = pnand %p4426_p12, %p96_p9 }
  0xaf   : > { %p4711_p8 = pneg %p5143_p0 }
  0xb1   : > { %s5141_s22 = scalar_lea.hbm %s8248_s2, %s4121_s25  ;;  %s4714_s14 = scalar_lea.hbm %s8248_s2, 1024 }
  0xb2   : > { %s4709_s30 = scalar_lea.hbm %s5141_s22, 512  ;;  %p4715_p5 = scmp.lt.u32.totalorder %s5141_s22, %s8248_s2 }
  0xb3   : > { %p4710_p2 = scmp.ne.s32.totalorder %s5141_s22, %s4709_s30  ;;  %p4716_p7 = scmp.lt.u32.totalorder %s4714_s14, %s4709_s30 }
  0xb4   : > { %p4718_p4 = scmp.lt.u32.totalorder %s4709_s30, %s5141_s22 }
  0xb5   : > { %p4712_p1 = pnand %p4711_p8, %p4710_p2  ;;  %p4717_p9 = por %p4716_p7, %p4715_p5 }
  0xb7   : > { %p4713_p3 = pneg %p4712_p1  ;;  %p4719_p11 = por %p4718_p4, %p4717_p9 }
  0xb9   : > { %p4720_p12 = pnand %p4719_p11, %p4713_p3 }
  0xbb   : > { %4723 = shalt.err (!%p4720_p12)
}
  0xbc   : > { %s4724_s26 = scalar_lea.vmem %s5147_s12, 512  ;;  %s4864_s25 = smov [#allocation6]  }
  0xbd   : > { %p4725_p2 = scmp.ne.s32.totalorder %s5147_s12, %s4724_s26  ;;  %s4729_s21 = sshll.u32 %s4864_s25, 4  ;;  %s4730_s21 = int_to_ptr.vmem [resolvable:$false] %s4729_s21 }
  0xbe   : > { %s4731_s28 = scalar_lea.vmem %s4730_s21, 1024  ;;  %p4732_p6 = scmp.lt.s32.totalorder %s5147_s12, %s4730_s21 }
  0xbf   : > { %p4727_p1 = pnand %p4725_p2, %p4711_p8  ;;  %p4733_p5 = scmp.lt.s32.totalorder %s4731_s28, %s4724_s26 }
  0xc1   : > { %p4728_p13 = pneg %p4727_p1  ;;  %p4734_p7 = por %p4733_p5, %p4732_p6 }
  0xc3   : > { %p4735_p9 = pnand %p4734_p7, %p4728_p13 }
  0xc5   : > { %4738 = shalt.err (!%p4735_p9)
}
  0xc6   : > { %s4865_s30 = smov 128   ;;  %s4866_s14 = smov 8  }
  0xc7   : > { %s8250_s29 = scalar_lea.sflag [#allocation3], %s5130_s13  ;;  %s422_s26 = sand.u32 1, %s4855_s20  }
  0xc8   : > { %4413 = dma.hbm_to_vmem [thread:$0]  (!%p5143_p0), %s5141_s22, 512, %s5147_s12, %s8250_s29, %s4865_s30, %s4865_s30, %s4866_s14  }
  0xc9   : > { %s3802_s25 = sshll.u32 %s5130_s13, 4  ;;  %s4122_s21 = sshll.u32 %s4855_s20, 8 }
  0xca   : > { %s426_s28 = scalar_lea.vmem [#allocation7], %s3802_s25  ;;  %s8251_s3 = sld [smem:[#allocation82_spill]] }
  0xcb   : > { %s433_s0 = sshll.u32 %s426_s28, 4  ;;  %s5190_s7 = scalar_lea.sflag [#allocation8], %s422_s26  ;;  %s5188_s0 = int_to_ptr.vmem [resolvable:$true] %s433_s0 }
  0xd0   : > { %s5186_s5 = scalar_lea.hbm %s8251_s3, %s4122_s21  ;;  %s4744_s2 = scalar_lea.hbm %s8251_s3, 512 }
  0xd1   : > { %s4739_s10 = scalar_lea.hbm %s5186_s5, 256  ;;  %p4745_p4 = scmp.lt.u32.totalorder %s5186_s5, %s8251_s3 }
  0xd2   : > { %p4740_p6 = scmp.ne.s32.totalorder %s5186_s5, %s4739_s10  ;;  %p4746_p11 = scmp.lt.u32.totalorder %s4744_s2, %s4739_s10 }
  0xd3   : > { %p4748_p2 = scmp.lt.u32.totalorder %s4739_s10, %s5186_s5 }
  0xd4   : > { %p4742_p13 = pnand %p4740_p6, %p4711_p8  ;;  %p4747_p12 = por %p4746_p11, %p4745_p4 }
  0xd6   : > { %p4743_p3 = pneg %p4742_p13  ;;  %p4749_p1 = por %p4748_p2, %p4747_p12 }
  0xd8   : > { %p4750_p5 = pnand %p4749_p1, %p4743_p3 }
  0xda   : > { %4753 = shalt.err (!%p4750_p5)
}
  0xdb   : > { %s4754_s29 = scalar_lea.vmem %s5188_s0, 256  ;;  %s4867_s26 = smov [#allocation7]  }
  0xdc   : > { %p4755_p7 = scmp.ne.s32.totalorder %s5188_s0, %s4754_s29  ;;  %s4759_s25 = sshll.u32 %s4867_s26, 4  ;;  %s4760_s25 = int_to_ptr.vmem [resolvable:$false] %s4759_s25 }
  0xdd   : > { %s4761_s21 = scalar_lea.vmem %s4760_s25, 512  ;;  %p4762_p13 = scmp.lt.s32.totalorder %s5188_s0, %s4760_s25 }
  0xde   : > { %p4757_p9 = pnand %p4755_p7, %p4711_p8  ;;  %p4763_p4 = scmp.lt.s32.totalorder %s4761_s21, %s4754_s29 }
  0xe0   : > { %p4758_p6 = pneg %p4757_p9  ;;  %p4764_p11 = por %p4763_p4, %p4762_p13 }
  0xe2   : > { %p4765_p12 = pnand %p4764_p11, %p4758_p6 }
  0xe4   : > { %4768 = shalt.err (!%p4765_p12)
}
  0xe5   : > { %4416 = dma.hbm_to_vmem [thread:$0]  (!%p5143_p0), %s5186_s5, 256, %s5188_s0, %s5190_s7, %s4865_s30, %s4865_s30, %s4866_s14  }
  0xe6   : > { %p8252_p8 = scmp.ne.s32.totalorder %s8231_s24, 0 }
  0xe8   : > { %445 = sbr.rel (%p8252_p8) target bundleno = 4013 (0xfad), region = 64 }
  0xef   : > { %p8253_p3 = scmp.eq.s32.totalorder %s4964_s23, 0 }
  0xf1   : > { %4814 = dma.done.wait (%p8253_p3), [#allocation5], 64   ;;  %p8254_p2 = pmov %p8253_p3 }
  0xf2   : > { %s5226_s10 = sand.u32 1, %s4847_s18  }
  0xf3   : > { %4816 = vsyncadd (%p8254_p2), [#allocation5], 4294967232  ;;  %8255 = sst [smem:[#allocation32_spill]] %s5226_s10  ;;  %s3807_s16 = sshll.u32 %s5226_s10, 5 }
  0xf4   : > { %s452_s28 = scalar_lea.sflag [#allocation3], %s5226_s10  ;;  %s5230_s13 = scalar_lea.vmem [#allocation6], %s3807_s16 }
  0xf5   : > { %4818 = dma.done.wait (%p5120_p10), %s452_s28, 512  }
  0xf6   : > { %4820 = vsyncadd (%p5120_p10), %s452_s28, 4294966784  ;;  %s460_s0 = sand.u32 1, %s4964_s23   ;;  %s7872_s5 = sshll.u32 %s5226_s10, 4 }
  0xf7   : > { %s461_s7 = scalar_lea.sflag [#allocation8], %s460_s0  ;;  %s5240_s24 = scalar_lea.vmem [#allocation7], %s7872_s5 }
  0xf8   : > { %8256 = sst [smem:[#allocation33_spill]] %s5240_s24 }
  0xf9   : > { %4822 = dma.done.wait (%p5120_p10), %s461_s7, 256  }
  0xfa   : > { %4824 = vsyncadd (%p5120_p10), %s461_s7, 4294967040  ;;  %p8257_p0 = pmov %p8254_p2 }
  0xfc   : > { %4826 = dma.done.wait (%p8257_p0), [#allocation8], 256   ;;  %p8258_p1 = pmov %p8257_p0 }
  0xfd   : > { %p8259_p5 = pmov %p8257_p0 }
  0xfe   : > { %4828 = vsyncadd (%p8258_p1), [#allocation8], 4294967040 }
  0xff   : > { %4830 = dma.done.wait (%p8259_p5), [#allocation11], 512   ;;  %p8260_p7 = pmov %p8257_p0 }
 0x100   : > { %p8261_p9 = pmov %p8257_p0 }
 0x101   : > { %4832 = vsyncadd (%p8260_p7), [#allocation11], 4294966784 }
 0x102   : > { %4834 = dma.done.wait (%p8261_p9), [#allocation14], 128   ;;  %p8262_p6 = pmov %p8257_p0 }
 0x104   : > { %4836 = vsyncadd (%p8262_p6), [#allocation14], 4294967168 }
 0x105   : > { %485 = sfence }
 0x106   : > { %v4528_v0 = vld [vmem:[#allocation9] sm:$0xff]   ;;  %v7950_v1 = vmov 0.0   ;;  %v4529_v2 = vld [vmem:[#allocation9 + $0x8] sm:$0xff]   ;;  %vm4869_vm0 = vmmov 0   ;;  %s3814_s9 = sshll.u32 %s4964_s23, 1  ;;  %v4530_v3 = vld [vmem:[#allocation10] sm:$0xff]  }
 0x107   : > { %4185 = vmatprep.subr.bf16.mxu1 %v7950_v1  ;;  %4201 = vmatprep.subr.bf16.mxu0 %v7950_v1  ;;  %p531_p10 = scmp.lt.s32.totalorder %s3814_s9, 3  ;;  %v542_v4 = vld [vmem:[%s5230_s13] sm:$0xff]  ;;  %v543_v5 = vld [vmem:[%s5230_s13 + $0x8] sm:$0xff]  ;;  %s8263_s1 = sld [smem:[#allocation80_spill]]  ;;  %vm567_vm1 = vcmask 261120   ;;  %v4531_v10 = vld [vmem:[#allocation10 + $0x8] sm:$0xff]  }
 0x108   : > { %4186 = vmatpush3.bf16.msra.mxu1 %v4528_v0  ;;  %4189 = vmatprep.mubr.msk.bf16.mxu1 %vm4869_vm0, %v7950_v1  ;;  %v549_v8 = vpack.c.bf16 %v543_v5, %v542_v4  ;;  %v544_v11 = vld [vmem:[%s5230_s13 + $0x10] sm:$0xff]  ;;  %v545_v12 = vld [vmem:[%s5230_s13 + $0x18] sm:$0xff]  ;;  %vm687_vm2 = vcmask 64512   ;;  %s7875_s4 = smov 96   ;;  %v7948_v28 = vmov 0.0|0.0   ;;  %s7873_s12 = smov 120  }
 0x109   : > { %4187 = vmatprep.subr.bf16.mxu1 %v7950_v1  ;;  %4203 = vmatprep.mubr.msk.bf16.mxu0 %vm4869_vm0, %v7950_v1  ;;  %s8975_s9 = smov (!%p531_p10, %s3814_s9), 3  ;;  %v550_v13 = vpack.c.bf16 %v545_v12, %v544_v11  ;;  %s5316_s29 = sld [smem:[#allocation2]]  ;;  %v5383_v35 = vld [vmem:[%s5240_s24] sm:$0xff]  ;;  %vm1134_vm3 = vcmask 130048   ;;  %vm3253_vm4 = vcmask 195584   ;;  %vm3513_vm5 = vcmask 523264  }
 0x10a   : > { %s3815_s30 = sshll.u32 %s8975_s9, 3  ;;  %s5318_s26 = sld [smem:[#allocation2 + $0x10]] }
 0x10b   : > { %s5320_s25 = sld [smem:[#allocation2 + $0x1]]  ;;  %s5324_s16 = sld [smem:[#allocation2 + $0x2]] }
 0x10c   : > { %4188 = vmatpush3.bf16.msra.mxu1 %v4529_v2  ;;  %s5322_s21 = sld [smem:[#allocation2 + $0x11]]  ;;  %s5326_s28 = sld [smem:[#allocation2 + $0x12]] }
 0x10d   : > { %4193 = vmatprep.subr.bf16.mxu1 %v4530_v3  ;;  %s5271_s2 = scalar_lea.vmem %s8263_s1, %s3815_s30  ;;  %s5328_s13 = sld [smem:[#allocation2 + $0x3]] }
 0x10e   : > { %8264 = sst [smem:[#allocation34_spill]] %s5271_s2  ;;  %v540_v6 = vld [vmem:[%s5271_s2] sm:$0xff]  ;;  %v541_v7 = vld [vmem:[%s5271_s2 + $0x8] sm:$0xff]  ;;  %s5330_s0 = sld [smem:[#allocation2 + $0x20]] }
 0x10f   : > { %v548_v9 = vpack.c.bf16 %v541_v7, %v540_v6  ;;  %8265 = sst [smem:[#allocation35_spill]] %s5316_s29  ;;  %s5332_s7 = sld [smem:[#allocation2 + $0x13]]  ;;  %v784_v39 = vstv %s5316_s29 }
 0x110   : > { %8266 = sst [smem:[#allocation36_spill]] %s5318_s26  ;;  %s5334_s9 = sld [smem:[#allocation2 + $0x21]]  ;;  %v787_v36 = vstv %s5318_s26 }
 0x111   : > { %4190 = vmatmul.mubr.msk.bf16.vlgmr.msra.gmra.mrb[0].mxu1 %vm567_vm1, %v548_v9  ;;  %8267 = sst [smem:[#allocation37_spill]] %s5320_s25  ;;  %s5336_s30 = sld [smem:[#allocation2 + $0x22]]  ;;  %v804_v40 = vstv %s5320_s25  ;;  %v5406_v42 = vmul.f32 %v787_v36, %v5383_v35  ;;  %v826_v44 = vstv %s5324_s16 }
 0x112   : > { %4194 = vmatpush3.bf16.msra.mxu1 %v4530_v3  ;;  %4197 = vmatprep.mubr.msk.bf16.mxu1 %vm567_vm1, %v549_v8  ;;  %8268 = sst [smem:[#allocation38_spill]] %s5322_s21  ;;  %s5338_s14 = sld [smem:[#allocation2 + $0x23]]  ;;  %v807_v37 = vstv %s5322_s21  ;;  %v829_v38 = vstv %s5326_s28 }
 0x113   : > { %4195 = vmatprep.subr.bf16.mxu1 %v4531_v10  ;;  %8269 = sst [smem:[#allocation39_spill]] %s5324_s16  ;;  %s5340_s22 = sld [smem:[#allocation2 + $0x4]]  ;;  %v5411_v43 = vmul.f32 %v807_v37, %v5383_v35  ;;  %v5424_v48 = vmul.f32 %v829_v38, %v5383_v35  ;;  %v7960_v49 = vstv %s5328_s13 }
 0x114   : > { %8270 = sst [smem:[#allocation40_spill]] %s5326_s28  ;;  %s5342_s5 = sld [smem:[#allocation2 + $0x14]]  ;;  %v7970_v46 = vstv %s5330_s0 }
 0x115   : > { %8271 = sst [smem:[#allocation41_spill]] %s5328_s13  ;;  %s5348_s1 = sld [smem:[#allocation2 + $0x5]]  ;;  %v851_v41 = vstv %s5332_s7 }
 0x116   : > { %4196 = vmatpush3.bf16.msra.mxu1 %v4531_v10  ;;  %8272 = sst [smem:[#allocation42_spill]] %s5330_s0  ;;  %s5350_s3 = sld [smem:[#allocation2 + $0x31]]  ;;  %v7969_v47 = vstv %s5334_s9  ;;  %v5435_v51 = vmul.f32 %v851_v41, %v5383_v35 }
 0x117   : > { %4207 = vmatprep.subr.bf16.mxu1 %v7950_v1  ;;  %8273 = sst [smem:[#allocation43_spill]] %s5332_s7  ;;  %s5352_s8 = sld [smem:[#allocation2 + $0x32]] }
 0x118   : > { %8274 = sst [smem:[#allocation44_spill]] %s5334_s9  ;;  %s5354_s19 = sld [smem:[#allocation2 + $0x33]] }
 0x119   : > { %4198 = vmatmul.mubr.msk.bf16.vlgmr.msra.gmra.mrb[4].mxu1 %vm567_vm1, %v550_v13  ;;  %8275 = sst [smem:[#allocation45_spill]] %s5336_s30  ;;  %s5356_s18 = sld [smem:[#allocation2 + $0x34]]  ;;  %v7958_v54 = vstv %s5340_s22 }
 0x11a   : > { %4209 = vmatprep.mubr.msk.bf16.mxu1 %vm4869_vm0, %v7950_v1  ;;  %8276 = sst [smem:[#allocation46_spill]] %s5338_s14  ;;  %s5358_s27 = sld [smem:[#allocation2 + $0x15]]  ;;  %v873_v45 = vstv %s5342_s5 }
 0x11b   : > { %8277 = sst [smem:[#allocation47_spill]] %s5340_s22  ;;  %s5360_s20 = sld [smem:[#allocation2 + $0x25]]  ;;  %v5447_v55 = vmul.f32 %v873_v45, %v5383_v35  ;;  %v7959_v57 = vstv %s5348_s1 }
 0x11c   : > { %8278 = sst [smem:[#allocation48_spill]] %s5342_s5  ;;  %s5362_s15 = sld [smem:[#allocation2 + $0x35]] }
 0x11d   : > { %8281 = sst [smem:[#allocation51_spill]] %s5348_s1  ;;  %s5364_s17 = sld [smem:[#allocation2 + $0x6]] }
 0x11e   : > { %8282 = sst [smem:[#allocation52_spill]] %s5350_s3  ;;  %s5366_s11 = sld [smem:[#allocation2 + $0x16]] }
 0x11f   : > { %8283 = sst [smem:[#allocation53_spill]] %s5352_s8  ;;  %s5372_s2 = sld [smem:[#allocation2 + $0x7]] }
 0x120   : > { %8284 = sst [smem:[#allocation54_spill]] %s5354_s19  ;;  %s5368_s10 = sld [smem:[#allocation2 + $0x26]]  ;;  %v895_v53 = vstv %s5358_s27 }
 0x121   : > { %8285 = sst [smem:[#allocation55_spill]] %s5356_s18  ;;  %s5370_s23 = sld [smem:[#allocation2 + $0x36]]  ;;  %v5468_v0 = vmul.f32 %v895_v53, %v5383_v35 }
 0x122   : > { %8286 = sst [smem:[#allocation56_spill]] %s5358_s27  ;;  %s5374_s6 = sld [smem:[#allocation2 + $0x17]] }
 0x123   : > { %8287 = sst [smem:[#allocation57_spill]] %s5360_s20  ;;  %s5376_s18 = sld [smem:[#allocation2 + $0x27]] }
 0x124   : > { %8288 = sst [smem:[#allocation58_spill]] %s5362_s15  ;;  %s5378_s20 = sld [smem:[#allocation2 + $0x37]]  ;;  %v917_v61 = vstv %s5366_s11 }
 0x125   : > { %8289 = sst [smem:[#allocation59_spill]] %s5364_s17  ;;  %s5380_s17 = sld [smem:[#allocation2 + $0x8]]  ;;  %v5486_v7 = vmul.f32 %v917_v61, %v5383_v35 }
 0x126   : > { %8290 = sst [smem:[#allocation60_spill]] %s5368_s10  ;;  %s5399_s24 = sld [smem:[#allocation2 + $0x19]] }
 0x127   : > { %8291 = sst [smem:[#allocation61_spill]] %s5370_s23  ;;  %s5387_s23 = sld [smem:[#allocation2 + $0x18]] }
 0x128   : > { %8292 = sst [smem:[#allocation62_spill]] %s5372_s2  ;;  %s5389_s2 = sld [smem:[#allocation2 + $0x28]]  ;;  %v939_v2 = vstv %s5374_s6 }
 0x129   : > { %8293 = sst [smem:[#allocation63_spill]] %s5376_s18  ;;  %s5415_s25 = sld [smem:[#allocation2 + $0x39]]  ;;  %v5499_v12 = vmul.f32 %v939_v2, %v5383_v35 }
 0x12a   : > { %8294 = sst [smem:[#allocation64_spill]] %s5378_s20  ;;  %s5392_s18 = sld [smem:[#allocation2 + $0x38]] }
 0x12b   : > { %8295 = sst [smem:[#allocation65_spill]] %s5380_s17  ;;  %s5394_s20 = sld [smem:[#allocation2 + $0x9]] }
 0x12c   : > { %s5401_s17 = sld [smem:[#allocation2 + $0x29]]  ;;  %s5417_s29 = sld [smem:[#allocation2 + $0x1a]]  ;;  %v983_v10 = vstv %s5399_s24 }
 0x12d   : > { %s5427_s21 = sld [smem:[#allocation2 + $0xa]]  ;;  %s5441_s13 = sld [smem:[#allocation2 + $0x1b]]  ;;  %v961_v6 = vstv %s5387_s23 }
 0x12e   : > { %8296 = sst [smem:[#allocation66_spill]] %s5389_s2  ;;  %s5429_s16 = sld [smem:[#allocation2 + $0x2a]] }
 0x12f   : > { %8300 = sst [smem:[#allocation70_spill]] %s5415_s25  ;;  %s5439_s0 = sld [smem:[#allocation2 + $0x3a]] }
 0x130   : > { %8297 = sst [smem:[#allocation67_spill]] %s5392_s18  ;;  %s5451_s7 = sld [smem:[#allocation2 + $0xb]] }
 0x131   : > { %8298 = sst [smem:[#allocation68_spill]] %s5394_s20  ;;  %s8303_s14 = sld [smem:[#allocation59_spill]] }
 0x132   : > { %8299 = sst [smem:[#allocation69_spill]] %s5401_s17  ;;  %s5453_s28 = sld [smem:[#allocation2 + $0x2b]] }
 0x133   : > { %s5459_s22 = sld [smem:[#allocation2 + $0x3b]]  ;;  %s5461_s26 = sld [smem:[#allocation2 + $0x1c]] }
 0x134   : > { %s5471_s3 = sld [smem:[#allocation2 + $0xc]]  ;;  %s5481_s27 = sld [smem:[#allocation2 + $0x1d]] }
 0x135   : > { %s5479_s9 = sld [smem:[#allocation2 + $0x3c]]  ;;  %s5491_s15 = sld [smem:[#allocation2 + $0xd]] }
 0x136   : > { %s5493_s30 = sld [smem:[#allocation2 + $0x1e]]  ;;  %s5503_s10 = sld [smem:[#allocation2 + $0x2d]] }
 0x137   : > { %v7961_v5 = vstv %s8303_s14  ;;  %s5505_s5 = sld [smem:[#allocation2 + $0x1f]]  ;;  %s5517_s8 = sld [smem:[#allocation2 + $0xe]] }
 0x138   : > { %8304 = sst [smem:[#allocation71_spill]] %s5453_s28  ;;  %s5530_s2 = sld [smem:[#allocation2 + $0x2e]] }
 0x139   : > { %s5532_s14 = sld [smem:[#allocation2 + $0x3e]]  ;;  %s5540_s18 = sld [smem:[#allocation2 + $0xf]] }
 0x13a   : > { %8307 = sst [smem:[#allocation72_spill]] %s5471_s3  ;;  %s5547_s17 = sld [smem:[#allocation2 + $0x3f]] }
 0x13b   : > { %8313 = sst [smem:[#allocation74_spill]] %s5491_s15  ;;  %s8332_s11 = sld [smem:[#allocation41_spill]] }
 0x13c   : > { %8314 = sst [smem:[#allocation75_spill]] %s5503_s10  ;;  %s8333_s6 = sld [smem:[#allocation47_spill]] }
 0x13d   : > { %8315 = sst [smem:[#allocation76_spill]] %s5505_s5  ;;  %v7956_v9 = vstv %s5505_s5  ;;  %s8342_s19 = sld [smem:[#allocation57_spill]] }
 0x13e   : > { %8317 = sst [smem:[#allocation78_spill]] %s5517_s8  ;;  %s8344_s5 = sld [smem:[#allocation63_spill]] }
 0x13f   : > { %8320 = sst [smem:[#allocation36_spill]] %s5530_s2  ;;  %s8349_s24 = sld [smem:[#allocation53_spill]] }
 0x140   : > { %8322 = sst [smem:[#allocation38_spill]] %s5532_s14  ;;  %s8356_s25 = sld [smem:[#allocation58_spill]] }
 0x141   : > { %8326 = sst [smem:[#allocation43_spill]] %s5547_s17  ;;  %s8352_s14 = sld [smem:[#allocation54_spill]] }
 0x142   : > { %s8359_s23 = sld [smem:[#allocation68_spill]] }
 0x1e4   : > { %v605_v14 = vpop.f32.mrb[0].mxu1 }
 0x1e5   : > { %v4191_v15 = vpop.f32.mrb[1].mxu1  ;;  %v5303_v30 = vpack.c.bf16 %v605_v14, %v605_v14  ;;  %v1005_v14 = vstv %s5417_s29  ;;  %s8339_s29 = sld [smem:[#allocation45_spill]] }
 0x1e6   : > { %v608_v16 = vpop.f32.mrb[2].mxu1 }
 0x1e7   : > { %v4192_v17 = vpop.f32.mrb[3].mxu1  ;;  %v5301_v29 = vpack.c.bf16 %v608_v16, %v608_v16 }
 0x1e8   : > { %v5512_v17 = vmul.f32 %v961_v6, %v5383_v35 }
 0x1ec   : > { %v4199_v18 = vpop.f32.mrb[4].mxu1 }
 0x1ed   : > { %v668_v19 = vpop.f32.mrb[5].mxu1 }
 0x1ee   : > { %v4200_v20 = vpop.f32.mrb[6].mxu1 }
 0x1ef   : > { %v5283_v21 = vpack.c.bf16 %v4200_v20, %v4199_v18  ;;  %v671_v22 = vpop.f32.mrb[7].mxu1  ;;  %v5285_v23 = vpack.i.bf16 %v4200_v20, %v4199_v18  ;;  %v1049_v20 = vstv %s5461_s26  ;;  %s8340_s26 = sld [smem:[#allocation46_spill]] }
 0x1f0   : > { %v5287_v24 = vpack.c.bf16 %v671_v22, %v668_v19  ;;  %v5289_v25 = vpack.i.bf16 %v671_v22, %v668_v19 }
 0x1f1   : > { %4494 = vrot.lane.b32.xlu1 %v5285_v23, %s7875_s4  ;;  %v738_v26 = vsel %vm687_vm2, %v5283_v21, 0  ;;  %s5346_s4 = sld [smem:[#allocation2 + $0x30]] }
 0x1f2   : > { %4208 = vmatpush3.bf16.xpose.msra.mxu1 %v738_v26  ;;  %v692_v27 = vsel %vm687_vm2, %v5287_v24, 0  ;;  %v5527_v26 = vmul.f32 %v983_v10, %v5383_v35 }
 0x1f3   : > { %4202 = vmatpush3.bf16.xpose.msra.mxu0 %v692_v27  ;;  %4339 = vmatprep.subr.bf16.mxu1 %v7948_v28  ;;  %v1027_v27 = vstv %s5441_s13  ;;  %s5542_s13 = sld [smem:[#allocation2 + $0x2f]] }
 0x1f4   : > { %4336 = vmatprep.subr.bf16.mxu0 %v7948_v28 }
 0x1f5   : > { %1323 = vrot.lane.b32.xlu1 %v5287_v24, %s7873_s12 }
 0x1f7   : > { %8280 = sst [smem:[#allocation50_spill]] %s5346_s4  ;;  %s5473_s4 = sld [smem:[#allocation2 + $0x2c]] }
 0x1f8   : > { %s8345_s17 = sld [smem:[#allocation50_spill]] }
 0x1f9   : > { %4210 = vmatmul.mubr.msk.bf16.vlgmr.msra.gmra.mrb[8].mxu1 %vm687_vm2, %v5301_v29  ;;  %1375 = vrot.lane.b32.xlu1 %v5283_v21, %s7873_s12  ;;  %s5344_s12 = sld [smem:[#allocation2 + $0x24]]  ;;  %8324 = sst [smem:[#allocation40_spill]] %s5542_s13 }
 0x1fa   : > { %4204 = vmatmul.mubr.msk.bf16.vlgmr.msra.gmra.mrb[0].mxu0 %vm687_vm2, %v5303_v30  ;;  %4224 = vmatprep.mubr.msk.f32.mxu1 %vm4869_vm0, %v7950_v1  ;;  %s8354_s13 = sld [smem:[#allocation55_spill]] }
 0x1fb   : > { %4217 = vmatprep.mubr.msk.f32.mxu0 %vm4869_vm0, %v7950_v1 }
 0x1fd   : > { %8309 = sst [smem:[#allocation73_spill]] %s5473_s4 }
 0x1fe   : > { %s8312_s4 = sld [smem:[#allocation33_spill]] }
 0x1ff   : > { %8279 = sst [smem:[#allocation49_spill]] %s5344_s12  ;;  %s8306_s12 = sld [smem:[#allocation62_spill]] }
 0x200   : > { %s8325_s20 = sld [smem:[#allocation73_spill]] }
 0x201   : > { %s8341_s1 = sld [smem:[#allocation49_spill]] }
 0x204   : > { %v5520_v19 = vld [vmem:[%s8312_s4 + $0x8] sm:$0xff]  ;;  %s8347_s4 = sld [smem:[#allocation52_spill]] }
 0x205   : > { %v7968_v11 = vstv %s8306_s12  ;;  %s5515_s12 = sld [smem:[#allocation2 + $0x3d]]  ;;  %v5561_v28 = vmul.f32 %v807_v37, %v5520_v19  ;;  %v5574_v15 = vmul.f32 %v851_v41, %v5520_v19  ;;  %v5578_v37 = vmul.f32 %v1049_v20, %v5383_v35 }
 0x206   : > { %v5588_v41 = vmul.f32 %v873_v45, %v5520_v19  ;;  %v5598_v16 = vmul.f32 %v895_v53, %v5520_v19  ;;  %v5610_v45 = vmul.f32 %v7956_v9, %v5383_v35  ;;  %v5616_v63 = vmul.f32 %v917_v61, %v5520_v19 }
 0x207   : > { %v5622_v18 = vmul.f32 %v939_v2, %v5520_v19  ;;  %v5627_v60 = vmul.f32 %v961_v6, %v5520_v19  ;;  %v5632_v9 = vmul.f32 %v983_v10, %v5520_v19  ;;  %v5637_v61 = vmul.f32 %v1005_v14, %v5520_v19 }
 0x208   : > { %v5640_v2 = vmul.f32 %v1027_v27, %v5520_v19  ;;  %v5643_v53 = vmul.f32 %v1049_v20, %v5520_v19 }
 0x20b   : > { %8316 = sst [smem:[#allocation77_spill]] %s5515_s12 }
 0x263   : > { %v4495_v31 = vpop.permute.xlu1 %4494 }
 0x264   : > { %v4497_v32 = vunpack.i.h.bf16 %v4495_v31  ;;  %v4496_v33 = vunpack.i.l.bf16 %v4495_v31  ;;  %v5556_v31 = vmul.f32 %v1027_v27, %v5383_v35 }
 0x266   : > { %v4340_v34 = vpack.c.bf16 %v4497_v32, %v4496_v33  ;;  %v5552_v32 = vmul.f32 %v787_v36, %v5520_v19  ;;  %v1071_v33 = vstv %s5481_s27  ;;  %s8343_s27 = sld [smem:[#allocation60_spill]] }
 0x267   : > { %v5591_v22 = vmul.f32 %v1071_v33, %v5383_v35  ;;  %v5646_v6 = vmul.f32 %v1071_v33, %v5520_v19 }
 0x268   : > { %4341 = vmatpush3.bf16.msra.mxu1 %v4340_v34  ;;  %v5538_v34 = vmul.f32 %v1005_v14, %v5383_v35 }
 0x269   : > { %4233 = vmatprep.subr.bf16.mxu1 %v7950_v1  ;;  %v5566_v1 = vmul.f32 %v829_v38, %v5520_v19  ;;  %v1093_v38 = vstv %s5493_s30  ;;  %s8357_s30 = sld [smem:[#allocation61_spill]] }
 0x26a   : > { %v5602_v36 = vmul.f32 %v1093_v38, %v5383_v35  ;;  %v5666_v33 = vmul.f32 %v1093_v38, %v5520_v19 }
 0x2cc   : > { %v5634_v4 = vpop.f32.mrb[8].mxu1 }
 0x2cd   : > { %v5648_v10 = vpop.f32.mrb[0].mxu0  ;;  %v4211_v59 = vpop.f32.mrb[9].mxu1  ;;  %v5653_v14 = vmul.f32 %v784_v39, %v5634_v4  ;;  %v5658_v27 = vmul.f32 %v804_v40, %v5634_v4  ;;  %v5663_v20 = vmul.f32 %v826_v44, %v5634_v4 }
 0x2ce   : > { %v4205_v62 = vpop.f32.mrb[1].mxu0  ;;  %v777_v58 = vpop.f32.mrb[10].mxu1  ;;  %v785_v59 = vmul.f32 %v784_v39, %v5648_v10  ;;  %v805_v13 = vmul.f32 %v804_v40, %v5648_v10  ;;  %v827_v8 = vmul.f32 %v826_v44, %v5648_v10  ;;  %v849_v3 = vmul.f32 %v7960_v49, %v5648_v10 }
 0x2cf   : > { %v731_v56 = vpop.f32.mrb[2].mxu0  ;;  %v4212_v52 = vpop.f32.mrb[11].mxu1  ;;  %v871_v58 = vmul.f32 %v7958_v54, %v5648_v10  ;;  %v893_v39 = vmul.f32 %v7959_v57, %v5648_v10  ;;  %v915_v40 = vmul.f32 %v7961_v5, %v5648_v10  ;;  %v937_v44 = vmul.f32 %v7968_v11, %v5648_v10 }
 0x2d0   : > { %v4206_v56 = vpop.f32.mrb[3].mxu0  ;;  %v790_v52 = vadd.f32 %v5406_v42, %v785_v59  ;;  %v810_v62 = vadd.f32 %v5411_v43, %v805_v13  ;;  %v832_v38 = vadd.f32 %v5424_v48, %v827_v8  ;;  %v854_v54 = vadd.f32 %v5435_v51, %v849_v3 }
 0x2d1   : > { %v876_v57 = vadd.f32 %v5447_v55, %v871_v58  ;;  %v898_v49 = vadd.f32 %v5468_v0, %v893_v39  ;;  %v920_v5 = vadd.f32 %v5486_v7, %v915_v40  ;;  %v942_v50 = vadd.f32 %v5499_v12, %v937_v44 }
 0x2d2   : > { %v793_v56 = vadd.f32 %v7970_v46, %v790_v52  ;;  %v813_v42 = vadd.f32 %v7969_v47, %v810_v62  ;;  %v8346_v59 = vstv %s8339_s29  ;;  %v8348_v48 = vstv %s8340_s26  ;;  %s8358_s29 = sld [smem:[#allocation65_spill]] }
 0x2d3   : > { %v835_v43 = vadd.f32 %v8346_v59, %v832_v38  ;;  %v857_v51 = vadd.f32 %v8348_v48, %v854_v54  ;;  %v8350_v3 = vstv %s8341_s1  ;;  %v8351_v8 = vstv %s8342_s19 }
 0x2d4   : > { %v879_v55 = vadd.f32 %v8350_v3, %v876_v57  ;;  %v901_v0 = vadd.f32 %v8351_v8, %v898_v49  ;;  %v8353_v7 = vstv %s8343_s27  ;;  %v8355_v13 = vstv %s8344_s5  ;;  %s8372_s5 = sld [smem:[#allocation69_spill]] }
 0x2d5   : > { %v923_v12 = vadd.f32 %v8353_v7, %v920_v5  ;;  %v945_v58 = vadd.f32 %v8355_v13, %v942_v50  ;;  %v795_v39 = vmax.f32 %v793_v56, 0.0  ;;  %v815_v40 = vmax.f32 %v813_v42, 0.0 }
 0x2d6   : > { %v837_v44 = vmax.f32 %v835_v43, 0.0  ;;  %v859_v52 = vmax.f32 %v857_v51, 0.0  ;;  %v881_v54 = vmax.f32 %v879_v55, 0.0  ;;  %v903_v57 = vmax.f32 %v901_v0, 0.0 }
 0x2d7   : > { %v925_v62 = vmax.f32 %v923_v12, 0.0  ;;  %v8360_v49 = vstv %s8332_s11  ;;  %v8361_v38 = vstv %s8345_s17  ;;  %v8362_v59 = vstv %s8347_s4  ;;  %s8370_s11 = sld [smem:[#allocation66_spill]] }
 0x2d8   : > { %v850_v5 = vmul.f32 %v8360_v49, %v5634_v4  ;;  %v798_v50 = vmul.f32 %v8361_v38, %v795_v39  ;;  %v818_v56 = vmul.f32 %v8362_v59, %v815_v40  ;;  %v8363_v42 = vstv %s8349_s24 }
 0x2d9   : > { %v840_v48 = vmul.f32 %v8363_v42, %v837_v44  ;;  %v947_v43 = vmax.f32 %v945_v58, 0.0  ;;  %v8364_v3 = vstv %s8352_s14  ;;  %v8365_v8 = vstv %s8354_s13 }
 0x2da   : > { %v862_v51 = vmul.f32 %v8364_v3, %v859_v52  ;;  %v884_v55 = vmul.f32 %v8365_v8, %v881_v54  ;;  %v8366_v7 = vstv %s8356_s25  ;;  %v8367_v13 = vstv %s8357_s30 }
 0x2db   : > { %v906_v0 = vmul.f32 %v8366_v7, %v903_v57  ;;  %v928_v12 = vmul.f32 %v8367_v13, %v925_v62  ;;  %v820_v11 = vadd.f32 %v818_v56, %v798_v50  ;;  %v8368_v47 = vstv %s8358_s29 }
 0x2dc   : > { %v959_v49 = vmul.f32 %v8368_v47, %v5648_v10  ;;  %v8369_v46 = vstv %s8359_s23  ;;  %v8371_v40 = vstv %s5427_s21  ;;  %v8373_v44 = vstv %s5451_s7 }
 0x2dd   : > { %v981_v39 = vmul.f32 %v8369_v46, %v5648_v10  ;;  %v1003_v58 = vmul.f32 %v8371_v40, %v5648_v10  ;;  %v1025_v52 = vmul.f32 %v8373_v44, %v5648_v10  ;;  %v8374_v54 = vstv %s5471_s3  ;;  %s8377_s3 = sld [smem:[#allocation64_spill]] }
 0x2de   : > { %v1047_v57 = vmul.f32 %v8374_v54, %v5648_v10  ;;  %v8375_v62 = vstv %s5491_s15  ;;  %v8376_v38 = vstv %s5517_s8  ;;  %v842_v50 = vadd.f32 %v840_v48, %v820_v11  ;;  %s8380_s8 = sld [smem:[#allocation67_spill]]  ;;  %s8382_s15 = sld [smem:[#allocation70_spill]] }
 0x2df   : > { %v1069_v47 = vmul.f32 %v8375_v62, %v5648_v10  ;;  %v1091_v46 = vmul.f32 %v8376_v38, %v5648_v10  ;;  %v964_v59 = vadd.f32 %v5512_v17, %v959_v49  ;;  %v986_v56 = vadd.f32 %v5527_v26, %v981_v39 }
 0x2e0   : > { %v1008_v42 = vadd.f32 %v5538_v34, %v1003_v58  ;;  %v1030_v3 = vadd.f32 %v5556_v31, %v1025_v52  ;;  %v1052_v8 = vadd.f32 %v5578_v37, %v1047_v57  ;;  %v864_v40 = vadd.f32 %v862_v51, %v842_v50 }
 0x2e1   : > { %v1074_v7 = vadd.f32 %v5591_v22, %v1069_v47  ;;  %v1096_v13 = vadd.f32 %v5602_v36, %v1091_v46  ;;  %v8378_v44 = vstv %s8370_s11  ;;  %v8379_v62 = vstv %s8372_s5 }
 0x2e2   : > { %v967_v54 = vadd.f32 %v8378_v44, %v964_v59  ;;  %v989_v11 = vadd.f32 %v8379_v62, %v986_v56  ;;  %v8381_v17 = vstv %s5429_s16  ;;  %v8383_v48 = vstv %s5453_s28  ;;  %s8395_s28 = sld [smem:[#allocation45_spill]] }
 0x2e3   : > { %v1011_v26 = vadd.f32 %v8381_v17, %v1008_v42  ;;  %v1033_v34 = vadd.f32 %v8383_v48, %v1030_v3  ;;  %v8384_v49 = vstv %s8325_s20  ;;  %v8385_v39 = vstv %s5503_s10  ;;  %s8388_s20 = sld [smem:[#allocation51_spill]]  ;;  %s8393_s10 = sld [smem:[#allocation44_spill]] }
 0x2e4   : > { %v1055_v31 = vadd.f32 %v8384_v49, %v1052_v8  ;;  %v1077_v37 = vadd.f32 %v8385_v39, %v1074_v7  ;;  %v8386_v22 = vstv %s5530_s2  ;;  %v886_v51 = vadd.f32 %v884_v55, %v864_v40  ;;  %s8391_s2 = sld [smem:[#allocation42_spill]] }
 0x2e5   : > { %v1099_v36 = vadd.f32 %v8386_v22, %v1096_v13  ;;  %v969_v58 = vmax.f32 %v967_v54, 0.0  ;;  %v991_v52 = vmax.f32 %v989_v11, 0.0  ;;  %v1013_v57 = vmax.f32 %v1011_v26, 0.0 }
 0x2e6   : > { %v8387_v47 = vstv %s8377_s3  ;;  %v1035_v46 = vmax.f32 %v1033_v34, 0.0  ;;  %v1057_v50 = vmax.f32 %v1055_v31, 0.0  ;;  %v1079_v59 = vmax.f32 %v1077_v37, 0.0 }
 0x2e7   : > { %v950_v38 = vmul.f32 %v8387_v47, %v947_v43  ;;  %v908_v56 = vadd.f32 %v906_v0, %v886_v51  ;;  %v8389_v42 = vstv %s8380_s8  ;;  %v8390_v8 = vstv %s8382_s15  ;;  %s8399_s15 = sld [smem:[#allocation40_spill]] }
 0x2e8   : > { %v972_v3 = vmul.f32 %v8389_v42, %v969_v58  ;;  %v994_v7 = vmul.f32 %v8390_v8, %v991_v52  ;;  %v1101_v13 = vmax.f32 %v1099_v36, 0.0  ;;  %v8392_v44 = vstv %s5439_s0 }
 0x2e9   : > { %v1016_v55 = vmul.f32 %v8392_v44, %v1013_v57  ;;  %v8394_v40 = vstv %s5459_s22  ;;  %v8396_v62 = vstv %s5479_s9  ;;  %v8397_v11 = vstv %s5515_s12  ;;  %s8403_s12 = sld [smem:[#allocation38_spill]] }
 0x2ea   : > { %v1038_v54 = vmul.f32 %v8394_v40, %v1035_v46  ;;  %v1060_v43 = vmul.f32 %v8396_v62, %v1057_v50  ;;  %v1082_v17 = vmul.f32 %v8397_v11, %v1079_v59  ;;  %v930_v26 = vadd.f32 %v928_v12, %v908_v56 }
 0x2eb   : > { %v8398_v0 = vstv %s5540_s18  ;;  %v791_v34 = vadd.f32 %v5552_v32, %v5653_v14  ;;  %v811_v49 = vadd.f32 %v5561_v28, %v5658_v27  ;;  %v833_v31 = vadd.f32 %v5566_v1, %v5663_v20 }
 0x2ec   : > { %v1113_v48 = vmul.f32 %v8398_v0, %v5648_v10  ;;  %v855_v39 = vadd.f32 %v5574_v15, %v850_v5  ;;  %v8400_v37 = vstv %s8333_s6  ;;  %v8401_v12 = vstv %s8388_s20  ;;  %s8408_s20 = sld [smem:[#allocation59_spill]]  ;;  %s8436_s6 = sld [smem:[#allocation78_spill]] }
 0x2ed   : > { %v872_v22 = vmul.f32 %v8400_v37, %v5634_v4  ;;  %v894_v36 = vmul.f32 %v8401_v12, %v5634_v4  ;;  %v952_v10 = vadd.f32 %v950_v38, %v930_v26  ;;  %v8402_v32 = vstv %s8391_s2  ;;  %s8420_s2 = sld [smem:[#allocation63_spill]] }
 0x2ee   : > { %v1118_v51 = vadd.f32 %v5610_v45, %v1113_v48  ;;  %v794_v14 = vadd.f32 %v8402_v32, %v791_v34  ;;  %v8404_v28 = vstv %s8393_s10  ;;  %v8405_v1 = vstv %s8395_s28  ;;  %s8411_s10 = sld [smem:[#allocation62_spill]]  ;;  %s8427_s28 = sld [smem:[#allocation43_spill]] }
 0x2ef   : > { %v814_v27 = vadd.f32 %v8404_v28, %v811_v49  ;;  %v836_v15 = vadd.f32 %v8405_v1, %v833_v31  ;;  %v8406_v20 = vstv %s8340_s26  ;;  %v877_v58 = vadd.f32 %v5588_v41, %v872_v22  ;;  %s5968_s26 = sld [smem:[#allocation2 + $0x92]] }
 0x2f0   : > { %v858_v5 = vadd.f32 %v8406_v20, %v855_v39  ;;  %v899_v52 = vadd.f32 %v5598_v16, %v894_v36  ;;  %v974_v57 = vadd.f32 %v972_v3, %v952_v10  ;;  %v8407_v47 = vstv %s8399_s15 }
 0x2f1   : > { %v1121_v38 = vadd.f32 %v8407_v47, %v1118_v51  ;;  %v796_v45 = vmax.f32 %v794_v14, 0.0  ;;  %v816_v46 = vmax.f32 %v814_v27, 0.0  ;;  %v838_v50 = vmax.f32 %v836_v15, 0.0 }
 0x2f2   : > { %v860_v59 = vmax.f32 %v858_v5, 0.0  ;;  %v8409_v56 = vstv %s8341_s1  ;;  %v8410_v8 = vstv %s8342_s19  ;;  %v996_v40 = vadd.f32 %v994_v7, %v974_v57  ;;  %s5970_s1 = sld [smem:[#allocation2 + $0xa2]] }
 0x2f3   : > { %v880_v42 = vadd.f32 %v8409_v56, %v877_v58  ;;  %v902_v44 = vadd.f32 %v8410_v8, %v899_v52  ;;  %v8412_v41 = vstv %s8403_s12  ;;  %v8413_v3 = vstv %s8345_s17  ;;  %s5835_s17 = sld [smem:[#allocation2 + $0x40]]  ;;  %s5972_s19 = sld [smem:[#allocation2 + $0xb2]] }
 0x2f4   : > { %v1104_v16 = vmul.f32 %v8412_v41, %v1101_v13  ;;  %v799_v62 = vmul.f32 %v8413_v3, %v796_v45  ;;  %v8414_v11 = vstv %s8347_s4  ;;  %v1123_v0 = vmax.f32 %v1121_v38, 0.0  ;;  %s5960_s4 = sld [smem:[#allocation2 + $0x91]] }
 0x2f5   : > { %v819_v26 = vmul.f32 %v8414_v11, %v816_v46  ;;  %v8415_v48 = vstv %s8349_s24  ;;  %v882_v49 = vmax.f32 %v880_v42, 0.0  ;;  %v904_v31 = vmax.f32 %v902_v44, 0.0  ;;  %s5958_s24 = sld [smem:[#allocation2 + $0x81]] }
 0x2f6   : > { %v841_v34 = vmul.f32 %v8415_v48, %v838_v50  ;;  %v1018_v39 = vadd.f32 %v1016_v55, %v996_v40  ;;  %v8416_v22 = vstv %s8352_s14  ;;  %v8417_v7 = vstv %s8408_s20  ;;  %s8433_s14 = sld [smem:[#allocation72_spill]]  ;;  %s5978_s20 = sld [smem:[#allocation2 + $0xa3]] }
 0x2f7   : > { %v821_v37 = vadd.f32 %v819_v26, %v799_v62  ;;  %v863_v12 = vmul.f32 %v8416_v22, %v860_v59  ;;  %v916_v36 = vmul.f32 %v8417_v7, %v5634_v4  ;;  %v8418_v13 = vstv %s8354_s13  ;;  %s8435_s13 = sld [smem:[#allocation74_spill]] }
 0x2f8   : > { %v885_v10 = vmul.f32 %v8418_v13, %v882_v49  ;;  %v8419_v51 = vstv %s8356_s25  ;;  %v8421_v14 = vstv %s8411_s10  ;;  %v8422_v55 = vstv %s8358_s29  ;;  %s5962_s25 = sld [smem:[#allocation2 + $0xa1]]  ;;  %s5966_s29 = sld [smem:[#allocation2 + $0x82]] }
 0x2f9   : > { %v907_v32 = vmul.f32 %v8419_v51, %v904_v31  ;;  %v938_v28 = vmul.f32 %v8421_v14, %v5634_v4  ;;  %v960_v27 = vmul.f32 %v8422_v55, %v5634_v4  ;;  %v1040_v1 = vadd.f32 %v1038_v54, %v1018_v39  ;;  %8474 = sst [smem:[#allocation46_spill]] %s5970_s1  ;;  %s5980_s10 = sld [smem:[#allocation2 + $0xb3]] }
 0x2fa   : > { %v843_v15 = vadd.f32 %v841_v34, %v821_v37  ;;  %v921_v20 = vadd.f32 %v5616_v63, %v916_v36  ;;  %v8423_v5 = vstv %s8359_s23  ;;  %v8424_v47 = vstv %s5427_s21  ;;  %s8430_s21 = sld [smem:[#allocation71_spill]]  ;;  %s8447_s23 = sld [smem:[#allocation75_spill]] }
 0x2fb   : > { %v982_v58 = vmul.f32 %v8423_v5, %v5634_v4  ;;  %v943_v52 = vadd.f32 %v5622_v18, %v938_v28  ;;  %v965_v57 = vadd.f32 %v5627_v60, %v960_v27  ;;  %v1004_v38 = vmul.f32 %v8424_v47, %v5634_v4  ;;  %8470 = sst [smem:[#allocation37_spill]] %s5958_s24 }
 0x2fc   : > { %v8425_v45 = vstv %s5451_s7  ;;  %v1062_v50 = vadd.f32 %v1060_v43, %v1040_v1  ;;  %v865_v54 = vadd.f32 %v863_v12, %v843_v15  ;;  %v8426_v59 = vstv %s8343_s27  ;;  %s8431_s7 = sld [smem:[#allocation76_spill]]  ;;  %8475 = sst [smem:[#allocation49_spill]] %s5972_s19 }
 0x2fd   : > { %v1026_v46 = vmul.f32 %v8425_v45, %v5634_v4  ;;  %v924_v63 = vadd.f32 %v8426_v59, %v921_v20  ;;  %v987_v56 = vadd.f32 %v5632_v9, %v982_v58  ;;  %v8428_v42 = vstv %s8420_s2  ;;  %s5974_s27 = sld [smem:[#allocation2 + $0x83]]  ;;  %s5984_s2 = sld [smem:[#allocation2 + $0x94]] }
 0x2fe   : > { %v946_v8 = vadd.f32 %v8428_v42, %v943_v52  ;;  %v8429_v18 = vstv %s8370_s11  ;;  %v1009_v44 = vadd.f32 %v5637_v61, %v1004_v38  ;;  %v1084_v41 = vadd.f32 %v1082_v17, %v1062_v50  ;;  %8471 = sst [smem:[#allocation39_spill]] %s5962_s25  ;;  %s5976_s11 = sld [smem:[#allocation2 + $0x93]] }
 0x2ff   : > { %v968_v60 = vadd.f32 %v8429_v18, %v965_v57  ;;  %v1031_v40 = vadd.f32 %v5640_v2, %v1026_v46  ;;  %v887_v43 = vadd.f32 %v885_v10, %v865_v54  ;;  %v926_v3 = vmax.f32 %v924_v63, 0.0  ;;  %8473 = sst [smem:[#allocation47_spill]] %s5966_s29  ;;  %s6073_s19 = sld [smem:[#allocation2 + $0xaa]] }
 0x300   : > { %v8432_v62 = vstv %s8372_s5  ;;  %v948_v9 = vmax.f32 %v946_v8, 0.0  ;;  %v8434_v48 = vstv %s5429_s16  ;;  %v1106_v61 = vadd.f32 %v1104_v16, %v1084_v41  ;;  %s8439_s5 = sld [smem:[#allocation70_spill]]  ;;  %s8444_s16 = sld [smem:[#allocation73_spill]] }
 0x301   : > { %v990_v11 = vadd.f32 %v8432_v62, %v987_v56  ;;  %v970_v26 = vmax.f32 %v968_v60, 0.0  ;;  %v1012_v34 = vadd.f32 %v8434_v48, %v1009_v44  ;;  %v8437_v49 = vstv %s8427_s28  ;;  %8478 = sst [smem:[#allocation50_spill]] %s5978_s20 }
 0x302   : > { %v1126_v31 = vmul.f32 %v8437_v49, %v1123_v0  ;;  %v909_v2 = vadd.f32 %v907_v32, %v887_v43  ;;  %v8438_v39 = vstv %s8357_s30  ;;  %v1131_v37 = vstv %s5835_s17  ;;  %s5964_s30 = sld [smem:[#allocation2 + $0xb1]]  ;;  %8479 = sst [smem:[#allocation52_spill]] %s5980_s10 }
 0x303   : > { %v929_v17 = vmul.f32 %v8438_v39, %v926_v3  ;;  %v992_v22 = vmax.f32 %v990_v11, 0.0  ;;  %v8440_v12 = vstv %s8430_s21  ;;  %v8441_v36 = vstv %s8431_s7  ;;  %8476 = sst [smem:[#allocation57_spill]] %s5974_s27  ;;  %s5982_s17 = sld [smem:[#allocation2 + $0x84]] }
 0x304   : > { %v1034_v7 = vadd.f32 %v8440_v12, %v1031_v40  ;;  %v1117_v13 = vmul.f32 %v8441_v36, %v5520_v19  ;;  %v1128_v10 = vadd.f32 %v1126_v31, %v1106_v61  ;;  %v8442_v14 = vstv %s8377_s3  ;;  %s8449_s3 = sld [smem:[#allocation36_spill]]  ;;  %8481 = sst [smem:[#allocation54_spill]] %s5984_s2 }
 0x305   : > { %v931_v51 = vadd.f32 %v929_v17, %v909_v2  ;;  %v951_v28 = vmul.f32 %v8442_v14, %v948_v9  ;;  %v8443_v16 = vstv %s8433_s14  ;;  %v8445_v32 = vstv %s8380_s8  ;;  %s8453_s8 = sld [smem:[#allocation77_spill]]  ;;  %8477 = sst [smem:[#allocation60_spill]] %s5976_s11 }
 0x306   : > { %v1048_v0 = vmul.f32 %v8443_v16, %v5634_v4  ;;  %v973_v55 = vmul.f32 %v8445_v32, %v970_v26  ;;  %v1014_v27 = vmax.f32 %v1012_v34, 0.0  ;;  %v8446_v1 = vstv %s8435_s13  ;;  %s5988_s21 = sld [smem:[#allocation2 + $0xb4]]  ;;  %s5990_s7 = sld [smem:[#allocation2 + $0x85]] }
 0x307   : > { %v1070_v15 = vmul.f32 %v8446_v1, %v5634_v4  ;;  %v8448_v20 = vstv %s8436_s6  ;;  %v1132_v58 = vadd.f32 %v1131_v37, %v1128_v10  ;;  %v953_v52 = vadd.f32 %v951_v28, %v931_v51  ;;  %s5992_s14 = sld [smem:[#allocation2 + $0x95]]  ;;  %8497 = sst [smem:[#allocation38_spill]] %s6073_s19 }
 0x308   : > { %v1092_v5 = vmul.f32 %v8448_v20, %v5634_v4  ;;  %v1053_v57 = vadd.f32 %v5643_v53, %v1048_v0  ;;  %v8450_v47 = vstv %s5540_s18  ;;  %v8451_v45 = vstv %s8439_s5  ;;  %s8463_s18 = smov 96   ;;  %8472 = sst [smem:[#allocation41_spill]] %s5964_s30 }
 0x309   : > { %v1114_v38 = vmul.f32 %v8450_v47, %v5634_v4  ;;  %v995_v46 = vmul.f32 %v8451_v45, %v992_v22  ;;  %v1036_v50 = vmax.f32 %v1034_v7, 0.0  ;;  %v1075_v54 = vadd.f32 %v5646_v6, %v1070_v15  ;;  %v1324_v45 = vpop.permute.xlu1 %1323  ;;  %8480 = sst [smem:[#allocation53_spill]] %s5982_s17  ;;  %s5994_s13 = sld [smem:[#allocation2 + $0xa5]] }
 0x30a   : > { %v1097_v59 = vadd.f32 %v5666_v33, %v1092_v5  ;;  %v1135_v63 = vsel %vm1134_vm3, %v1132_v58, -inf  ;;  %v975_v56 = vadd.f32 %v973_v55, %v953_v52  ;;  %v8452_v42 = vstv %s8444_s16  ;;  %s5996_s6 = sld [smem:[#allocation2 + $0xb5]]  ;;  %s5998_s5 = sld [smem:[#allocation2 + $0x86]] }
 0x30b   : > { %v1056_v8 = vadd.f32 %v8452_v42, %v1053_v57  ;;  %v1119_v53 = vadd.f32 %v1117_v13, %v1114_v38  ;;  %1136 = vmax.xlane.f32.xlu0 %v1135_v63  ;;  %v8454_v18 = vstv %s8447_s23  ;;  %v8455_v44 = vstv %s5439_s0  ;;  %s5952_s0 = sld [smem:[#allocation2 + $0x90]]  ;;  %s6000_s16 = sld [smem:[#allocation2 + $0x96]] }
 0x30c   : > { %v1078_v4 = vadd.f32 %v8454_v18, %v1075_v54  ;;  %v997_v60 = vadd.f32 %v995_v46, %v975_v56  ;;  %v1017_v40 = vmul.f32 %v8455_v44, %v1014_v27  ;;  %v8456_v6 = vstv %s8449_s3  ;;  %8483 = sst [smem:[#allocation58_spill]] %s5988_s21  ;;  %s6002_s23 = sld [smem:[#allocation2 + $0xa6]] }
 0x30d   : > { %v1058_v41 = vmax.f32 %v1056_v8, 0.0  ;;  %v1100_v43 = vadd.f32 %v8456_v6, %v1097_v59  ;;  %v8457_v3 = vstv %s5459_s22  ;;  %v8458_v9 = vstv %s8399_s15  ;;  %s8464_s15 = smov 120   ;;  %v1376_v46 = vpop.permute.xlu1 %1375  ;;  %s5956_s22 = sld [smem:[#allocation2 + $0xb0]] }
 0x30e   : > { %v1019_v33 = vadd.f32 %v1017_v40, %v997_v60  ;;  %v1039_v62 = vmul.f32 %v8457_v3, %v1036_v50  ;;  %v1080_v11 = vmax.f32 %v1078_v4, 0.0  ;;  %v1122_v26 = vadd.f32 %v8458_v9, %v1119_v53  ;;  %8484 = sst [smem:[#allocation61_spill]] %s5990_s7  ;;  %s6061_s30 = sld [smem:[#allocation2 + $0xb9]] }
 0x30f   : > { %v8459_v34 = vstv %s5479_s9  ;;  %v1102_v49 = vmax.f32 %v1100_v43, 0.0  ;;  %v8460_v2 = vstv %s8453_s8  ;;  %v8461_v12 = vstv %s8403_s12  ;;  %s5950_s12 = sld [smem:[#allocation2 + $0x80]]  ;;  %8485 = sst [smem:[#allocation65_spill]] %s5994_s13 }
 0x310   : > { %v1041_v48 = vadd.f32 %v1039_v62, %v1019_v33  ;;  %v1061_v61 = vmul.f32 %v8459_v34, %v1058_v41  ;;  %v1083_v39 = vmul.f32 %v8460_v2, %v1080_v11  ;;  %v1124_v17 = vmax.f32 %v1122_v26, 0.0  ;;  %s5954_s9 = sld [smem:[#allocation2 + $0xa0]]  ;;  %8486 = sst [smem:[#allocation68_spill]] %s5996_s6 }
 0x311   : > { %v1105_v7 = vmul.f32 %v8461_v12, %v1102_v49  ;;  %v8462_v13 = vstv %s8427_s28  ;;  %v8465_v52 = vmov 0.0   ;;  %v1381_v56 = vsel %vm687_vm2, %v1376_v46, 0  ;;  %s5986_s28 = sld [smem:[#allocation2 + $0xa4]]  ;;  %8487 = sst [smem:[#allocation66_spill]] %s5998_s5 }
 0x312   : > { %v1063_v31 = vadd.f32 %v1061_v61, %v1041_v48  ;;  %v1127_v10 = vmul.f32 %v8462_v13, %v1124_v17  ;;  %v8466_v53 = vmov 0.0|0.0   ;;  %v1329_v18 = vsel %vm687_vm2, %v1324_v45, 0  ;;  %8488 = sst [smem:[#allocation69_spill]] %s6002_s23  ;;  %s6007_s8 = sld [smem:[#allocation2 + $0x87]] }
 0x313   : > { %8469 = sst [smem:[#allocation35_spill]] %s5956_s22  ;;  %s6004_s3 = sld [smem:[#allocation2 + $0xb6]]  ;;  %v1430_v44 = vstv %s5952_s0  ;;  %v1450_v40 = vstv %s5960_s4  ;;  %v1472_v41 = vstv %s5968_s26  ;;  %v8044_v62 = vstv %s5958_s24 }
 0x314   : > { %v1085_v22 = vadd.f32 %v1083_v39, %v1063_v31  ;;  %s6014_s5 = sld [smem:[#allocation2 + $0xb7]]  ;;  %s6017_s23 = sld [smem:[#allocation2 + $0x88]]  ;;  %v6025_v43 = vmul.f32 %v1430_v44, %v5520_v19  ;;  %v6037_v11 = vmul.f32 %v1450_v40, %v5520_v19  ;;  %v1455_v9 = vstv %s5962_s25 }
 0x315   : > { %8467 = sst [smem:[#allocation48_spill]] %s5950_s12  ;;  %v8046_v6 = vstv %s5950_s12  ;;  %v1494_v26 = vstv %s5976_s11  ;;  %s6041_s12 = sld [smem:[#allocation2 + $0xb8]]  ;;  %v8039_v34 = vstv %s5966_s29  ;;  %v6050_v61 = vmul.f32 %v1472_v41, %v5520_v19 }
 0x316   : > { %v1107_v36 = vadd.f32 %v1105_v7, %v1085_v22  ;;  %8468 = sst [smem:[#allocation56_spill]] %s5954_s9  ;;  %v1435_v33 = vstv %s5954_s9  ;;  %v1516_v49 = vstv %s5984_s2  ;;  %s6055_s25 = sld [smem:[#allocation2 + $0x9a]]  ;;  %v1477_v31 = vstv %s5970_s1 }
 0x317   : > { %8482 = sst [smem:[#allocation55_spill]] %s5986_s28  ;;  %s6043_s22 = sld [smem:[#allocation2 + $0x89]]  ;;  %v8040_v39 = vstv %s5974_s27  ;;  %v1538_v17 = vstv %s5992_s14  ;;  %v6068_v22 = vmul.f32 %v1494_v26, %v5520_v19  ;;  %v8051_v12 = vstv %s5978_s20 }
 0x318   : > { %v1129_v51 = vadd.f32 %v1127_v10, %v1107_v36  ;;  %8490 = sst [smem:[#allocation67_spill]] %s6007_s8  ;;  %s6053_s9 = sld [smem:[#allocation2 + $0xa9]]  ;;  %v1560_v36 = vstv %s6000_s16  ;;  %v8041_v13 = vstv %s5982_s17  ;;  %v6081_v10 = vmul.f32 %v1516_v49, %v5520_v19 }
 0x319   : > { %8489 = sst [smem:[#allocation64_spill]] %s6004_s3  ;;  %s6019_s3 = sld [smem:[#allocation2 + $0x98]] }
 0x31a   : > { %v1133_v14 = vadd.f32 %v1131_v37, %v1129_v51  ;;  %8492 = sst [smem:[#allocation42_spill]] %s6014_s5  ;;  %s6031_s5 = sld [smem:[#allocation2 + $0x99]]  ;;  %v8050_v51 = vstv %s5986_s28 }
 0x31b   : > { %8493 = sst [smem:[#allocation44_spill]] %s6017_s23  ;;  %s6063_s29 = sld [smem:[#allocation2 + $0x8a]] }
 0x31c   : > { %v1138_v28 = vsel %vm1134_vm3, %v1133_v14, -inf  ;;  %8495 = sst [smem:[#allocation40_spill]] %s6041_s12  ;;  %s8496_s1 = sld [smem:[#allocation66_spill]] }
 0x31d   : > { %1139 = vmax.xlane.f32.xlu0 %v1138_v28  ;;  %s6075_s27 = sld [smem:[#allocation2 + $0x9b]]  ;;  %s6085_s20 = sld [smem:[#allocation2 + $0xba]]  ;;  %v8043_v28 = vstv %s5990_s7 }
 0x31e   : > { %s6087_s10 = sld [smem:[#allocation2 + $0x8b]]  ;;  %s6109_s21 = sld [smem:[#allocation2 + $0x8c]] }
 0x31f   : > { %s6097_s19 = sld [smem:[#allocation2 + $0xab]]  ;;  %s6119_s6 = sld [smem:[#allocation2 + $0x9d]] }
 0x320   : > { %s6099_s2 = sld [smem:[#allocation2 + $0xbb]]  ;;  %s6129_s11 = sld [smem:[#allocation2 + $0x9e]] }
 0x321   : > { %s6139_s17 = sld [smem:[#allocation2 + $0x9f]]  ;;  %s6145_s23 = sld [smem:[#allocation2 + $0xad]] }
 0x322   : > { %s6162_s12 = sld [smem:[#allocation2 + $0x8e]]  ;;  %s8519_s0 = sld [smem:[#allocation33_spill]] }
 0x323   : > { %8500 = sst [smem:[#allocation59_spill]] %s6085_s20  ;;  %s6177_s4 = sld [smem:[#allocation2 + $0xbe]] }
 0x324   : > { %8505 = sst [smem:[#allocation43_spill]] %s6109_s21  ;;  %s8521_s24 = sld [smem:[#allocation48_spill]] }
 0x325   : > { %8502 = sst [smem:[#allocation62_spill]] %s6097_s19  ;;  %s8531_s14 = sld [smem:[#allocation55_spill]] }
 0x326   : > { %8504 = sst [smem:[#allocation63_spill]] %s6099_s2  ;;  %s8533_s28 = sld [smem:[#allocation69_spill]] }
 0x327   : > { %8507 = sst [smem:[#allocation76_spill]] %s6119_s6  ;;  %v8038_v48 = vstv %s6139_s17  ;;  %s8535_s16 = sld [smem:[#allocation35_spill]] }
 0x328   : > { %8509 = sst [smem:[#allocation74_spill]] %s6129_s11  ;;  %s8538_s26 = sld [smem:[#allocation49_spill]] }
 0x329   : > { %8511 = sst [smem:[#allocation70_spill]] %s6139_s17  ;;  %s8541_s17 = sld [smem:[#allocation58_spill]] }
 0x32a   : > { %8513 = sst [smem:[#allocation73_spill]] %s6145_s23 }
 0x32b   : > { %8517 = sst [smem:[#allocation36_spill]] %s6162_s12 }
 0x32c   : > { %8520 = sst [smem:[#allocation60_spill]] %s6177_s4 }
 0x32d   : > { %s8542_s4 = sld [smem:[#allocation68_spill]] }
 0x333   : > { %4489 = vrot.lane.b32.xlu0 %v5289_v25, %s8463_s18  ;;  %s6009_s18 = sld [smem:[#allocation2 + $0x97]] }
 0x337   : > { %1320 = vrot.lane.b32.xlu0 %v5303_v30, %s8464_s15 }
 0x398   : > { %v1137_v16 = vpop.xlane.xlu0 %1136 }
 0x399   : > { %v1141_v0 = vsub.f32 %v1132_v58, %v1137_v16  ;;  %v6093_v16 = vmul.f32 %v1538_v17, %v5520_v19 }
 0x39b   : > { %v1143_v27 = vmul.f32 1.442695, %v1141_v0  ;;  %v8049_v0 = vstv %s5994_s13  ;;  %s6111_s13 = sld [smem:[#allocation2 + $0x9c]] }
 0x3aa   : > { %v1140_v32 = vpop.xlane.xlu0 %1139 }
 0x3ab   : > { %v1142_v55 = vsub.f32 %v1133_v14, %v1140_v32  ;;  %v1582_v32 = vstv %s6009_s18  ;;  %s6117_s18 = sld [smem:[#allocation2 + $0xac]] }
 0x3ad   : > { %v1145_v1 = vmul.f32 1.442695, %v1142_v55  ;;  %v6204_v55 = vld [vmem:[%s8519_s0] sm:$0xff]  ;;  %s6260_s0 = sld [smem:[#allocation2 + $0xaf]] }
 0x3ae   : > { %v4490_v15 = vpop.permute.xlu0 %4489 }
 0x3af   : > { %4538 = vpow2.f32 %v1145_v1  ;;  %v4492_v20 = vunpack.i.h.bf16 %v4490_v15  ;;  %v4491_v5 = vunpack.i.l.bf16 %v4490_v15  ;;  %v6106_v1 = vmul.f32 %v1560_v36, %v5520_v19 }
 0x3b0   : > { %4540 = vpow2.f32 %v1143_v27  ;;  %v8045_v27 = vstv %s8496_s1  ;;  %v1604_v15 = vstv %s6019_s3  ;;  %s6127_s3 = sld [smem:[#allocation2 + $0xbc]]  ;;  %s8536_s1 = sld [smem:[#allocation41_spill]] }
 0x3b1   : > { %v4337_v37 = vpack.c.bf16 %v4492_v20, %v4491_v5  ;;  %8506 = sst [smem:[#allocation71_spill]] %s6117_s18  ;;  %v6132_v46 = vmul.f32 %v1604_v15, %v5520_v19 }
 0x3b2   : > { %v1321_v60 = vpop.permute.xlu0 %1320 }
 0x3b3   : > { %4338 = vmatpush3.bf16.msra.mxu0 %v4337_v37  ;;  %v8047_v37 = vstv %s6007_s8  ;;  %s6147_s8 = sld [smem:[#allocation2 + $0xbd]] }
 0x3b4   : > { %4227 = vmatprep.subr.bf16.mxu0 %v8465_v52 }
 0x3b6   : > { %8508 = sst [smem:[#allocation72_spill]] %s6127_s3 }
 0x3b9   : > { %v4539_v57 = vpop.eup %4538  ;;  %8515 = sst [smem:[#allocation75_spill]] %s6147_s8  ;;  %s8543_s8 = sld [smem:[#allocation44_spill]] }
 0x3ba   : > { %v1150_v47 = vsel %vm1134_vm3, %v4539_v57, 0.0  ;;  %v4541_v38 = vpop.eup %4540 }
 0x3bb   : > { %1151 = vadd.xlane.f32.xlu1 %v1150_v47  ;;  %v1147_v58 = vsel %vm1134_vm3, %v4541_v38, 0.0  ;;  %v6122_v47 = vmul.f32 %v1582_v32, %v5520_v19 }
 0x3bf   : > { %1148 = vadd.xlane.f32.xlu1 %v1147_v58 }
 0x3d0   : > { %1372 = vrot.lane.b32.xlu1 %v5301_v29, %s8464_s15  ;;  %s6012_s15 = sld [smem:[#allocation2 + $0xa7]] }
 0x3d6   : > { %8491 = sst [smem:[#allocation51_spill]] %s6012_s15  ;;  %s6029_s15 = sld [smem:[#allocation2 + $0xa8]] }
 0x3d7   : > { %s8534_s7 = sld [smem:[#allocation51_spill]] }
 0x3dc   : > { %8494 = sst [smem:[#allocation45_spill]] %s6029_s15 }
 0x3dd   : > { %s6164_s15 = sld [smem:[#allocation2 + $0xae]] }
 0x3e3   : > { %8518 = sst [smem:[#allocation77_spill]] %s6164_s15 }
 0x448   : > { %v1152_v50 = vpop.xlane.xlu1 %1151 }
 0x449   : > { %4542 = vrcp.f32 %v1152_v50  ;;  %v8029_v50 = vstv %s6119_s6  ;;  %s6262_s6 = sld [smem:[#allocation2 + $0xbf]] }
 0x44c   : > { %v1149_v54 = vpop.xlane.xlu1 %1148 }
 0x44d   : > { %4544 = vrcp.f32 %v1149_v54 }
 0x450   : > { %v1373_v4 = vpop.permute.xlu1 %1372 }
 0x453   : > { %v4543_v59 = vpop.eup %4542 }
 0x454   : > { %v1156_v63 = vmul.f32 %v4543_v59, %v4539_v57  ;;  %v1626_v57 = vstv %s6031_s5  ;;  %v1648_v59 = vstv %s6055_s25  ;;  %s6137_s5 = sld [smem:[#allocation2 + $0x8d]]  ;;  %s8516_s25 = sld [smem:[#allocation38_spill]] }
 0x455   : > { %v6175_v58 = vmul.f32 %v1648_v59, %v5520_v19  ;;  %v6225_v7 = vmul.f32 %v6204_v55, %v1626_v57 }
 0x456   : > { %4225 = vmatmul.mubr.msk.f32.vlgmr.msra.gmra.mrb[12].mxu1 %vm1134_vm3, %v1156_v63  ;;  %v6197_v63 = vmul.f32 %v1538_v17, %v5383_v35 }
 0x457   : > { %v4545_v42 = vpop.eup %4544  ;;  %4234 = vmatpush3.bf16.xpose.msra.mxu1 %v1381_v56  ;;  %4235 = vmatprep.mubr.msk.bf16.mxu1 %vm4869_vm0, %v8465_v52  ;;  %v6143_v56 = vmul.f32 %v1626_v57, %v5520_v19  ;;  %v6240_v57 = vmul.f32 %v8029_v50, %v5520_v19 }
 0x458   : > { %v1155_v8 = vmul.f32 %v4545_v42, %v4541_v38  ;;  %4345 = vmatprep.subr.bf16.mxu1 %v8466_v53  ;;  %v6152_v42 = vmul.f32 %v1430_v44, %v5383_v35  ;;  %v6169_v44 = vmul.f32 %v1472_v41, %v5383_v35  ;;  %v6189_v41 = vmul.f32 %v1516_v49, %v5383_v35 }
 0x459   : > { %v6209_v49 = vmul.f32 %v6204_v55, %v1560_v36  ;;  %v8031_v36 = vstv %s6129_s11  ;;  %s8540_s11 = sld [smem:[#allocation52_spill]] }
 0x45a   : > { %4218 = vmatmul.mubr.msk.f32.vlgmr.msra.gmra.mrb[4].mxu0 %vm1134_vm3, %v1155_v8  ;;  %8510 = sst [smem:[#allocation78_spill]] %s6137_s5  ;;  %v6157_v8 = vmul.f32 %v1450_v40, %v5383_v35  ;;  %v6251_v2 = vmul.f32 %v8031_v36, %v5520_v19 }
 0x45b   : > { %4228 = vmatpush3.bf16.xpose.msra.mxu0 %v1329_v18  ;;  %4229 = vmatprep.mubr.msk.bf16.mxu0 %vm4869_vm0, %v8465_v52  ;;  %v6218_v18 = vmul.f32 %v6204_v55, %v1604_v15 }
 0x45c   : > { %4342 = vmatprep.subr.bf16.mxu0 %v8466_v53 }
 0x45e   : > { %4236 = vmatmul.mubr.msk.bf16.vlgmr.msra.gmra.mrb[16].mxu1 %vm687_vm2, %v1373_v4  ;;  %v6184_v4 = vmul.f32 %v1494_v26, %v5383_v35  ;;  %v1692_v26 = vstv %s6111_s13  ;;  %s8532_s13 = sld [smem:[#allocation65_spill]] }
 0x45f   : > { %4250 = vmatprep.mubr.msk.f32.mxu1 %vm4869_vm0, %v8465_v52  ;;  %v6231_v35 = vmul.f32 %v1692_v26, %v5520_v19  ;;  %v6254_v15 = vmul.f32 %v6204_v55, %v1692_v26 }
 0x462   : > { %4230 = vmatmul.mubr.msk.bf16.vlgmr.msra.gmra.mrb[8].mxu0 %vm687_vm2, %v1321_v60  ;;  %v1670_v60 = vstv %s6075_s27  ;;  %s6179_s27 = sld [smem:[#allocation2 + $0x8f]] }
 0x463   : > { %4243 = vmatprep.mubr.msk.f32.mxu0 %vm4869_vm0, %v8465_v52  ;;  %v6200_v45 = vmul.f32 %v1670_v60, %v5520_v19 }
 0x529   : > { %v6171_v54 = vpop.f32.mrb[12].mxu1 }
 0x52a   : > { %v4226_v5 = vpop.f32.mrb[13].mxu1 }
 0x52b   : > { %v6212_v5 = vmul.f32 %v6204_v55, %v1582_v32  ;;  %v6228_v32 = vmul.f32 %v6204_v55, %v1648_v59  ;;  %v6244_v59 = vmul.f32 %v6204_v55, %v1670_v60 }
 0x52d   : > { %v6220_v40 = vpop.f32.mrb[4].mxu0 }
 0x52e   : > { %v4219_v17 = vpop.f32.mrb[5].mxu0 }
 0x52f   : > { %v6268_v17 = vmul.f32 %v8038_v48, %v5520_v19 }
 0x531   : > { %v6256_v50 = vpop.f32.mrb[16].mxu1 }
 0x532   : > { %v4237_v36 = vpop.f32.mrb[17].mxu1  ;;  %v1429_v26 = vmul.f32 %v8046_v6, %v6256_v50  ;;  %v1449_v38 = vmul.f32 %v8044_v62, %v6256_v50  ;;  %v1471_v14 = vmul.f32 %v8039_v34, %v6256_v50  ;;  %v1493_v3 = vmul.f32 %v8040_v39, %v6256_v50 }
 0x533   : > { %v1420_v20 = vpop.f32.mrb[18].mxu1  ;;  %v1515_v60 = vmul.f32 %v8041_v13, %v6256_v50  ;;  %v1537_v19 = vmul.f32 %v8043_v28, %v6256_v50  ;;  %v1559_v36 = vmul.f32 %v8045_v27, %v6256_v50  ;;  %v1581_v48 = vmul.f32 %v8047_v37, %v6256_v50 }
 0x534   : > { %v4238_v34 = vpop.f32.mrb[19].mxu1  ;;  %v1434_v20 = vadd.f32 %v6025_v43, %v1429_v26  ;;  %v1454_v39 = vadd.f32 %v6037_v11, %v1449_v38  ;;  %v1476_v13 = vadd.f32 %v6050_v61, %v1471_v14  ;;  %v1498_v28 = vadd.f32 %v6068_v22, %v1493_v3 }
 0x535   : > { %v6298_v62 = vpop.f32.mrb[8].mxu0  ;;  %v1520_v27 = vadd.f32 %v6081_v10, %v1515_v60  ;;  %v1542_v6 = vadd.f32 %v6093_v16, %v1537_v19  ;;  %v1564_v34 = vadd.f32 %v6106_v1, %v1559_v36  ;;  %v1586_v37 = vadd.f32 %v6122_v47, %v1581_v48 }
 0x536   : > { %v4231_v43 = vpop.f32.mrb[9].mxu0  ;;  %v1437_v26 = vadd.f32 %v1435_v33, %v1434_v20  ;;  %v1457_v11 = vadd.f32 %v1455_v9, %v1454_v39  ;;  %v1479_v61 = vadd.f32 %v1477_v31, %v1476_v13  ;;  %v1501_v3 = vadd.f32 %v8051_v12, %v1498_v28 }
 0x537   : > { %v1368_v22 = vpop.f32.mrb[10].mxu0  ;;  %v1523_v10 = vadd.f32 %v8050_v51, %v1520_v27  ;;  %v1545_v14 = vadd.f32 %v8049_v0, %v1542_v6  ;;  %v8537_v16 = vstv %s8533_s28  ;;  %v8539_v1 = vstv %s8534_s7  ;;  %s8552_s7 = sld [smem:[#allocation45_spill]] }
 0x538   : > { %v1567_v48 = vadd.f32 %v8537_v16, %v1564_v34  ;;  %v1589_v47 = vadd.f32 %v8539_v1, %v1586_v37  ;;  %v4232_v39 = vpop.f32.mrb[11].mxu0  ;;  %v1439_v38 = vmax.f32 %v1437_v26, 0.0  ;;  %v1459_v13 = vmax.f32 %v1457_v11, 0.0 }
 0x539   : > { %v1481_v60 = vmax.f32 %v1479_v61, 0.0  ;;  %v1503_v28 = vmax.f32 %v1501_v3, 0.0  ;;  %v1525_v19 = vmax.f32 %v1523_v10, 0.0  ;;  %v1547_v27 = vmax.f32 %v1545_v14, 0.0 }
 0x53a   : > { %v1763_v6 = vstv %s6260_s0  ;;  %v8544_v20 = vstv %s8535_s16  ;;  %v8545_v34 = vstv %s8536_s1  ;;  %v1569_v22 = vmax.f32 %v1567_v48, 0.0  ;;  %s4874_s0 = smov 112  }
 0x53b   : > { %v1442_v37 = vmul.f32 %v8544_v20, %v1439_v38  ;;  %v1462_v43 = vmul.f32 %v8545_v34, %v1459_v13  ;;  %v1591_v26 = vmax.f32 %v1589_v47, 0.0  ;;  %v8546_v11 = vstv %s8538_s26 }
 0x53c   : > { %v1484_v16 = vmul.f32 %v8546_v11, %v1481_v60  ;;  %v8547_v61 = vstv %s8540_s11  ;;  %v8548_v3 = vstv %s8541_s17  ;;  %v8549_v10 = vstv %s8542_s4 }
 0x53d   : > { %v1506_v1 = vmul.f32 %v8547_v61, %v1503_v28  ;;  %v1528_v39 = vmul.f32 %v8548_v3, %v1525_v19  ;;  %v1550_v0 = vmul.f32 %v8549_v10, %v1547_v27  ;;  %v1464_v14 = vadd.f32 %v1462_v43, %v1442_v37 }
 0x53e   : > { %v8550_v51 = vstv %s8543_s8  ;;  %v8551_v36 = vstv %s6043_s22  ;;  %v8553_v13 = vstv %s6063_s29  ;;  %v8554_v47 = vstv %s6087_s10 }
 0x53f   : > { %v1603_v12 = vmul.f32 %v8550_v51, %v6256_v50  ;;  %v1625_v38 = vmul.f32 %v8551_v36, %v6256_v50  ;;  %v1647_v48 = vmul.f32 %v8553_v13, %v6256_v50  ;;  %v1669_v60 = vmul.f32 %v8554_v47, %v6256_v50 }
 0x540   : > { %v8555_v28 = vstv %s6109_s21  ;;  %v8556_v27 = vstv %s6137_s5  ;;  %v8557_v20 = vstv %s6162_s12  ;;  %v1486_v37 = vadd.f32 %v1484_v16, %v1464_v14  ;;  %s8558_s21 = sld [smem:[#allocation64_spill]]  ;;  %s8559_s5 = sld [smem:[#allocation42_spill]] }
 0x541   : > { %v1691_v19 = vmul.f32 %v8555_v28, %v6256_v50  ;;  %v1713_v51 = vmul.f32 %v8556_v27, %v6256_v50  ;;  %v1735_v36 = vmul.f32 %v8557_v20, %v6256_v50  ;;  %v1608_v34 = vadd.f32 %v6132_v46, %v1603_v12  ;;  %s8562_s12 = sld [smem:[#allocation40_spill]] }
 0x542   : > { %v1630_v43 = vadd.f32 %v6143_v56, %v1625_v38  ;;  %v1652_v11 = vadd.f32 %v6175_v58, %v1647_v48  ;;  %v1674_v61 = vadd.f32 %v6200_v45, %v1669_v60  ;;  %v1508_v47 = vadd.f32 %v1506_v1, %v1486_v37 }
 0x543   : > { %v1696_v3 = vadd.f32 %v6231_v35, %v1691_v19  ;;  %v1718_v10 = vadd.f32 %v6240_v57, %v1713_v51  ;;  %v1740_v13 = vadd.f32 %v6251_v2, %v1735_v36  ;;  %v8560_v28 = vstv %s8552_s7 }
 0x544   : > { %v1611_v27 = vadd.f32 %v8560_v28, %v1608_v34  ;;  %v8561_v16 = vstv %s6053_s9  ;;  %v8563_v46 = vstv %s8516_s25  ;;  %v8564_v14 = vstv %s6097_s19  ;;  %s8569_s25 = sld [smem:[#allocation37_spill]]  ;;  %s8572_s19 = sld [smem:[#allocation57_spill]] }
 0x545   : > { %v1633_v12 = vadd.f32 %v8561_v16, %v1630_v43  ;;  %v1655_v56 = vadd.f32 %v8563_v46, %v1652_v11  ;;  %v1677_v58 = vadd.f32 %v8564_v14, %v1674_v61  ;;  %v8565_v38 = vstv %s6117_s18  ;;  %s8571_s18 = sld [smem:[#allocation47_spill]] }
 0x546   : > { %v1699_v45 = vadd.f32 %v8565_v38, %v1696_v3  ;;  %v8566_v48 = vstv %s6145_s23  ;;  %v8567_v60 = vstv %s6164_s15  ;;  %v1530_v2 = vadd.f32 %v1528_v39, %v1508_v47  ;;  %s8573_s23 = sld [smem:[#allocation53_spill]] }
 0x547   : > { %v1721_v35 = vadd.f32 %v8566_v48, %v1718_v10  ;;  %v1743_v57 = vadd.f32 %v8567_v60, %v1740_v13  ;;  %v1613_v1 = vmax.f32 %v1611_v27, 0.0  ;;  %v1635_v19 = vmax.f32 %v1633_v12, 0.0  ;;  %s8574_s15 = sld [smem:[#allocation61_spill]] }
 0x548   : > { %v1657_v51 = vmax.f32 %v1655_v56, 0.0  ;;  %v8568_v20 = vstv %s8558_s21  ;;  %v8570_v37 = vstv %s8559_s5  ;;  %v1679_v43 = vmax.f32 %v1677_v58, 0.0 }
 0x549   : > { %v1572_v36 = vmul.f32 %v8568_v20, %v1569_v22  ;;  %v1594_v34 = vmul.f32 %v8570_v37, %v1591_v26  ;;  %v1701_v11 = vmax.f32 %v1699_v45, 0.0  ;;  %v1552_v61 = vadd.f32 %v1550_v0, %v1530_v2 }
 0x54a   : > { %v8575_v3 = vstv %s8562_s12  ;;  %v1723_v39 = vmax.f32 %v1721_v35, 0.0  ;;  %v1745_v13 = vmax.f32 %v1743_v57, 0.0  ;;  %v8576_v47 = vstv %s6061_s30  ;;  %s8597_s12 = sld [smem:[#allocation66_spill]] }
 0x54b   : > { %v1616_v10 = vmul.f32 %v8575_v3, %v1613_v1  ;;  %v1638_v28 = vmul.f32 %v8576_v47, %v1635_v19  ;;  %v8577_v27 = vstv %s6085_s20  ;;  %v8578_v12 = vstv %s6099_s2  ;;  %s8589_s2 = sld [smem:[#allocation50_spill]]  ;;  %s8599_s20 = sld [smem:[#allocation67_spill]] }
 0x54c   : > { %v1660_v16 = vmul.f32 %v8577_v27, %v1657_v51  ;;  %v1682_v46 = vmul.f32 %v8578_v12, %v1679_v43  ;;  %v8579_v22 = vstv %s6127_s3  ;;  %v1574_v14 = vadd.f32 %v1572_v36, %v1552_v61  ;;  %s8640_s3 = sld [smem:[#allocation59_spill]] }
 0x54d   : > { %v1704_v56 = vmul.f32 %v8579_v22, %v1701_v11  ;;  %v8580_v26 = vstv %s6179_s27  ;;  %v8581_v38 = vstv %s8521_s24  ;;  %v8582_v45 = vstv %s8569_s25  ;;  %s8643_s25 = sld [smem:[#allocation63_spill]] }
 0x54e   : > { %v1757_v58 = vmul.f32 %v8580_v26, %v6256_v50  ;;  %v1428_v0 = vmul.f32 %v8581_v38, %v6298_v62  ;;  %v1448_v48 = vmul.f32 %v8582_v45, %v6298_v62  ;;  %v8584_v35 = vstv %s8571_s18  ;;  %s8625_s18 = sld [smem:[#allocation40_spill]]  ;;  %s6571_s24 = sld [smem:[#allocation2 + $0x120]] }
 0x54f   : > { %v1470_v60 = vmul.f32 %v8584_v35, %v6298_v62  ;;  %v8586_v57 = vstv %s8572_s19  ;;  %v8588_v1 = vstv %s8573_s23  ;;  %v8590_v19 = vstv %s8574_s15  ;;  %s8591_s19 = sld [smem:[#allocation75_spill]]  ;;  %s8592_s23 = sld [smem:[#allocation60_spill]] }
 0x550   : > { %v1492_v2 = vmul.f32 %v8586_v57, %v6298_v62  ;;  %v1514_v50 = vmul.f32 %v8588_v1, %v6298_v62  ;;  %v1536_v51 = vmul.f32 %v8590_v19, %v6298_v62  ;;  %v1596_v20 = vadd.f32 %v1594_v34, %v1574_v14  ;;  %s8624_s15 = sld [smem:[#allocation78_spill]] }
 0x551   : > { %v1762_v36 = vadd.f32 %v6268_v17, %v1757_v58  ;;  %v1433_v37 = vadd.f32 %v6152_v42, %v1428_v0  ;;  %v1453_v43 = vadd.f32 %v6157_v8, %v1448_v48  ;;  %v1475_v11 = vadd.f32 %v6169_v44, %v1470_v60 }
 0x552   : > { %v1497_v61 = vadd.f32 %v6184_v4, %v1492_v2  ;;  %v1519_v3 = vadd.f32 %v6189_v41, %v1514_v50  ;;  %v1541_v47 = vadd.f32 %v6197_v63, %v1536_v51  ;;  %v1618_v27 = vadd.f32 %v1616_v10, %v1596_v20 }
 0x553   : > { %v1765_v12 = vadd.f32 %v1763_v6, %v1762_v36  ;;  %v1436_v17 = vadd.f32 %v1435_v33, %v1433_v37  ;;  %v1456_v42 = vadd.f32 %v1455_v9, %v1453_v43  ;;  %v1478_v8 = vadd.f32 %v1477_v31, %v1475_v11 }
 0x554   : > { %v8593_v44 = vstv %s8589_s2  ;;  %v8594_v4 = vstv %s8531_s14  ;;  %v8595_v14 = vstv %s8532_s13  ;;  %v1640_v63 = vadd.f32 %v1638_v28, %v1618_v27  ;;  %s6442_s2 = sld [smem:[#allocation2 + $0xc0]]  ;;  %8656 = sst [smem:[#allocation48_spill]] %s6571_s24 }
 0x555   : > { %v1500_v34 = vadd.f32 %v8593_v44, %v1497_v61  ;;  %v1522_v22 = vadd.f32 %v8594_v4, %v1519_v3  ;;  %v1544_v41 = vadd.f32 %v8595_v14, %v1541_v47  ;;  %v1767_v10 = vmax.f32 %v1765_v12, 0.0  ;;  %s6577_s14 = sld [smem:[#allocation2 + $0x111]] }
 0x556   : > { %v1438_v26 = vmax.f32 %v1436_v17, 0.0  ;;  %v1458_v58 = vmax.f32 %v1456_v42, 0.0  ;;  %v8596_v38 = vstv %s8591_s19  ;;  %v8598_v0 = vstv %s8592_s23  ;;  %s6579_s13 = sld [smem:[#allocation2 + $0x121]] }
 0x557   : > { %v1726_v33 = vmul.f32 %v8596_v38, %v1723_v39  ;;  %v1748_v9 = vmul.f32 %v8598_v0, %v1745_v13  ;;  %v1480_v31 = vmax.f32 %v1478_v8, 0.0  ;;  %v1502_v45 = vmax.f32 %v1500_v34, 0.0 }
 0x558   : > { %v1662_v48 = vadd.f32 %v1660_v16, %v1640_v63  ;;  %v8600_v35 = vstv %s8535_s16  ;;  %v8601_v57 = vstv %s8536_s1  ;;  %v1524_v2 = vmax.f32 %v1522_v22, 0.0  ;;  %s8608_s1 = sld [smem:[#allocation51_spill]]  ;;  %s6581_s16 = sld [smem:[#allocation2 + $0x131]] }
 0x559   : > { %v1441_v60 = vmul.f32 %v8600_v35, %v1438_v26  ;;  %v1461_v28 = vmul.f32 %v8601_v57, %v1458_v58  ;;  %v8602_v1 = vstv %s6262_s6  ;;  %v8603_v39 = vstv %s8538_s26  ;;  %s6573_s26 = sld [smem:[#allocation2 + $0x130]] }
 0x55a   : > { %v1770_v50 = vmul.f32 %v8602_v1, %v1767_v10  ;;  %v1483_v19 = vmul.f32 %v8603_v39, %v1480_v31  ;;  %v8604_v13 = vstv %s8540_s11  ;;  %v1546_v20 = vmax.f32 %v1544_v41, 0.0  ;;  %s8618_s11 = sld [smem:[#allocation74_spill]] }
 0x55b   : > { %v1505_v51 = vmul.f32 %v8604_v13, %v1502_v45  ;;  %v1684_v36 = vadd.f32 %v1682_v46, %v1662_v48  ;;  %v1463_v37 = vadd.f32 %v1461_v28, %v1441_v60  ;;  %v8605_v16 = vstv %s8597_s12  ;;  %s6587_s12 = sld [smem:[#allocation2 + $0x122]] }
 0x55c   : > { %v1558_v43 = vmul.f32 %v8605_v16, %v6298_v62  ;;  %v8606_v11 = vstv %s8599_s20  ;;  %v8607_v3 = vstv %s8543_s8  ;;  %v8609_v27 = vstv %s6043_s22  ;;  %s8613_s22 = sld [smem:[#allocation38_spill]]  ;;  %s8623_s8 = sld [smem:[#allocation43_spill]] }
 0x55d   : > { %v1580_v61 = vmul.f32 %v8606_v11, %v6298_v62  ;;  %v1602_v47 = vmul.f32 %v8607_v3, %v6298_v62  ;;  %v1624_v12 = vmul.f32 %v8609_v27, %v6298_v62  ;;  %v8610_v17 = vstv %s6063_s29  ;;  %s8614_s29 = sld [smem:[#allocation76_spill]]  ;;  %8659 = sst [smem:[#allocation69_spill]] %s6579_s13 }
 0x55e   : > { %v1646_v46 = vmul.f32 %v8610_v17, %v6298_v62  ;;  %v8611_v42 = vstv %s6087_s10  ;;  %v1706_v44 = vadd.f32 %v1704_v56, %v1684_v36  ;;  %v1485_v34 = vadd.f32 %v1483_v19, %v1463_v37  ;;  %s8621_s10 = sld [smem:[#allocation62_spill]]  ;;  %8660 = sst [smem:[#allocation35_spill]] %s6581_s16 }
 0x55f   : > { %v1668_v8 = vmul.f32 %v8611_v42, %v6298_v62  ;;  %v1563_v4 = vadd.f32 %v6209_v49, %v1558_v43  ;;  %v1585_v22 = vadd.f32 %v6212_v5, %v1580_v61  ;;  %v8612_v14 = vstv %s8541_s17  ;;  %s8622_s17 = sld [smem:[#allocation70_spill]]  ;;  %8657 = sst [smem:[#allocation55_spill]] %s6573_s26 }
 0x560   : > { %v1527_v41 = vmul.f32 %v8612_v14, %v1524_v2  ;;  %v1607_v63 = vadd.f32 %v6218_v18, %v1602_v47  ;;  %v1629_v10 = vadd.f32 %v6225_v7, %v1624_v12  ;;  %v1651_v26 = vadd.f32 %v6228_v32, %v1646_v46  ;;  %s6589_s20 = sld [smem:[#allocation2 + $0x132]]  ;;  %s6665_s26 = sld [smem:[#allocation2 + $0x119]] }
 0x561   : > { %v1728_v58 = vadd.f32 %v1726_v33, %v1706_v44  ;;  %v1507_v38 = vadd.f32 %v1505_v51, %v1485_v34  ;;  %v8615_v0 = vstv %s8533_s28  ;;  %v8616_v31 = vstv %s8608_s1  ;;  %s6575_s28 = sld [smem:[#allocation2 + $0x101]]  ;;  %8662 = sst [smem:[#allocation49_spill]] %s6587_s12 }
 0x562   : > { %v1566_v56 = vadd.f32 %v8615_v0, %v1563_v4  ;;  %v1588_v49 = vadd.f32 %v8616_v31, %v1585_v22  ;;  %v8617_v45 = vstv %s8542_s4  ;;  %v8619_v48 = vstv %s8552_s7  ;;  %s8628_s7 = sld [smem:[#allocation36_spill]]  ;;  %s8645_s4 = sld [smem:[#allocation72_spill]] }
 0x563   : > { %v1549_v5 = vmul.f32 %v8617_v45, %v1546_v20  ;;  %v1610_v35 = vadd.f32 %v8619_v48, %v1607_v63  ;;  %v8620_v18 = vstv %s6053_s9  ;;  %v1673_v7 = vadd.f32 %v6244_v59, %v1668_v8  ;;  %s8635_s9 = sld [smem:[#allocation71_spill]]  ;;  %s6593_s1 = sld [smem:[#allocation2 + $0x113]] }
 0x564   : > { %v1632_v60 = vadd.f32 %v8620_v18, %v1629_v10  ;;  %v1750_v32 = vadd.f32 %v1748_v9, %v1728_v58  ;;  %v1529_v33 = vadd.f32 %v1527_v41, %v1507_v38  ;;  %v1568_v57 = vmax.f32 %v1566_v56, 0.0 }
 0x565   : > { %v1590_v28 = vmax.f32 %v1588_v49, 0.0  ;;  %v1774_v2 = vstv %s6442_s2  ;;  %v1612_v1 = vmax.f32 %v1610_v35, 0.0  ;;  %v8626_v39 = vstv %s8613_s22  ;;  %s6591_s2 = sld [smem:[#allocation2 + $0x103]] }
 0x566   : > { %v1654_v19 = vadd.f32 %v8626_v39, %v1651_v26  ;;  %v8627_v13 = vstv %s8614_s29  ;;  %v1772_v20 = vadd.f32 %v1770_v50, %v1750_v32  ;;  %v1551_v36 = vadd.f32 %v1549_v5, %v1529_v33  ;;  %8663 = sst [smem:[#allocation52_spill]] %s6589_s20  ;;  %s6595_s22 = sld [smem:[#allocation2 + $0x123]] }
 0x567   : > { %v1715_v51 = vmul.f32 %v6204_v55, %v8627_v13  ;;  %v8629_v59 = vstv %s8558_s21  ;;  %v8630_v9 = vstv %s8618_s11  ;;  %v8631_v43 = vstv %s8559_s5  ;;  %s8637_s21 = sld [smem:[#allocation73_spill]]  ;;  %s8642_s5 = sld [smem:[#allocation77_spill]] }
 0x568   : > { %v1571_v37 = vmul.f32 %v8629_v59, %v1568_v57  ;;  %v1737_v16 = vmul.f32 %v6204_v55, %v8630_v9  ;;  %v1593_v11 = vmul.f32 %v8631_v43, %v1590_v28  ;;  %v1634_v61 = vmax.f32 %v1632_v60, 0.0  ;;  %8658 = sst [smem:[#allocation65_spill]] %s6575_s28  ;;  %s6597_s29 = sld [smem:[#allocation2 + $0x133]] }
 0x569   : > { %v8632_v3 = vstv %s8621_s10  ;;  %v8633_v27 = vstv %s8622_s17  ;;  %v1776_v17 = vadd.f32 %v1774_v2, %v1772_v20  ;;  %v8634_v42 = vstv %s8623_s8  ;;  %s6599_s11 = sld [smem:[#allocation2 + $0x104]]  ;;  %s6685_s20 = sld [smem:[#allocation2 + $0x12a]] }
 0x56a   : > { %v1676_v47 = vadd.f32 %v8632_v3, %v1673_v7  ;;  %v1759_v12 = vmul.f32 %v6204_v55, %v8633_v27  ;;  %v1573_v46 = vadd.f32 %v1571_v37, %v1551_v36  ;;  %v1690_v50 = vmul.f32 %v8634_v42, %v6298_v62  ;;  %s6601_s10 = sld [smem:[#allocation2 + $0x114]] }
 0x56b   : > { %v8636_v8 = vstv %s8624_s15  ;;  %v8638_v34 = vstv %s8625_s18  ;;  %v1656_v22 = vmax.f32 %v1654_v19, 0.0  ;;  %v8639_v14 = vstv %s8628_s7  ;;  %8664 = sst [smem:[#allocation58_spill]] %s6591_s2  ;;  %s6603_s17 = sld [smem:[#allocation2 + $0x124]] }
 0x56c   : > { %v1712_v44 = vmul.f32 %v8636_v8, %v6298_v62  ;;  %v1615_v4 = vmul.f32 %v8638_v34, %v1612_v1  ;;  %v1734_v41 = vmul.f32 %v8639_v14, %v6298_v62  ;;  %v8641_v63 = vstv %s6179_s27  ;;  %s6569_s27 = sld [smem:[#allocation2 + $0x110]]  ;;  %8665 = sst [smem:[#allocation68_spill]] %s6595_s22 }
 0x56d   : > { %v1756_v10 = vmul.f32 %v8641_v63, %v6298_v62  ;;  %v1780_v26 = vsel %vm1134_vm3, %v1776_v17, -inf  ;;  %v1595_v58 = vadd.f32 %v1593_v11, %v1573_v46  ;;  %v1695_v38 = vadd.f32 %v6254_v15, %v1690_v50  ;;  %s6605_s8 = sld [smem:[#allocation2 + $0x134]]  ;;  %s6607_s15 = sld [smem:[#allocation2 + $0x105]] }
 0x56e   : > { %v1717_v0 = vadd.f32 %v1715_v51, %v1712_v44  ;;  %1781 = vmax.xlane.f32.xlu1 %v1780_v26  ;;  %v8644_v56 = vstv %s6061_s30  ;;  %v1678_v49 = vmax.f32 %v1676_v47, 0.0  ;;  %v1739_v45 = vadd.f32 %v1737_v16, %v1734_v41  ;;  %s4873_s30 = smov 88   ;;  %8666 = sst [smem:[#allocation44_spill]] %s6597_s29 }
 0x56f   : > { %v1637_v31 = vmul.f32 %v8644_v56, %v1634_v61  ;;  %v1617_v5 = vadd.f32 %v1615_v4, %v1595_v58  ;;  %v8646_v48 = vstv %s8635_s9  ;;  %v8647_v62 = vstv %s8637_s21  ;;  %8667 = sst [smem:[#allocation45_spill]] %s6599_s11  ;;  %s6609_s18 = sld [smem:[#allocation2 + $0x115]] }
 0x570   : > { %v1698_v35 = vadd.f32 %v8646_v48, %v1695_v38  ;;  %v1720_v18 = vadd.f32 %v8647_v62, %v1717_v0  ;;  %v1761_v60 = vadd.f32 %v1759_v12, %v1756_v10  ;;  %v8648_v32 = vstv %s8640_s3  ;;  %s8671_s7 = sld [smem:[#allocation33_spill]]  ;;  %s6611_s9 = sld [smem:[#allocation2 + $0x125]] }
 0x571   : > { %v1639_v7 = vadd.f32 %v1637_v31, %v1617_v5  ;;  %v1659_v33 = vmul.f32 %v8648_v32, %v1656_v22  ;;  %v8649_v57 = vstv %s8642_s5  ;;  %v8650_v39 = vstv %s8643_s25  ;;  %8668 = sst [smem:[#allocation64_spill]] %s6603_s17  ;;  %s6613_s21 = sld [smem:[#allocation2 + $0x135]] }
 0x572   : > { %v1700_v15 = vmax.f32 %v1698_v35, 0.0  ;;  %v1742_v28 = vadd.f32 %v8649_v57, %v1739_v45  ;;  %v1681_v19 = vmul.f32 %v8650_v39, %v1678_v49  ;;  %v1722_v13 = vmax.f32 %v1720_v18, 0.0  ;;  %s6615_s3 = sld [smem:[#allocation2 + $0x106]]  ;;  %8683 = sst [smem:[#allocation75_spill]] %s6685_s20 }
 0x573   : > { %v1661_v1 = vadd.f32 %v1659_v33, %v1639_v7  ;;  %v1764_v51 = vadd.f32 %v1763_v6, %v1761_v60  ;;  %v8651_v36 = vstv %s8645_s4  ;;  %v8652_v16 = vstv %s8591_s19  ;;  %s6583_s19 = sld [smem:[#allocation2 + $0x102]]  ;;  %8669 = sst [smem:[#allocation42_spill]] %s6605_s8 }
 0x574   : > { %v1703_v59 = vmul.f32 %v8651_v36, %v1700_v15  ;;  %v1744_v37 = vmax.f32 %v1742_v28, 0.0  ;;  %v1725_v43 = vmul.f32 %v8652_v16, %v1722_v13  ;;  %v8653_v3 = vstv %s8592_s23  ;;  %s6585_s23 = sld [smem:[#allocation2 + $0x112]]  ;;  %8670 = sst [smem:[#allocation37_spill]] %s6607_s15 }
 0x575   : > { %v1683_v20 = vadd.f32 %v1681_v19, %v1661_v1  ;;  %v1766_v11 = vmax.f32 %v1764_v51, 0.0  ;;  %v8654_v12 = vstv %s6262_s6  ;;  %s6567_s6 = sld [smem:[#allocation2 + $0x100]]  ;;  %s6617_s5 = sld [smem:[#allocation2 + $0x116]]  ;;  %v2064_v28 = vstv %s6569_s27 }
 0x576   : > { %v1747_v47 = vmul.f32 %v8653_v3, %v1744_v37  ;;  %8672 = sst [smem:[#allocation47_spill]] %s6611_s9  ;;  %s6619_s25 = sld [smem:[#allocation2 + $0x126]]  ;;  %v2084_v1 = vstv %s6577_s14  ;;  %v6638_v13 = vld [vmem:[%s8671_s7 + $0x8] sm:$0xff]  ;;  %v2128_v16 = vstv %s6593_s1  ;;  %v2150_v3 = vstv %s6601_s10 }
 0x577   : > { %v1705_v9 = vadd.f32 %v1703_v59, %v1683_v20  ;;  %v1769_v46 = vmul.f32 %v8654_v12, %v1766_v11  ;;  %8673 = sst [smem:[#allocation57_spill]] %s6613_s21  ;;  %s6622_s4 = sld [smem:[#allocation2 + $0x136]]  ;;  %v6641_v51 = vmul.f32 %v6638_v13, %v2064_v28  ;;  %v2069_v20 = vstv %s6571_s24 }
 0x578   : > { %8674 = sst [smem:[#allocation53_spill]] %s6615_s3  ;;  %s6629_s21 = sld [smem:[#allocation2 + $0x127]]  ;;  %v8109_v59 = vstv %s6575_s28  ;;  %v6651_v37 = vmul.f32 %v6638_v13, %v2084_v1  ;;  %v8112_v12 = vstv %s6591_s2 }
 0x579   : > { %v1727_v61 = vadd.f32 %v1725_v43, %v1705_v9  ;;  %8661 = sst [smem:[#allocation41_spill]] %s6583_s19  ;;  %s6632_s3 = sld [smem:[#allocation2 + $0x137]]  ;;  %v2089_v9 = vstv %s6579_s13  ;;  %v8110_v11 = vstv %s6583_s19 }
 0x57a   : > { %v2106_v39 = vstv %s6585_s23  ;;  %s6634_s9 = sld [smem:[#allocation2 + $0x108]]  ;;  %s6657_s7 = sld [smem:[#allocation2 + $0x109]] }
 0x57b   : > { %v1749_v27 = vadd.f32 %v1747_v47, %v1727_v61  ;;  %8655 = sst [smem:[#allocation54_spill]] %s6567_s6  ;;  %v8113_v19 = vstv %s6567_s6  ;;  %s6645_s27 = sld [smem:[#allocation2 + $0x118]]  ;;  %v6662_v61 = vmul.f32 %v6638_v13, %v2106_v39  ;;  %v2111_v47 = vstv %s6587_s12 }
 0x57c   : > { %8675 = sst [smem:[#allocation61_spill]] %s6619_s25  ;;  %s6647_s14 = sld [smem:[#allocation2 + $0x128]] }
 0x57d   : > { %v1771_v42 = vadd.f32 %v1769_v46, %v1749_v27  ;;  %8676 = sst [smem:[#allocation56_spill]] %s6622_s4  ;;  %s6655_s23 = sld [smem:[#allocation2 + $0x138]]  ;;  %v2172_v46 = vstv %s6609_s18 }
 0x57e   : > { %8678 = sst [smem:[#allocation46_spill]] %s6629_s21  ;;  %s6667_s24 = sld [smem:[#allocation2 + $0x129]] }
 0x57f   : > { %v1775_v50 = vadd.f32 %v1774_v2, %v1771_v42  ;;  %4504 = vrot.lane.b32.xlu1 %v5285_v23, %s4873_s30  ;;  %s6673_s1 = sld [smem:[#allocation2 + $0x139]]  ;;  %s8679_s16 = sld [smem:[#allocation47_spill]]  ;;  %v6678_v42 = vmul.f32 %v6638_v13, %v2128_v16 }
 0x580   : > { %s6675_s13 = sld [smem:[#allocation2 + $0x10a]]  ;;  %s8682_s10 = sld [smem:[#allocation53_spill]] }
 0x581   : > { %v1777_v6 = vsel %vm1134_vm3, %v1775_v50, -inf  ;;  %s6683_s28 = sld [smem:[#allocation2 + $0x11a]]  ;;  %s6695_s12 = sld [smem:[#allocation2 + $0x11b]] }
 0x582   : > { %1778 = vmax.xlane.f32.xlu0 %v1777_v6  ;;  %s6693_s18 = sld [smem:[#allocation2 + $0x13a]]  ;;  %s6703_s29 = sld [smem:[#allocation2 + $0x10b]] }
 0x583   : > { %1959 = vrot.lane.b32.xlu1 %v5287_v24, %s4874_s0  ;;  %s6711_s8 = sld [smem:[#allocation2 + $0x11c]]  ;;  %s6751_s4 = sld [smem:[#allocation2 + $0x12d]] }
 0x584   : > { %s6724_s19 = sld [smem:[#allocation2 + $0x10c]]  ;;  %s8708_s2 = sld [smem:[#allocation61_spill]] }
 0x586   : > { %8680 = sst [smem:[#allocation50_spill]] %s6675_s13 }
 0x587   : > { %2009 = vrot.lane.b32.xlu1 %v5283_v21, %s4874_s0  ;;  %s8766_s6 = sld [smem:[#allocation50_spill]] }
 0x588   : > { %8684 = sst [smem:[#allocation60_spill]] %s6693_s18  ;;  %s6831_s18 = sld [smem:[#allocation2 + $0x11f]] }
 0x589   : > { %8687 = sst [smem:[#allocation51_spill]] %s6711_s8 }
 0x58a   : > { %8688 = sst [smem:[#allocation38_spill]] %s6724_s19 }
 0x58b   : > { %2007 = vrot.lane.b32.xlu1 %v5301_v29, %s4874_s0  ;;  %8693 = sst [smem:[#allocation43_spill]] %s6751_s4 }
 0x58e   : > { %8701 = sst [smem:[#allocation73_spill]] %s6831_s18 }
 0x5fb   : > { %v1782_v8 = vpop.xlane.xlu1 %1781 }
 0x5fc   : > { %v1784_v44 = vsub.f32 %v1776_v17, %v1782_v8  ;;  %v8114_v8 = vstv %s6599_s11  ;;  %s8712_s11 = sld [smem:[#allocation44_spill]] }
 0x5fe   : > { %v1787_v34 = vmul.f32 1.442695, %v1784_v44  ;;  %v6688_v44 = vmul.f32 %v6638_v13, %v2150_v3 }
 0x5ff   : > { %v4505_v4 = vpop.permute.xlu1 %4504 }
 0x600   : > { %4546 = vpow2.f32 %v1787_v34  ;;  %v4507_v22 = vunpack.i.h.bf16 %v4505_v4  ;;  %v4506_v2 = vunpack.i.l.bf16 %v4505_v4  ;;  %v8124_v34 = vstv %s6603_s17  ;;  %s6735_s17 = sld [smem:[#allocation2 + $0x13c]] }
 0x601   : > { %v8101_v4 = vstv %s6711_s8  ;;  %s6828_s8 = sld [smem:[#allocation2 + $0x12e]] }
 0x602   : > { %v4346_v14 = vpack.c.bf16 %v4507_v22, %v4506_v2  ;;  %v2194_v22 = vstv %s6617_s5  ;;  %v8115_v2 = vstv %s6607_s15  ;;  %s6709_s5 = sld [smem:[#allocation2 + $0x13b]]  ;;  %s8711_s15 = sld [smem:[#allocation52_spill]] }
 0x603   : > { %v1960_v56 = vpop.permute.xlu1 %1959 }
 0x604   : > { %4347 = vmatpush3.bf16.msra.mxu1 %v4346_v14  ;;  %v1965_v15 = vsel %vm687_vm2, %v1960_v56, 0  ;;  %v6699_v14 = vmul.f32 %v6638_v13, %v2172_v46 }
 0x605   : > { %4259 = vmatprep.subr.bf16.mxu1 %v8465_v52 }
 0x606   : > { %8691 = sst [smem:[#allocation62_spill]] %s6735_s17  ;;  %s8771_s17 = sld [smem:[#allocation42_spill]] }
 0x607   : > { %v2010_v49 = vpop.permute.xlu1 %2009  ;;  %8700 = sst [smem:[#allocation71_spill]] %s6828_s8 }
 0x608   : > { %v2015_v5 = vsel %vm687_vm2, %v2010_v49, 0  ;;  %8686 = sst [smem:[#allocation67_spill]] %s6709_s5  ;;  %s8709_s5 = sld [smem:[#allocation55_spill]] }
 0x60a   : > { %v4547_v41 = vpop.eup %4546 }
 0x60b   : > { %v1792_v63 = vsel %vm1134_vm3, %v4547_v41, 0.0  ;;  %v2008_v35 = vpop.permute.xlu1 %2007 }
 0x60c   : > { %1793 = vadd.xlane.f32.xlu0 %v1792_v63 }
 0x60f   : > { %v1779_v10 = vpop.xlane.xlu0 %1778 }
 0x610   : > { %v1783_v26 = vsub.f32 %v1775_v50, %v1779_v10  ;;  %v2133_v50 = vstv %s6595_s22  ;;  %s6705_s22 = sld [smem:[#allocation2 + $0x12b]]  ;;  %v8116_v10 = vstv %s8682_s10  ;;  %s8710_s10 = sld [smem:[#allocation35_spill]] }
 0x612   : > { %v1785_v58 = vmul.f32 1.442695, %v1783_v26 }
 0x614   : > { %4548 = vpow2.f32 %v1785_v58  ;;  %v6714_v58 = vmul.f32 %v6204_v55, %v2064_v28 }
 0x616   : > { %8685 = sst [smem:[#allocation66_spill]] %s6705_s22 }
 0x61e   : > { %v4549_v38 = vpop.eup %4548 }
 0x61f   : > { %v1789_v17 = vsel %vm1134_vm3, %v4549_v38, 0.0 }
 0x620   : > { %1790 = vadd.xlane.f32.xlu0 %v1789_v17  ;;  %v6720_v17 = vmul.f32 %v6638_v13, %v2194_v22 }
 0x636   : > { %4499 = vrot.lane.b32.xlu0 %v5289_v25, %s4873_s30  ;;  %s6624_s30 = sld [smem:[#allocation2 + $0x107]] }
 0x63a   : > { %1957 = vrot.lane.b32.xlu0 %v5303_v30, %s4874_s0  ;;  %s6627_s0 = sld [smem:[#allocation2 + $0x117]] }
 0x63c   : > { %8677 = sst [smem:[#allocation39_spill]] %s6624_s30  ;;  %v8117_v49 = vstv %s6624_s30  ;;  %s6758_s30 = sld [smem:[#allocation2 + $0x11e]] }
 0x640   : > { %v2216_v26 = vstv %s6627_s0  ;;  %s6726_s0 = sld [smem:[#allocation2 + $0x11d]] }
 0x642   : > { %8695 = sst [smem:[#allocation40_spill]] %s6758_s30 }
 0x646   : > { %8689 = sst [smem:[#allocation76_spill]] %s6726_s0 }
 0x699   : > { %v1794_v0 = vpop.xlane.xlu0 %1793 }
 0x69a   : > { %4550 = vrcp.f32 %v1794_v0  ;;  %v8122_v0 = vstv %s6619_s25  ;;  %s6756_s25 = sld [smem:[#allocation2 + $0x13d]] }
 0x6a0   : > { %8694 = sst [smem:[#allocation78_spill]] %s6756_s25 }
 0x6a1   : > { %s8774_s25 = sld [smem:[#allocation46_spill]] }
 0x6a4   : > { %v4551_v31 = vpop.eup %4550 }
 0x6a5   : > { %v1798_v45 = vmul.f32 %v4551_v31, %v4547_v41  ;;  %v8123_v41 = vstv %s8679_s16  ;;  %v6729_v31 = vmul.f32 %v6204_v55, %v2106_v39  ;;  %s6733_s16 = sld [smem:[#allocation2 + $0x12c]] }
 0x6a7   : > { %4251 = vmatmul.mubr.msk.f32.vlgmr.msra.gmra.mrb[14].mxu1 %vm1134_vm3, %v1798_v45  ;;  %v2238_v45 = vstv %s6645_s27  ;;  %s6749_s27 = sld [smem:[#allocation2 + $0x10d]] }
 0x6a8   : > { %4260 = vmatpush3.bf16.xpose.msra.mxu1 %v2015_v5  ;;  %4261 = vmatprep.mubr.msk.bf16.mxu1 %vm4869_vm0, %v8465_v52  ;;  %v6738_v5 = vmul.f32 %v6204_v55, %v2128_v16 }
 0x6a9   : > { %4351 = vmatprep.subr.bf16.mxu1 %v8466_v53 }
 0x6ab   : > { %8690 = sst [smem:[#allocation74_spill]] %s6733_s16 }
 0x6ad   : > { %v1791_v48 = vpop.xlane.xlu0 %1790  ;;  %8692 = sst [smem:[#allocation70_spill]] %s6749_s27 }
 0x6ae   : > { %4552 = vrcp.f32 %v1791_v48  ;;  %v6741_v48 = vmul.f32 %v6204_v55, %v2150_v3  ;;  %v2282_v3 = vstv %s6683_s28  ;;  %s6806_s28 = sld [smem:[#allocation2 + $0x10e]] }
 0x6af   : > { %4262 = vmatmul.mubr.msk.bf16.vlgmr.msra.gmra.mrb[20].mxu1 %vm687_vm2, %v2008_v35  ;;  %v6744_v35 = vmul.f32 %v6638_v13, %v2216_v26  ;;  %v6790_v39 = vmul.f32 %v6638_v13, %v2282_v3 }
 0x6b0   : > { %4276 = vmatprep.mubr.msk.f32.mxu1 %vm4869_vm0, %v8465_v52 }
 0x6b1   : > { %v4500_v62 = vpop.permute.xlu0 %4499 }
 0x6b2   : > { %v4502_v18 = vunpack.i.h.bf16 %v4500_v62  ;;  %v4501_v60 = vunpack.i.l.bf16 %v4500_v62  ;;  %v8121_v62 = vstv %s6758_s30  ;;  %s6908_s30 = sld [smem:[#allocation2 + $0x13e]] }
 0x6b4   : > { %v4343_v7 = vpack.c.bf16 %v4502_v18, %v4501_v60  ;;  %v2260_v60 = vstv %s6665_s26  ;;  %v2304_v18 = vstv %s6695_s12  ;;  %8697 = sst [smem:[#allocation36_spill]] %s6806_s28  ;;  %s8706_s26 = sld [smem:[#allocation64_spill]] }
 0x6b5   : > { %v1958_v57 = vpop.permute.xlu0 %1957  ;;  %v6787_v16 = vmul.f32 %v6204_v55, %v2260_v60  ;;  %v6797_v56 = vmul.f32 %v6638_v13, %v2304_v18  ;;  %s6884_s12 = sld [smem:[#allocation2 + $0x10f]] }
 0x6b6   : > { %4344 = vmatpush3.bf16.msra.mxu0 %v4343_v7 }
 0x6b7   : > { %4253 = vmatprep.subr.bf16.mxu0 %v8465_v52 }
 0x6b8   : > { %v4553_v32 = vpop.eup %4552 }
 0x6b9   : > { %v1797_v33 = vmul.f32 %v4553_v32, %v4549_v38  ;;  %v6717_v38 = vmul.f32 %v6204_v55, %v2084_v1  ;;  %v6770_v1 = vmul.f32 %v6638_v13, %v2238_v45  ;;  %v6809_v32 = vmul.f32 %v6204_v55, %v2304_v18 }
 0x6bb   : > { %4244 = vmatmul.mubr.msk.f32.vlgmr.msra.gmra.mrb[6].mxu0 %vm1134_vm3, %v1797_v33  ;;  %v6761_v33 = vmul.f32 %v6204_v55, %v2172_v46  ;;  %v6814_v46 = vmul.f32 %v6638_v13, %v8101_v4 }
 0x6bc   : > { %4255 = vmatprep.mubr.msk.bf16.mxu0 %vm4869_vm0, %v8465_v52 }
 0x6bf   : > { %4254 = vmatpush3.bf16.xpose.msra.mxu0 %v1965_v15  ;;  %v6764_v15 = vmul.f32 %v6204_v55, %v2194_v22  ;;  %v6777_v22 = vmul.f32 %v6638_v13, %v2260_v60  ;;  %v6801_v60 = vmul.f32 %v6204_v55, %v2282_v3 }
 0x6c0   : > { %4348 = vmatprep.subr.bf16.mxu0 %v8466_v53 }
 0x6c6   : > { %4256 = vmatmul.mubr.msk.bf16.vlgmr.msra.gmra.mrb[12].mxu0 %vm687_vm2, %v1958_v57  ;;  %v6767_v57 = vmul.f32 %v6204_v55, %v2216_v26  ;;  %v6781_v26 = vmul.f32 %v6204_v55, %v2238_v45 }
 0x6c7   : > { %4269 = vmatprep.mubr.msk.f32.mxu0 %vm4869_vm0, %v8465_v52 }
 0x77a   : > { %v6753_v7 = vpop.f32.mrb[14].mxu1 }
 0x77b   : > { %v4252_v28 = vpop.f32.mrb[15].mxu1 }
 0x77c   : > { %v8103_v28 = vstv %s6726_s0  ;;  %s8713_s0 = sld [smem:[#allocation42_spill]] }
 0x77d   : > { %v6824_v27 = vmul.f32 %v6638_v13, %v8103_v28 }
 0x782   : > { %v6819_v6 = vpop.f32.mrb[20].mxu1 }
 0x783   : > { %v4263_v4 = vpop.f32.mrb[21].mxu1  ;;  %v2063_v3 = vmul.f32 %v8113_v19, %v6819_v6  ;;  %v2083_v45 = vmul.f32 %v8109_v59, %v6819_v6  ;;  %v2105_v63 = vmul.f32 %v8110_v11, %v6819_v6  ;;  %v2127_v28 = vmul.f32 %v8112_v12, %v6819_v6 }
 0x784   : > { %v2054_v18 = vpop.f32.mrb[22].mxu1  ;;  %v2149_v55 = vmul.f32 %v8114_v8, %v6819_v6  ;;  %v2171_v4 = vmul.f32 %v8115_v2, %v6819_v6  ;;  %v2193_v59 = vmul.f32 %v8116_v10, %v6819_v6  ;;  %v2215_v11 = vmul.f32 %v8117_v49, %v6819_v6 }
 0x785   : > { %v4264_v12 = vpop.f32.mrb[23].mxu1  ;;  %v2068_v18 = vadd.f32 %v6641_v51, %v2063_v3  ;;  %v2088_v19 = vadd.f32 %v6651_v37, %v2083_v45  ;;  %v2110_v8 = vadd.f32 %v6662_v61, %v2105_v63  ;;  %v2132_v43 = vadd.f32 %v6678_v42, %v2127_v28 }
 0x786   : > { %v2154_v2 = vadd.f32 %v6688_v44, %v2149_v55  ;;  %v2176_v36 = vadd.f32 %v6699_v14, %v2171_v4  ;;  %v2198_v10 = vadd.f32 %v6720_v17, %v2193_v59  ;;  %v2220_v49 = vadd.f32 %v6744_v35, %v2215_v11 }
 0x787   : > { %v2071_v12 = vadd.f32 %v2069_v20, %v2068_v18  ;;  %v2091_v51 = vadd.f32 %v2089_v9, %v2088_v19  ;;  %v2113_v37 = vadd.f32 %v2111_v47, %v2110_v8  ;;  %v2135_v61 = vadd.f32 %v2133_v50, %v2132_v43 }
 0x788   : > { %v2157_v42 = vadd.f32 %v8124_v34, %v2154_v2  ;;  %v2179_v44 = vadd.f32 %v8123_v41, %v2176_v36  ;;  %v2201_v59 = vadd.f32 %v8122_v0, %v2198_v10  ;;  %v8129_v11 = vstv %s6806_s28  ;;  %s8729_s28 = sld [smem:[#allocation56_spill]] }
 0x789   : > { %v2073_v14 = vmax.f32 %v2071_v12, 0.0  ;;  %v2093_v63 = vmax.f32 %v2091_v51, 0.0  ;;  %v2115_v19 = vmax.f32 %v2113_v37, 0.0  ;;  %v2137_v17 = vmax.f32 %v2135_v61, 0.0 }
 0x78a   : > { %v2159_v8 = vmax.f32 %v2157_v42, 0.0  ;;  %v2372_v43 = vmul.f32 %v6638_v13, %v8121_v62  ;;  %v2375_v2 = vstv %s6828_s8  ;;  %v2392_v36 = vstv %s6831_s18  ;;  %s8737_s18 = sld [smem:[#allocation67_spill]]  ;;  %s8743_s8 = sld [smem:[#allocation58_spill]] }
 0x78b   : > { %v8714_v35 = vstv %s8709_s5  ;;  %v8715_v28 = vstv %s8710_s10  ;;  %v2181_v3 = vmax.f32 %v2179_v44, 0.0  ;;  %v8716_v55 = vstv %s6629_s21  ;;  %s6910_s21 = sld [smem:[#allocation2 + $0x12f]] }
 0x78c   : > { %v2076_v10 = vmul.f32 %v8714_v35, %v2073_v14  ;;  %v2096_v45 = vmul.f32 %v8715_v28, %v2093_v63  ;;  %v2223_v4 = vadd.f32 %v8716_v55, %v2220_v49  ;;  %v8717_v18 = vstv %s8711_s15 }
 0x78d   : > { %v2118_v12 = vmul.f32 %v8717_v18, %v2115_v19  ;;  %v8718_v51 = vstv %s8712_s11  ;;  %v8719_v61 = vstv %s8713_s0  ;;  %v2203_v62 = vmax.f32 %v2201_v59, 0.0  ;;  %s6926_s0 = sld [smem:[#allocation2 + $0x13f]] }
 0x78e   : > { %v2140_v37 = vmul.f32 %v8718_v51, %v2137_v17  ;;  %v2162_v42 = vmul.f32 %v8719_v61, %v2159_v8  ;;  %v2098_v0 = vadd.f32 %v2096_v45, %v2076_v10  ;;  %v8720_v41 = vstv %s6634_s9  ;;  %v6912_v49 = vpop.f32.mrb[6].mxu0 }
 0x78f   : > { %v2237_v34 = vmul.f32 %v8720_v41, %v6819_v6  ;;  %v8721_v14 = vstv %s6657_s7  ;;  %v8722_v63 = vstv %s6675_s13  ;;  %v8723_v19 = vstv %s6703_s29  ;;  %s6928_s13 = sld [smem:[#allocation2 + $0x140]]  ;;  %v4245_v45 = vpop.f32.mrb[7].mxu0 }
 0x790   : > { %v2259_v35 = vmul.f32 %v8721_v14, %v6819_v6  ;;  %v2281_v44 = vmul.f32 %v8722_v63, %v6819_v6  ;;  %v2303_v17 = vmul.f32 %v8723_v19, %v6819_v6  ;;  %v8724_v59 = vstv %s6724_s19  ;;  %s8740_s19 = sld [smem:[#allocation65_spill]] }
 0x791   : > { %v2325_v8 = vmul.f32 %v8724_v59, %v6819_v6  ;;  %v8725_v41 = vstv %s6749_s27  ;;  %v2369_v28 = vmul.f32 %v8129_v11, %v6819_v6  ;;  %v2120_v55 = vadd.f32 %v2118_v12, %v2098_v0  ;;  %s8726_s27 = sld [smem:[#allocation57_spill]] }
 0x792   : > { %v2347_v10 = vmul.f32 %v8725_v41, %v6819_v6  ;;  %v2242_v18 = vadd.f32 %v6770_v1, %v2237_v34  ;;  %v2264_v51 = vadd.f32 %v6777_v22, %v2259_v35  ;;  %v2286_v61 = vadd.f32 %v6790_v39, %v2281_v44 }
 0x793   : > { %v2308_v14 = vadd.f32 %v6797_v56, %v2303_v17  ;;  %v2330_v63 = vadd.f32 %v6814_v46, %v2325_v8  ;;  %v2374_v59 = vadd.f32 %v2372_v43, %v2369_v28  ;;  %v2142_v41 = vadd.f32 %v2140_v37, %v2120_v55 }
 0x794   : > { %v2352_v19 = vadd.f32 %v6824_v27, %v2347_v10  ;;  %v8727_v45 = vstv %s6647_s14  ;;  %v8728_v0 = vstv %s6667_s24  ;;  %v8730_v1 = vstv %s6685_s20  ;;  %s8742_s20 = sld [smem:[#allocation41_spill]] }
 0x795   : > { %v2245_v11 = vadd.f32 %v8727_v45, %v2242_v18  ;;  %v2267_v34 = vadd.f32 %v8728_v0, %v2264_v51  ;;  %v2289_v12 = vadd.f32 %v8730_v1, %v2286_v61  ;;  %v8731_v22 = vstv %s6705_s22  ;;  %s8738_s22 = sld [smem:[#allocation62_spill]] }
 0x796   : > { %v2311_v35 = vadd.f32 %v8731_v22, %v2308_v14  ;;  %v8732_v39 = vstv %s6733_s16  ;;  %v2389_v56 = vstv %s6884_s12  ;;  %v2394_v27 = vmul.f32 %v6638_v13, %v2392_v36  ;;  %s8735_s16 = sld [smem:[#allocation60_spill]]  ;;  %s7172_s12 = sld [smem:[#allocation2 + $0x1b1]] }
 0x797   : > { %v2333_v44 = vadd.f32 %v8732_v39, %v2330_v63  ;;  %v2164_v46 = vadd.f32 %v2162_v42, %v2142_v41  ;;  %v8733_v43 = vstv %s8726_s27  ;;  %v2225_v17 = vmax.f32 %v2223_v4, 0.0  ;;  %s8748_s27 = sld [smem:[#allocation37_spill]] }
 0x798   : > { %v2184_v37 = vmul.f32 %v8733_v43, %v2181_v3  ;;  %v8734_v8 = vstv %s6751_s4  ;;  %v2247_v28 = vmax.f32 %v2245_v11, 0.0  ;;  %v2269_v55 = vmax.f32 %v2267_v34, 0.0  ;;  %s8739_s4 = sld [smem:[#allocation54_spill]] }
 0x799   : > { %v2355_v10 = vadd.f32 %v8734_v8, %v2352_v19  ;;  %v2291_v18 = vmax.f32 %v2289_v12, 0.0  ;;  %v2377_v51 = vadd.f32 %v2375_v2, %v2374_v59  ;;  %v8736_v14 = vstv %s8729_s28  ;;  %s8747_s28 = sld [smem:[#allocation45_spill]]  ;;  %v6973_v43 = vpop.f32.mrb[12].mxu0 }
 0x79a   : > { %v2186_v61 = vadd.f32 %v2184_v37, %v2164_v46  ;;  %v2206_v63 = vmul.f32 %v8736_v14, %v2203_v62  ;;  %v2313_v45 = vmax.f32 %v2311_v35, 0.0  ;;  %v2335_v42 = vmax.f32 %v2333_v44, 0.0 }
 0x79b   : > { %v2380_v3 = vstv %s6908_s30  ;;  %v2397_v4 = vstv %s6910_s21  ;;  %v2402_v41 = vstv %s6926_s0  ;;  %v2408_v19 = vstv %s6928_s13  ;;  %s4876_s21 = smov 104   ;;  %s7158_s13 = sld [smem:[#allocation2 + $0x180]] }
 0x79c   : > { %v2208_v11 = vadd.f32 %v2206_v63, %v2186_v61  ;;  %v8741_v0 = vstv %s6632_s3  ;;  %v2357_v1 = vmax.f32 %v2355_v10, 0.0  ;;  %v2391_v59 = vmul.f32 %v2389_v56, %v6819_v6  ;;  %v4257_v63 = vpop.f32.mrb[13].mxu0  ;;  %s7162_s30 = sld [smem:[#allocation2 + $0x1a0]]  ;;  %s7170_s0 = sld [smem:[#allocation2 + $0x1a1]] }
 0x79d   : > { %v2228_v34 = vmul.f32 %v8741_v0, %v2225_v17  ;;  %v8744_v62 = vstv %s6655_s23  ;;  %v8745_v22 = vstv %s6673_s1  ;;  %v8746_v39 = vstv %s8735_s16  ;;  %s8764_s16 = sld [smem:[#allocation39_spill]]  ;;  %8822 = sst [smem:[#allocation69_spill]] %s7172_s12 }
 0x79e   : > { %v2250_v12 = vmul.f32 %v8744_v62, %v2247_v28  ;;  %v2272_v35 = vmul.f32 %v8745_v22, %v2269_v55  ;;  %v2294_v44 = vmul.f32 %v8746_v39, %v2291_v18  ;;  %v2379_v46 = vmax.f32 %v2377_v51, 0.0 }
 0x79f   : > { %v2230_v37 = vadd.f32 %v2228_v34, %v2208_v11  ;;  %v8749_v8 = vstv %s8737_s18  ;;  %v8750_v61 = vstv %s8738_s22  ;;  %v2396_v14 = vadd.f32 %v2394_v27, %v2391_v59  ;;  %v2004_v11 = vpop.f32.mrb[14].mxu0 }
 0x7a0   : > { %v2316_v17 = vmul.f32 %v8749_v8, %v2313_v45  ;;  %v2338_v10 = vmul.f32 %v8750_v61, %v2335_v42  ;;  %v8751_v6 = vstv %s8739_s4  ;;  %v8752_v0 = vstv %s8740_s19  ;;  %s8758_s19 = sld [smem:[#allocation78_spill]]  ;;  %v4258_v8 = vpop.f32.mrb[15].mxu0 }
 0x7a1   : > { %v2062_v28 = vmul.f32 %v8751_v6, %v6973_v43  ;;  %v2082_v55 = vmul.f32 %v8752_v0, %v6973_v43  ;;  %v8753_v62 = vstv %s8742_s20  ;;  %v8754_v51 = vstv %s8743_s8  ;;  %s8759_s20 = sld [smem:[#allocation47_spill]]  ;;  %s8760_s8 = sld [smem:[#allocation53_spill]] }
 0x7a2   : > { %v2104_v18 = vmul.f32 %v8753_v62, %v6973_v43  ;;  %v2126_v22 = vmul.f32 %v8754_v51, %v6973_v43  ;;  %v2252_v45 = vadd.f32 %v2250_v12, %v2230_v37  ;;  %v2399_v27 = vadd.f32 %v2397_v4, %v2396_v14  ;;  %s8787_s4 = sld [smem:[#allocation38_spill]]  ;;  %8818 = sst [smem:[#allocation59_spill]] %s7158_s13 }
 0x7a3   : > { %v8756_v42 = vstv %s8747_s28  ;;  %v8757_v59 = vstv %s8748_s27  ;;  %v2067_v61 = vadd.f32 %v6714_v58, %v2062_v28  ;;  %v2087_v63 = vadd.f32 %v6717_v38, %v2082_v55  ;;  %s8805_s28 = sld [smem:[#allocation43_spill]]  ;;  %8821 = sst [smem:[#allocation72_spill]] %s7170_s0 }
 0x7a4   : > { %v2148_v34 = vmul.f32 %v8756_v42, %v6973_v43  ;;  %v2170_v39 = vmul.f32 %v8757_v59, %v6973_v43  ;;  %v2109_v6 = vadd.f32 %v6729_v31, %v2104_v18  ;;  %v2131_v12 = vadd.f32 %v6738_v5, %v2126_v22  ;;  %s7200_s27 = sld [smem:[#allocation2 + $0x195]] }
 0x7a5   : > { %v2274_v37 = vadd.f32 %v2272_v35, %v2252_v45  ;;  %v2401_v14 = vmax.f32 %v2399_v27, 0.0  ;;  %v2070_v51 = vadd.f32 %v2069_v20, %v2067_v61  ;;  %v2090_v58 = vadd.f32 %v2089_v9, %v2087_v63 }
 0x7a6   : > { %v2153_v0 = vadd.f32 %v6741_v48, %v2148_v34  ;;  %v2175_v62 = vadd.f32 %v6761_v33, %v2170_v39  ;;  %v2112_v38 = vadd.f32 %v2111_v47, %v2109_v6  ;;  %v2134_v31 = vadd.f32 %v2133_v50, %v2131_v12 }
 0x7a7   : > { %v2296_v5 = vadd.f32 %v2294_v44, %v2274_v37  ;;  %v8761_v35 = vstv %s8758_s19  ;;  %v8762_v55 = vstv %s8706_s26  ;;  %v8763_v18 = vstv %s8759_s20  ;;  %s8802_s26 = sld [smem:[#allocation74_spill]]  ;;  %s8807_s20 = sld [smem:[#allocation60_spill]] }
 0x7a8   : > { %v2360_v28 = vmul.f32 %v8761_v35, %v2357_v1  ;;  %v2156_v48 = vadd.f32 %v8762_v55, %v2153_v0  ;;  %v2178_v33 = vadd.f32 %v8763_v18, %v2175_v62  ;;  %v2072_v22 = vmax.f32 %v2070_v51, 0.0 }
 0x7a9   : > { %v2092_v11 = vmax.f32 %v2090_v58, 0.0  ;;  %v2114_v20 = vmax.f32 %v2112_v38, 0.0  ;;  %v2136_v9 = vmax.f32 %v2134_v31, 0.0  ;;  %v2318_v45 = vadd.f32 %v2316_v17, %v2296_v5 }
 0x7aa   : > { %v2382_v47 = vmul.f32 %v2380_v3, %v2379_v46  ;;  %v2404_v50 = vmul.f32 %v2402_v41, %v2401_v14  ;;  %v8765_v1 = vstv %s8760_s8  ;;  %v8767_v27 = vstv %s8709_s5  ;;  %s8790_s5 = sld [smem:[#allocation66_spill]]  ;;  %s7213_s8 = sld [smem:[#allocation2 + $0x1b6]] }
 0x7ab   : > { %v2192_v44 = vmul.f32 %v8765_v1, %v6973_v43  ;;  %v2075_v42 = vmul.f32 %v8767_v27, %v2072_v22  ;;  %v8768_v34 = vstv %s8710_s10  ;;  %v2158_v39 = vmax.f32 %v2156_v48, 0.0  ;;  %s8789_s10 = sld [smem:[#allocation56_spill]] }
 0x7ac   : > { %v2095_v59 = vmul.f32 %v8768_v34, %v2092_v11  ;;  %v2180_v8 = vmax.f32 %v2178_v33, 0.0  ;;  %v2340_v61 = vadd.f32 %v2338_v10, %v2318_v45  ;;  %v8769_v63 = vstv %s8711_s15  ;;  %s8780_s15 = sld [smem:[#allocation51_spill]] }
 0x7ad   : > { %v2117_v6 = vmul.f32 %v8769_v63, %v2114_v20  ;;  %v8770_v17 = vstv %s8712_s11  ;;  %v2197_v12 = vadd.f32 %v6764_v15, %v2192_v44  ;;  %v8772_v14 = vstv %s8764_s16  ;;  %s8779_s11 = sld [smem:[#allocation33_spill]] }
 0x7ae   : > { %v2139_v46 = vmul.f32 %v8770_v17, %v2136_v9  ;;  %v2097_v37 = vadd.f32 %v2095_v59, %v2075_v42  ;;  %v2214_v0 = vmul.f32 %v8772_v14, %v6973_v43  ;;  %v8773_v62 = vstv %s6634_s9  ;;  %s8781_s9 = sld [smem:[#allocation76_spill]]  ;;  %s7176_s16 = sld [smem:[#allocation2 + $0x192]] }
 0x7af   : > { %v2236_v51 = vmul.f32 %v8773_v62, %v6973_v43  ;;  %v8775_v58 = vstv %s6657_s7  ;;  %v2362_v10 = vadd.f32 %v2360_v28, %v2340_v61  ;;  %v8776_v31 = vstv %s8708_s2  ;;  %s8782_s7 = sld [smem:[#allocation57_spill]]  ;;  %s8784_s2 = sld [smem:[#allocation40_spill]] }
 0x7b0   : > { %v2258_v38 = vmul.f32 %v8775_v58, %v6973_v43  ;;  %v2200_v5 = vadd.f32 %v8776_v31, %v2197_v12  ;;  %v8777_v35 = vstv %s8766_s6  ;;  %v8778_v15 = vstv %s6703_s29  ;;  %s8785_s29 = sld [smem:[#allocation75_spill]]  ;;  %s7178_s6 = sld [smem:[#allocation2 + $0x1a2]] }
 0x7b1   : > { %v2280_v55 = vmul.f32 %v8777_v35, %v6973_v43  ;;  %v2302_v48 = vmul.f32 %v8778_v15, %v6973_v43  ;;  %v2119_v18 = vadd.f32 %v2117_v6, %v2097_v37  ;;  %v2219_v33 = vadd.f32 %v6767_v57, %v2214_v0 }
 0x7b2   : > { %v2241_v22 = vadd.f32 %v6781_v26, %v2236_v51  ;;  %v2263_v28 = vadd.f32 %v6787_v16, %v2258_v38  ;;  %v2384_v11 = vadd.f32 %v2382_v47, %v2362_v10  ;;  %v8783_v20 = vstv %s8771_s17  ;;  %s7180_s17 = sld [smem:[#allocation2 + $0x1b2]] }
 0x7b3   : > { %v2161_v9 = vmul.f32 %v8783_v20, %v2158_v39  ;;  %v2202_v45 = vmax.f32 %v2200_v5, 0.0  ;;  %v2285_v1 = vadd.f32 %v6801_v60, %v2280_v55  ;;  %v2141_v44 = vadd.f32 %v2139_v46, %v2119_v18  ;;  %v7066_v39 = vld [vmem:[%s8779_s11] sm:$0xff]  ;;  %s7227_s11 = sld [smem:[#allocation2 + $0x1b7]] }
 0x7b4   : > { %v8786_v27 = vstv %s8774_s25  ;;  %v8788_v34 = vstv %s6647_s14  ;;  %v2307_v26 = vadd.f32 %v6809_v32, %v2302_v48  ;;  %v2406_v16 = vadd.f32 %v2404_v50, %v2384_v11  ;;  %s8797_s14 = sld [smem:[#allocation70_spill]]  ;;  %s7182_s25 = sld [smem:[#allocation2 + $0x183]] }
 0x7b5   : > { %v2222_v42 = vadd.f32 %v8786_v27, %v2219_v33  ;;  %v2244_v57 = vadd.f32 %v8788_v34, %v2241_v22  ;;  %v8791_v47 = vstv %s6667_s24  ;;  %v8793_v61 = vstv %s8780_s15  ;;  %s8798_s24 = sld [smem:[#allocation36_spill]]  ;;  %s7184_s15 = sld [smem:[#allocation2 + $0x193]] }
 0x7b6   : > { %v2266_v59 = vadd.f32 %v8791_v47, %v2263_v28  ;;  %v2327_v60 = vmul.f32 %v7066_v39, %v8793_v61  ;;  %v8794_v63 = vstv %s8781_s9  ;;  %v2163_v17 = vadd.f32 %v2161_v9, %v2141_v44  ;;  %8824 = sst [smem:[#allocation68_spill]] %s7178_s6  ;;  %s7186_s9 = sld [smem:[#allocation2 + $0x1a3]] }
 0x7b7   : > { %v2349_v6 = vmul.f32 %v7066_v39, %v8794_v63  ;;  %v8795_v46 = vstv %s8782_s7  ;;  %v2224_v37 = vmax.f32 %v2222_v42, 0.0  ;;  %v8796_v14 = vstv %s8784_s2  ;;  %s7188_s7 = sld [smem:[#allocation2 + $0x1b3]]  ;;  %s7190_s2 = sld [smem:[#allocation2 + $0x184]] }
 0x7b8   : > { %v2183_v12 = vmul.f32 %v8795_v46, %v2180_v8  ;;  %v2371_v32 = vmul.f32 %v7066_v39, %v8796_v14  ;;  %v2410_v50 = vadd.f32 %v2408_v19, %v2406_v16  ;;  %v2246_v0 = vmax.f32 %v2244_v57, 0.0  ;;  %8825 = sst [smem:[#allocation64_spill]] %s7180_s17 }
 0x7b9   : > { %v8799_v62 = vstv %s8785_s29  ;;  %v8800_v58 = vstv %s8787_s4  ;;  %v8801_v31 = vstv %s8789_s10  ;;  %v8803_v5 = vstv %s8790_s5  ;;  %s7192_s29 = sld [smem:[#allocation2 + $0x194]]  ;;  %s7198_s5 = sld [smem:[#allocation2 + $0x185]] }
 0x7ba   : > { %v2288_v51 = vadd.f32 %v8799_v62, %v2285_v1  ;;  %v2324_v38 = vmul.f32 %v8800_v58, %v6973_v43  ;;  %v2185_v10 = vadd.f32 %v2183_v12, %v2163_v17  ;;  %v2205_v8 = vmul.f32 %v8801_v31, %v2202_v45  ;;  %s7194_s4 = sld [smem:[#allocation2 + $0x1a4]]  ;;  %8837 = sst [smem:[#allocation45_spill]] %s7227_s11 }
 0x7bb   : > { %v2310_v35 = vadd.f32 %v8803_v5, %v2307_v26  ;;  %v2393_v55 = vmul.f32 %v7066_v39, %v2392_v36  ;;  %v2414_v15 = vsel %vm1134_vm3, %v2410_v50, -inf  ;;  %v8804_v48 = vstv %s6632_s3  ;;  %s4875_s3 = smov 80   ;;  %s7196_s10 = sld [smem:[#allocation2 + $0x1b4]] }
 0x7bc   : > { %v2227_v18 = vmul.f32 %v8804_v48, %v2224_v37  ;;  %v2268_v33 = vmax.f32 %v2266_v59, 0.0  ;;  %v2329_v22 = vadd.f32 %v2327_v60, %v2324_v38  ;;  %2415 = vmax.xlane.f32.xlu1 %v2414_v15  ;;  %v2207_v28 = vadd.f32 %v2205_v8, %v2185_v10  ;;  %8826 = sst [smem:[#allocation61_spill]] %s7186_s9 }
 0x7bd   : > { %v8806_v11 = vstv %s8797_s14  ;;  %v8808_v9 = vstv %s8798_s24  ;;  %v2390_v36 = vmul.f32 %v2389_v56, %v6973_v43  ;;  %v8810_v1 = vstv %s6655_s23  ;;  %s7164_s23 = sld [smem:[#allocation2 + $0x1b0]]  ;;  %s7202_s14 = sld [smem:[#allocation2 + $0x1a5]] }
 0x7be   : > { %v2346_v20 = vmul.f32 %v8806_v11, %v6973_v43  ;;  %v2368_v45 = vmul.f32 %v8808_v9, %v6973_v43  ;;  %v2249_v44 = vmul.f32 %v8810_v1, %v2246_v0  ;;  %v2290_v27 = vmax.f32 %v2288_v51, 0.0  ;;  %8827 = sst [smem:[#allocation55_spill]] %s7188_s7  ;;  %s7204_s24 = sld [smem:[#allocation2 + $0x1b5]] }
 0x7bf   : > { %v2229_v42 = vadd.f32 %v2227_v18, %v2207_v28  ;;  %v8811_v34 = vstv %s8802_s26  ;;  %v2312_v47 = vmax.f32 %v2310_v35, 0.0  ;;  %v8812_v61 = vstv %s6673_s1  ;;  %s7166_s1 = sld [smem:[#allocation2 + $0x181]]  ;;  %8830 = sst [smem:[#allocation44_spill]] %s7198_s5 }
 0x7c0   : > { %v2332_v57 = vadd.f32 %v8811_v34, %v2329_v22  ;;  %v2351_v26 = vadd.f32 %v2349_v6, %v2346_v20  ;;  %v2373_v16 = vadd.f32 %v2371_v32, %v2368_v45  ;;  %v2271_v60 = vmul.f32 %v8812_v61, %v2268_v33  ;;  %8828 = sst [smem:[#allocation35_spill]] %s7194_s4  ;;  %s7207_s26 = sld [smem:[#allocation2 + $0x186]] }
 0x7c1   : > { %v2251_v59 = vadd.f32 %v2249_v44, %v2229_v42  ;;  %v8813_v63 = vstv %s8805_s28  ;;  %v2395_v46 = vadd.f32 %v2393_v55, %v2390_v36  ;;  %v8814_v43 = vstv %s8807_s20  ;;  %8829 = sst [smem:[#allocation52_spill]] %s7196_s10  ;;  %s7209_s28 = sld [smem:[#allocation2 + $0x196]] }
 0x7c2   : > { %v2354_v17 = vadd.f32 %v8813_v63, %v2351_v26  ;;  %v2293_v12 = vmul.f32 %v8814_v43, %v2290_v27  ;;  %v2334_v37 = vmax.f32 %v2332_v57, 0.0  ;;  %v2376_v14 = vadd.f32 %v2375_v2, %v2373_v16  ;;  %s7211_s20 = sld [smem:[#allocation2 + $0x1a6]]  ;;  %s7291_s7 = sld [smem:[#allocation2 + $0x1aa]] }
 0x7c3   : > { %v2273_v56 = vadd.f32 %v2271_v60, %v2251_v59  ;;  %v8815_v6 = vstv %s8737_s18  ;;  %v2398_v51 = vadd.f32 %v2397_v4, %v2395_v46  ;;  %v8816_v38 = vstv %s8738_s22  ;;  %s7160_s22 = sld [smem:[#allocation2 + $0x190]]  ;;  %8819 = sst [smem:[#allocation77_spill]] %s7164_s23 }
 0x7c4   : > { %v2315_v62 = vmul.f32 %v8815_v6, %v2312_v47  ;;  %v2356_v32 = vmax.f32 %v2354_v17, 0.0  ;;  %v2337_v10 = vmul.f32 %v8816_v38, %v2334_v37  ;;  %v2378_v31 = vmax.f32 %v2376_v14, 0.0  ;;  %s7168_s18 = sld [smem:[#allocation2 + $0x191]]  ;;  %8831 = sst [smem:[#allocation67_spill]] %s7202_s14 }
 0x7c5   : > { %v2295_v0 = vadd.f32 %v2293_v12, %v2273_v56  ;;  %v8817_v5 = vstv %s8758_s19  ;;  %v2400_v55 = vmax.f32 %v2398_v51, 0.0  ;;  %8820 = sst [smem:[#allocation63_spill]] %s7166_s1  ;;  %s7174_s19 = sld [smem:[#allocation2 + $0x182]]  ;;  %v8178_v12 = vstv %s7158_s13 }
 0x7c6   : > { %v2359_v35 = vmul.f32 %v8817_v5, %v2356_v32  ;;  %v2381_v48 = vmul.f32 %v2380_v3, %v2378_v31  ;;  %8832 = sst [smem:[#allocation62_spill]] %s7204_s24  ;;  %v2740_v14 = vstv %s7176_s16  ;;  %v2708_v6 = vstv %s7164_s23  ;;  %s7235_s13 = sld [smem:[#allocation2 + $0x198]] }
 0x7c7   : > { %v2317_v58 = vadd.f32 %v2315_v62, %v2295_v0  ;;  %v2403_v2 = vmul.f32 %v2402_v41, %v2400_v55  ;;  %8833 = sst [smem:[#allocation54_spill]] %s7207_s26  ;;  %v2703_v0 = vstv %s7162_s30  ;;  %v8174_v62 = vstv %s7166_s1  ;;  %s7243_s16 = sld [smem:[#allocation2 + $0x1a8]] }
 0x7c8   : > { %8834 = sst [smem:[#allocation65_spill]] %s7211_s20  ;;  %v2762_v32 = vstv %s7184_s15  ;;  %v2728_v38 = vstv %s7172_s12  ;;  %s7245_s23 = sld [smem:[#allocation2 + $0x1b8]]  ;;  %v2745_v5 = vstv %s7178_s6  ;;  %v8177_v55 = vstv %s7182_s25 }
 0x7c9   : > { %v2339_v8 = vadd.f32 %v2337_v10, %v2317_v58  ;;  %v2723_v58 = vstv %s7170_s0  ;;  %v2784_v10 = vstv %s7192_s29  ;;  %s7253_s15 = sld [smem:[#allocation2 + $0x189]]  ;;  %s7265_s0 = sld [smem:[#allocation2 + $0x19a]] }
 0x7ca   : > { %v2718_v43 = vstv %s7168_s18  ;;  %s7233_s18 = sld [smem:[#allocation2 + $0x188]]  ;;  %s7255_s12 = sld [smem:[#allocation2 + $0x199]] }
 0x7cb   : > { %v2361_v15 = vadd.f32 %v2359_v35, %v2339_v8  ;;  %8823 = sst [smem:[#allocation49_spill]] %s7174_s19  ;;  %v7238_v51 = vmul.f32 %v6638_v13, %v2718_v43  ;;  %v8176_v31 = vstv %s7174_s19  ;;  %v7249_v8 = vmul.f32 %v6638_v13, %v2740_v14  ;;  %s7263_s29 = sld [smem:[#allocation2 + $0x1a9]] }
 0x7cc   : > { %v2750_v35 = vstv %s7180_s17  ;;  %s7273_s17 = sld [smem:[#allocation2 + $0x1b9]]  ;;  %s7275_s6 = sld [smem:[#allocation2 + $0x19b]] }
 0x7cd   : > { %v2383_v18 = vadd.f32 %v2381_v48, %v2361_v15  ;;  %4514 = vrot.lane.b32.xlu1 %v5285_v23, %s4875_s3  ;;  %8838 = sst [smem:[#allocation37_spill]] %s7243_s16  ;;  %v7259_v15 = vmul.f32 %v6638_v13, %v2762_v32  ;;  %v2767_v48 = vstv %s7186_s9  ;;  %s7282_s9 = sld [smem:[#allocation2 + $0x19c]] }
 0x7ce   : > { %8839 = sst [smem:[#allocation48_spill]] %s7245_s23  ;;  %s7306_s10 = sld [smem:[#allocation2 + $0x1ab]] }
 0x7cf   : > { %v2405_v33 = vadd.f32 %v2403_v2, %v2383_v18  ;;  %8840 = sst [smem:[#allocation78_spill]] %s7253_s15  ;;  %v2806_v18 = vstv %s7200_s27  ;;  %s7280_s27 = sld [smem:[#allocation2 + $0x18a]] }
 0x7d0   : > { %8844 = sst [smem:[#allocation50_spill]] %s7291_s7  ;;  %s7317_s24 = sld [smem:[#allocation2 + $0x18c]] }
 0x7d1   : > { %v2409_v4 = vadd.f32 %v2408_v19, %v2405_v33  ;;  %2593 = vrot.lane.b32.xlu1 %v5287_v24, %s4876_s21  ;;  %v8179_v33 = vstv %s7190_s2  ;;  %s7348_s11 = sld [smem:[#allocation2 + $0x19e]]  ;;  %s7366_s23 = sld [smem:[#allocation2 + $0x1ac]] }
 0x7d2   : > { %8841 = sst [smem:[#allocation47_spill]] %s7273_s17  ;;  %s7382_s17 = sld [smem:[#allocation2 + $0x18d]] }
 0x7d3   : > { %v2411_v22 = vsel %vm1134_vm3, %v2409_v4, -inf  ;;  %8842 = sst [smem:[#allocation53_spill]] %s7275_s6  ;;  %s7457_s19 = sld [smem:[#allocation2 + $0x18f]] }
 0x7d4   : > { %2412 = vmax.xlane.f32.xlu0 %v2411_v22  ;;  %v2789_v22 = vstv %s7194_s4  ;;  %8843 = sst [smem:[#allocation39_spill]] %s7282_s9  ;;  %s7293_s4 = sld [smem:[#allocation2 + $0x1ba]] }
 0x7d5   : > { %2643 = vrot.lane.b32.xlu1 %v5283_v21, %s4876_s21  ;;  %8847 = sst [smem:[#allocation51_spill]] %s7306_s10  ;;  %s8911_s1 = sld [smem:[#allocation78_spill]] }
 0x7d6   : > { %8848 = sst [smem:[#allocation76_spill]] %s7317_s24 }
 0x7d7   : > { %8851 = sst [smem:[#allocation40_spill]] %s7348_s11 }
 0x7d8   : > { %8853 = sst [smem:[#allocation75_spill]] %s7366_s23 }
 0x7d9   : > { %2641 = vrot.lane.b32.xlu1 %v5301_v29, %s4876_s21  ;;  %8854 = sst [smem:[#allocation38_spill]] %s7382_s17 }
 0x7da   : > { %8845 = sst [smem:[#allocation42_spill]] %s7293_s4  ;;  %s7408_s4 = sld [smem:[#allocation2 + $0x19f]] }
 0x7e0   : > { %8856 = sst [smem:[#allocation66_spill]] %s7408_s4 }
 0x849   : > { %v2416_v3 = vpop.xlane.xlu1 %2415 }
 0x84a   : > { %v2418_v28 = vsub.f32 %v2410_v50, %v2416_v3 }
 0x84c   : > { %v2421_v11 = vmul.f32 1.442695, %v2418_v28  ;;  %v8180_v28 = vstv %s7198_s5  ;;  %s8918_s5 = sld [smem:[#allocation37_spill]] }
 0x84d   : > { %v4515_v41 = vpop.permute.xlu1 %4514 }
 0x84e   : > { %4554 = vpow2.f32 %v2421_v11  ;;  %v4517_v20 = vunpack.i.h.bf16 %v4515_v41  ;;  %v4516_v9 = vunpack.i.l.bf16 %v4515_v41  ;;  %v2828_v11 = vstv %s7209_s28  ;;  %s7304_s28 = sld [smem:[#allocation2 + $0x18b]] }
 0x850   : > { %v4352_v45 = vpack.c.bf16 %v4517_v20, %v4516_v9  ;;  %v7288_v20 = vmul.f32 %v6638_v13, %v2806_v18  ;;  %v2811_v9 = vstv %s7202_s14  ;;  %s7451_s14 = sld [smem:[#allocation2 + $0x1ae]] }
 0x851   : > { %v2594_v27 = vpop.permute.xlu1 %2593 }
 0x852   : > { %4353 = vmatpush3.bf16.msra.mxu1 %v4352_v45  ;;  %v2599_v46 = vsel %vm687_vm2, %v2594_v27, 0  ;;  %v7296_v45 = vmul.f32 %v7066_v39, %v2718_v43  ;;  %v7322_v27 = vmul.f32 %v7066_v39, %v2784_v10 }
 0x853   : > { %4285 = vmatprep.subr.bf16.mxu1 %v8465_v52 }
 0x854   : > { %8846 = sst [smem:[#allocation46_spill]] %s7304_s28 }
 0x855   : > { %v2644_v34 = vpop.permute.xlu1 %2643 }
 0x856   : > { %v2649_v26 = vsel %vm687_vm2, %v2644_v34, 0  ;;  %8865 = sst [smem:[#allocation70_spill]] %s7451_s14 }
 0x858   : > { %v4555_v19 = vpop.eup %4554 }
 0x859   : > { %v2426_v24 = vsel %vm1134_vm3, %v4555_v19, 0.0  ;;  %v2642_v16 = vpop.permute.xlu1 %2641 }
 0x85a   : > { %2427 = vadd.xlane.f32.xlu0 %v2426_v24 }
 0x861   : > { %v2413_v36 = vpop.xlane.xlu0 %2412 }
 0x862   : > { %v2417_v1 = vsub.f32 %v2409_v4, %v2413_v36  ;;  %v7270_v4 = vmul.f32 %v6638_v13, %v2784_v10  ;;  %v8181_v36 = vstv %s7207_s26  ;;  %s8923_s26 = sld [smem:[#allocation50_spill]] }
 0x864   : > { %v2419_v21 = vmul.f32 1.442695, %v2417_v1 }
 0x866   : > { %4556 = vpow2.f32 %v2419_v21  ;;  %v7309_v21 = vmul.f32 %v7066_v39, %v2762_v32 }
 0x870   : > { %v4557_v29 = vpop.eup %4556 }
 0x871   : > { %v2423_v50 = vsel %vm1134_vm3, %v4557_v29, 0.0 }
 0x872   : > { %2424 = vadd.xlane.f32.xlu0 %v2423_v50  ;;  %v7314_v50 = vmul.f32 %v6638_v13, %v2828_v11 }
 0x888   : > { %4509 = vrot.lane.b32.xlu0 %v5289_v25, %s4875_s3  ;;  %s7216_s3 = sld [smem:[#allocation2 + $0x187]] }
 0x88c   : > { %2591 = vrot.lane.b32.xlu0 %v5303_v30, %s4876_s21  ;;  %s7218_s21 = sld [smem:[#allocation2 + $0x197]] }
 0x88e   : > { %8835 = sst [smem:[#allocation41_spill]] %s7216_s3 }
 0x88f   : > { %s8910_s30 = sld [smem:[#allocation41_spill]] }
 0x892   : > { %v2850_v1 = vstv %s7218_s21  ;;  %s7319_s21 = sld [smem:[#allocation2 + $0x19d]] }
 0x898   : > { %8849 = sst [smem:[#allocation57_spill]] %s7319_s21 }
 0x8e7   : > { %v2428_v44 = vpop.xlane.xlu0 %2427 }
 0x8e8   : > { %4558 = vrcp.f32 %v2428_v44  ;;  %v2872_v44 = vstv %s7235_s13  ;;  %s8850_s13 = sld [smem:[#allocation33_spill]] }
 0x8e9   : > { %v7351_v32 = vmul.f32 %v7066_v39, %v2872_v44 }
 0x8f2   : > { %v4559_v42 = vpop.eup %4558 }
 0x8f3   : > { %v2432_v57 = vmul.f32 %v4559_v42, %v4555_v19  ;;  %v7299_v19 = vmul.f32 %v7066_v39, %v2740_v14  ;;  %v7325_v42 = vmul.f32 %v7066_v39, %v2806_v18  ;;  %v8167_v14 = vstv %s7275_s6  ;;  %s8912_s6 = sld [smem:[#allocation46_spill]] }
 0x8f5   : > { %4277 = vmatmul.mubr.msk.f32.vlgmr.msra.gmra.mrb[24].mxu1 %vm1134_vm3, %v2432_v57  ;;  %v2833_v57 = vstv %s7211_s20  ;;  %s8870_s20 = sld [smem:[#allocation52_spill]] }
 0x8f6   : > { %4286 = vmatpush3.bf16.xpose.msra.mxu1 %v2649_v26  ;;  %4287 = vmatprep.mubr.msk.bf16.mxu1 %vm4869_vm0, %v8465_v52  ;;  %v8193_v26 = vstv %s7319_s21  ;;  %s8866_s21 = sld [smem:[#allocation55_spill]] }
 0x8f7   : > { %4357 = vmatprep.subr.bf16.mxu1 %v8466_v53 }
 0x8fd   : > { %4288 = vmatmul.mubr.msk.bf16.vlgmr.msra.gmra.mrb[28].mxu1 %vm687_vm2, %v2642_v16  ;;  %v8182_v16 = vstv %s7216_s3  ;;  %s8924_s3 = sld [smem:[#allocation40_spill]] }
 0x8fe   : > { %4302 = vmatprep.mubr.msk.f32.mxu1 %vm4869_vm0, %v8465_v52 }
 0x8ff   : > { %v2425_v30 = vpop.xlane.xlu0 %2424 }
 0x900   : > { %4560 = vrcp.f32 %v2425_v30  ;;  %v7331_v30 = vmul.f32 %v7066_v39, %v2828_v11 }
 0x903   : > { %v4510_v47 = vpop.permute.xlu0 %4509 }
 0x904   : > { %v4512_v59 = vunpack.i.h.bf16 %v4510_v47  ;;  %v4511_v61 = vunpack.i.l.bf16 %v4510_v47  ;;  %v2852_v47 = vmul.f32 %v6638_v13, %v2850_v1 }
 0x906   : > { %v4349_v60 = vpack.c.bf16 %v4512_v59, %v4511_v61 }
 0x907   : > { %v2592_v56 = vpop.permute.xlu0 %2591 }
 0x908   : > { %4350 = vmatpush3.bf16.msra.mxu0 %v4349_v60  ;;  %v2894_v60 = vstv %s7255_s12  ;;  %s8852_s12 = sld [smem:[#allocation59_spill]] }
 0x909   : > { %4279 = vmatprep.subr.bf16.mxu0 %v8465_v52  ;;  %v7355_v18 = vmul.f32 %v6638_v13, %v2894_v60 }
 0x90a   : > { %v4561_v63 = vpop.eup %4560 }
 0x90b   : > { %v2431_v17 = vmul.f32 %v4561_v63, %v4557_v29  ;;  %v2869_v63 = vstv %s7233_s18  ;;  %s8932_s18 = sld [smem:[#allocation66_spill]] }
 0x90d   : > { %4270 = vmatmul.mubr.msk.f32.vlgmr.msra.gmra.mrb[16].mxu0 %vm1134_vm3, %v2431_v17  ;;  %v7339_v17 = vmul.f32 %v6638_v13, %v2872_v44  ;;  %v7369_v44 = vmul.f32 %v7066_v39, %v2894_v60 }
 0x90e   : > { %4281 = vmatprep.mubr.msk.bf16.mxu0 %vm4869_vm0, %v8465_v52 }
 0x911   : > { %4280 = vmatpush3.bf16.xpose.msra.mxu0 %v2599_v46  ;;  %v8166_v46 = vstv %s7265_s0 }
 0x912   : > { %4354 = vmatprep.subr.bf16.mxu0 %v8466_v53  ;;  %v2698_v53 = vstv %s7160_s22  ;;  %s7225_s22 = sld [smem:[#allocation2 + $0x1a7]]  ;;  %v7364_v61 = vmul.f32 %v6638_v13, %v8166_v46 }
 0x913   : > { %v7222_v37 = vmul.f32 %v6638_v13, %v2698_v53  ;;  %v7285_v41 = vmul.f32 %v7066_v39, %v2698_v53  ;;  %v7375_v53 = vld [vmem:[%s8850_s13 + $0x8] sm:$0xff]  ;;  %s7394_s13 = sld [smem:[#allocation2 + $0x18e]] }
 0x918   : > { %4282 = vmatmul.mubr.msk.bf16.vlgmr.msra.gmra.mrb[20].mxu0 %vm687_vm2, %v2592_v56  ;;  %8836 = sst [smem:[#allocation58_spill]] %s7225_s22  ;;  %v8196_v59 = vstv %s7225_s22  ;;  %v7343_v56 = vmul.f32 %v7066_v39, %v2850_v1  ;;  %v8171_v1 = vstv %s7282_s9  ;;  %s7443_s9 = sld [smem:[#allocation2 + $0x1ad]] }
 0x919   : > { %4295 = vmatprep.mubr.msk.f32.mxu0 %vm4869_vm0, %v8465_v52  ;;  %v7391_v11 = vmul.f32 %v7375_v53, %v8171_v1  ;;  %8855 = sst [smem:[#allocation56_spill]] %s7394_s13  ;;  %s7482_s22 = sld [smem:[#allocation2 + $0x1bc]] }
 0x91e   : > { %8864 = sst [smem:[#allocation73_spill]] %s7443_s9 }
 0x91f   : > { %8871 = sst [smem:[#allocation36_spill]] %s7482_s22 }
 0x9c8   : > { %v7311_v29 = vpop.f32.mrb[24].mxu1 }
 0x9c9   : > { %v4278_v34 = vpop.f32.mrb[25].mxu1 }
 0x9ca   : > { %v7380_v34 = vmul.f32 %v7375_v53, %v8167_v14 }
 0x9d0   : > { %v7384_v13 = vpop.f32.mrb[28].mxu1 }
 0x9d1   : > { %v4289_v3 = vpop.f32.mrb[29].mxu1  ;;  %v2697_v14 = vmul.f32 %v8178_v12, %v7384_v13  ;;  %v2717_v2 = vmul.f32 %v8174_v62, %v7384_v13  ;;  %v2739_v24 = vmul.f32 %v8176_v31, %v7384_v13  ;;  %v2761_v60 = vmul.f32 %v8177_v55, %v7384_v13 }
 0x9d2   : > { %v2688_v1 = vpop.f32.mrb[30].mxu1  ;;  %v2783_v3 = vmul.f32 %v8179_v33, %v7384_v13  ;;  %v2805_v62 = vmul.f32 %v8180_v28, %v7384_v13  ;;  %v2827_v31 = vmul.f32 %v8181_v36, %v7384_v13  ;;  %v2849_v55 = vmul.f32 %v8182_v16, %v7384_v13 }
 0x9d3   : > { %v4290_v12 = vpop.f32.mrb[31].mxu1  ;;  %v2702_v1 = vadd.f32 %v7222_v37, %v2697_v14  ;;  %v2722_v46 = vadd.f32 %v7238_v51, %v2717_v2  ;;  %v2744_v33 = vadd.f32 %v7249_v8, %v2739_v24  ;;  %v2766_v43 = vadd.f32 %v7259_v15, %v2761_v60 }
 0x9d4   : > { %v2788_v28 = vadd.f32 %v7270_v4, %v2783_v3  ;;  %v2810_v10 = vadd.f32 %v7288_v20, %v2805_v62  ;;  %v2832_v36 = vadd.f32 %v7314_v50, %v2827_v31  ;;  %v8188_v16 = vstv %s7348_s11  ;;  %s7477_s11 = sld [smem:[#allocation2 + $0x1bb]] }
 0x9d5   : > { %v2705_v12 = vadd.f32 %v2703_v0, %v2702_v1  ;;  %v2725_v37 = vadd.f32 %v2723_v58, %v2722_v46  ;;  %v2747_v51 = vadd.f32 %v2745_v5, %v2744_v33  ;;  %v2769_v8 = vadd.f32 %v2767_v48, %v2766_v43 }
 0x9d6   : > { %v2791_v15 = vadd.f32 %v2789_v22, %v2788_v28  ;;  %v2813_v62 = vadd.f32 %v2811_v9, %v2810_v10  ;;  %v2854_v2 = vadd.f32 %v2852_v47, %v2849_v55  ;;  %v2965_v31 = vstv %s7366_s23  ;;  %s8886_s23 = sld [smem:[#allocation39_spill]] }
 0x9d7   : > { %v2707_v4 = vmax.f32 %v2705_v12, 0.0  ;;  %v2727_v20 = vmax.f32 %v2725_v37, 0.0  ;;  %v2749_v24 = vmax.f32 %v2747_v51, 0.0  ;;  %v8195_v50 = vstv %s7382_s17  ;;  %s8874_s17 = sld [smem:[#allocation62_spill]] }
 0x9d8   : > { %v2835_v33 = vadd.f32 %v2833_v57, %v2832_v36  ;;  %v2984_v28 = vmul.f32 %v7375_v53, %v8193_v26  ;;  %v8201_v55 = vstv %s7394_s13  ;;  %v3006_v47 = vmul.f32 %v7375_v53, %v8188_v16  ;;  %s8879_s13 = sld [smem:[#allocation45_spill]] }
 0x9d9   : > { %v2710_v46 = vmul.f32 %v2708_v6, %v2707_v4  ;;  %v2730_v43 = vmul.f32 %v2728_v38, %v2727_v20  ;;  %v2771_v36 = vmax.f32 %v2769_v8, 0.0  ;;  %v8203_v14 = vstv %s7408_s4  ;;  %s8883_s4 = sld [smem:[#allocation48_spill]] }
 0x9da   : > { %v2752_v10 = vmul.f32 %v2750_v35, %v2749_v24  ;;  %v2793_v60 = vmax.f32 %v2791_v15, 0.0  ;;  %v2815_v3 = vmax.f32 %v2813_v62, 0.0  ;;  %v2857_v1 = vadd.f32 %v8196_v59, %v2854_v2 }
 0x9db   : > { %v2732_v12 = vadd.f32 %v2730_v43, %v2710_v46  ;;  %v2871_v37 = vmul.f32 %v2869_v63, %v7384_v13  ;;  %v8867_v51 = vstv %s7253_s15  ;;  %v8868_v16 = vstv %s7280_s27  ;;  %s7490_s15 = sld [smem:[#allocation2 + $0x1af]] }
 0x9dc   : > { %v2893_v4 = vmul.f32 %v8867_v51, %v7384_v13  ;;  %v2915_v20 = vmul.f32 %v8868_v16, %v7384_v13  ;;  %v2837_v8 = vmax.f32 %v2835_v33, 0.0  ;;  %v8869_v24 = vstv %s7304_s28  ;;  %s7511_s28 = sld [smem:[#allocation2 + $0x1be]] }
 0x9dd   : > { %v2937_v15 = vmul.f32 %v8869_v24, %v7384_v13  ;;  %v8872_v62 = vstv %s7317_s24  ;;  %v2981_v46 = vmul.f32 %v8195_v50, %v7384_v13  ;;  %v2754_v16 = vadd.f32 %v2752_v10, %v2732_v12  ;;  %s7508_s24 = sld [smem:[#allocation2 + $0x1bd]] }
 0x9de   : > { %v2959_v2 = vmul.f32 %v8872_v62, %v7384_v13  ;;  %v8873_v43 = vstv %s8866_s21  ;;  %v2876_v33 = vadd.f32 %v7339_v17, %v2871_v37  ;;  %v2898_v24 = vadd.f32 %v7355_v18, %v2893_v4 }
 0x9df   : > { %v2774_v51 = vmul.f32 %v8873_v43, %v2771_v36  ;;  %v2920_v26 = vadd.f32 %v7364_v61, %v2915_v20  ;;  %v2942_v62 = vadd.f32 %v7380_v34, %v2937_v15  ;;  %v3003_v59 = vmul.f32 %v8201_v55, %v7384_v13 }
 0x9e0   : > { %v2964_v50 = vadd.f32 %v7391_v11, %v2959_v2  ;;  %v7502_v10 = vpop.f32.mrb[16].mxu0  ;;  %v8875_v12 = vstv %s8870_s20  ;;  %v8876_v37 = vstv %s7243_s16  ;;  %v2986_v61 = vadd.f32 %v2984_v28, %v2981_v46  ;;  %s7522_s16 = sld [smem:[#allocation2 + $0x1bf]] }
 0x9e1   : > { %v2776_v36 = vadd.f32 %v2774_v51, %v2754_v16  ;;  %v2796_v17 = vmul.f32 %v8875_v12, %v2793_v60  ;;  %v2879_v18 = vadd.f32 %v8876_v37, %v2876_v33  ;;  %v4271_v4 = vpop.f32.mrb[17].mxu0  ;;  %v2987_v11 = vstv %s7443_s9  ;;  %s8889_s9 = sld [smem:[#allocation42_spill]] }
 0x9e2   : > { %v8210_v34 = vstv %s7451_s14  ;;  %v3023_v20 = vstv %s7457_s19  ;;  %v3028_v60 = vmul.f32 %v7375_v53, %v8203_v14  ;;  %v8877_v2 = vstv %s8874_s17  ;;  %s8895_s14 = sld [smem:[#allocation49_spill]]  ;;  %s4877_s19 = smov 72  }
 0x9e3   : > { %v2798_v15 = vadd.f32 %v2796_v17, %v2776_v36  ;;  %v2818_v28 = vmul.f32 %v8877_v2, %v2815_v3  ;;  %v2859_v46 = vmax.f32 %v2857_v1, 0.0  ;;  %v8878_v16 = vstv %s7263_s29 }
 0x9e4   : > { %v2901_v43 = vadd.f32 %v8878_v16, %v2898_v24  ;;  %v8880_v51 = vstv %s7291_s7  ;;  %v8881_v12 = vstv %s7306_s10  ;;  %v2967_v4 = vadd.f32 %v2965_v31, %v2964_v50  ;;  %s8885_s10 = sld [smem:[#allocation53_spill]]  ;;  %s8888_s7 = sld [smem:[#allocation47_spill]] }
 0x9e5   : > { %v2923_v33 = vadd.f32 %v8880_v51, %v2920_v26  ;;  %v2945_v37 = vadd.f32 %v8881_v12, %v2942_v62  ;;  %v3008_v55 = vadd.f32 %v3006_v47, %v3003_v59  ;;  %v2820_v53 = vadd.f32 %v2818_v28, %v2798_v15 }
 0x9e6   : > { %v8882_v36 = vstv %s7213_s8  ;;  %v2881_v3 = vmax.f32 %v2879_v18, 0.0  ;;  %v2989_v1 = vadd.f32 %v2987_v11, %v2986_v61  ;;  %v2948_v2 = vstv %s7477_s11  ;;  %s4878_s11 = smov 8  }
 0x9e7   : > { %v2840_v17 = vmul.f32 %v8882_v36, %v2837_v8  ;;  %v8213_v24 = vstv %s7482_s22  ;;  %v8209_v16 = vstv %s7490_s15  ;;  %v8884_v14 = vstv %s7265_s0  ;;  %s8893_s0 = sld [smem:[#allocation63_spill]]  ;;  %s8903_s22 = sld [smem:[#allocation54_spill]] }
 0x9e8   : > { %v7540_v26 = vmul.f32 %v7066_v39, %v8884_v14  ;;  %v8887_v50 = vstv %s8879_s13  ;;  %v2903_v8 = vmax.f32 %v2901_v43, 0.0  ;;  %v3025_v62 = vmul.f32 %v3023_v20, %v7384_v13 }
 0x9e9   : > { %v2842_v59 = vadd.f32 %v2840_v17, %v2820_v53  ;;  %v2862_v47 = vmul.f32 %v8887_v50, %v2859_v46  ;;  %v2925_v18 = vmax.f32 %v2923_v33, 0.0  ;;  %v2947_v61 = vmax.f32 %v2945_v37, 0.0 }
 0x9ea   : > { %v2969_v15 = vmax.f32 %v2967_v4, 0.0  ;;  %v3011_v28 = vadd.f32 %v8210_v34, %v3008_v55  ;;  %v8890_v51 = vstv %s8883_s4  ;;  %v2991_v53 = vmax.f32 %v2989_v1, 0.0  ;;  %s8896_s4 = sld [smem:[#allocation44_spill]] }
 0x9eb   : > { %v2864_v14 = vadd.f32 %v2862_v47, %v2842_v59  ;;  %v2884_v12 = vmul.f32 %v8890_v51, %v2881_v3  ;;  %v3030_v46 = vadd.f32 %v3028_v60, %v3025_v62  ;;  %v8212_v36 = vstv %s7508_s24  ;;  %v7568_v1 = vpop.f32.mrb[20].mxu0 }
 0x9ec   : > { %v3014_v43 = vstv %s7511_s28  ;;  %v8891_v17 = vstv %s8885_s10  ;;  %v8892_v33 = vstv %s8886_s23  ;;  %v8894_v4 = vstv %s8888_s7  ;;  %s7576_s23 = sld [smem:[#allocation2 + $0x1c0]]  ;;  %s8948_s10 = sld [smem:[#allocation36_spill]] }
 0x9ed   : > { %v7556_v13 = vmul.f32 %v7066_v39, %v8891_v17  ;;  %v7561_v37 = vmul.f32 %v7066_v39, %v8892_v33  ;;  %v2886_v55 = vadd.f32 %v2884_v12, %v2864_v14  ;;  %v2906_v59 = vmul.f32 %v8894_v4, %v2903_v8  ;;  %v4283_v14 = vpop.f32.mrb[21].mxu0 }
 0x9ee   : > { %v3033_v60 = vadd.f32 %v8209_v16, %v3030_v46  ;;  %v3036_v3 = vstv %s7522_s16  ;;  %v8897_v50 = vstv %s8889_s9  ;;  %v2950_v62 = vmul.f32 %v2948_v2, %v2947_v61  ;;  %v2638_v34 = vpop.f32.mrb[22].mxu0  ;;  %s8955_s16 = sld [smem:[#allocation85_spill]] }
 0x9ef   : > { %v2928_v47 = vmul.f32 %v8897_v50, %v2925_v18  ;;  %v2972_v51 = vmul.f32 %v8213_v24, %v2969_v15  ;;  %v3013_v17 = vmax.f32 %v3011_v28, 0.0  ;;  %v2908_v12 = vadd.f32 %v2906_v59, %v2886_v55  ;;  %v4284_v14 = vpop.f32.mrb[23].mxu0 }
 0x9f0   : > { %v2994_v8 = vmul.f32 %v8212_v36, %v2991_v53  ;;  %v8898_v46 = vstv %s8852_s12  ;;  %v8899_v4 = vstv %s8893_s0  ;;  %v8900_v18 = vstv %s8895_s14  ;;  %s8921_s14 = sld [smem:[#allocation57_spill]]  ;;  %s4881_s12 = smov [#allocation15]  }
 0x9f1   : > { %v2696_v33 = vmul.f32 %v8898_v46, %v7568_v1  ;;  %v2716_v16 = vmul.f32 %v8899_v4, %v7568_v1  ;;  %v2738_v61 = vmul.f32 %v8900_v18, %v7568_v1  ;;  %v8902_v15 = vstv %s7182_s25  ;;  %s4880_s25 = smov 24   ;;  %s4773_s0 = sshll.u32 %s4881_s12, 4  ;;  %s4774_s0 = int_to_ptr.vmem [resolvable:$false] %s4773_s0 }
 0x9f2   : > { %v2760_v28 = vmul.f32 %v8902_v15, %v7568_v1  ;;  %v8904_v55 = vstv %s7190_s2  ;;  %v8905_v59 = vstv %s8896_s4  ;;  %v2930_v34 = vadd.f32 %v2928_v47, %v2908_v12  ;;  %s8915_s2 = sld [smem:[#allocation58_spill]]  ;;  %s8916_s4 = sld [smem:[#allocation76_spill]] }
 0x9f3   : > { %v2782_v53 = vmul.f32 %v8904_v55, %v7568_v1  ;;  %v2804_v50 = vmul.f32 %v8905_v59, %v7568_v1  ;;  %v3035_v46 = vmax.f32 %v3033_v60, 0.0  ;;  %v2701_v4 = vadd.f32 %v7285_v41, %v2696_v33 }
 0x9f4   : > { %v2721_v18 = vadd.f32 %v7296_v45, %v2716_v16  ;;  %v2743_v36 = vadd.f32 %v7299_v19, %v2738_v61  ;;  %v2765_v15 = vadd.f32 %v7309_v21, %v2760_v28  ;;  %v2952_v59 = vadd.f32 %v2950_v62, %v2930_v34 }
 0x9f5   : > { %v2787_v55 = vadd.f32 %v7322_v27, %v2782_v53  ;;  %v2809_v24 = vadd.f32 %v7325_v42, %v2804_v50  ;;  %v2704_v14 = vadd.f32 %v2703_v0, %v2701_v4  ;;  %v8908_v41 = vstv %s8903_s22  ;;  %s8930_s22 = sld [smem:[#allocation51_spill]] }
 0x9f6   : > { %v2724_v60 = vadd.f32 %v2723_v58, %v2721_v18  ;;  %v2826_v45 = vmul.f32 %v8908_v41, %v7568_v1  ;;  %v2746_v19 = vadd.f32 %v2745_v5, %v2743_v36  ;;  %v2768_v21 = vadd.f32 %v2767_v48, %v2765_v15 }
 0x9f7   : > { %v2790_v27 = vadd.f32 %v2789_v22, %v2787_v55  ;;  %v2812_v42 = vadd.f32 %v2811_v9, %v2809_v24  ;;  %v2974_v16 = vadd.f32 %v2972_v51, %v2952_v59  ;;  %v2706_v0 = vmax.f32 %v2704_v14, 0.0 }
 0x9f8   : > { %v2726_v47 = vmax.f32 %v2724_v60, 0.0  ;;  %v2831_v58 = vadd.f32 %v7331_v30, %v2826_v45  ;;  %v3016_v62 = vmul.f32 %v3014_v43, %v3013_v17  ;;  %v3042_v5 = vstv %s7576_s23 }
 0x9f9   : > { %v2748_v36 = vmax.f32 %v2746_v19, 0.0  ;;  %v2770_v48 = vmax.f32 %v2768_v21, 0.0  ;;  %v2996_v22 = vadd.f32 %v2994_v8, %v2974_v16  ;;  %v2709_v9 = vmul.f32 %v2708_v6, %v2706_v0 }
 0x9fa   : > { %v2729_v24 = vmul.f32 %v2728_v38, %v2726_v47  ;;  %v2792_v51 = vmax.f32 %v2790_v27, 0.0  ;;  %v3038_v12 = vmul.f32 %v3036_v3, %v3035_v46  ;;  %v2814_v33 = vmax.f32 %v2812_v42, 0.0 }
 0x9fb   : > { %v2751_v30 = vmul.f32 %v2750_v35, %v2748_v36  ;;  %v2834_v17 = vadd.f32 %v2833_v57, %v2831_v58  ;;  %v3018_v61 = vadd.f32 %v3016_v62, %v2996_v22  ;;  %v8913_v53 = vstv %s8866_s21  ;;  %s8960_s21 = sld [smem:[#allocation32_spill]] }
 0x9fc   : > { %v2731_v28 = vadd.f32 %v2729_v24, %v2709_v9  ;;  %v2773_v50 = vmul.f32 %v8913_v53, %v2770_v48  ;;  %v8914_v8 = vstv %s8910_s30  ;;  %v2870_v38 = vmul.f32 %v2869_v63, %v7568_v1  ;;  %s8956_s30 = sld [smem:[#allocation34_spill]] }
 0x9fd   : > { %v2848_v6 = vmul.f32 %v8914_v8, %v7568_v1  ;;  %v8917_v34 = vstv %s8911_s1  ;;  %v8919_v46 = vstv %s7280_s27  ;;  %v8920_v4 = vstv %s8912_s6  ;;  %s8934_s27 = sld [smem:[#allocation56_spill]] }
 0x9fe   : > { %v2892_v35 = vmul.f32 %v8917_v34, %v7568_v1  ;;  %v2914_v57 = vmul.f32 %v8919_v46, %v7568_v1  ;;  %v2936_v18 = vmul.f32 %v8920_v4, %v7568_v1  ;;  %v3040_v15 = vadd.f32 %v3038_v12, %v3018_v61 }
 0x9ff   : > { %v2753_v55 = vadd.f32 %v2751_v30, %v2731_v28  ;;  %v8922_v59 = vstv %s8870_s20  ;;  %v2853_v60 = vadd.f32 %v7343_v56, %v2848_v6  ;;  %v2836_v63 = vmax.f32 %v2834_v17, 0.0  ;;  %s8928_s20 = sld [smem:[#allocation38_spill]] }
 0xa00   : > { %v2795_v14 = vmul.f32 %v8922_v59, %v2792_v51  ;;  %v2875_v41 = vadd.f32 %v7351_v32, %v2870_v38  ;;  %v2897_v45 = vadd.f32 %v7369_v44, %v2892_v35  ;;  %v2919_v19 = vadd.f32 %v7540_v26, %v2914_v57 }
 0xa01   : > { %v7658_v21 = vadd.f32 %v3042_v5, %v3040_v15  ;;  %v2775_v27 = vadd.f32 %v2773_v50, %v2753_v55  ;;  %v8925_v42 = vstv %s8915_s2  ;;  %v8926_v0 = vstv %s8916_s4  ;;  %s8957_s2 = sld [smem:[#allocation88_spill]] }
 0xa02   : > { %v2856_v16 = vadd.f32 %v8925_v42, %v2853_v60  ;;  %v2958_v47 = vmul.f32 %v8926_v0, %v7568_v1  ;;  %v8927_v56 = vstv %s8918_s5  ;;  %v8929_v32 = vstv %s7263_s29  ;;  %s8938_s29 = sld [smem:[#allocation48_spill]] }
 0xa03   : > { %v2878_v58 = vadd.f32 %v8927_v56, %v2875_v41  ;;  %v2900_v62 = vadd.f32 %v8929_v32, %v2897_v45  ;;  %v2941_v44 = vadd.f32 %v7556_v13, %v2936_v18  ;;  %v8931_v36 = vstv %s8921_s14 }
 0xa04   : > { %v2983_v26 = vmul.f32 %v7066_v39, %v8931_v36  ;;  %v3048_v48 = vsel %vm1134_vm3, %v7658_v21, -inf  ;;  %v2797_v22 = vadd.f32 %v2795_v14, %v2775_v27  ;;  %v8933_v9 = vstv %s8874_s17  ;;  %s8961_s17 = sld [smem:[#allocation30_spill]] }
 0xa05   : > { %v2817_v24 = vmul.f32 %v8933_v9, %v2814_v33  ;;  %v2858_v51 = vmax.f32 %v2856_v16, 0.0  ;;  %3049 = vmax.xlane.f32.xlu1 %v3048_v48  ;;  %v8935_v12 = vstv %s7213_s8  ;;  %v8936_v17 = vstv %s8923_s26  ;;  %s8946_s8 = sld [smem:[#allocation70_spill]] }
 0xa06   : > { %v2839_v30 = vmul.f32 %v8935_v12, %v2836_v63  ;;  %v2922_v61 = vadd.f32 %v8936_v17, %v2919_v19  ;;  %v8937_v13 = vstv %s8924_s3  ;;  %v2880_v50 = vmax.f32 %v2878_v58, 0.0 }
 0xa07   : > { %v3005_v28 = vmul.f32 %v7066_v39, %v8937_v13  ;;  %v2819_v53 = vadd.f32 %v2817_v24, %v2797_v22  ;;  %v2963_v8 = vadd.f32 %v7561_v37, %v2958_v47  ;;  %v8940_v6 = vstv %s8928_s20 }
 0xa08   : > { %v2980_v33 = vmul.f32 %v8940_v6, %v7568_v1  ;;  %v2902_v38 = vmax.f32 %v2900_v62, 0.0  ;;  %v8941_v34 = vstv %s8930_s22  ;;  %v8943_v46 = vstv %s8932_s18 }
 0xa09   : > { %v2944_v35 = vadd.f32 %v8941_v34, %v2941_v44  ;;  %v3027_v57 = vmul.f32 %v7066_v39, %v8943_v46  ;;  %v2841_v4 = vadd.f32 %v2839_v30, %v2819_v53  ;;  %v8944_v18 = vstv %s8879_s13  ;;  %s3619_s13 = scalar_lea.sflag [#allocation4], %s8960_s21 }
 0xa0a   : > { %v2861_v15 = vmul.f32 %v8944_v18, %v2858_v51  ;;  %v2985_v55 = vadd.f32 %v2983_v26, %v2980_v33  ;;  %v8945_v59 = vstv %s8934_s27  ;;  %v2924_v14 = vmax.f32 %v2922_v61, 0.0  ;;  %s8958_s27 = sld [smem:[#allocation87_spill]]  ;;  %p8964_p4 = scmp.ne.s32.totalorder %s8961_s17, 0 }
 0xa0b   : > { %v3002_v37 = vmul.f32 %v8945_v59, %v7568_v1  ;;  %v3024_v60 = vmul.f32 %v3023_v20, %v7568_v1  ;;  %v8947_v41 = vstv %s8938_s29  ;;  %v2966_v39 = vadd.f32 %v2965_v31, %v2963_v8  ;;  %s8959_s29 = sld [smem:[#allocation27_spill]] }
 0xa0c   : > { %v2863_v63 = vadd.f32 %v2861_v15, %v2841_v4  ;;  %v2883_v45 = vmul.f32 %v8947_v41, %v2880_v50  ;;  %v2946_v27 = vmax.f32 %v2944_v35, 0.0  ;;  %v8949_v16 = vstv %s8888_s7  ;;  %v3257_v41 = vld [vmem:[%s8955_s16 + $0x8] sm:$0xff] }
 0xa0d   : > { %v3007_v19 = vadd.f32 %v3005_v28, %v3002_v37  ;;  %v2905_v0 = vmul.f32 %v8949_v16, %v2902_v38  ;;  %v2988_v47 = vadd.f32 %v2987_v11, %v2985_v55  ;;  %v3029_v56 = vadd.f32 %v3027_v57, %v3024_v60 }
 0xa0e   : > { %v2885_v42 = vadd.f32 %v2883_v45, %v2863_v63  ;;  %v8950_v32 = vstv %s8889_s9  ;;  %v2968_v1 = vmax.f32 %v2966_v39, 0.0  ;;  %v8951_v62 = vstv %s8946_s8  ;;  %s4879_s9 = smov 16   ;;  %v3258_v45 = vld [vmem:[%s8955_s16 + $0x10] sm:$0xff] }
 0xa0f   : > { %v2927_v20 = vmul.f32 %v8950_v32, %v2924_v14  ;;  %v3010_v44 = vadd.f32 %v8951_v62, %v3007_v19  ;;  %v2949_v31 = vmul.f32 %v2948_v2, %v2946_v27  ;;  %v2990_v26 = vmax.f32 %v2988_v47, 0.0  ;;  %v3259_v19 = vld [vmem:[%s8955_s16 + $0x18] sm:$0xff] }
 0xa10   : > { %v2907_v58 = vadd.f32 %v2905_v0, %v2885_v42  ;;  %v8952_v48 = vstv %s7490_s15  ;;  %v8953_v24 = vstv %s8948_s10  ;;  %v8954_v30 = vstv %s7508_s24  ;;  %s8962_s10 = sshll.u32 %s8960_s21, 4  ;;  %s8963_s15 = sld [smem:[#allocation90_spill]] }
 0xa11   : > { %v3032_v22 = vadd.f32 %v8952_v48, %v3029_v56  ;;  %v2971_v51 = vmul.f32 %v8953_v24, %v2968_v1  ;;  %v3012_v11 = vmax.f32 %v3010_v44, 0.0  ;;  %v2993_v17 = vmul.f32 %v8954_v30, %v2990_v26  ;;  %v4535_v24 = vld [vmem:[%s8957_s2 + $0x8] sm:$0xff]   ;;  %s4123_s8 = sshll.u32 %s8959_s29, 8 }
 0xa12   : > { %v2929_v36 = vadd.f32 %v2927_v20, %v2907_v58  ;;  %v4364_v27 = vpack.c.bf16 %v3259_v19, %v3258_v45 }
 0xa13   : > { %v3034_v61 = vmax.f32 %v3032_v22, 0.0  ;;  %v3015_v28 = vmul.f32 %v3014_v43, %v3012_v11 }
 0xa14   : > { %v2951_v9 = vadd.f32 %v2949_v31, %v2929_v36 }
 0xa15   : > { %v3037_v53 = vmul.f32 %v3036_v3, %v3034_v61  ;;  %v4582_v61 = vld [vmem:[%s8956_s30 + $0x8] sm:$0xff] }
 0xa16   : > { %v2973_v12 = vadd.f32 %v2971_v51, %v2951_v9  ;;  %4524 = vrot.lane.b32.xlu1 %v5285_v23, %s4877_s19  ;;  %v4533_v9 = vld [vmem:[#allocation12 + $0x8] sm:$0xff]   ;;  %v4098_v51 = vld [vmem:[#allocation13] ss:$0 sm:$0xff]  ;;  %s7805_s28 = scalar_lea.hbm %s8963_s15, %s4123_s8 }
 0xa18   : > { %v2995_v13 = vadd.f32 %v2993_v17, %v2973_v12 }
 0xa1a   : > { %v3017_v2 = vadd.f32 %v3015_v28, %v2995_v13  ;;  %3227 = vrot.lane.b32.xlu1 %v6912_v49, %s4878_s11  ;;  %v4583_v28 = vld [vmem:[%s8956_s30] sm:$0xff] }
 0xa1c   : > { %v3039_v50 = vadd.f32 %v3037_v53, %v3017_v2 }
 0xa1e   : > { %v3043_v8 = vadd.f32 %v3042_v5, %v3039_v50  ;;  %3229 = vrot.lane.b32.xlu1 %v6753_v7, %s4878_s11 }
 0xa20   : > { %v3045_v6 = vsel %vm1134_vm3, %v3043_v8, -inf }
 0xa21   : > { %3046 = vmax.xlane.f32.xlu0 %v3045_v6 }
 0xa22   : > { %3237 = vrot.lane.b32.xlu1 %v7311_v29, %s4879_s9 }
 0xa92   : > { %v3050_v23 = vpop.xlane.xlu1 %3049 }
 0xa93   : > { %v3052_v43 = vsub.f32 %v7658_v21, %v3050_v23 }
 0xa95   : > { %v3055_v3 = vmul.f32 1.442695, %v3052_v43 }
 0xa96   : > { %v4525_v33 = vpop.permute.xlu1 %4524 }
 0xa97   : > { %4562 = vpow2.f32 %v3055_v3  ;;  %v4527_v38 = vunpack.i.h.bf16 %v4525_v33  ;;  %v4526_v34 = vunpack.i.l.bf16 %v4525_v33 }
 0xa99   : > { %v4358_v49 = vpack.c.bf16 %v4527_v38, %v4526_v34 }
 0xa9a   : > { %v3228_v56 = vpop.permute.xlu1 %3227 }
 0xa9b   : > { %4359 = vmatpush3.bf16.msra.mxu1 %v4358_v49  ;;  %v3249_v1 = vsel %vm687_vm2, %v6220_v40, %v3228_v56  ;;  %v4532_v40 = vld [vmem:[#allocation12] sm:$0xff]  }
 0xa9c   : > { %4316 = vmatprep.subr.bf16.mxu1 %v8465_v52 }
 0xa9e   : > { %v3230_v58 = vpop.permute.xlu1 %3229 }
 0xa9f   : > { %v3250_v44 = vsel %vm687_vm2, %v6171_v54, %v3230_v58  ;;  %v4534_v54 = vld [vmem:[%s8957_s2] sm:$0xff]   ;;  %v4101_v58 = vld [vmem:[#allocation13 + $0x1] ss:$0 sm:$0xff] }
 0xaa1   : > { %v4563_v5 = vpop.eup %4562 }
 0xaa2   : > { %v3060_v35 = vsel %vm1134_vm3, %v4563_v5, 0.0  ;;  %v3238_v32 = vpop.permute.xlu1 %3237 }
 0xaa3   : > { %3061 = vadd.xlane.f32.xlu0 %v3060_v35  ;;  %v3252_v26 = vsel %vm1134_vm3, %v3250_v44, %v3238_v32 }
 0xaae   : > { %v3047_v7 = vpop.xlane.xlu0 %3046 }
 0xaaf   : > { %v3051_v46 = vsub.f32 %v3043_v8, %v3047_v7 }
 0xab1   : > { %v3053_v57 = vmul.f32 1.442695, %v3051_v46 }
 0xab3   : > { %4564 = vpow2.f32 %v3053_v57 }
 0xabd   : > { %v4565_v29 = vpop.eup %4564 }
 0xabe   : > { %v3057_v21 = vsel %vm1134_vm3, %v4565_v29, 0.0 }
 0xabf   : > { %3058 = vadd.xlane.f32.xlu0 %v3057_v21 }
 0xad5   : > { %4519 = vrot.lane.b32.xlu0 %v5289_v25, %s4877_s19  ;;  %s529_s19 = scalar_lea.vmem [#allocation15], %s8962_s10 }
 0xad9   : > { %3235 = vrot.lane.b32.xlu0 %v7502_v10, %s4879_s9  ;;  %v3256_v10 = vld [vmem:[%s8955_s16] sm:$0xff]  ;;  %s3632_s9 = sshll.u32 %s529_s19, 4  ;;  %s7808_s9 = int_to_ptr.vmem [resolvable:$true] %s3632_s9 }
 0xada   : > { %v4360_v39 = vpack.c.bf16 %v3257_v41, %v3256_v10  ;;  %s4769_s23 = scalar_lea.vmem %s7808_s9, 256  ;;  %p4776_p8 = scmp.lt.s32.totalorder %s7808_s9, %s4774_s0 }
 0xadb   : > { %p4770_p13 = scmp.ne.s32.totalorder %s7808_s9, %s4769_s23 }
 0xadd   : > { %p4771_p11 = pnand %p4770_p13, %p8964_p4 }
 0xadf   : > { %p4772_p12 = pneg %p4771_p11 }
 0xb30   : > { %v3062_v4 = vpop.xlane.xlu0 %3061 }
 0xb31   : > { %4566 = vrcp.f32 %v3062_v4 }
 0xb3b   : > { %v4567_v18 = vpop.eup %4566 }
 0xb3c   : > { %v3066_v15 = vmul.f32 %v4567_v18, %v4563_v5 }
 0xb3e   : > { %4303 = vmatmul.mubr.msk.f32.vlgmr.msra.gmra.mrb[26].mxu1 %vm1134_vm3, %v3066_v15 }
 0xb3f   : > { %4320 = vmatprep.mubr.msk.bf16.mxu1 %vm4869_vm0, %v8465_v52  ;;  %4317 = vmatpush3.bf16.msra.mxu1 %v4532_v40  ;;  %v4537_v40 = vld [vmem:[%s8957_s2 + $0x18] sm:$0xff]  }
 0xb40   : > { %4318 = vmatprep.subr.bf16.mxu1 %v8465_v52 }
 0xb43   : > { %4319 = vmatpush3.bf16.msra.mxu1 %v4533_v9  ;;  %v4103_v9 = vld [vmem:[%s8958_s27] ss:$0 sm:$0xff] }
 0xb4c   : > { %v3059_v55 = vpop.xlane.xlu0 %3058 }
 0xb4d   : > { %4568 = vrcp.f32 %v3059_v55 }
 0xb50   : > { %v4520_v59 = vpop.permute.xlu0 %4519 }
 0xb51   : > { %v4522_v37 = vunpack.i.h.bf16 %v4520_v59  ;;  %v4521_v14 = vunpack.i.l.bf16 %v4520_v59 }
 0xb53   : > { %v4355_v60 = vpack.c.bf16 %v4522_v37, %v4521_v14 }
 0xb54   : > { %v3236_v20 = vpop.permute.xlu0 %3235 }
 0xb55   : > { %4356 = vmatpush3.bf16.msra.mxu0 %v4355_v60  ;;  %v3251_v36 = vsel %vm1134_vm3, %v3249_v1, %v3236_v20  ;;  %v4102_v1 = vld [vmem:[#allocation13 + $0x2] ss:$0 sm:$0xff] }
 0xb56   : > { %4361 = vmatprep.subr.bf16.mxu0 %v4360_v39 }
 0xb57   : > { %v4569_v63 = vpop.eup %4568 }
 0xb58   : > { %v3065_v25 = vmul.f32 %v4569_v63, %v4565_v29 }
 0xb5a   : > { %4296 = vmatmul.mubr.msk.f32.vlgmr.msra.gmra.mrb[18].mxu0 %vm1134_vm3, %v3065_v25 }
 0xb5b   : > { %4363 = vmatpush3.bf16.msra.mxu0 %v4360_v39 }
 0xb5c   : > { %4365 = vmatprep.subr.bf16.mxu0 %v4364_v27 }
 0xb5f   : > { %4367 = vmatpush3.bf16.msra.mxu0 %v4364_v27 }
 0xb60   : > { %4324 = vmatprep.subr.bf16.mxu0 %v8465_v52 }
 0xc11   : > { %v3221_v42 = vpop.f32.mrb[26].mxu1 }
 0xc12   : > { %3245 = vrot.lane.b32.xlu1 %v3221_v42, %s4880_s25  ;;  %v4304_v16 = vpop.f32.mrb[27].mxu1 }
 0xc2d   : > { %v3142_v0 = vpop.f32.mrb[18].mxu0 }
 0xc2e   : > { %3243 = vrot.lane.b32.xlu0 %v3142_v0, %s4880_s25  ;;  %v4297_v47 = vpop.f32.mrb[19].mxu0  ;;  %s4775_s25 = scalar_lea.vmem %s4774_s0, 512 }
 0xc2f   : > { %p4777_p3 = scmp.lt.s32.totalorder %s4775_s25, %s4769_s23 }
 0xc31   : > { %p4778_p2 = por %p4777_p3, %p4776_p8 }
 0xc33   : > { %p4779_p0 = pnand %p4778_p2, %p4772_p12 }
 0xc84   : > { %v3246_v62 = vpop.permute.xlu1 %3245 }
 0xc85   : > { %v3255_v22 = vsel %vm3253_vm4, %v3252_v26, %v3246_v62 }
 0xca0   : > { %v3244_v31 = vpop.permute.xlu0 %3243 }
 0xca1   : > { %v3254_v48 = vsel %vm3253_vm4, %v3251_v36, %v3244_v31 }
 0xca2   : > { %4313 = vmatprep.mubr.msk.f32.mxu0 %vm567_vm1, %v3254_v48 }
 0xca3   : > { %4314 = vmatmul.mubr.msk.f32.vlgmr.msra.gmra.mrb[24].mxu0 %vm567_vm1, %v3255_v22  ;;  %v4536_v22 = vld [vmem:[%s8957_s2 + $0x10] sm:$0xff]  }
 0xca4   : > { %4332 = vmatprep.mubr.msk.bf16.mxu0 %vm4869_vm0, %v8465_v52  ;;  %4325 = vmatpush3.bf16.msra.mxu0 %v4534_v54 }
 0xca5   : > { %4326 = vmatprep.subr.bf16.mxu0 %v8465_v52 }
 0xca8   : > { %4327 = vmatpush3.bf16.msra.mxu0 %v4535_v24 }
 0xca9   : > { %4328 = vmatprep.subr.bf16.mxu0 %v8465_v52 }
 0xcac   : > { %4329 = vmatpush3.bf16.msra.mxu0 %v4536_v22 }
 0xcad   : > { %4330 = vmatprep.subr.bf16.mxu0 %v8465_v52 }
 0xcb0   : > { %4331 = vmatpush3.bf16.msra.mxu0 %v4537_v40 }
 0xd76   : > { %v4315_v11 = vpop.f32.mrb[24].mxu0 }
 0xd77   : > { %v3343_v12 = vadd.f32 %v4315_v11, %v4098_v51  ;;  %v3337_v30 = vpop.f32.mrb[25].mxu0 }
 0xd78   : > { %v3338_v17 = vadd.f32 %v4098_v51, %v3337_v30 }
 0xd79   : > { %v3347_v13 = vadd.f32 %v4582_v61, %v3343_v12 }
 0xd7a   : > { %v3346_v2 = vadd.f32 %v4583_v28, %v3338_v17  ;;  %v4107_v28 = vld [vmem:[#allocation13 + $0x5] ss:$0 sm:$0xff] }
 0xd7b   : > { %v3355_v53 = vsel %vm567_vm1, %v3347_v13, 0.0 }
 0xd7c   : > { %v3356_v50 = vrot.slane %v3355_v53, 4  ;;  %v3348_v8 = vsel %vm567_vm1, %v3346_v2, 0.0 }
 0xd7d   : > { %v3349_v6 = vrot.slane %v3348_v8, 4 }
 0xd7e   : > { %v3357_v23 = vadd.f32 %v3356_v50, %v3355_v53 }
 0xd7f   : > { %v3350_v43 = vadd.f32 %v3349_v6, %v3348_v8 }
 0xd80   : > { %v3358_v3 = vrot.slane %v3357_v23, 2 }
 0xd81   : > { %v3351_v33 = vrot.slane %v3350_v43, 2 }
 0xd82   : > { %v3359_v38 = vadd.f32 %v3358_v3, %v3357_v23 }
 0xd83   : > { %v3352_v34 = vadd.f32 %v3351_v33, %v3350_v43 }
 0xd84   : > { %v3360_v49 = vrot.slane %v3359_v38, 1 }
 0xd85   : > { %v3353_v5 = vrot.slane %v3352_v34, 1 }
 0xd86   : > { %v3361_v35 = vadd.f32 %v3360_v49, %v3359_v38 }
 0xd87   : > { %v3354_v7 = vadd.f32 %v3353_v5, %v3352_v34 }
 0xd88   : > { %v3364_v46 = vmul.f32 0.125, %v3361_v35 }
 0xd89   : > { %v3363_v57 = vmul.f32 0.125, %v3354_v7 }
 0xd8a   : > { %v3366_v29 = vsub.f32 %v3347_v13, %v3364_v46 }
 0xd8b   : > { %v3365_v21 = vsub.f32 %v3346_v2, %v3363_v57 }
 0xd8c   : > { %v3368_v4 = vmul.f32 %v3366_v29, %v3366_v29 }
 0xd8d   : > { %v3367_v18 = vmul.f32 %v3365_v21, %v3365_v21 }
 0xd8e   : > { %v3376_v15 = vsel %vm567_vm1, %v3368_v4, 0.0 }
 0xd8f   : > { %v3377_v55 = vrot.slane %v3376_v15, 4  ;;  %v3369_v59 = vsel %vm567_vm1, %v3367_v18, 0.0 }
 0xd90   : > { %v3370_v37 = vrot.slane %v3369_v59, 4 }
 0xd91   : > { %v3378_v14 = vadd.f32 %v3377_v55, %v3376_v15 }
 0xd92   : > { %v3371_v60 = vadd.f32 %v3370_v37, %v3369_v59 }
 0xd93   : > { %v3379_v63 = vrot.slane %v3378_v14, 2 }
 0xd94   : > { %v3372_v25 = vrot.slane %v3371_v60, 2 }
 0xd95   : > { %v3380_v10 = vadd.f32 %v3379_v63, %v3378_v14 }
 0xd96   : > { %v3373_v41 = vadd.f32 %v3372_v25, %v3371_v60 }
 0xd97   : > { %v3381_v45 = vrot.slane %v3380_v10, 1 }
 0xd98   : > { %v3374_v39 = vrot.slane %v3373_v41, 1 }
 0xd99   : > { %v3382_v19 = vadd.f32 %v3381_v45, %v3380_v10 }
 0xd9a   : > { %v3375_v27 = vadd.f32 %v3374_v39, %v3373_v41 }
 0xd9b   : > { %v3384_v42 = vmul.f32 0.125, %v3382_v19 }
 0xd9c   : > { %v3383_v16 = vmul.f32 0.125, %v3375_v27 }
 0xd9d   : > { %v3386_v0 = vadd.f32 1e-05, %v3384_v42 }
 0xd9e   : > { %v3385_v47 = vadd.f32 1e-05, %v3383_v16 }
 0xd9f   : > { %4570 = vrsqrt.f32 %v3386_v0 }
 0xda0   : > { %4572 = vrsqrt.f32 %v3385_v47 }
 0xda9   : > { %v4571_v56 = vpop.eup %4570 }
 0xdaa   : > { %v4573_v32 = vpop.eup %4572  ;;  %v3390_v20 = vmul.f32 %v4571_v56, %v3366_v29 }
 0xdab   : > { %v3389_v62 = vmul.f32 %v4573_v32, %v3365_v21 }
 0xdac   : > { %v3397_v44 = vmul.f32 %v4101_v58, %v3390_v20 }
 0xdad   : > { %v3396_v36 = vmul.f32 %v4101_v58, %v3389_v62 }
 0xdae   : > { %v3404_v31 = vadd.f32 %v4102_v1, %v3397_v44 }
 0xdaf   : > { %v3403_v26 = vadd.f32 %v4102_v1, %v3396_v36  ;;  %v4113_v36 = vld [vmem:[#allocation13 + $0x3] ss:$0 sm:$0xff] }
 0xdb1   : > { %v3405_v48 = vpack.c.bf16 %v3404_v31, %v3403_v26 }
 0xdb3   : > { %4321 = vmatmul.mubr.msk.bf16.vlgmr.msra.gmra.mrb[32].mxu1 %vm567_vm1, %v3405_v48  ;;  %v4114_v48 = vld [vmem:[#allocation13 + $0x4] ss:$0 sm:$0xff] }
 0xe86   : > { %v3466_v54 = vpop.f32.mrb[32].mxu1 }
 0xe87   : > { %v3467_v24 = vadd.f32 %v4103_v9, %v3466_v54  ;;  %v4322_v51 = vpop.f32.mrb[33].mxu1 }
 0xe88   : > { %v3469_v11 = vpop.f32.mrb[34].mxu1 }
 0xe89   : > { %v3470_v12 = vadd.f32 %v4103_v9, %v3469_v11  ;;  %v4323_v30 = vpop.f32.mrb[35].mxu1  ;;  %v3473_v17 = vmax.f32 %v3467_v24, 0.0 }
 0xe8b   : > { %v3474_v61 = vmax.f32 %v3470_v12, 0.0 }
 0xe8d   : > { %v3475_v13 = vpack.c.bf16 %v3474_v61, %v3473_v17 }
 0xe8f   : > { %4333 = vmatmul.mubr.msk.bf16.vlgmr.msra.gmra.mrb[28].mxu0 %vm3513_vm5, %v3475_v13 }
 0xf62   : > { %v3551_v2 = vpop.f32.mrb[28].mxu0 }
 0xf63   : > { %v3552_v53 = vadd.f32 %v4107_v28, %v3551_v2  ;;  %v4334_v52 = vpop.f32.mrb[29].mxu0 }
 0xf64   : > { %v3554_v50 = vpop.f32.mrb[30].mxu0 }
 0xf65   : > { %v3558_v8 = vadd.f32 %v3552_v53, %v3403_v26  ;;  %v3555_v6 = vadd.f32 %v4107_v28, %v3554_v50  ;;  %v4335_v23 = vpop.f32.mrb[31].mxu0 }
 0xf67   : > { %v3560_v43 = vsel %vm567_vm1, %v3558_v8, 0.0  ;;  %v3559_v3 = vadd.f32 %v3555_v6, %v3404_v31 }
 0xf68   : > { %v3561_v33 = vrot.slane %v3560_v43, 4 }
 0xf69   : > { %v3567_v38 = vsel %vm567_vm1, %v3559_v3, 0.0 }
 0xf6a   : > { %v3562_v34 = vadd.f32 %v3561_v33, %v3560_v43  ;;  %v3568_v49 = vrot.slane %v3567_v38, 4 }
 0xf6c   : > { %v3563_v5 = vrot.slane %v3562_v34, 2  ;;  %v3569_v35 = vadd.f32 %v3568_v49, %v3567_v38 }
 0xf6e   : > { %v3564_v7 = vadd.f32 %v3563_v5, %v3562_v34  ;;  %v3570_v46 = vrot.slane %v3569_v35, 2 }
 0xf70   : > { %v3565_v57 = vrot.slane %v3564_v7, 1  ;;  %v3571_v29 = vadd.f32 %v3570_v46, %v3569_v35 }
 0xf72   : > { %v3566_v21 = vadd.f32 %v3565_v57, %v3564_v7  ;;  %v3572_v4 = vrot.slane %v3571_v29, 1 }
 0xf74   : > { %v3574_v18 = vmul.f32 0.125, %v3566_v21  ;;  %v3573_v15 = vadd.f32 %v3572_v4, %v3571_v29 }
 0xf76   : > { %v3576_v55 = vsub.f32 %v3558_v8, %v3574_v18  ;;  %v3575_v59 = vmul.f32 0.125, %v3573_v15 }
 0xf78   : > { %v3578_v37 = vmul.f32 %v3576_v55, %v3576_v55  ;;  %v3577_v14 = vsub.f32 %v3559_v3, %v3575_v59 }
 0xf7a   : > { %v3580_v60 = vsel %vm567_vm1, %v3578_v37, 0.0  ;;  %v3579_v63 = vmul.f32 %v3577_v14, %v3577_v14 }
 0xf7b   : > { %v3581_v25 = vrot.slane %v3580_v60, 4 }
 0xf7c   : > { %v3587_v10 = vsel %vm567_vm1, %v3579_v63, 0.0 }
 0xf7d   : > { %v3582_v41 = vadd.f32 %v3581_v25, %v3580_v60  ;;  %v3588_v45 = vrot.slane %v3587_v10, 4 }
 0xf7f   : > { %v3583_v39 = vrot.slane %v3582_v41, 2  ;;  %v3589_v19 = vadd.f32 %v3588_v45, %v3587_v10 }
 0xf81   : > { %v3584_v27 = vadd.f32 %v3583_v39, %v3582_v41  ;;  %v3590_v42 = vrot.slane %v3589_v19, 2 }
 0xf83   : > { %v3585_v16 = vrot.slane %v3584_v27, 1  ;;  %v3591_v0 = vadd.f32 %v3590_v42, %v3589_v19 }
 0xf85   : > { %v3586_v47 = vadd.f32 %v3585_v16, %v3584_v27  ;;  %v3592_v56 = vrot.slane %v3591_v0, 1 }
 0xf87   : > { %v3594_v58 = vmul.f32 0.125, %v3586_v47  ;;  %v3593_v32 = vadd.f32 %v3592_v56, %v3591_v0 }
 0xf89   : > { %v3596_v20 = vadd.f32 1e-05, %v3594_v58  ;;  %v3595_v1 = vmul.f32 0.125, %v3593_v32 }
 0xf8b   : > { %4574 = vrsqrt.f32 %v3596_v20  ;;  %v3597_v62 = vadd.f32 1e-05, %v3595_v1 }
 0xf8d   : > { %4576 = vrsqrt.f32 %v3597_v62 }
 0xf95   : > { %v4575_v44 = vpop.eup %4574 }
 0xf96   : > { %v3600_v31 = vmul.f32 %v4575_v44, %v3576_v55 }
 0xf97   : > { %v4577_v26 = vpop.eup %4576 }
 0xf98   : > { %v3607_v22 = vmul.f32 %v4113_v36, %v3600_v31  ;;  %v3601_v40 = vmul.f32 %v4577_v26, %v3577_v14 }
 0xf9a   : > { %v3614_v9 = vadd.f32 %v4114_v48, %v3607_v22  ;;  %v3608_v54 = vmul.f32 %v4113_v36, %v3601_v40 }
 0xf9c   : > { %v3615_v24 = vadd.f32 %v4114_v48, %v3608_v54  ;;  %3616 = vst.msk [vmem:[%s529_s19] sm:$0xff] %vm567_vm1, %v3614_v9 }
 0xf9e   : > { %3617 = vst.msk [vmem:[%s529_s19 + $0x8] sm:$0xff] %vm567_vm1, %v3615_v24 }
 0xf9f   : > { %4782 = shalt.err (!%p4779_p0)
}
 0xfa0   : > { %s4783_s30 = scalar_lea.hbm %s7805_s28, 256  ;;  %s4787_s4 = scalar_lea.hbm %s8963_s15, 512 }
 0xfa1   : > { %p4784_p1 = scmp.ne.s32.totalorder %s7805_s28, %s4783_s30  ;;  %p4788_p9 = scmp.lt.u32.totalorder %s7805_s28, %s8963_s15 }
 0xfa2   : > { %p4789_p6 = scmp.lt.u32.totalorder %s4787_s4, %s4783_s30  ;;  %p4791_p13 = scmp.lt.u32.totalorder %s4783_s30, %s7805_s28 }
 0xfa3   : > { %p4785_p5 = pnand %p4784_p1, %p8964_p4 }
 0xfa4   : > { %p4790_p10 = por %p4789_p6, %p4788_p9 }
 0xfa5   : > { %p4786_p7 = pneg %p4785_p5 }
 0xfa6   : > { %p4792_p11 = por %p4791_p13, %p4790_p10 }
 0xfa8   : > { %p4793_p12 = pnand %p4792_p11, %p4786_p7 }
 0xfaa   : > { %4796 = shalt.err (!%p4793_p12)
}
 0xfab   : > { %s4882_s26 = smov 128  }
 0xfac   : > { %4392 = dma.vmem_to_hbm [thread:$0]  (%p8964_p4), %s7808_s9, 256, %s7805_s28, %s3619_s13, %s4882_s26, %s4882_s26, %s4878_s11  }
 0xfad PF: > { %s8965_s3 = sld [smem:[#allocation23_spill]]  ;;  %s8966_s20 = sld [smem:[#allocation31_spill]] }
 0xfae   : > { %s8967_s22 = sld [smem:[#allocation26_spill]] }
 0xfb3   : > { %s3647_s18 = sand.u32 1, %s8965_s3   ;;  %p8968_p8 = scmp.ne.s32.totalorder %s8966_s20, 0 }
 0xfb4   : > { %p8969_p3 = scmp.ge.s32.totalorder %s8967_s22, 2  ;;  %s3648_s27 = scalar_lea.sflag [#allocation4], %s3647_s18 }
 0xfb6   : > { %p4418_p2 = pnand %p8969_p3, %p8968_p8 }
 0xfb8   : > { %4838 = dma.done.wait (!%p4418_p2), %s3648_s27, 256  }
 0xfb9   : > { %4840 = vsyncadd (!%p4418_p2), %s3648_s27, 4294967040  ;;  %s8970_s20 = sld [smem:[#allocation28_spill]]  ;;  %s8971_s17 = sld [smem:[#allocation24_spill]] }
 0xfba   : > { %s8972_s18 = sld [smem:[#allocation25_spill]]  ;;  %s8973_s19 = sld [smem:[#allocation29_spill]] }
 0xfbf   : > { %p30_p0 = scmp.ge.s32.totalorder %s8970_s20, 4  }
 0xfc1   :  { %32 = sbr.rel (!%p30_p0) target bundleno = 23 (0x17), region = 146 }
 0xfc8   :  { %3653 = vsyncpa [#allocation3], 1 }
 0xfc9   :  { %3655 = vsyncpa [#allocation3 + $0x1], 1 }
 0xfca   :  { %3656 = vsyncpa [#allocation8], 1 }
 0xfcb   :  { %3658 = vsyncpa [#allocation8 + $0x1], 1 }
 0xfcc   :  { %3659 = vsyncpa [#allocation11], 1 }
 0xfcd   :  { %3660 = vsyncpa [#allocation14], 1 }
 0xfce   :  { %3661 = vsyncpa [#allocation4], 1 }
 0xfcf   :  { %3663 = vsyncpa [#allocation4 + $0x1], 1 }
 0xfd0   :  { %3664 = vsyncpa [#allocation5], 1 }
 0xfd1   :  { %3666 = vsyncpa [#allocation5 + $0x1], 1 }

</bundles_post_ra>
